<compile_context>
chip_gen: v7x
topology: tpu7x:2x2x1
jax: 0.10.0
libtpu: 0.0.40
codegen_flags: <defaults>
</compile_context>

<pallas_src>
import functools
import math

import jax
import jax.numpy as jnp
from jax.experimental import pallas as pl
from jax.experimental.pallas import tpu as pltpu

HIDDEN = 768       # out_features of linear, layernorm dim
INTER = 3072       # in_features of linear (gelu input width)
LN_EPS = 1e-5


def _gelu_exact(x):
    # torch._C._nn.gelu default is the exact erf formulation
    return 0.5 * x * (1.0 + jax.lax.erf(x * (1.0 / math.sqrt(2.0))))


def gelu_linear_add_ln_kernel(x_ref, w_ref, b_ref, res_ref, g_ref, beta_ref, o_ref):
    # GELU in f32 (v5e has no bf16 VPU), cast to bf16 for a bf16-native MXU matmul
    # with f32 accumulation.
    xg = _gelu_exact(x_ref[...].astype(jnp.float32)).astype(jnp.bfloat16)
    y = jnp.dot(xg, w_ref[...], preferred_element_type=jnp.float32)

    # bias + (dropout = identity in eval) + residual, all in f32
    y = y + b_ref[...] + res_ref[...].astype(jnp.float32)

    # two-pass LayerNorm over the last dim (cancellation-safe)
    mean = jnp.mean(y, axis=-1, keepdims=True)
    ctr = y - mean
    var = jnp.mean(ctr * ctr, axis=-1, keepdims=True)
    yn = ctr * jax.lax.rsqrt(var + LN_EPS)
    o_ref[...] = (yn * g_ref[...] + beta_ref[...]).astype(o_ref.dtype)


@functools.partial(jax.jit, static_argnames=("tm",))
def gelu_linear_dropout_add_layernorm(x527, x526, w_bf16, b, gamma, beta, *, tm=96):
    """x527: [B, S, INTER] (bf16), x526: [B, S, HIDDEN] (bf16) -> [B, S, HIDDEN] (bf16)."""
    B, S, _ = x527.shape
    M = B * S
    x2d = x527.reshape(M, INTER)
    res2d = x526.reshape(M, HIDDEN)
    b2d = b.reshape(1, HIDDEN).astype(jnp.float32)
    g2d = gamma.reshape(1, HIDDEN).astype(jnp.float32)
    beta2d = beta.reshape(1, HIDDEN).astype(jnp.float32)

    # Weight is expected to arrive already bf16 (cast once at parameter load).
    # Trace-time check only; emits nothing when the caller did the right thing.
    if w_bf16.dtype != jnp.bfloat16:
        w_bf16 = w_bf16.astype(jnp.bfloat16)

    # Pick a row tile (multiple of 8) that divides M so we never pay a jnp.pad HBM pass.
    tile = None
    for cand in (tm, 128, 96, 64, 48, 32, 24, 16, 8):
        if cand <= M and M % cand == 0:
            tile = cand
            break
    if tile is None:
        # Rare fallback for awkward M: pad rows (extra HBM pass, but still correct).
        tile = tm
        m_pad = pl.cdiv(M, tile) * tile
        x2d = jnp.pad(x2d, ((0, m_pad - M), (0, 0)))
        res2d = jnp.pad(res2d, ((0, m_pad - M), (0, 0)))
    else:
        m_pad = M

    grid = (m_pad // tile,)
    out = pl.pallas_call(
        gelu_linear_add_ln_kernel,
        out_shape=jax.ShapeDtypeStruct((m_pad, HIDDEN), x527.dtype),
        grid_spec=pltpu.PrefetchScalarGridSpec(
            num_scalar_prefetch=0,
            grid=grid,
            in_specs=[
                pl.BlockSpec((tile, INTER), lambda i: (i, 0)),       # gelu/matmul input
                pl.BlockSpec((INTER, HIDDEN), lambda i: (0, 0),      # weight: bf16, VMEM-
                             pipeline_mode=pl.Buffered(1)),          #   resident, 1 buffer
                pl.BlockSpec((1, HIDDEN), lambda i: (0, 0)),         # bias
                pl.BlockSpec((tile, HIDDEN), lambda i: (i, 0)),      # residual
                pl.BlockSpec((1, HIDDEN), lambda i: (0, 0)),         # ln gamma
                pl.BlockSpec((1, HIDDEN), lambda i: (0, 0)),         # ln beta
            ],
            out_specs=pl.BlockSpec((tile, HIDDEN), lambda i: (i, 0)),
        ),
        compiler_params=pltpu.CompilerParams(
            dimension_semantics=("parallel",),
            vmem_limit_bytes=48 * 1024 * 1024,
        ),
    )(x2d, w_bf16, b2d, res2d, g2d, beta2d)

    if m_pad != M:
        out = out[:M]
    return out.reshape(B, S, HIDDEN)


def _reference(x527, x526, w_bf16, b, gamma, beta):
    # Matches the kernel's numerics: f32 GELU of bf16 input, bf16 matmul operands,
    # f32 accumulation, f32 epilogue.
    B, S, _ = x526.shape
    xg = _gelu_exact(x527.astype(jnp.float32)).astype(jnp.bfloat16)
    y = jnp.dot(xg.reshape(-1, INTER), w_bf16.astype(jnp.bfloat16),
                preferred_element_type=jnp.float32).reshape(B, S, HIDDEN)
    y = y + b.astype(jnp.float32) + x526.astype(jnp.float32)
    mean = jnp.mean(y, axis=-1, keepdims=True)
    var = jnp.mean((y - mean) ** 2, axis=-1, keepdims=True)
    return (y - mean) * jax.lax.rsqrt(var + LN_EPS) * gamma + beta


if __name__ == "__main__":
    key = jax.random.PRNGKey(0)
    k1, k2, k3, k4 = jax.random.split(key, 4)

    B, S = 1, 384  # matches module spec: [1, 384, 3072] / [1, 384, 768]
    # Upstream producer emits bf16 activations; the cast happens here, at construction,
    # OUTSIDE the jitted wrapper (never cast inside the wrapper — that's an extra HBM pass).
    x527 = jax.random.normal(k1, (B, S, INTER), dtype=jnp.float32).astype(jnp.bfloat16)
    x526 = jax.random.normal(k2, (B, S, HIDDEN), dtype=jnp.float32).astype(jnp.bfloat16)

    # deterministic parameter init (Linear(3072 -> 768) + LayerNorm(768))
    lim = 1.0 / math.sqrt(INTER)
    w = jax.random.uniform(k3, (INTER, HIDDEN), jnp.float32, -lim, lim)  # W^T layout
    b = jax.random.uniform(k4, (HIDDEN,), jnp.float32, -lim, lim)
    gamma = jnp.ones((HIDDEN,), jnp.float32)
    beta = jnp.zeros((HIDDEN,), jnp.float32)

    # Cast the weight to bf16 ONCE at parameter-load time (outside jit).
    w_bf16 = jax.device_put(w.astype(jnp.bfloat16))

    # tm=96 -> 4 grid steps for M=384 (2 per core on v7x, pipelined on v5e/v6e), no padding.
    out = gelu_linear_dropout_add_layernorm(x527, x526, w_bf16, b, gamma, beta, tm=96)
    out = jax.block_until_ready(out)

    ref = _reference(x527, x526, w_bf16, b, gamma, beta)
    assert out.shape == (B, S, HIDDEN)
    assert out.dtype == jnp.bfloat16
    out_f32 = out.astype(jnp.float32)
    ref_f32 = ref.astype(jnp.float32)
    max_err = float(jnp.max(jnp.abs(out_f32 - ref_f32)))
    assert jnp.allclose(out_f32, ref_f32, atol=3e-2, rtol=3e-2), (
        f"mismatch vs reference, max abs err = {max_err}")

    print("KERNEL_OK")
</pallas_src>

<mosaic_0001>
module attributes {stable_mosaic.version = 11 : i64} {
  func.func @gelu_linear_add_ln_kernel(%arg0: i32, %arg1: memref<96x3072xbf16, #tpu.memory_space<vmem>>, %arg2: memref<3072x768xbf16, #tpu.memory_space<vmem>>, %arg3: memref<1x768xf32, #tpu.memory_space<vmem>>, %arg4: memref<96x768xbf16, #tpu.memory_space<vmem>>, %arg5: memref<1x768xf32, #tpu.memory_space<vmem>>, %arg6: memref<1x768xf32, #tpu.memory_space<vmem>>, %arg7: memref<96x768xbf16, #tpu.memory_space<vmem>>) attributes {dimension_semantics = [#tpu.dimension_semantics<parallel>], iteration_bounds = array<i64: 4>, scalar_prefetch = 0 : i64, scratch_operands = 0 : i64, tpu.core_type = #tpu.core_type<tc>, window_params = [{transform_indices = @transform_0, window_bounds = array<i64: 96, 3072>}, {pipeline_mode = #tpu.pipeline_mode<synchronous>, transform_indices = @transform_1, window_bounds = array<i64: 3072, 768>}, {pipeline_mode = #tpu.pipeline_mode<synchronous>, transform_indices = @transform_2, window_bounds = array<i64: 1, 768>}, {transform_indices = @transform_3, window_bounds = array<i64: 96, 768>}, {pipeline_mode = #tpu.pipeline_mode<synchronous>, transform_indices = @transform_4, window_bounds = array<i64: 1, 768>}, {pipeline_mode = #tpu.pipeline_mode<synchronous>, transform_indices = @transform_5, window_bounds = array<i64: 1, 768>}, {transform_indices = @transform_6, window_bounds = array<i64: 96, 768>}]} {
    %c0 = arith.constant 0 : index
    %c0_0 = arith.constant 0 : index
    %0 = vector.load %arg1[%c0, %c0_0] : memref<96x3072xbf16, #tpu.memory_space<vmem>>, vector<96x3072xbf16>
    %1 = arith.extf %0 : vector<96x3072xbf16> to vector<96x3072xf32>
    %cst = arith.constant 5.000000e-01 : f32
    %2 = vector.broadcast %cst : f32 to vector<96x3072xf32>
    %3 = arith.mulf %2, %1 : vector<96x3072xf32>
    %cst_1 = arith.constant 0.707106769 : f32
    %4 = vector.broadcast %cst_1 : f32 to vector<96x3072xf32>
    %5 = arith.mulf %1, %4 : vector<96x3072xf32>
    %6 = math.erf %5 : vector<96x3072xf32>
    %cst_2 = arith.constant 1.000000e+00 : f32
    %7 = vector.broadcast %cst_2 : f32 to vector<96x3072xf32>
    %8 = arith.addf %7, %6 : vector<96x3072xf32>
    %9 = arith.mulf %3, %8 : vector<96x3072xf32>
    %10 = arith.truncf %9 : vector<96x3072xf32> to vector<96x3072xbf16>
    %c0_3 = arith.constant 0 : index
    %c0_4 = arith.constant 0 : index
    %11 = vector.load %arg2[%c0_3, %c0_4] : memref<3072x768xbf16, #tpu.memory_space<vmem>>, vector<3072x768xbf16>
    %cst_5 = arith.constant dense<0.000000e+00> : vector<96x768xf32>
    %12 = tpu.matmul %10, %11, %cst_5 {dimension_numbers = #tpu.dot_dimension_numbers<[1], [0], [0], [1], [0, 0, 1, 1], [], []>} : vector<96x3072xbf16>, vector<3072x768xbf16>, vector<96x768xf32> -> vector<96x768xf32>
    %c0_6 = arith.constant 0 : index
    %c0_7 = arith.constant 0 : index
    %13 = vector.load %arg3[%c0_6, %c0_7] : memref<1x768xf32, #tpu.memory_space<vmem>>, vector<1x768xf32>
    %14 = vector.broadcast %13 : vector<1x768xf32> to vector<96x768xf32>
    %15 = arith.addf %12, %14 : vector<96x768xf32>
    %c0_8 = arith.constant 0 : index
    %c0_9 = arith.constant 0 : index
    %16 = vector.load %arg4[%c0_8, %c0_9] : memref<96x768xbf16, #tpu.memory_space<vmem>>, vector<96x768xbf16>
    %17 = arith.extf %16 : vector<96x768xbf16> to vector<96x768xf32>
    %18 = arith.addf %15, %17 : vector<96x768xf32>
    %cst_10 = arith.constant dense<0.000000e+00> : vector<96xf32>
    %19 = vector.multi_reduction <add>, %18, %cst_10 [1] : vector<96x768xf32> to vector<96xf32>
    %20 = vector.shape_cast %19 : vector<96xf32> to vector<96x1xf32>
    %cst_11 = arith.constant 7.680000e+02 : f32
    %21 = vector.broadcast %cst_11 : f32 to vector<96x1xf32>
    %22 = arith.divf %20, %21 : vector<96x1xf32>
    %23 = vector.broadcast %22 : vector<96x1xf32> to vector<96x768xf32>
    %24 = arith.subf %18, %23 : vector<96x768xf32>
    %25 = arith.mulf %24, %24 : vector<96x768xf32>
    %cst_12 = arith.constant dense<0.000000e+00> : vector<96xf32>
    %26 = vector.multi_reduction <add>, %25, %cst_12 [1] : vector<96x768xf32> to vector<96xf32>
    %27 = vector.shape_cast %26 : vector<96xf32> to vector<96x1xf32>
    %cst_13 = arith.constant 7.680000e+02 : f32
    %28 = vector.broadcast %cst_13 : f32 to vector<96x1xf32>
    %29 = arith.divf %27, %28 : vector<96x1xf32>
    %cst_14 = arith.constant 9.99999974E-6 : f32
    %30 = vector.broadcast %cst_14 : f32 to vector<96x1xf32>
    %31 = arith.addf %29, %30 : vector<96x1xf32>
    %32 = math.rsqrt %31 : vector<96x1xf32>
    %33 = vector.broadcast %32 : vector<96x1xf32> to vector<96x768xf32>
    %34 = arith.mulf %24, %33 : vector<96x768xf32>
    %c0_15 = arith.constant 0 : index
    %c0_16 = arith.constant 0 : index
    %35 = vector.load %arg5[%c0_15, %c0_16] : memref<1x768xf32, #tpu.memory_space<vmem>>, vector<1x768xf32>
    %36 = vector.broadcast %35 : vector<1x768xf32> to vector<96x768xf32>
    %37 = arith.mulf %34, %36 : vector<96x768xf32>
    %c0_17 = arith.constant 0 : index
    %c0_18 = arith.constant 0 : index
    %38 = vector.load %arg6[%c0_17, %c0_18] : memref<1x768xf32, #tpu.memory_space<vmem>>, vector<1x768xf32>
    %39 = vector.broadcast %38 : vector<1x768xf32> to vector<96x768xf32>
    %40 = arith.addf %37, %39 : vector<96x768xf32>
    %41 = arith.truncf %40 : vector<96x768xf32> to vector<96x768xbf16>
    %c0_19 = arith.constant 0 : index
    %c0_20 = arith.constant 0 : index
    %42 = vector.load %arg7[%c0_19, %c0_20] : memref<96x768xbf16, #tpu.memory_space<vmem>>, vector<96x768xbf16>
    tpu.vector_store %arg7[%c0_19, %c0_20], %41 {strides = array<i32>} : memref<96x768xbf16, #tpu.memory_space<vmem>>, vector<96x768xbf16>,
    return
  }
  func.func @transform_0(%arg0: i32) -> (i32, i32) {
    %c0_i32 = arith.constant 0 : i32
    %c0_i32_0 = arith.constant 0 : i32
    return %arg0, %c0_i32 : i32, i32
  }
  func.func @transform_1(%arg0: i32) -> (i32, i32) {
    %c0_i32 = arith.constant 0 : i32
    %c0_i32_0 = arith.constant 0 : i32
    %c0_i32_1 = arith.constant 0 : i32
    return %c0_i32, %c0_i32_0 : i32, i32
  }
  func.func @transform_2(%arg0: i32) -> (i32, i32) {
    %c0_i32 = arith.constant 0 : i32
    %c0_i32_0 = arith.constant 0 : i32
    %c0_i32_1 = arith.constant 0 : i32
    return %c0_i32, %c0_i32_0 : i32, i32
  }
  func.func @transform_3(%arg0: i32) -> (i32, i32) {
    %c0_i32 = arith.constant 0 : i32
    %c0_i32_0 = arith.constant 0 : i32
    return %arg0, %c0_i32 : i32, i32
  }
  func.func @transform_4(%arg0: i32) -> (i32, i32) {
    %c0_i32 = arith.constant 0 : i32
    %c0_i32_0 = arith.constant 0 : i32
    %c0_i32_1 = arith.constant 0 : i32
    return %c0_i32, %c0_i32_0 : i32, i32
  }
  func.func @transform_5(%arg0: i32) -> (i32, i32) {
    %c0_i32 = arith.constant 0 : i32
    %c0_i32_0 = arith.constant 0 : i32
    %c0_i32_1 = arith.constant 0 : i32
    return %c0_i32, %c0_i32_0 : i32, i32
  }
  func.func @transform_6(%arg0: i32) -> (i32, i32) {
    %c0_i32 = arith.constant 0 : i32
    %c0_i32_0 = arith.constant 0 : i32
    return %arg0, %c0_i32 : i32, i32
  }
}

</mosaic_0001>

<bundles_post_ra>
// kernel: gelu_linear_dropout_add_layernorm.1
= control target key start
LH: loop header
LB: loop body
LE: loop exit
PB: predicated region body
PF: predicated region fallthrough
CT: control target
= control target key end

     0   :  { %s22421_s0 = inlined_call_operand.hbm [shape: bf16[384,3072], index: 0, kind: input, shape index: {}]   ;;  %s22422_s1 = inlined_call_operand.hbm [shape: bf16[3072,768], index: 1, kind: input, shape index: {}]   ;;  %s22423_s2 = inlined_call_operand.vmem [shape: f32[1,768], index: 2, kind: input, shape index: {}]   ;;  %s22424_s3 = inlined_call_operand.hbm [shape: bf16[384,768], index: 3, kind: input, shape index: {}]   ;;  %s22425_s4 = inlined_call_operand.vmem [shape: f32[1,768], index: 4, kind: input, shape index: {}]   ;;  %s22426_s5 = inlined_call_operand.vmem [shape: f32[1,768], index: 5, kind: input, shape index: {}]   ;;  %s22427_s6 = inlined_call_operand.hbm [shape: bf16[384,768], index: 6, kind: output, shape index: {}]  }
   0x1   :  { %22836 = sst [smem:[#allocation121_spill]] %s22421_s0 }
   0x2   :  { %11 = vsyncpa [#allocation3], 0 }
   0x3   :  { %13 = vsyncpa [#allocation3 + $0x1], 0 }
   0x4   :  { %14 = vsyncpa [#allocation6], 0 }
   0x5   :  { %15 = vsyncpa [#allocation4], 0 }
   0x6   :  { %17 = vsyncpa [#allocation4 + $0x1], 0  ;;  %s18541_s21 = smov 0   ;;  %s18543_s22 = smov 0  }
   0x7   :  { %s18545_s23 = smov 0   ;;  %s18547_s24 = smov 0  }
   0x8 LB: > { %22837 = sst [smem:[#allocation13_spill]] %s18490_s23  ;;  %s18562_s25 = sadd.s32 1, %s18494_s24   ;;  %s18494_s24 = sphi %s18547_s24, %s23518_s24   ;;  %s18490_s23 = sphi %s18545_s23, %s23515_s23   ;;  %s18486_s22 = sphi %s18543_s22, %s23517_s22   ;;  %s18482_s21 = sphi %s18541_s21, %s23516_s21  }
   0x9   : > { %s30_s26 = sadd.s32 1, %s18490_s23  ;;  %s27_s27 = ssub.s32 %s18494_s24, %s18562_s25 }
   0xa   : > { %p37_p0 = scmp.ne.s32.totalorder %s18490_s23, %s18486_s22  ;;  %p28_p1 = scmp.eq.s32.totalorder %s27_s27, 0 }
   0xb   : > { %p38_p2 = scmp.eq.s32.totalorder %s18494_s24, 0  ;;  %p15958_p3 = scmp.lt.s32.totalorder %s18494_s24, 4 }
   0xc   : > { %s18572_s28 = scalar_select %p28_p1, %s18490_s23, %s30_s26  }
   0xd   : > { %p39_p4 = por %p38_p2, %p37_p0  ;;  %s225_s29 = sand.u32 1, %s18494_s24  }
   0xe   : > { %22838 = sst [smem:[#allocation14_spill]] %s18572_s28  ;;  %s227_s30 = sand.u32 1, %s18490_s23  }
   0xf   : > { %s15925_s7 = smul.u32 1152, %s227_s30  ;;  %p18579_p5 = pnand %p15958_p3, %p39_p4 }
  0x10   : > { %s15959_s9 = smul.u32 18432, %s18494_s24  ;;  %s22840_s0 = sld [smem:[#allocation121_spill]] }
  0x11   : > { %s22839_s8 = scalar_select %p18579_p5, 1, 0 }
  0x12   : > { %s229_s10 = scalar_lea.vmem [#allocation2], %s15925_s7  ;;  %s18591_s15 = smul.u32 288, %s227_s30 }
  0x13   : > { %s237_s11 = sshll.u32 %s229_s10, 4  ;;  %s18593_s16 = scalar_lea.sflag [#allocation3], %s225_s29  ;;  %s18589_s11 = int_to_ptr.vmem [resolvable:$true] %s237_s11 }
  0x14   : > { %p22430_p7 = pneg %p18579_p5 }
  0x16   : > { %s18587_s14 = scalar_lea.hbm %s22840_s0, %s15959_s9  ;;  %s18337_s20 = scalar_lea.hbm %s22840_s0, 73728 }
  0x17   : > { %s18332_s17 = scalar_lea.hbm %s18587_s14, 18432  ;;  %p18338_p10 = scmp.lt.u32.totalorder %s18587_s14, %s22840_s0 }
  0x18   : > { %p18333_p6 = scmp.ne.s32.totalorder %s18587_s14, %s18332_s17  ;;  %p18339_p11 = scmp.lt.u32.totalorder %s18337_s20, %s18332_s17 }
  0x19   : > { %p18341_p13 = scmp.lt.u32.totalorder %s18332_s17, %s18587_s14 }
  0x1a   : > { %p18335_p8 = pnand %p22430_p7, %p18333_p6  ;;  %p18340_p12 = por %p18339_p11, %p18338_p10 }
  0x1c   : > { %p18336_p9 = pneg %p18335_p8  ;;  %p18342_p1 = por %p18341_p13, %p18340_p12 }
  0x1e   : > { %p18343_p2 = pnand %p18342_p1, %p18336_p9 }
  0x20   : > { %18346 = shalt.err (!%p18343_p2)
}
  0x21   : > { %s18347_s29 = scalar_lea.vmem %s18589_s11, 18432  ;;  %s18496_s30 = smov [#allocation2]  }
  0x22   : > { %p18348_p3 = scmp.ne.s32.totalorder %s18589_s11, %s18347_s29  ;;  %s18352_s7 = sshll.u32 %s18496_s30, 4  ;;  %s18353_s7 = int_to_ptr.vmem [resolvable:$false] %s18352_s7 }
  0x23   : > { %s18354_s9 = scalar_lea.vmem %s18353_s7, 36864  ;;  %p18355_p8 = scmp.lt.s32.totalorder %s18589_s11, %s18353_s7 }
  0x24   : > { %p18350_p4 = pnand %p18348_p3, %p22430_p7  ;;  %p18356_p10 = scmp.lt.s32.totalorder %s18354_s9, %s18347_s29 }
  0x26   : > { %p18351_p6 = pneg %p18350_p4  ;;  %p18357_p11 = por %p18356_p10, %p18355_p8 }
  0x28   : > { %p18358_p12 = pnand %p18357_p11, %p18351_p6 }
  0x2a   : > { %18361 = shalt.err (!%p18358_p12)
}
  0x2b   : > { %s18497_s10 = smov 1536   ;;  %s18498_s12 = smov 96  }
  0x2c   : > { %15949 = dma.hbm_to_vmem [thread:$0]  (!%p18579_p5), %s18587_s14, 18432, %s18589_s11, %s18593_s16, %s18497_s10, %s18497_s10, %s18498_s12  }
  0x2d   : > { %s18622_s13 = sadd.s32 4294967295, %s18494_s24   ;;  %s13826_s17 = sadd.s32 4294967294, %s18494_s24  }
  0x2e   : > { %p43_p9 = scmp.ne.s32.totalorder %s18486_s22, %s18482_s21  ;;  %p22429_p13 = scmp.eq.s32.totalorder %s18622_s13, 0 }
  0x2f   : > { %p177_p1 = scmp.eq.s32.totalorder %s18622_s13, 3  ;;  %p183_p2 = scmp.eq.s32.totalorder %s13826_s17, 3 }
  0x30   : > { %p13827_p3 = scmp.ge.s32.totalorder %s18494_s24, 1  ;;  %p18632_p4 = por %p22429_p13, %p43_p9 }
  0x31   : > { %p18639_p6 = por %p177_p1, %p37_p0  ;;  %p18643_p8 = por %p183_p2, %p43_p9 }
  0x32   : > { %s22841_s18 = scalar_select %p18632_p4, 1, 0 }
  0x33   : > { %s22842_s11 = scalar_select %p18639_p6, 1, 0 }
  0x34   : > { %s22843_s14 = scalar_select %p18643_p8, 1, 0 }
  0x35   : > { %p190_p10 = scmp.lt.s32.totalorder %s18494_s24, 5  ;;  %s18499_s20 = smov [#allocation5]  }
  0x36   : > { %s202_s26 = sshll.u32 %s18499_s20, 4  ;;  %s15960_s27 = smul.u32 4608, %s18494_s24  ;;  %s18652_s26 = int_to_ptr.vmem [resolvable:$true] %s202_s26 }
  0x37   : > { %p18648_p11 = pnand %p13827_p3, %p190_p10  ;;  %s251_s29 = scalar_lea.vmem [#allocation7], %s18591_s15 }
  0x38   : > { %s259_s30 = sshll.u32 %s251_s29, 4  ;;  %s18667_s12 = scalar_lea.hbm %s22424_s3, %s15960_s27  ;;  %s18669_s30 = int_to_ptr.vmem [resolvable:$true] %s259_s30 }
  0x39   : > { %s22844_s19 = scalar_select %p18648_p11, 1, 0 }
  0x3a   : > { %p15942_p12 = pneg %p18648_p11  ;;  %s18362_s0 = scalar_lea.hbm %s22422_s1, 147456 }
  0x3b   : > { %p18363_p9 = scmp.ne.s32.totalorder %s22422_s1, %s18362_s0  ;;  %p18369_p10 = scmp.lt.u32.totalorder %s18362_s0, %s22422_s1 }
  0x3c   : > { %p18660_p0 = pnand %p15942_p12, %p22429_p13 }
  0x3e   : > { %p18364_p1 = pneg %p18660_p0 }
  0x40   : > { %p18365_p2 = pnand %p18364_p1, %p18363_p9 }
  0x42   : > { %p18366_p3 = pneg %p18365_p2 }
  0x44   : > { %p18371_p12 = pnand %p18369_p10, %p18366_p3 }
  0x46   : > { %18374 = shalt.err (!%p18371_p12)
}
  0x47   : > { %s18375_s27 = scalar_lea.vmem %s18652_s26, 147456  ;;  %p18383_p6 = scmp.lt.s32.totalorder %s18652_s26, %s18652_s26 }
  0x48   : > { %p18376_p13 = scmp.ne.s32.totalorder %s18652_s26, %s18375_s27  ;;  %p18384_p4 = scmp.lt.s32.totalorder %s18375_s27, %s18375_s27 }
  0x4a   : > { %p18378_p7 = pnand %p18376_p13, %p18364_p1  ;;  %p18385_p11 = por %p18384_p4, %p18383_p6 }
  0x4c   : > { %p18379_p8 = pneg %p18378_p7 }
  0x4e   : > { %p18386_p5 = pnand %p18385_p11, %p18379_p8 }
  0x50   : > { %18389 = shalt.err (!%p18386_p5)
}
  0x51   : > { %s18500_s28 = smov 384   ;;  %s18501_s0 = smov 24  }
  0x52   : > { %15945 = dma.hbm_to_vmem [thread:$0]  (!%p18660_p0), %s22422_s1, 147456, %s18652_s26, [#allocation6], %s18500_s28, %s18500_s28, %s18501_s0  }
  0x53   : > { %s18390_s10 = scalar_lea.hbm %s18667_s12, 4608  ;;  %p22846_p5 = scmp.ne.s32.totalorder %s22839_s8, 0 }
  0x54   : > { %p18391_p7 = scmp.ne.s32.totalorder %s18667_s12, %s18390_s10  ;;  %s18395_s15 = scalar_lea.hbm %s22424_s3, 18432 }
  0x55   : > { %p22847_p13 = pneg %p22846_p5  ;;  %p18396_p8 = scmp.lt.u32.totalorder %s18667_s12, %s22424_s3 }
  0x56   : > { %p18397_p11 = scmp.lt.u32.totalorder %s18395_s15, %s18390_s10  ;;  %p18399_p1 = scmp.lt.u32.totalorder %s18390_s10, %s18667_s12 }
  0x57   : > { %p18393_p4 = pnand %p18391_p7, %p22847_p13 }
  0x58   : > { %p18398_p9 = por %p18397_p11, %p18396_p8 }
  0x59   : > { %p18394_p6 = pneg %p18393_p4 }
  0x5a   : > { %p18400_p2 = por %p18399_p1, %p18398_p9 }
  0x5c   : > { %p18401_p3 = pnand %p18400_p2, %p18394_p6 }
  0x5e   : > { %18404 = shalt.err (!%p18401_p3)
}
  0x5f   : > { %s18405_s26 = scalar_lea.vmem %s18669_s30, 4608  ;;  %p22848_p10 = pmov %p22847_p13 }
  0x60   : > { %p18406_p0 = scmp.ne.s32.totalorder %s18669_s30, %s18405_s26  ;;  %s18502_s7 = smov [#allocation7]  }
  0x61   : > { %s18410_s23 = sshll.u32 %s18502_s7, 4  ;;  %s18411_s23 = int_to_ptr.vmem [resolvable:$false] %s18410_s23 }
  0x62   : > { %p18408_p12 = pnand %p18406_p0, %p22848_p10  ;;  %s18412_s9 = scalar_lea.vmem %s18411_s23, 9216 }
  0x63   : > { %p18413_p13 = scmp.lt.s32.totalorder %s18669_s30, %s18411_s23  ;;  %p18414_p4 = scmp.lt.s32.totalorder %s18412_s9, %s18405_s26 }
  0x64   : > { %p18409_p7 = pneg %p18408_p12 }
  0x65   : > { %p18415_p8 = por %p18414_p4, %p18413_p13 }
  0x67   : > { %p18416_p11 = pnand %p18415_p8, %p18409_p7 }
  0x69   : > { %18419 = shalt.err (!%p18416_p11)
}
  0x6a   : > { %15952 = dma.hbm_to_vmem [thread:$0]  (!%p22846_p5), %s18667_s12, 4608, %s18669_s30, %s18593_s16, %s18500_s28, %s18500_s28, %s18501_s0  }
  0x6b   : > { %p22849_p6 = scmp.ne.s32.totalorder %s22844_s19, 0 }
  0x6d   : > { %271 = sbr.rel (%p22849_p6) target bundleno = 2048 (0x800), region = 44 }
  0x74   : > { %s273_s10 = sand.u32 1, %s18622_s13   ;;  %s18726_s17 = sand.u32 1, %s18486_s22  }
  0x75   : > { %s15929_s20 = smul.u32 1152, %s18726_s17  ;;  %s274_s15 = scalar_lea.sflag [#allocation3], %s273_s10 }
  0x76   : > { %p22850_p9 = scmp.ne.s32.totalorder %s22841_s18, 0 }
  0x77   : > { %s18729_s8 = scalar_lea.vmem [#allocation2], %s15929_s20 }
  0x78   : > { %18465 = dma.done.wait (%p22850_p9), %s274_s15, 18432  }
  0x79   : > { %18467 = vsyncadd (%p22850_p9), %s274_s15, 4294948864  ;;  %p22851_p5 = scmp.eq.s32.totalorder %s18622_s13, 0 }
  0x7b   : > { %18469 = dma.done.wait (%p22851_p5), [#allocation6], 147456   ;;  %p22852_p1 = pmov %p22851_p5 }
  0x7c   : > { %s15930_s16 = smul.u32 288, %s18726_s17 }
  0x7d   : > { %18471 = vsyncadd (%p22852_p1), [#allocation6], 4294819840 }
  0x7e   : > { %s18742_s19 = scalar_lea.vmem [#allocation7], %s15930_s16 }
  0x7f   : > { %18473 = dma.done.wait (%p22850_p9), %s274_s15, 4608  }
  0x80   : > { %18475 = vsyncadd (%p22850_p9), %s274_s15, 4294962688  ;;  %v16003_v0 = vld [vmem:[#allocation5 + $0x4] ss:$24 sps:$4 sm:$0xff]   ;;  %v16007_v2 = vld [vmem:[#allocation5] ss:$24 sps:$4 sm:$0xff]   ;;  %s22115_s7 = scalar_lea.vmem [#allocation8], %s15930_s16 }
  0x81   : > { %v16005_v1 = vld [vmem:[#allocation5 + $0x1204] ss:$24 sps:$4 sm:$0xff]   ;;  %9287 = vmatprep.subr.bf16.mxu1 %v16003_v0  ;;  %v16008_v3 = vld [vmem:[#allocation5 + $0x1200] ss:$24 sps:$4 sm:$0xff]   ;;  %v16009_v4 = vld [vmem:[#allocation5 + $0x34] ss:$24 sps:$4 sm:$0xff]  }
  0x82   : > { %9845 = vmatprep.subr.bf16.mxu0 %v16005_v1  ;;  %9288 = vmatpush1.bf16.msra.mxu1 %v16007_v2  ;;  %v16011_v5 = vld [vmem:[#allocation5 + $0x1234] ss:$24 sps:$4 sm:$0xff]   ;;  %v16013_v6 = vld [vmem:[#allocation5 + $0x30] ss:$24 sps:$4 sm:$0xff]   ;;  %v16015_v8 = vld [vmem:[#allocation5 + $0x64] ss:$24 sps:$4 sm:$0xff]  }
  0x83   : > { %9846 = vmatpush1.bf16.msra.mxu0 %v16008_v3  ;;  %9289 = vmatprep.subr.bf16.mxu1 %v16009_v4  ;;  %v16014_v7 = vld [vmem:[#allocation5 + $0x1230] ss:$24 sps:$4 sm:$0xff]   ;;  %v16017_v9 = vld [vmem:[#allocation5 + $0x1264] ss:$24 sps:$4 sm:$0xff]   ;;  %v16019_v10 = vld [vmem:[#allocation5 + $0x60] ss:$24 sps:$4 sm:$0xff]  }
  0x84   : > { %9847 = vmatprep.subr.bf16.mxu0 %v16011_v5  ;;  %v16020_v11 = vld [vmem:[#allocation5 + $0x1260] ss:$24 sps:$4 sm:$0xff]   ;;  %v16021_v12 = vld [vmem:[#allocation5 + $0x94] ss:$24 sps:$4 sm:$0xff]   ;;  %v16025_v14 = vld [vmem:[#allocation5 + $0x90] ss:$24 sps:$4 sm:$0xff]  }
  0x85   : > { %v16023_v13 = vld [vmem:[#allocation5 + $0x1294] ss:$24 sps:$4 sm:$0xff]   ;;  %v16026_v15 = vld [vmem:[#allocation5 + $0x1290] ss:$24 sps:$4 sm:$0xff]   ;;  %v16027_v16 = vld [vmem:[#allocation5 + $0xc4] ss:$24 sps:$4 sm:$0xff]  }
  0x86   : > { %9290 = vmatpush1.bf16.msra.mxu1 %v16013_v6  ;;  %v16029_v17 = vld [vmem:[#allocation5 + $0x12c4] ss:$24 sps:$4 sm:$0xff]   ;;  %v16031_v18 = vld [vmem:[#allocation5 + $0xc0] ss:$24 sps:$4 sm:$0xff]   ;;  %v16033_v20 = vld [vmem:[#allocation5 + $0xf4] ss:$24 sps:$4 sm:$0xff]  }
  0x87   : > { %9848 = vmatpush1.bf16.msra.mxu0 %v16014_v7  ;;  %9291 = vmatprep.subr.bf16.mxu1 %v16015_v8  ;;  %v16032_v19 = vld [vmem:[#allocation5 + $0x12c0] ss:$24 sps:$4 sm:$0xff]   ;;  %v16035_v21 = vld [vmem:[#allocation5 + $0x12f4] ss:$24 sps:$4 sm:$0xff]   ;;  %v16037_v22 = vld [vmem:[#allocation5 + $0xf0] ss:$24 sps:$4 sm:$0xff]  }
  0x88   : > { %9849 = vmatprep.subr.bf16.mxu0 %v16017_v9  ;;  %v16038_v23 = vld [vmem:[#allocation5 + $0x12f0] ss:$24 sps:$4 sm:$0xff]   ;;  %v16039_v24 = vld [vmem:[#allocation5 + $0x124] ss:$24 sps:$4 sm:$0xff]   ;;  %v16043_v26 = vld [vmem:[#allocation5 + $0x120] ss:$24 sps:$4 sm:$0xff]  }
  0x89   : > { %v16041_v25 = vld [vmem:[#allocation5 + $0x1324] ss:$24 sps:$4 sm:$0xff]   ;;  %v16044_v27 = vld [vmem:[#allocation5 + $0x1320] ss:$24 sps:$4 sm:$0xff]   ;;  %v16045_v28 = vld [vmem:[#allocation5 + $0x154] ss:$24 sps:$4 sm:$0xff]  }
  0x8a   : > { %9292 = vmatpush1.bf16.msra.mxu1 %v16019_v10  ;;  %v16047_v29 = vld [vmem:[#allocation5 + $0x1354] ss:$24 sps:$4 sm:$0xff]   ;;  %v16049_v30 = vld [vmem:[#allocation5 + $0x150] ss:$24 sps:$4 sm:$0xff]   ;;  %v16051_v32 = vld [vmem:[#allocation5 + $0x184] ss:$24 sps:$4 sm:$0xff]  }
  0x8b   : > { %9850 = vmatpush1.bf16.msra.mxu0 %v16020_v11  ;;  %9293 = vmatprep.subr.bf16.mxu1 %v16021_v12  ;;  %v16050_v31 = vld [vmem:[#allocation5 + $0x1350] ss:$24 sps:$4 sm:$0xff]   ;;  %v16053_v33 = vld [vmem:[#allocation5 + $0x1384] ss:$24 sps:$4 sm:$0xff]   ;;  %v16055_v34 = vld [vmem:[#allocation5 + $0x180] ss:$24 sps:$4 sm:$0xff]  }
  0x8c   : > { %9851 = vmatprep.subr.bf16.mxu0 %v16023_v13  ;;  %v16056_v35 = vld [vmem:[#allocation5 + $0x1380] ss:$24 sps:$4 sm:$0xff]   ;;  %v16057_v36 = vld [vmem:[#allocation5 + $0x1b4] ss:$24 sps:$4 sm:$0xff]   ;;  %v16061_v38 = vld [vmem:[#allocation5 + $0x1b0] ss:$24 sps:$4 sm:$0xff]  }
  0x8d   : > { %v16059_v37 = vld [vmem:[#allocation5 + $0x13b4] ss:$24 sps:$4 sm:$0xff]   ;;  %v16062_v39 = vld [vmem:[#allocation5 + $0x13b0] ss:$24 sps:$4 sm:$0xff]   ;;  %v16063_v40 = vld [vmem:[#allocation5 + $0x1e4] ss:$24 sps:$4 sm:$0xff]  }
  0x8e   : > { %9294 = vmatpush1.bf16.msra.mxu1 %v16025_v14  ;;  %v16065_v41 = vld [vmem:[#allocation5 + $0x13e4] ss:$24 sps:$4 sm:$0xff]   ;;  %v16067_v42 = vld [vmem:[#allocation5 + $0x1e0] ss:$24 sps:$4 sm:$0xff]   ;;  %v16069_v44 = vld [vmem:[#allocation5 + $0x214] ss:$24 sps:$4 sm:$0xff]  }
  0x8f   : > { %9852 = vmatpush1.bf16.msra.mxu0 %v16026_v15  ;;  %9295 = vmatprep.subr.bf16.mxu1 %v16027_v16  ;;  %v16068_v43 = vld [vmem:[#allocation5 + $0x13e0] ss:$24 sps:$4 sm:$0xff]   ;;  %v16071_v45 = vld [vmem:[#allocation5 + $0x1414] ss:$24 sps:$4 sm:$0xff]   ;;  %v16073_v46 = vld [vmem:[#allocation5 + $0x210] ss:$24 sps:$4 sm:$0xff]  }
  0x90   : > { %9853 = vmatprep.subr.bf16.mxu0 %v16029_v17  ;;  %v16074_v47 = vld [vmem:[#allocation5 + $0x1410] ss:$24 sps:$4 sm:$0xff]   ;;  %v18749_v48 = vld [vmem:[%s18729_s8] sm:$0xff]  ;;  %v16081_v1 = vld [vmem:[#allocation5 + $0x274] ss:$24 sps:$4 sm:$0xff]   ;;  %s15962_s23 = smul.u32 4608, %s18622_s13 }
  0x91   : > { %v18752_v49 = vld [vmem:[%s18729_s8 + $0x60] sm:$0xff]  ;;  %v472_v50 = vunpack.c.h.bf16 %v18749_v48  ;;  %v18757_v54 = vld [vmem:[%s18729_s8 + $0x30] sm:$0xff]  ;;  %v471_v55 = vunpack.c.l.bf16 %v18749_v48  ;;  %s13723_s9 = sshll.u32 %s22115_s7, 4  ;;  %s13709_s15 = scalar_lea.sflag [#allocation4], %s18726_s17  ;;  %s22375_s9 = int_to_ptr.vmem [resolvable:$true] %s13723_s9 }
  0x92   : > { %9296 = vmatpush1.bf16.msra.mxu1 %v16031_v18  ;;  %v16075_v51 = vld [vmem:[#allocation5 + $0x244] ss:$24 sps:$4 sm:$0xff]   ;;  %v496_v53 = vunpack.c.h.bf16 %v18752_v49  ;;  %v18761_v57 = vld [vmem:[%s18729_s8 + $0x90] sm:$0xff]  ;;  %v484_v58 = vunpack.c.h.bf16 %v18757_v54  ;;  %v495_v59 = vunpack.c.l.bf16 %v18752_v49  ;;  %v16079_v60 = vld [vmem:[#allocation5 + $0x240] ss:$24 sps:$4 sm:$0xff]   ;;  %v483_v63 = vunpack.c.l.bf16 %v18757_v54  ;;  %s22373_s20 = scalar_lea.hbm %s22427_s6, %s15962_s23  ;;  %p23512_p3 = scmp.ne.s32.totalorder %s22842_s11, 0 }
  0x93   : > { %9854 = vmatpush1.bf16.msra.mxu0 %v16032_v19  ;;  %9297 = vmatprep.subr.bf16.mxu1 %v16033_v20  ;;  %v16077_v52 = vld [vmem:[#allocation5 + $0x1444] ss:$24 sps:$4 sm:$0xff]   ;;  %v1048_v56 = vmul.f32 0.70710677, %v472_v50  ;;  %v508_v62 = vunpack.c.h.bf16 %v18761_v57  ;;  %v16080_v0 = vld [vmem:[#allocation5 + $0x1440] ss:$24 sps:$4 sm:$0xff]   ;;  %v507_v7 = vunpack.c.l.bf16 %v18761_v57 }
  0x94   : > { %9855 = vmatprep.subr.bf16.mxu0 %v16035_v21  ;;  %v1072_v61 = vmul.f32 0.70710677, %v496_v53  ;;  %v1060_v2 = vmul.f32 0.70710677, %v484_v58  ;;  %v1047_v4 = vmul.f32 0.70710677, %v471_v55 }
  0x95   : > { %17731 = verf.f32 %v1048_v56  ;;  %v1084_v3 = vmul.f32 0.70710677, %v508_v62  ;;  %v16083_v5 = vld [vmem:[#allocation5 + $0x1474] ss:$24 sps:$4 sm:$0xff]   ;;  %v1071_v6 = vmul.f32 0.70710677, %v495_v59 }
  0x96   : > { %9298 = vmatpush1.bf16.msra.mxu1 %v16037_v22  ;;  %17733 = verf.f32 %v1072_v61  ;;  %v1059_v8 = vmul.f32 0.70710677, %v483_v63  ;;  %v16085_v9 = vld [vmem:[#allocation5 + $0x270] ss:$24 sps:$4 sm:$0xff]   ;;  %v1083_v10 = vmul.f32 0.70710677, %v507_v7 }
  0x97   : > { %9856 = vmatpush1.bf16.msra.mxu0 %v16038_v23  ;;  %9299 = vmatprep.subr.bf16.mxu1 %v16039_v24  ;;  %17735 = verf.f32 %v1060_v2  ;;  %v16086_v11 = vld [vmem:[#allocation5 + $0x1470] ss:$24 sps:$4 sm:$0xff]   ;;  %v16087_v12 = vld [vmem:[#allocation5 + $0x2a4] ss:$24 sps:$4 sm:$0xff]   ;;  %v16091_v14 = vld [vmem:[#allocation5 + $0x2a0] ss:$24 sps:$4 sm:$0xff]  }
  0x98   : > { %9857 = vmatprep.subr.bf16.mxu0 %v16041_v25  ;;  %17737 = verf.f32 %v1084_v3  ;;  %v16089_v13 = vld [vmem:[#allocation5 + $0x14a4] ss:$24 sps:$4 sm:$0xff]   ;;  %v16092_v15 = vld [vmem:[#allocation5 + $0x14a0] ss:$24 sps:$4 sm:$0xff]   ;;  %v16093_v16 = vld [vmem:[#allocation5 + $0x2d4] ss:$24 sps:$4 sm:$0xff]  }
  0x99   : > { %17739 = verf.f32 %v1047_v4  ;;  %v760_v17 = vmul.f32 0.5, %v472_v50  ;;  %v16095_v19 = vld [vmem:[#allocation5 + $0x14d4] ss:$24 sps:$4 sm:$0xff]   ;;  %v784_v20 = vmul.f32 0.5, %v496_v53  ;;  %v772_v23 = vmul.f32 0.5, %v484_v58  ;;  %v18784_v50 = vld [vmem:[%s18729_s8 + $0x120] sm:$0xff] }
  0x9a   : > { %9300 = vmatpush1.bf16.msra.mxu1 %v16043_v26  ;;  %17741 = verf.f32 %v1071_v6  ;;  %v16097_v25 = vld [vmem:[#allocation5 + $0x2d0] ss:$24 sps:$4 sm:$0xff]   ;;  %v544_v54 = vunpack.c.h.bf16 %v18784_v50  ;;  %v16107_v4 = vld [vmem:[#allocation5 + $0x334] ss:$24 sps:$4 sm:$0xff]   ;;  %s18503_s16 = smov [#allocation8]  }
  0x9b   : > { %9858 = vmatpush1.bf16.msra.mxu0 %v16044_v27  ;;  %9301 = vmatprep.subr.bf16.mxu1 %v16045_v28  ;;  %17743 = verf.f32 %v1059_v8  ;;  %v796_v27 = vmul.f32 0.5, %v508_v62  ;;  %v18788_v56 = vld [vmem:[%s18729_s8 + $0xf0] sm:$0xff]  ;;  %v543_v8 = vunpack.c.l.bf16 %v18784_v50 }
  0x9c   : > { %9859 = vmatprep.subr.bf16.mxu0 %v16047_v29  ;;  %17745 = verf.f32 %v1083_v10  ;;  %v16098_v29 = vld [vmem:[#allocation5 + $0x14d0] ss:$24 sps:$4 sm:$0xff]  }
  0x9d   : > { %v18794_v61 = vld [vmem:[%s18729_s8 + $0x150] sm:$0xff] }
  0x9e   : > { %9302 = vmatpush1.bf16.msra.mxu1 %v16049_v30  ;;  %v556_v6 = vunpack.c.h.bf16 %v18794_v61 }
  0x9f   : > { %9860 = vmatpush1.bf16.msra.mxu0 %v16050_v31  ;;  %9303 = vmatprep.subr.bf16.mxu1 %v16051_v32  ;;  %v17732_v18 = vpop.eup %17731  ;;  %v759_v32 = vmul.f32 0.5, %v471_v55 }
  0xa0   : > { %9861 = vmatprep.subr.bf16.mxu0 %v16053_v33  ;;  %v17734_v21 = vpop.eup %17733  ;;  %v1624_v22 = vadd.f32 1.0, %v17732_v18  ;;  %v16113_v18 = vld [vmem:[#allocation5 + $0x364] ss:$24 sps:$4 sm:$0xff]  }
  0xa1   : > { %v17736_v24 = vpop.eup %17735  ;;  %v1648_v26 = vadd.f32 1.0, %v17734_v21  ;;  %v555_v21 = vunpack.c.l.bf16 %v18794_v61 }
  0xa2   : > { %9304 = vmatpush1.bf16.msra.mxu1 %v16055_v34  ;;  %v17738_v28 = vpop.eup %17737  ;;  %v1912_v30 = vmul.f32 %v1624_v22, %v760_v17  ;;  %v1636_v31 = vadd.f32 1.0, %v17736_v24  ;;  %v16108_v17 = vld [vmem:[#allocation5 + $0x1530] ss:$24 sps:$4 sm:$0xff]   ;;  %v16116_v24 = vld [vmem:[#allocation5 + $0x1564] ss:$24 sps:$4 sm:$0xff]  }
  0xa3   : > { %9862 = vmatpush1.bf16.msra.mxu0 %v16056_v35  ;;  %9305 = vmatprep.subr.bf16.mxu1 %v16057_v36  ;;  %v17740_v33 = vpop.eup %17739  ;;  %v1936_v34 = vmul.f32 %v1648_v26, %v784_v20  ;;  %v16101_v35 = vld [vmem:[#allocation5 + $0x304] ss:$24 sps:$4 sm:$0xff]   ;;  %v1660_v36 = vadd.f32 1.0, %v17738_v28  ;;  %v531_v20 = vunpack.c.l.bf16 %v18788_v56  ;;  %v16119_v28 = vld [vmem:[#allocation5 + $0x394] ss:$24 sps:$4 sm:$0xff]  }
  0xa4   : > { %9863 = vmatprep.subr.bf16.mxu0 %v16059_v37  ;;  %v783_v37 = vmul.f32 0.5, %v495_v59 }
  0xa6   : > { %9306 = vmatpush1.bf16.msra.mxu1 %v16061_v38  ;;  %v17742_v38 = vpop.eup %17741 }
  0xa7   : > { %9864 = vmatpush1.bf16.msra.mxu0 %v16062_v39  ;;  %9307 = vmatprep.subr.bf16.mxu1 %v16063_v40  ;;  %v1924_v39 = vmul.f32 %v1636_v31, %v772_v23  ;;  %v16104_v40 = vld [vmem:[#allocation5 + $0x1504] ss:$24 sps:$4 sm:$0xff]   ;;  %v1647_v48 = vadd.f32 1.0, %v17742_v38  ;;  %v16111_v23 = vld [vmem:[#allocation5 + $0x360] ss:$24 sps:$4 sm:$0xff]  }
  0xa8   : > { %9865 = vmatprep.subr.bf16.mxu0 %v16065_v41  ;;  %v1623_v41 = vadd.f32 1.0, %v17740_v33  ;;  %v18825_v33 = vmul.f32 0.5, %v556_v6 }
  0xa9   : > { %v1935_v59 = vmul.f32 %v1647_v48, %v783_v37 }
  0xaa   : > { %9308 = vmatpush1.bf16.msra.mxu1 %v16067_v42  ;;  %v771_v42 = vmul.f32 0.5, %v483_v63  ;;  %v1911_v53 = vmul.f32 %v1623_v41, %v759_v32  ;;  %v16114_v32 = vld [vmem:[#allocation5 + $0x1560] ss:$24 sps:$4 sm:$0xff]   ;;  %v16117_v41 = vld [vmem:[#allocation5 + $0x390] ss:$24 sps:$4 sm:$0xff]  }
  0xab   : > { %9866 = vmatpush1.bf16.msra.mxu0 %v16068_v43  ;;  %9309 = vmatprep.subr.bf16.mxu1 %v16069_v44  ;;  %v795_v43 = vmul.f32 0.5, %v507_v7  ;;  %v351_v44 = vld [vmem:[%s18729_s8 + $0xc0] sm:$0xff]  ;;  %v16105_v7 = vld [vmem:[#allocation5 + $0x330] ss:$24 sps:$4 sm:$0xff]  }
  0xac   : > { %9867 = vmatprep.subr.bf16.mxu0 %v16071_v45  ;;  %v17744_v45 = vpop.eup %17743  ;;  %v520_v49 = vunpack.c.h.bf16 %v351_v44  ;;  %v519_v57 = vunpack.c.l.bf16 %v351_v44  ;;  %v18797_v2 = vpack.c.bf16 %v1935_v59, %v1911_v53  ;;  %v18837_v44 = vmul.f32 0.5, %v531_v20 }
  0xad   : > { %v1635_v55 = vadd.f32 1.0, %v17744_v45 }
  0xae   : > { %9310 = vmatpush1.bf16.msra.mxu1 %v16073_v46  ;;  %v18781_v46 = vpack.c.bf16 %v1936_v34, %v1912_v30  ;;  %v1096_v63 = vmul.f32 0.70710677, %v520_v49  ;;  %v18819_v26 = vmul.f32 0.5, %v519_v57  ;;  %v1107_v30 = vmul.f32 0.70710677, %v531_v20 }
  0xaf   : > { %9868 = vmatpush1.bf16.msra.mxu0 %v16074_v47  ;;  %9311 = vmatprep.subr.bf16.mxu1 %v16075_v51  ;;  %v1948_v47 = vmul.f32 %v1660_v36, %v796_v27  ;;  %v17746_v51 = vpop.eup %17745  ;;  %v1923_v62 = vmul.f32 %v1635_v55, %v771_v42  ;;  %v1131_v34 = vmul.f32 0.70710677, %v555_v21  ;;  %v18831_v36 = vld [vmem:[%s18729_s8 + $0x210] sm:$0xff] }
  0xb0   : > { %9869 = vmatprep.subr.bf16.mxu0 %v16077_v52  ;;  %v16099_v52 = vld [vmem:[#allocation5 + $0x300] ss:$24 sps:$4 sm:$0xff]   ;;  %9319 = vmatprep.mubr.bf16.mxu1 %v18781_v46  ;;  %17747 = verf.f32 %v1096_v63  ;;  %v16122_v42 = vld [vmem:[#allocation5 + $0x1594] ss:$24 sps:$4 sm:$0xff]   ;;  %v604_v45 = vunpack.c.h.bf16 %v18831_v36  ;;  %v16128_v63 = vld [vmem:[#allocation5 + $0x15c4] ss:$24 sps:$4 sm:$0xff]  }
  0xb1   : > { %v18791_v58 = vpack.c.bf16 %v1948_v47, %v1924_v39  ;;  %v18840_v47 = vmul.f32 0.5, %v555_v21 }
  0xb2   : > { %9312 = vmatpush1.bf16.msra.mxu1 %v16079_v60  ;;  %v1659_v60 = vadd.f32 1.0, %v17746_v51 }
  0xb3   : > { %9870 = vmatpush1.bf16.msra.mxu0 %v16080_v0  ;;  %9313 = vmatprep.subr.bf16.mxu1 %v16081_v1  ;;  %22853 = vst [vmem:[#allocation15_spill] sm:$0xff] %v18791_v58  ;;  %v1120_v0 = vmul.f32 0.70710677, %v544_v54  ;;  %v16102_v1 = vld [vmem:[#allocation5 + $0x1500] ss:$24 sps:$4 sm:$0xff]  }
  0xb4   : > { %9871 = vmatprep.subr.bf16.mxu0 %v16083_v5  ;;  %9877 = vmatprep.mubr.bf16.mxu0 %v18791_v58  ;;  %v1947_v3 = vmul.f32 %v1659_v60, %v795_v43  ;;  %v532_v5 = vunpack.c.h.bf16 %v18788_v56  ;;  %v18835_v43 = vmul.f32 0.5, %v543_v8  ;;  %v16125_v56 = vld [vmem:[#allocation5 + $0x3c4] ss:$24 sps:$4 sm:$0xff]   ;;  %v603_v60 = vunpack.c.l.bf16 %v18831_v36 }
  0xb5   : > { %17749 = verf.f32 %v1120_v0 }
  0xb6   : > { %9314 = vmatpush1.bf16.msra.mxu1 %v16085_v9  ;;  %v1095_v9 = vmul.f32 0.70710677, %v519_v57  ;;  %v18803_v10 = vpack.c.bf16 %v1947_v3, %v1923_v62  ;;  %v16123_v62 = vld [vmem:[#allocation5 + $0x3c0] ss:$24 sps:$4 sm:$0xff]  }
  0xb7   : > { %9872 = vmatpush1.bf16.msra.mxu0 %v16086_v11  ;;  %9315 = vmatprep.subr.bf16.mxu1 %v16087_v12  ;;  %v16110_v11 = vld [vmem:[#allocation5 + $0x1534] ss:$24 sps:$4 sm:$0xff]   ;;  %v18806_v12 = vld [vmem:[%s18729_s8 + $0x180] sm:$0xff] }
  0xb8   : > { %9873 = vmatprep.subr.bf16.mxu0 %v16089_v13  ;;  %22854 = vst [vmem:[#allocation16_spill] sm:$0xff] %v18803_v10  ;;  %v18808_v13 = vmul.f32 0.5, %v520_v49  ;;  %17751 = verf.f32 %v1095_v9  ;;  %v568_v22 = vunpack.c.h.bf16 %v18806_v12  ;;  %v567_v31 = vunpack.c.l.bf16 %v18806_v12 }
  0xba   : > { %9316 = vmatpush1.bf16.msra.mxu1 %v16091_v14  ;;  %v1108_v14 = vmul.f32 0.70710677, %v532_v5  ;;  %v1144_v38 = vmul.f32 0.70710677, %v568_v22  ;;  %v1143_v50 = vmul.f32 0.70710677, %v567_v31  ;;  %v17748_v49 = vpop.eup %17747 }
  0xbb   : > { %9874 = vmatpush1.bf16.msra.mxu0 %v16092_v15  ;;  %9317 = vmatprep.subr.bf16.mxu1 %v16093_v16  ;;  %v1132_v15 = vmul.f32 0.70710677, %v556_v6  ;;  %v18811_v16 = vld [vmem:[%s18729_s8 + $0x1e0] sm:$0xff]  ;;  %v18842_v51 = vmul.f32 0.5, %v568_v22  ;;  %v1672_v57 = vadd.f32 1.0, %v17748_v49  ;;  %v18848_v3 = vmul.f32 0.5, %v567_v31 }
  0xbc   : > { %9875 = vmatprep.subr.bf16.mxu0 %v16095_v19  ;;  %v1119_v19 = vmul.f32 0.70710677, %v543_v8  ;;  %17753 = verf.f32 %v1108_v14  ;;  %v592_v27 = vunpack.c.h.bf16 %v18811_v16  ;;  %v591_v37 = vunpack.c.l.bf16 %v18811_v16  ;;  %v18857_v8 = vld [vmem:[%s18729_s8 + $0x2a0] sm:$0xff]  ;;  %v16129_v22 = vld [vmem:[#allocation5 + $0x3f0] ss:$24 sps:$4 sm:$0xff]  }
  0xbd   : > { %17755 = verf.f32 %v1132_v15  ;;  %v16137_v31 = vld [vmem:[#allocation5 + $0x424] ss:$24 sps:$4 sm:$0xff]  }
  0xbe   : > { %9318 = vmatpush1.bf16.msra.mxu1 %v16097_v25  ;;  %v18817_v25 = vmul.f32 0.5, %v544_v54  ;;  %17757 = verf.f32 %v1119_v19  ;;  %v1168_v39 = vmul.f32 0.70710677, %v592_v27  ;;  %v1167_v53 = vmul.f32 0.70710677, %v591_v37 }
  0xbf   : > { %9876 = vmatpush1.bf16.msra.mxu0 %v16098_v29  ;;  %9380 = vmatprep.subr.bf16.mxu1 %v16101_v35  ;;  %v18822_v29 = vmul.f32 0.5, %v532_v5  ;;  %v18828_v35 = vld [vmem:[%s18729_s8 + $0x1b0] sm:$0xff]  ;;  %17759 = verf.f32 %v1107_v30  ;;  %v17750_v55 = vpop.eup %17749  ;;  %v18851_v6 = vmul.f32 0.5, %v591_v37  ;;  %v1179_v19 = vmul.f32 0.70710677, %v603_v60 }
  0xc0   : > { %9938 = vmatprep.subr.bf16.mxu0 %v16104_v40  ;;  %v580_v40 = vunpack.c.h.bf16 %v18828_v35  ;;  %17761 = verf.f32 %v1131_v34  ;;  %v16120_v54 = vld [vmem:[#allocation5 + $0x1590] ss:$24 sps:$4 sm:$0xff]   ;;  %v579_v59 = vunpack.c.l.bf16 %v18828_v35  ;;  %v1696_v0 = vadd.f32 1.0, %v17750_v55  ;;  %v16134_v30 = vld [vmem:[#allocation5 + $0x15f4] ss:$24 sps:$4 sm:$0xff]  }
  0xc1   : > { %9320 = vmatmul.mubr.bf16.vlgmr.msra.gmra.mrb[0].mxu1 %v18797_v2  ;;  %17763 = verf.f32 %v1144_v38 }
  0xc2   : > { %9381 = vmatpush1.bf16.msra.mxu1 %v16099_v52  ;;  %9878 = vmatmul.mubr.bf16.vlgmr.msra.gmra.mrb[0].mxu0 %v18803_v10  ;;  %v1156_v48 = vmul.f32 0.70710677, %v580_v40  ;;  %17765 = verf.f32 %v1168_v39  ;;  %v1180_v52 = vmul.f32 0.70710677, %v604_v45  ;;  %v17752_v61 = vpop.eup %17751  ;;  %v1984_v12 = vmul.f32 %v1696_v0, %v18817_v25  ;;  %v16318_v10 = vld [vmem:[#allocation5 + $0x1bc0] ss:$24 sps:$4 sm:$0xff]  }
  0xc3   : > { %9382 = vmatprep.subr.bf16.mxu1 %v16107_v4  ;;  %9939 = vmatpush1.bf16.msra.mxu0 %v16102_v1  ;;  %v18846_v1 = vmul.f32 0.5, %v592_v27  ;;  %v1960_v4 = vmul.f32 %v1672_v57, %v18808_v13  ;;  %v1671_v5 = vadd.f32 1.0, %v17752_v61  ;;  %v18860_v14 = vmul.f32 0.5, %v580_v40  ;;  %v16131_v13 = vld [vmem:[#allocation5 + $0x3f4] ss:$24 sps:$4 sm:$0xff]  }
  0xc4   : > { %9940 = vmatprep.subr.bf16.mxu0 %v16110_v11  ;;  %17767 = verf.f32 %v1156_v48  ;;  %v16126_v11 = vld [vmem:[#allocation5 + $0x15c0] ss:$24 sps:$4 sm:$0xff]   ;;  %v1155_v15 = vmul.f32 0.70710677, %v579_v59  ;;  %v640_v25 = vunpack.c.h.bf16 %v18857_v8  ;;  %v18871_v27 = vld [vmem:[%s18729_s8 + $0x270] sm:$0xff]  ;;  %v18877_v40 = vmul.f32 0.5, %v579_v59 }
  0xc5   : > { %17769 = verf.f32 %v1180_v52  ;;  %v1959_v35 = vmul.f32 %v1671_v5, %v18819_v26  ;;  %v18885_v48 = vld [vmem:[%s18729_s8 + $0x2d0] sm:$0xff] }
  0xc6   : > { %9383 = vmatpush1.bf16.msra.mxu1 %v16105_v7  ;;  %17771 = verf.f32 %v1143_v50  ;;  %v18854_v7 = vld [vmem:[%s18729_s8 + $0x240] sm:$0xff]  ;;  %v17754_v9 = vpop.eup %17753  ;;  %v1216_v26 = vmul.f32 0.70710677, %v640_v25  ;;  %v628_v50 = vunpack.c.h.bf16 %v18871_v27  ;;  %v652_v5 = vunpack.c.h.bf16 %v18885_v48 }
  0xc7   : > { %9384 = vmatprep.subr.bf16.mxu1 %v16113_v18  ;;  %9941 = vmatpush1.bf16.msra.mxu0 %v16108_v17  ;;  %17773 = verf.f32 %v1167_v53  ;;  %v17756_v16 = vpop.eup %17755  ;;  %v1684_v17 = vadd.f32 1.0, %v17754_v9  ;;  %v18862_v18 = vmul.f32 0.5, %v604_v45  ;;  %v616_v20 = vunpack.c.h.bf16 %v18854_v7 }
  0xc8   : > { %9942 = vmatprep.subr.bf16.mxu0 %v16116_v24  ;;  %v17758_v21 = vpop.eup %17757  ;;  %v1708_v24 = vadd.f32 1.0, %v17756_v16  ;;  %17775 = verf.f32 %v1155_v15  ;;  %v1204_v16 = vmul.f32 0.70710677, %v628_v50 }
  0xc9   : > { %v1695_v34 = vadd.f32 1.0, %v17758_v21  ;;  %17777 = verf.f32 %v1179_v19  ;;  %v16141_v19 = vld [vmem:[#allocation5 + $0x450] ss:$24 sps:$4 sm:$0xff]   ;;  %v16146_v21 = vld [vmem:[#allocation5 + $0x1654] ss:$24 sps:$4 sm:$0xff]  }
  0xca   : > { %9385 = vmatpush1.bf16.msra.mxu1 %v16111_v23  ;;  %v18867_v23 = vpack.c.bf16 %v1984_v12, %v1960_v4  ;;  %v1996_v38 = vmul.f32 %v1708_v24, %v18825_v33  ;;  %v16132_v33 = vld [vmem:[#allocation5 + $0x15f0] ss:$24 sps:$4 sm:$0xff]   ;;  %v891_v4 = vmul.f32 0.5, %v603_v60 }
  0xcb   : > { %9386 = vmatprep.subr.bf16.mxu1 %v16119_v28  ;;  %9943 = vmatpush1.bf16.msra.mxu0 %v16114_v32  ;;  %v17760_v28 = vpop.eup %17759  ;;  %v1972_v32 = vmul.f32 %v1684_v17, %v18822_v29  ;;  %v1983_v29 = vmul.f32 %v1695_v34, %v18835_v43  ;;  %v16135_v43 = vld [vmem:[#allocation5 + $0x420] ss:$24 sps:$4 sm:$0xff]   ;;  %v1228_v17 = vmul.f32 0.70710677, %v652_v5 }
  0xcc   : > { %9944 = vmatprep.subr.bf16.mxu0 %v16122_v42  ;;  %v17762_v37 = vpop.eup %17761  ;;  %9329 = vmatprep.mubr.bf16.mxu1 %v18867_v23  ;;  %v1683_v39 = vadd.f32 1.0, %v17760_v28 }
  0xcd   : > { %v17764_v42 = vpop.eup %17763  ;;  %v1707_v45 = vadd.f32 1.0, %v17762_v37  ;;  %v18888_v52 = vpack.c.bf16 %v1996_v38, %v1972_v32  ;;  %v18891_v57 = vpack.c.bf16 %v1983_v29, %v1959_v35  ;;  %v639_v32 = vunpack.c.l.bf16 %v18857_v8  ;;  %v18937_v8 = vld [vmem:[%s18729_s8 + $0x360] sm:$0xff] }
  0xce   : > { %9387 = vmatpush1.bf16.msra.mxu1 %v16117_v41  ;;  %v1192_v41 = vmul.f32 0.70710677, %v616_v20  ;;  %v17766_v49 = vpop.eup %17765  ;;  %v1971_v53 = vmul.f32 %v1683_v39, %v18837_v44  ;;  %v1720_v55 = vadd.f32 1.0, %v17764_v42  ;;  %v627_v39 = vunpack.c.l.bf16 %v18871_v27 }
  0xcf   : > { %9388 = vmatprep.subr.bf16.mxu1 %v16125_v56  ;;  %9945 = vmatpush1.bf16.msra.mxu0 %v16120_v54  ;;  %22855 = vst [vmem:[#allocation17_spill] sm:$0xff] %v18888_v52  ;;  %v17768_v54 = vpop.eup %17767  ;;  %v16140_v56 = vld [vmem:[#allocation5 + $0x1624] ss:$24 sps:$4 sm:$0xff]   ;;  %v1995_v59 = vmul.f32 %v1707_v45, %v18840_v47  ;;  %v1744_v61 = vadd.f32 1.0, %v17766_v49  ;;  %v18926_v42 = vmul.f32 0.5, %v628_v50  ;;  %v940_v50 = vmul.f32 0.5, %v652_v5 }
  0xd0   : > { %9946 = vmatprep.subr.bf16.mxu0 %v16128_v63  ;;  %17779 = verf.f32 %v1192_v41  ;;  %9887 = vmatprep.mubr.bf16.mxu0 %v18888_v52  ;;  %v16138_v63 = vld [vmem:[#allocation5 + $0x1620] ss:$24 sps:$4 sm:$0xff]   ;;  %v2008_v0 = vmul.f32 %v1720_v55, %v18842_v51  ;;  %v1732_v44 = vadd.f32 1.0, %v17768_v54  ;;  %v1215_v49 = vmul.f32 0.70710677, %v639_v32  ;;  %v18940_v54 = vld [vmem:[%s18729_s8 + $0x330] sm:$0xff] }
  0xd1   : > { %17781 = verf.f32 %v1216_v26  ;;  %9330 = vmatmul.mubr.bf16.gmra.mrb[4].mxu1 %v18891_v57  ;;  %v18900_v47 = vpack.c.bf16 %v1995_v59, %v1971_v53  ;;  %v2032_v12 = vmul.f32 %v1744_v61, %v18846_v1  ;;  %v16155_v26 = vld [vmem:[#allocation5 + $0x4b4] ss:$24 sps:$4 sm:$0xff]   ;;  %v18934_v53 = vld [vmem:[%s18729_s8 + $0x300] sm:$0xff]  ;;  %v1203_v55 = vmul.f32 0.70710677, %v627_v39 }
  0xd2   : > { %9389 = vmatpush1.bf16.msra.mxu1 %v16123_v62  ;;  %v17770_v62 = vpop.eup %17769  ;;  %v2020_v36 = vmul.f32 %v1732_v44, %v18860_v14  ;;  %17783 = verf.f32 %v1204_v16  ;;  %v16144_v14 = vld [vmem:[#allocation5 + $0x1650] ss:$24 sps:$4 sm:$0xff]   ;;  %v16150_v61 = vld [vmem:[#allocation5 + $0x1680] ss:$24 sps:$4 sm:$0xff]   ;;  %v664_v44 = vunpack.c.h.bf16 %v18934_v53  ;;  %v18955_v16 = vmul.f32 0.5, %v639_v32 }
  0xd3   : > { %9390 = vmatprep.subr.bf16.mxu1 %v16131_v13  ;;  %9947 = vmatpush1.bf16.msra.mxu0 %v16126_v11  ;;  %v17772_v9 = vpop.eup %17771  ;;  %22856 = vst [vmem:[#allocation18_spill] sm:$0xff] %v18900_v47  ;;  %v16143_v11 = vld [vmem:[#allocation5 + $0x454] ss:$24 sps:$4 sm:$0xff]   ;;  %v1756_v15 = vadd.f32 1.0, %v17770_v62  ;;  %v18908_v13 = vmul.f32 0.5, %v616_v20  ;;  %v18911_v1 = vpack.c.bf16 %v2032_v12, %v2008_v0  ;;  %17785 = verf.f32 %v1228_v17 }
  0xd4   : > { %9948 = vmatprep.subr.bf16.mxu0 %v16134_v30  ;;  %v17774_v51 = vpop.eup %17773  ;;  %v1719_v60 = vadd.f32 1.0, %v17772_v9  ;;  %9888 = vmatmul.mubr.bf16.gmra.mrb[4].mxu0 %v18900_v47  ;;  %v16149_v30 = vld [vmem:[#allocation5 + $0x484] ss:$24 sps:$4 sm:$0xff]   ;;  %v615_v20 = vunpack.c.l.bf16 %v18854_v7  ;;  %v928_v7 = vmul.f32 0.5, %v640_v25  ;;  %v18946_v59 = vld [vmem:[%s18729_s8 + $0x390] sm:$0xff]  ;;  %v688_v9 = vunpack.c.h.bf16 %v18937_v8 }
  0xd5   : > { %v1743_v24 = vadd.f32 1.0, %v17774_v51  ;;  %v17776_v28 = vpop.eup %17775  ;;  %9339 = vmatprep.mubr.bf16.mxu1 %v18911_v1  ;;  %v1240_v51 = vmul.f32 0.70710677, %v664_v44  ;;  %v18958_v17 = vmul.f32 0.5, %v627_v39  ;;  %v16167_v39 = vld [vmem:[#allocation5 + $0x514] ss:$24 sps:$4 sm:$0xff]  }
  0xd6   : > { %9391 = vmatpush1.bf16.msra.mxu1 %v16129_v22  ;;  %v2044_v22 = vmul.f32 %v1756_v15, %v18862_v18  ;;  %v17778_v34 = vpop.eup %17777  ;;  %v16152_v18 = vld [vmem:[#allocation5 + $0x1684] ss:$24 sps:$4 sm:$0xff]   ;;  %v1731_v38 = vadd.f32 1.0, %v17776_v28  ;;  %v1191_v29 = vmul.f32 0.70710677, %v615_v20 }
  0xd7   : > { %9392 = vmatprep.subr.bf16.mxu1 %v16137_v31  ;;  %9949 = vmatpush1.bf16.msra.mxu0 %v16132_v33  ;;  %v2007_v31 = vmul.f32 %v1719_v60, %v18848_v3  ;;  %v2031_v37 = vmul.f32 %v1743_v24, %v18851_v6  ;;  %v16147_v3 = vld [vmem:[#allocation5 + $0x480] ss:$24 sps:$4 sm:$0xff]   ;;  %v1755_v41 = vadd.f32 1.0, %v17778_v34  ;;  %v651_v33 = vunpack.c.l.bf16 %v18885_v48  ;;  %v16161_v15 = vld [vmem:[#allocation5 + $0x4e4] ss:$24 sps:$4 sm:$0xff]  }
  0xd8   : > { %9950 = vmatprep.subr.bf16.mxu0 %v16140_v56  ;;  %v18918_v35 = vpack.c.bf16 %v2044_v22, %v2020_v36  ;;  %v2019_v45 = vmul.f32 %v1731_v38, %v18877_v40  ;;  %17787 = verf.f32 %v1191_v29  ;;  %v18943_v56 = vmul.f32 0.5, %v615_v20  ;;  %v16156_v24 = vld [vmem:[#allocation5 + $0x16b0] ss:$24 sps:$4 sm:$0xff]   ;;  %v16164_v20 = vld [vmem:[#allocation5 + $0x16e4] ss:$24 sps:$4 sm:$0xff]  }
  0xd9   : > { %v18929_v6 = vpack.c.bf16 %v2031_v37, %v2007_v31  ;;  %v2043_v27 = vmul.f32 %v1755_v41, %v891_v4  ;;  %17789 = verf.f32 %v1215_v49  ;;  %v1227_v48 = vmul.f32 0.70710677, %v651_v33  ;;  %v16158_v4 = vld [vmem:[#allocation5 + $0x16b4] ss:$24 sps:$4 sm:$0xff]   ;;  %v16162_v38 = vld [vmem:[#allocation5 + $0x16e0] ss:$24 sps:$4 sm:$0xff]  }
  0xda   : > { %9393 = vmatpush1.bf16.msra.mxu1 %v16135_v43  ;;  %22857 = vst [vmem:[#allocation19_spill] sm:$0xff] %v18918_v35  ;;  %9897 = vmatprep.mubr.bf16.mxu0 %v18918_v35  ;;  %v17780_v25 = vpop.eup %17779  ;;  %17791 = verf.f32 %v1203_v55  ;;  %v700_v36 = vunpack.c.h.bf16 %v18946_v59  ;;  %v663_v34 = vunpack.c.l.bf16 %v18934_v53  ;;  %v675_v41 = vunpack.c.l.bf16 %v18940_v54  ;;  %v16165_v49 = vld [vmem:[#allocation5 + $0x510] ss:$24 sps:$4 sm:$0xff]  }
  0xdb   : > { %9394 = vmatprep.subr.bf16.mxu1 %v16143_v11  ;;  %9951 = vmatpush1.bf16.msra.mxu0 %v16138_v63  ;;  %v17782_v43 = vpop.eup %17781  ;;  %v1768_v40 = vadd.f32 1.0, %v17780_v25  ;;  %v18948_v62 = vpack.c.bf16 %v2043_v27, %v2019_v45  ;;  %v16153_v63 = vld [vmem:[#allocation5 + $0x4b0] ss:$24 sps:$4 sm:$0xff]   ;;  %17793 = verf.f32 %v1227_v48  ;;  %v676_v11 = vunpack.c.h.bf16 %v18940_v54  ;;  %v16170_v54 = vld [vmem:[#allocation5 + $0x1714] ss:$24 sps:$4 sm:$0xff]  }
  0xdc   : > { %9952 = vmatprep.subr.bf16.mxu0 %v16146_v21  ;;  %9340 = vmatmul.mubr.bf16.gmra.mrb[8].mxu1 %v18929_v6  ;;  %v1792_v0 = vadd.f32 1.0, %v17782_v43  ;;  %v17784_v60 = vpop.eup %17783  ;;  %17795 = verf.f32 %v1240_v51  ;;  %v1276_v32 = vmul.f32 0.70710677, %v700_v36  ;;  %v18971_v29 = vmul.f32 0.5, %v688_v9  ;;  %v16297_v35 = vld [vmem:[#allocation5 + $0x930] ss:$24 sps:$4 sm:$0xff]  }
  0xdd   : > { %22858 = vst [vmem:[#allocation20_spill] sm:$0xff] %v18948_v62  ;;  %v2056_v5 = vmul.f32 %v1768_v40, %v18908_v13  ;;  %9898 = vmatmul.mubr.bf16.gmra.mrb[8].mxu0 %v18948_v62  ;;  %v18960_v13 = vmul.f32 0.5, %v651_v33  ;;  %v1252_v21 = vmul.f32 0.70710677, %v676_v11  ;;  %v17786_v22 = vpop.eup %17785  ;;  %v1239_v45 = vmul.f32 0.70710677, %v663_v34 }
  0xde   : > { %9395 = vmatpush1.bf16.msra.mxu1 %v16141_v19  ;;  %v2080_v12 = vmul.f32 %v1792_v0, %v928_v7  ;;  %v1264_v19 = vmul.f32 0.70710677, %v688_v9  ;;  %v1804_v31 = vadd.f32 1.0, %v17786_v22  ;;  %v18973_v33 = vmul.f32 0.5, %v676_v11  ;;  %v18984_v40 = vld [vmem:[%s18729_s8 + $0x420] sm:$0xff]  ;;  %v18989_v0 = vld [vmem:[%s18729_s8 + $0x3f0] sm:$0xff] }
  0xdf   : > { %9396 = vmatprep.subr.bf16.mxu1 %v16149_v30  ;;  %9953 = vmatpush1.bf16.msra.mxu0 %v16144_v14  ;;  %v1780_v14 = vadd.f32 1.0, %v17784_v60  ;;  %v18964_v30 = vmul.f32 0.5, %v664_v44  ;;  %v699_v25 = vunpack.c.l.bf16 %v18946_v59  ;;  %v1251_v43 = vmul.f32 0.70710677, %v675_v41  ;;  %v16168_v9 = vld [vmem:[#allocation5 + $0x1710] ss:$24 sps:$4 sm:$0xff]  }
  0xe0   : > { %9954 = vmatprep.subr.bf16.mxu0 %v16152_v18  ;;  %v18962_v28 = vpack.c.bf16 %v2080_v12, %v2056_v5  ;;  %17797 = verf.f32 %v1264_v19  ;;  %v16159_v18 = vld [vmem:[#allocation5 + $0x4e0] ss:$24 sps:$4 sm:$0xff]   ;;  %v2092_v7 = vmul.f32 %v1804_v31, %v940_v50  ;;  %v16173_v11 = vld [vmem:[#allocation5 + $0x544] ss:$24 sps:$4 sm:$0xff]   ;;  %v18997_v60 = vld [vmem:[%s18729_s8 + $0x450] sm:$0xff] }
  0xe1   : > { %v2068_v37 = vmul.f32 %v1780_v14, %v18926_v42  ;;  %17799 = verf.f32 %v1252_v21  ;;  %v18975_v42 = vmul.f32 0.5, %v700_v36  ;;  %v1275_v59 = vmul.f32 0.70710677, %v699_v25 }
  0xe2   : > { %9397 = vmatpush1.bf16.msra.mxu1 %v16147_v3  ;;  %9349 = vmatprep.mubr.bf16.mxu1 %v18962_v28  ;;  %v687_v3 = vunpack.c.l.bf16 %v18937_v8  ;;  %17801 = verf.f32 %v1276_v32  ;;  %v18979_v8 = vld [vmem:[%s18729_s8 + $0x3c0] sm:$0xff]  ;;  %v736_v36 = vunpack.c.h.bf16 %v18984_v40  ;;  %v19006_v32 = vmul.f32 0.5, %v675_v41 }
  0xe3   : > { %9398 = vmatprep.subr.bf16.mxu1 %v16155_v26  ;;  %9955 = vmatpush1.bf16.msra.mxu0 %v16150_v61  ;;  %v17788_v26 = vpop.eup %17787  ;;  %v18981_v50 = vpack.c.bf16 %v2092_v7, %v2068_v37  ;;  %17803 = verf.f32 %v1239_v45  ;;  %v712_v12 = vunpack.c.h.bf16 %v18979_v8  ;;  %v16174_v45 = vld [vmem:[#allocation5 + $0x1740] ss:$24 sps:$4 sm:$0xff]  }
  0xe4   : > { %9956 = vmatprep.subr.bf16.mxu0 %v16158_v4  ;;  %v1263_v53 = vmul.f32 0.70710677, %v687_v3  ;;  %v17790_v27 = vpop.eup %17789  ;;  %v1767_v55 = vadd.f32 1.0, %v17788_v26  ;;  %v19000_v21 = vmul.f32 0.5, %v687_v3 }
  0xe5   : > { %22859 = vst [vmem:[#allocation21_spill] sm:$0xff] %v18981_v50  ;;  %v17792_v48 = vpop.eup %17791  ;;  %v1791_v61 = vadd.f32 1.0, %v17790_v27  ;;  %9907 = vmatprep.mubr.bf16.mxu0 %v18981_v50  ;;  %v1288_v22 = vmul.f32 0.70710677, %v712_v12  ;;  %v19015_v27 = vmul.f32 0.5, %v712_v12 }
  0xe6   : > { %9399 = vmatpush1.bf16.msra.mxu1 %v16153_v63  ;;  %v18986_v63 = vmul.f32 0.5, %v663_v34  ;;  %17805 = verf.f32 %v1263_v53  ;;  %v17794_v44 = vpop.eup %17793  ;;  %v2055_v4 = vmul.f32 %v1767_v55, %v18943_v56  ;;  %v1779_v5 = vadd.f32 1.0, %v17792_v48  ;;  %v16176_v56 = vld [vmem:[#allocation5 + $0x1744] ss:$24 sps:$4 sm:$0xff]   ;;  %v16177_v48 = vld [vmem:[#allocation5 + $0x570] ss:$24 sps:$4 sm:$0xff]  }
  0xe7   : > { %9400 = vmatprep.subr.bf16.mxu1 %v16161_v15  ;;  %9957 = vmatpush1.bf16.msra.mxu0 %v16156_v24  ;;  %17807 = verf.f32 %v1251_v43  ;;  %v2079_v15 = vmul.f32 %v1791_v61, %v18955_v16  ;;  %v1803_v51 = vadd.f32 1.0, %v17794_v44  ;;  %v724_v24 = vunpack.c.h.bf16 %v18989_v0  ;;  %v17796_v14 = vpop.eup %17795  ;;  %v16180_v61 = vld [vmem:[#allocation5 + $0x1770] ss:$24 sps:$4 sm:$0xff]  }
  0xe8   : > { %9958 = vmatprep.subr.bf16.mxu0 %v16164_v20  ;;  %17809 = verf.f32 %v1275_v59  ;;  %v2067_v19 = vmul.f32 %v1779_v5, %v18958_v17  ;;  %v16171_v20 = vld [vmem:[#allocation5 + $0x540] ss:$24 sps:$4 sm:$0xff]   ;;  %v1312_v34 = vmul.f32 0.70710677, %v736_v36  ;;  %v1816_v37 = vadd.f32 1.0, %v17796_v14 }
  0xe9   : > { %v19003_v31 = vpack.c.bf16 %v2079_v15, %v2055_v4  ;;  %v2091_v16 = vmul.f32 %v1803_v51, %v18960_v13  ;;  %v19008_v17 = vmul.f32 0.5, %v699_v25  ;;  %17811 = verf.f32 %v1288_v22  ;;  %v16182_v25 = vld [vmem:[#allocation5 + $0x1774] ss:$24 sps:$4 sm:$0xff]   ;;  %v16185_v5 = vld [vmem:[#allocation5 + $0x5a4] ss:$24 sps:$4 sm:$0xff]  }
  0xea   : > { %9401 = vmatpush1.bf16.msra.mxu1 %v16159_v18  ;;  %v17798_v18 = vpop.eup %17797  ;;  %17813 = verf.f32 %v1312_v34  ;;  %v1300_v41 = vmul.f32 0.70710677, %v724_v24  ;;  %v711_v59 = vunpack.c.l.bf16 %v18979_v8  ;;  %v19021_v4 = vmul.f32 0.5, %v736_v36  ;;  %v16183_v51 = vld [vmem:[#allocation5 + $0x5a0] ss:$24 sps:$4 sm:$0xff]  }
  0xeb   : > { %9402 = vmatprep.subr.bf16.mxu1 %v16167_v39  ;;  %9959 = vmatpush1.bf16.msra.mxu0 %v16162_v38  ;;  %v16179_v38 = vld [vmem:[#allocation5 + $0x574] ss:$24 sps:$4 sm:$0xff]   ;;  %v748_v39 = vunpack.c.h.bf16 %v18997_v60  ;;  %v17800_v3 = vpop.eup %17799  ;;  %v19012_v7 = vpack.c.bf16 %v2091_v16, %v2067_v19  ;;  %v1840_v13 = vadd.f32 1.0, %v17798_v18  ;;  %v16188_v19 = vld [vmem:[#allocation5 + $0x17a4] ss:$24 sps:$4 sm:$0xff]   ;;  %v723_v8 = vunpack.c.l.bf16 %v18989_v0 }
  0xec   : > { %9960 = vmatprep.subr.bf16.mxu0 %v16170_v54  ;;  %9350 = vmatmul.mubr.bf16.gmra.mrb[12].mxu1 %v19003_v31  ;;  %v17802_v26 = vpop.eup %17801  ;;  %v1828_v53 = vadd.f32 1.0, %v17800_v3  ;;  %17815 = verf.f32 %v1300_v41  ;;  %v19028_v36 = vmul.f32 0.5, %v724_v24  ;;  %v1287_v22 = vmul.f32 0.70710677, %v711_v59  ;;  %v16191_v0 = vld [vmem:[#allocation5 + $0x5d4] ss:$24 sps:$4 sm:$0xff]  }
  0xed   : > { %22860 = vst [vmem:[#allocation22_spill] sm:$0xff] %v19012_v7  ;;  %v1324_v55 = vmul.f32 0.70710677, %v748_v39  ;;  %9908 = vmatmul.mubr.bf16.gmra.mrb[12].mxu0 %v19012_v7  ;;  %v2128_v54 = vmul.f32 %v1840_v13, %v18971_v29  ;;  %v1852_v43 = vadd.f32 1.0, %v17802_v26  ;;  %v17804_v44 = vpop.eup %17803  ;;  %v747_v34 = vunpack.c.l.bf16 %v18997_v60  ;;  %v19036_v18 = vld [vmem:[%s18729_s8 + $0x8] sm:$0xff] }
  0xee   : > { %9403 = vmatpush1.bf16.msra.mxu1 %v16165_v49  ;;  %v2104_v49 = vmul.f32 %v1816_v37, %v18964_v30  ;;  %v2116_v30 = vmul.f32 %v1828_v53, %v18973_v33  ;;  %v1815_v15 = vadd.f32 1.0, %v17804_v44  ;;  %v19040_v3 = vld [vmem:[%s18729_s8 + $0x68] sm:$0xff]  ;;  %v1299_v60 = vmul.f32 0.70710677, %v723_v8  ;;  %v19057_v44 = vld [vmem:[%s18729_s8 + $0x38] sm:$0xff] }
  0xef   : > { %9404 = vmatprep.subr.bf16.mxu1 %v16173_v11  ;;  %9961 = vmatpush1.bf16.msra.mxu0 %v16168_v9  ;;  %17817 = verf.f32 %v1324_v55  ;;  %v735_v9 = vunpack.c.l.bf16 %v18984_v40  ;;  %v2140_v29 = vmul.f32 %v1852_v43, %v18975_v42  ;;  %v16194_v53 = vld [vmem:[#allocation5 + $0x17d4] ss:$24 sps:$4 sm:$0xff]   ;;  %v497_v43 = vunpack.c.l.bf16 %v19040_v3 }
  0xf0   : > { %9962 = vmatprep.subr.bf16.mxu0 %v16176_v56  ;;  %v17806_v11 = vpop.eup %17805  ;;  %v19024_v12 = vpack.c.bf16 %v2128_v54, %v2104_v49  ;;  %v2103_v42 = vmul.f32 %v1815_v15, %v18986_v63  ;;  %17819 = verf.f32 %v1287_v22  ;;  %v16186_v63 = vld [vmem:[#allocation5 + $0x17a0] ss:$24 sps:$4 sm:$0xff]   ;;  %v16189_v49 = vld [vmem:[#allocation5 + $0x5d0] ss:$24 sps:$4 sm:$0xff]   ;;  %v474_v54 = vunpack.c.h.bf16 %v19036_v18 }
  0xf1   : > { %v17808_v33 = vpop.eup %17807  ;;  %v1839_v56 = vadd.f32 1.0, %v17806_v11  ;;  %v1311_v40 = vmul.f32 0.70710677, %v735_v9  ;;  %v19031_v16 = vpack.c.bf16 %v2140_v29, %v2116_v30  ;;  %v1023_v11 = vmul.f32 0.5, %v735_v9 }
  0xf2   : > { %9405 = vmatpush1.bf16.msra.mxu1 %v16171_v20  ;;  %v17810_v14 = vpop.eup %17809  ;;  %9359 = vmatprep.mubr.bf16.mxu1 %v19024_v12  ;;  %v1827_v20 = vadd.f32 1.0, %v17808_v33  ;;  %v1011_v29 = vmul.f32 0.5, %v723_v8  ;;  %v19060_v15 = vmul.f32 0.5, %v747_v34  ;;  %v1050_v9 = vmul.f32 0.70710677, %v474_v54 }
  0xf3   : > { %9406 = vmatprep.subr.bf16.mxu1 %v16179_v38  ;;  %9963 = vmatpush1.bf16.msra.mxu0 %v16174_v45  ;;  %22861 = vst [vmem:[#allocation23_spill] sm:$0xff] %v19031_v16  ;;  %v2127_v24 = vmul.f32 %v1839_v56, %v19000_v21  ;;  %v1851_v37 = vadd.f32 1.0, %v17810_v14  ;;  %v1036_v38 = vmul.f32 0.5, %v748_v39  ;;  %v19044_v45 = vmul.f32 0.5, %v711_v59  ;;  %v17812_v41 = vpop.eup %17811 }
  0xf4   : > { %9964 = vmatprep.subr.bf16.mxu0 %v16182_v25  ;;  %9917 = vmatprep.mubr.bf16.mxu0 %v19031_v16  ;;  %v2115_v13 = vmul.f32 %v1827_v20, %v19006_v32  ;;  %17821 = verf.f32 %v1311_v40  ;;  %v1323_v39 = vmul.f32 0.70710677, %v747_v34  ;;  %v473_v25 = vunpack.c.l.bf16 %v19036_v18  ;;  %v17814_v55 = vpop.eup %17813  ;;  %v19399_v16 = vld [vmem:[%s18729_s8 + $0x40] sm:$0xff] }
  0xf5   : > { %v19046_v26 = vpack.c.bf16 %v2127_v24, %v2103_v42  ;;  %v2139_v21 = vmul.f32 %v1851_v37, %v19008_v17  ;;  %v1864_v32 = vadd.f32 1.0, %v17812_v41  ;;  %17823 = verf.f32 %v1299_v60  ;;  %v16200_v42 = vld [vmem:[#allocation5 + $0x1804] ss:$24 sps:$4 sm:$0xff]  }
  0xf6   : > { %9407 = vmatpush1.bf16.msra.mxu1 %v16177_v48  ;;  %v16197_v48 = vld [vmem:[#allocation5 + $0x604] ss:$24 sps:$4 sm:$0xff]   ;;  %17825 = verf.f32 %v1323_v39  ;;  %v498_v59 = vunpack.c.h.bf16 %v19040_v3  ;;  %v17816_v30 = vpop.eup %17815  ;;  %v19067_v40 = vmul.f32 0.5, %v473_v25  ;;  %v1049_v14 = vmul.f32 0.70710677, %v473_v25 }
  0xf7   : > { %9408 = vmatprep.subr.bf16.mxu1 %v16185_v5  ;;  %9965 = vmatpush1.bf16.msra.mxu0 %v16180_v61  ;;  %v19053_v17 = vpack.c.bf16 %v2139_v21, %v2115_v13  ;;  %v1888_v61 = vadd.f32 1.0, %v17814_v55  ;;  %v2152_v5 = vmul.f32 %v1864_v32, %v19015_v27  ;;  %v1876_v22 = vadd.f32 1.0, %v17816_v30  ;;  %v19085_v55 = vld [vmem:[%s18729_s8 + $0x128] sm:$0xff]  ;;  %v19088_v32 = vld [vmem:[%s18729_s8 + $0xf8] sm:$0xff] }
  0xf8   : > { %9966 = vmatprep.subr.bf16.mxu0 %v16188_v19  ;;  %9360 = vmatmul.mubr.bf16.gmra.mrb[16].mxu1 %v19046_v26  ;;  %v19063_v19 = vld [vmem:[%s18729_s8 + $0x98] sm:$0xff]  ;;  %v1073_v8 = vmul.f32 0.70710677, %v497_v43  ;;  %v485_v20 = vunpack.c.l.bf16 %v19057_v44  ;;  %v1074_v18 = vmul.f32 0.70710677, %v498_v59  ;;  %17827 = verf.f32 %v1049_v14 }
  0xf9   : > { %22862 = vst [vmem:[#allocation24_spill] sm:$0xff] %v19053_v17  ;;  %v17818_v33 = vpop.eup %17817  ;;  %9918 = vmatmul.mubr.bf16.gmra.mrb[16].mxu0 %v19053_v17  ;;  %v2176_v56 = vmul.f32 %v1888_v61, %v19021_v4  ;;  %17829 = verf.f32 %v1050_v9  ;;  %v486_v24 = vunpack.c.h.bf16 %v19057_v44  ;;  %v509_v37 = vunpack.c.l.bf16 %v19063_v19 }
  0xfa   : > { %9409 = vmatpush1.bf16.msra.mxu1 %v16183_v51  ;;  %v16192_v51 = vld [vmem:[#allocation5 + $0x17d0] ss:$24 sps:$4 sm:$0xff]   ;;  %v1900_v27 = vadd.f32 1.0, %v17818_v33  ;;  %v17820_v13 = vpop.eup %17819  ;;  %17831 = verf.f32 %v1073_v8  ;;  %v1061_v60 = vmul.f32 0.70710677, %v485_v20  ;;  %v785_v39 = vmul.f32 0.5, %v497_v43 }
  0xfb   : > { %9410 = vmatprep.subr.bf16.mxu1 %v16191_v0  ;;  %9967 = vmatpush1.bf16.msra.mxu0 %v16186_v63  ;;  %v19070_v34 = vpack.c.bf16 %v2176_v56, %v2152_v5  ;;  %v2164_v0 = vmul.f32 %v1876_v22, %v19028_v36  ;;  %v762_v63 = vmul.f32 0.5, %v474_v54  ;;  %v510_v36 = vunpack.c.h.bf16 %v19063_v19  ;;  %v19095_v56 = vld [vmem:[%s18729_s8 + $0x158] sm:$0xff] }
  0xfc   : > { %9968 = vmatprep.subr.bf16.mxu0 %v16194_v53  ;;  %v2188_v4 = vmul.f32 %v1900_v27, %v1036_v38  ;;  %v1863_v21 = vadd.f32 1.0, %v17820_v13  ;;  %17833 = verf.f32 %v1074_v18  ;;  %v1062_v25 = vmul.f32 0.70710677, %v486_v24 }
  0xfd   : > { %9369 = vmatprep.mubr.bf16.mxu1 %v19070_v34  ;;  %v1085_v61 = vmul.f32 0.70710677, %v509_v37  ;;  %v1086_v44 = vmul.f32 0.70710677, %v510_v36  ;;  %17835 = verf.f32 %v1061_v60  ;;  %v546_v33 = vunpack.c.h.bf16 %v19085_v55 }
  0xfe   : > { %9411 = vmatpush1.bf16.msra.mxu1 %v16189_v49  ;;  %v17822_v41 = vpop.eup %17821  ;;  %v19079_v38 = vpack.c.bf16 %v2188_v4, %v2164_v0  ;;  %v19082_v49 = vld [vmem:[%s18729_s8 + $0xc8] sm:$0xff]  ;;  %17837 = verf.f32 %v1062_v25  ;;  %v534_v22 = vunpack.c.h.bf16 %v19088_v32  ;;  %v773_v27 = vmul.f32 0.5, %v485_v20 }
  0xff   : > { %9473 = vmatprep.subr.bf16.mxu1 %v16197_v48  ;;  %9969 = vmatpush1.bf16.msra.mxu0 %v16192_v51  ;;  %v1887_v53 = vadd.f32 1.0, %v17822_v41  ;;  %v17824_v54 = vpop.eup %17823  ;;  %v2151_v48 = vmul.f32 %v1863_v21, %v19044_v45  ;;  %v522_v51 = vunpack.c.h.bf16 %v19082_v49  ;;  %17839 = verf.f32 %v1085_v61 }
 0x100   : > { %10031 = vmatprep.subr.bf16.mxu0 %v16200_v42  ;;  %22863 = vst [vmem:[#allocation25_spill] sm:$0xff] %v19079_v38  ;;  %9927 = vmatprep.mubr.bf16.mxu0 %v19079_v38  ;;  %v17826_v30 = vpop.eup %17825  ;;  %v1875_v5 = vadd.f32 1.0, %v17824_v54  ;;  %v786_v42 = vmul.f32 0.5, %v498_v59  ;;  %17841 = verf.f32 %v1086_v44  ;;  %v1122_v8 = vmul.f32 0.70710677, %v546_v33 }
 0x101   : > { %v2175_v43 = vmul.f32 %v1887_v53, %v1023_v11  ;;  %v1899_v19 = vadd.f32 1.0, %v17826_v30  ;;  %v1098_v9 = vmul.f32 0.70710677, %v522_v51  ;;  %v774_v18 = vmul.f32 0.5, %v486_v24 }
 0x102   : > { %v2163_v45 = vmul.f32 %v1875_v5, %v1011_v29  ;;  %v17828_v0 = vpop.eup %17827  ;;  %v558_v4 = vunpack.c.h.bf16 %v19095_v56  ;;  %v1110_v13 = vmul.f32 0.70710677, %v534_v22  ;;  %v521_v60 = vunpack.c.l.bf16 %v19082_v49 }
 0x103   : > { %v19098_v14 = vpack.c.bf16 %v2175_v43, %v2151_v48  ;;  %v2187_v11 = vmul.f32 %v1899_v19, %v19060_v15  ;;  %v17830_v41 = vpop.eup %17829  ;;  %v1625_v3 = vadd.f32 1.0, %v17828_v0  ;;  %17843 = verf.f32 %v1098_v9  ;;  %v19112_v43 = vld [vmem:[%s18729_s8 + $0x188] sm:$0xff] }
 0x104   : > { %v545_v59 = vunpack.c.l.bf16 %v19085_v55  ;;  %v17832_v15 = vpop.eup %17831  ;;  %v1626_v20 = vadd.f32 1.0, %v17830_v41  ;;  %v797_v21 = vmul.f32 0.5, %v509_v37  ;;  %17845 = verf.f32 %v1122_v8 }
 0x105   : > { %9370 = vmatmul.mubr.bf16.gmra.mrb[20].mxu1 %v19098_v14  ;;  %v19106_v29 = vpack.c.bf16 %v2187_v11, %v2163_v45  ;;  %v1134_v53 = vmul.f32 0.70710677, %v558_v4  ;;  %v798_v24 = vmul.f32 0.5, %v510_v36  ;;  %v1649_v54 = vadd.f32 1.0, %v17832_v15 }
 0x106   : > { %v17834_v25 = vpop.eup %17833  ;;  %v1913_v48 = vmul.f32 %v1625_v3, %v19067_v40  ;;  %17847 = verf.f32 %v1110_v13  ;;  %v1914_v44 = vmul.f32 %v1626_v20, %v762_v63  ;;  %v810_v30 = vmul.f32 0.5, %v522_v51  ;;  %v16195_v20 = vld [vmem:[#allocation5 + $0x600] ss:$24 sps:$4 sm:$0xff]  }
 0x107   : > { %22864 = vst [vmem:[#allocation26_spill] sm:$0xff] %v19106_v29  ;;  %9928 = vmatmul.mubr.bf16.gmra.mrb[20].mxu0 %v19106_v29  ;;  %v1650_v61 = vadd.f32 1.0, %v17834_v25  ;;  %17849 = verf.f32 %v1134_v53  ;;  %v17836_v5 = vpop.eup %17835  ;;  %v1937_v19 = vmul.f32 %v1649_v54, %v785_v39  ;;  %v1097_v37 = vmul.f32 0.70710677, %v521_v60  ;;  %v19123_v39 = vld [vmem:[%s18729_s8 + $0x1e8] sm:$0xff] }
 0x108   : > { %v1121_v45 = vmul.f32 0.70710677, %v545_v59  ;;  %v22438_v36 = vunpack.c.l.bf16 %v19088_v32  ;;  %v17838_v11 = vpop.eup %17837  ;;  %v1637_v9 = vadd.f32 1.0, %v17836_v5  ;;  %v834_v63 = vmul.f32 0.5, %v546_v33  ;;  %v16203_v25 = vld [vmem:[#allocation5 + $0x634] ss:$24 sps:$4 sm:$0xff]  }
 0x109   : > { %v1938_v40 = vmul.f32 %v1650_v61, %v786_v42  ;;  %v22437_v51 = vunpack.c.l.bf16 %v19095_v56  ;;  %v17840_v8 = vpop.eup %17839  ;;  %v1638_v0 = vadd.f32 1.0, %v17838_v11  ;;  %v19120_v13 = vpack.c.bf16 %v1937_v19, %v1913_v48  ;;  %v19129_v33 = vld [vmem:[%s18729_s8 + $0x1b8] sm:$0xff] }
 0x10a   : > { %17851 = verf.f32 %v1097_v37  ;;  %v22436_v41 = vunpack.c.h.bf16 %v19112_v43  ;;  %v17842_v3 = vpop.eup %17841  ;;  %v1661_v53 = vadd.f32 1.0, %v17840_v8  ;;  %v1925_v42 = vmul.f32 %v1637_v9, %v773_v27  ;;  %v16201_v8 = vld [vmem:[#allocation5 + $0x630] ss:$24 sps:$4 sm:$0xff]  }
 0x10b   : > { %v19126_v15 = vpack.c.bf16 %v1938_v40, %v1914_v44  ;;  %17853 = verf.f32 %v1121_v45  ;;  %v1662_v54 = vadd.f32 1.0, %v17842_v3  ;;  %v1926_v61 = vmul.f32 %v1638_v0, %v774_v18  ;;  %v16198_v40 = vld [vmem:[#allocation5 + $0x1800] ss:$24 sps:$4 sm:$0xff]   ;;  %v16209_v0 = vld [vmem:[#allocation5 + $0x664] ss:$24 sps:$4 sm:$0xff]  }
 0x10c   : > { %v822_v48 = vmul.f32 0.5, %v534_v22  ;;  %v1109_v5 = vmul.f32 0.70710677, %v22438_v36  ;;  %v1949_v19 = vmul.f32 %v1661_v53, %v797_v21  ;;  %v846_v37 = vmul.f32 0.5, %v558_v4  ;;  %v19141_v18 = vld [vmem:[%s18729_s8 + $0x218] sm:$0xff] }
 0x10d   : > { %9412 = vmatprep.mubr.bf16.mxu1 %v19126_v15  ;;  %v1133_v44 = vmul.f32 0.70710677, %v22437_v51  ;;  %v594_v27 = vunpack.c.h.bf16 %v19123_v39  ;;  %v17844_v11 = vpop.eup %17843  ;;  %v1950_v45 = vmul.f32 %v1662_v54, %v798_v24  ;;  %v1146_v22 = vmul.f32 0.70710677, %v22436_v41 }
 0x10e   : > { %9413 = vmatmul.mubr.bf16.vlgmr.msra.gmra.mrb[0].mxu1 %v19120_v13  ;;  %17855 = verf.f32 %v1109_v5  ;;  %v582_v9 = vunpack.c.h.bf16 %v19129_v33  ;;  %v17846_v21 = vpop.eup %17845  ;;  %v19144_v4 = vpack.c.bf16 %v1949_v19, %v1925_v42  ;;  %v1674_v3 = vadd.f32 1.0, %v17844_v11  ;;  %v16207_v42 = vld [vmem:[#allocation5 + $0x660] ss:$24 sps:$4 sm:$0xff]  }
 0x10f   : > { %9474 = vmatpush1.bf16.msra.mxu1 %v16195_v20  ;;  %v809_v24 = vmul.f32 0.5, %v521_v60  ;;  %17857 = verf.f32 %v1133_v44  ;;  %v19148_v54 = vpack.c.bf16 %v1950_v45, %v1926_v61  ;;  %v1698_v5 = vadd.f32 1.0, %v17846_v21  ;;  %v16206_v20 = vld [vmem:[#allocation5 + $0x1834] ss:$24 sps:$4 sm:$0xff]   ;;  %v16204_v60 = vld [vmem:[#allocation5 + $0x1830] ss:$24 sps:$4 sm:$0xff]  }
 0x110   : > { %22865 = vst [vmem:[#allocation27_spill] sm:$0xff] %v19144_v4  ;;  %v17848_v53 = vpop.eup %17847  ;;  %9475 = vmatprep.subr.bf16.mxu1 %v16203_v25  ;;  %v1170_v41 = vmul.f32 0.70710677, %v594_v27  ;;  %17859 = verf.f32 %v1146_v22  ;;  %v1962_v19 = vmul.f32 %v1674_v3, %v810_v30  ;;  %v833_v11 = vmul.f32 0.5, %v545_v59  ;;  %v16212_v30 = vld [vmem:[#allocation5 + $0x1864] ss:$24 sps:$4 sm:$0xff]  }
 0x111   : > { %22866 = vst [vmem:[#allocation28_spill] sm:$0xff] %v19148_v54  ;;  %v17850_v51 = vpop.eup %17849  ;;  %v1686_v36 = vadd.f32 1.0, %v17848_v53  ;;  %v22441_v49 = vunpack.c.h.bf16 %v19141_v18  ;;  %9970 = vmatprep.mubr.bf16.mxu0 %v19148_v54  ;;  %v1986_v61 = vmul.f32 %v1698_v5, %v834_v63  ;;  %v1158_v44 = vmul.f32 0.70710677, %v582_v9  ;;  %v19173_v5 = vld [vmem:[%s18729_s8 + $0x2a8] sm:$0xff] }
 0x112   : > { %v1710_v25 = vadd.f32 1.0, %v17850_v51  ;;  %17861 = verf.f32 %v1170_v41  ;;  %9971 = vmatmul.mubr.bf16.vlgmr.msra.gmra.mrb[0].mxu0 %v19144_v4  ;;  %v22867_v55 = vunpack.c.l.bf16 %v19088_v32  ;;  %v22439_v63 = vunpack.c.l.bf16 %v19112_v43  ;;  %v16215_v41 = vld [vmem:[#allocation5 + $0x694] ss:$24 sps:$4 sm:$0xff]  }
 0x113   : > { %9476 = vmatpush1.bf16.msra.mxu1 %v16201_v8  ;;  %v1974_v45 = vmul.f32 %v1686_v36, %v822_v48  ;;  %v1182_v22 = vmul.f32 0.70710677, %v22441_v49  ;;  %10032 = vmatpush1.bf16.msra.mxu0 %v16198_v40  ;;  %v19164_v21 = vpack.c.bf16 %v1986_v61, %v1962_v19  ;;  %17863 = verf.f32 %v1158_v44  ;;  %v19168_v36 = vld [vmem:[%s18729_s8 + $0x248] sm:$0xff]  ;;  %v16210_v40 = vld [vmem:[#allocation5 + $0x1860] ss:$24 sps:$4 sm:$0xff]  }
 0x114   : > { %v821_v59 = vmul.f32 0.5, %v22867_v55  ;;  %v17852_v51 = vpop.eup %17851  ;;  %9477 = vmatprep.subr.bf16.mxu1 %v16209_v0  ;;  %v1998_v3 = vmul.f32 %v1710_v25, %v846_v37  ;;  %v22440_v8 = vunpack.c.l.bf16 %v19123_v39  ;;  %10033 = vmatprep.subr.bf16.mxu0 %v16206_v20  ;;  %v1145_v53 = vmul.f32 0.70710677, %v22439_v63  ;;  %v16213_v20 = vld [vmem:[#allocation5 + $0x690] ss:$24 sps:$4 sm:$0xff]  }
 0x115   : > { %v17854_v32 = vpop.eup %17853  ;;  %v1673_v48 = vadd.f32 1.0, %v17852_v51  ;;  %17865 = verf.f32 %v1182_v22  ;;  %9422 = vmatprep.mubr.bf16.mxu1 %v19164_v21  ;;  %v22869_v19 = vunpack.c.l.bf16 %v19095_v56  ;;  %v16218_v44 = vld [vmem:[#allocation5 + $0x1894] ss:$24 sps:$4 sm:$0xff]   ;;  %v22442_v22 = vunpack.c.l.bf16 %v19129_v33 }
 0x116   : > { %v19176_v0 = vpack.c.bf16 %v1998_v3, %v1974_v45  ;;  %v1697_v37 = vadd.f32 1.0, %v17854_v32  ;;  %v1169_v25 = vmul.f32 0.70710677, %v22440_v8  ;;  %17867 = verf.f32 %v1145_v53  ;;  %v16221_v45 = vld [vmem:[#allocation5 + $0x6c4] ss:$24 sps:$4 sm:$0xff]  }
 0x117   : > { %v845_v61 = vmul.f32 0.5, %v22869_v19  ;;  %9478 = vmatpush1.bf16.msra.mxu1 %v16207_v42  ;;  %v1961_v55 = vmul.f32 %v1673_v48, %v809_v24  ;;  %v22445_v51 = vunpack.c.l.bf16 %v19141_v18  ;;  %10034 = vmatpush1.bf16.msra.mxu0 %v16204_v60  ;;  %v16219_v24 = vld [vmem:[#allocation5 + $0x6c0] ss:$24 sps:$4 sm:$0xff]   ;;  %v22870_v53 = vunpack.c.h.bf16 %v19112_v43 }
 0x118   : > { %22868 = vst [vmem:[#allocation29_spill] sm:$0xff] %v19176_v0  ;;  %v17856_v63 = vpop.eup %17855  ;;  %9479 = vmatprep.subr.bf16.mxu1 %v16215_v41  ;;  %v1985_v3 = vmul.f32 %v1697_v37, %v833_v11  ;;  %17869 = verf.f32 %v1169_v25  ;;  %10035 = vmatprep.subr.bf16.mxu0 %v16212_v30  ;;  %v882_v60 = vmul.f32 0.5, %v594_v27  ;;  %v1157_v11 = vmul.f32 0.70710677, %v22442_v22  ;;  %v16216_v37 = vld [vmem:[#allocation5 + $0x1890] ss:$24 sps:$4 sm:$0xff]  }
 0x119   : > { %v17858_v42 = vpop.eup %17857  ;;  %9980 = vmatprep.mubr.bf16.mxu0 %v19176_v0  ;;  %v1685_v48 = vadd.f32 1.0, %v17856_v63  ;;  %v858_v19 = vmul.f32 0.5, %v22870_v53  ;;  %v870_v30 = vmul.f32 0.5, %v582_v9  ;;  %v1181_v63 = vmul.f32 0.70710677, %v22445_v51  ;;  %v19200_v32 = vld [vmem:[%s18729_s8 + $0x278] sm:$0xff] }
 0x11a   : > { %v17860_v41 = vpop.eup %17859  ;;  %v19193_v25 = vpack.c.bf16 %v1985_v3, %v1961_v55  ;;  %v1709_v8 = vadd.f32 1.0, %v17858_v42  ;;  %v19203_v53 = vld [vmem:[%s18729_s8 + $0x2d8] sm:$0xff]  ;;  %v16227_v27 = vld [vmem:[#allocation5 + $0x6f4] ss:$24 sps:$4 sm:$0xff]   ;;  %v22871_v22 = vunpack.c.h.bf16 %v19141_v18  ;;  %17871 = verf.f32 %v1157_v11 }
 0x11b   : > { %9480 = vmatpush1.bf16.msra.mxu1 %v16213_v20  ;;  %v1973_v56 = vmul.f32 %v1685_v48, %v821_v59  ;;  %v1722_v49 = vadd.f32 1.0, %v17860_v41  ;;  %10036 = vmatpush1.bf16.msra.mxu0 %v16210_v40  ;;  %17873 = verf.f32 %v1181_v63  ;;  %v22872_v9 = vunpack.c.h.bf16 %v19168_v36  ;;  %v16224_v20 = vld [vmem:[#allocation5 + $0x18c4] ss:$24 sps:$4 sm:$0xff]  }
 0x11c   : > { %v894_v0 = vmul.f32 0.5, %v22871_v22  ;;  %v17862_v55 = vpop.eup %17861  ;;  %9481 = vmatprep.subr.bf16.mxu1 %v16221_v45  ;;  %v1997_v3 = vmul.f32 %v1709_v8, %v845_v61  ;;  %v22873_v51 = vunpack.c.h.bf16 %v19173_v5  ;;  %10037 = vmatprep.subr.bf16.mxu0 %v16218_v44  ;;  %v22448_v22 = vunpack.c.h.bf16 %v19200_v32  ;;  %v16222_v45 = vld [vmem:[#allocation5 + $0x18c0] ss:$24 sps:$4 sm:$0xff]   ;;  %v16225_v8 = vld [vmem:[#allocation5 + $0x6f0] ss:$24 sps:$4 sm:$0xff]  }
 0x11d   : > { %v1194_v42 = vmul.f32 0.70710677, %v22872_v9  ;;  %9423 = vmatmul.mubr.bf16.gmra.mrb[4].mxu1 %v19193_v25  ;;  %v1746_v59 = vadd.f32 1.0, %v17862_v55  ;;  %v2010_v48 = vmul.f32 %v1722_v49, %v858_v19  ;;  %v17864_v40 = vpop.eup %17863  ;;  %v22875_v41 = vunpack.c.l.bf16 %v19112_v43  ;;  %v16233_v9 = vld [vmem:[#allocation5 + $0x724] ss:$24 sps:$4 sm:$0xff]  }
 0x11e   : > { %v1218_v4 = vmul.f32 0.70710677, %v22873_v51  ;;  %v19214_v61 = vpack.c.bf16 %v1997_v3, %v1973_v56  ;;  %v1734_v49 = vadd.f32 1.0, %v17864_v40  ;;  %v22876_v56 = vunpack.c.l.bf16 %v19123_v39 }
 0x11f   : > { %v857_v63 = vmul.f32 0.5, %v22875_v41  ;;  %17875 = verf.f32 %v1194_v42  ;;  %v17866_v51 = vpop.eup %17865  ;;  %9482 = vmatpush1.bf16.msra.mxu1 %v16219_v24  ;;  %v2034_v55 = vmul.f32 %v1746_v59, %v882_v60  ;;  %10038 = vmatpush1.bf16.msra.mxu0 %v16216_v37  ;;  %v1206_v43 = vmul.f32 0.70710677, %v22448_v22  ;;  %v16230_v24 = vld [vmem:[#allocation5 + $0x18f4] ss:$24 sps:$4 sm:$0xff]  }
 0x120   : > { %22874 = vst [vmem:[#allocation30_spill] sm:$0xff] %v19214_v61  ;;  %17877 = verf.f32 %v1218_v4  ;;  %9483 = vmatprep.subr.bf16.mxu1 %v16227_v27  ;;  %v1758_v11 = vadd.f32 1.0, %v17866_v51  ;;  %v881_v3 = vmul.f32 0.5, %v22876_v56  ;;  %v22877_v42 = vunpack.c.h.bf16 %v19203_v53  ;;  %v17868_v44 = vpop.eup %17867  ;;  %10039 = vmatprep.subr.bf16.mxu0 %v16224_v20  ;;  %v16231_v60 = vld [vmem:[#allocation5 + $0x720] ss:$24 sps:$4 sm:$0xff]  }
 0x121   : > { %9981 = vmatmul.mubr.bf16.gmra.mrb[4].mxu0 %v19214_v61  ;;  %v19227_v4 = vpack.c.bf16 %v2034_v55, %v2010_v48  ;;  %v2022_v37 = vmul.f32 %v1734_v49, %v870_v30  ;;  %v22878_v27 = vunpack.c.l.bf16 %v19129_v33  ;;  %v22879_v39 = vunpack.c.l.bf16 %v19141_v18  ;;  %v16228_v56 = vld [vmem:[#allocation5 + $0x18f0] ss:$24 sps:$4 sm:$0xff]   ;;  %v16236_v48 = vld [vmem:[#allocation5 + $0x1924] ss:$24 sps:$4 sm:$0xff]   ;;  %v16239_v55 = vld [vmem:[#allocation5 + $0x754] ss:$24 sps:$4 sm:$0xff]  }
 0x122   : > { %v1230_v41 = vmul.f32 0.70710677, %v22877_v42  ;;  %v17870_v51 = vpop.eup %17869  ;;  %v2046_v22 = vmul.f32 %v1758_v11, %v894_v0  ;;  %v1721_v42 = vadd.f32 1.0, %v17868_v44  ;;  %17879 = verf.f32 %v1206_v43  ;;  %v19246_v44 = vld [vmem:[%s18729_s8 + $0x368] sm:$0xff]  ;;  %v16243_v61 = vld [vmem:[#allocation5 + $0x780] ss:$24 sps:$4 sm:$0xff]  }
 0x123   : > { %v869_v59 = vmul.f32 0.5, %v22878_v27  ;;  %v893_v40 = vmul.f32 0.5, %v22879_v39  ;;  %v22880_v20 = vunpack.c.l.bf16 %v19168_v36  ;;  %9484 = vmatpush1.bf16.msra.mxu1 %v16225_v8  ;;  %9432 = vmatprep.mubr.bf16.mxu1 %v19227_v4  ;;  %v1745_v33 = vadd.f32 1.0, %v17870_v51  ;;  %v19240_v27 = vld [vmem:[%s18729_s8 + $0x308] sm:$0xff] }
 0x124   : > { %17881 = verf.f32 %v1230_v41  ;;  %v22881_v18 = vunpack.c.l.bf16 %v19173_v5  ;;  %v22449_v49 = vunpack.c.l.bf16 %v19200_v32  ;;  %10040 = vmatpush1.bf16.msra.mxu0 %v16222_v45  ;;  %9485 = vmatprep.subr.bf16.mxu1 %v16233_v9  ;;  %v19242_v0 = vpack.c.bf16 %v2046_v22, %v2022_v37  ;;  %v17872_v43 = vpop.eup %17871  ;;  %v16237_v41 = vld [vmem:[#allocation5 + $0x750] ss:$24 sps:$4 sm:$0xff]  }
 0x125   : > { %v1193_v19 = vmul.f32 0.70710677, %v22880_v20  ;;  %v2009_v11 = vmul.f32 %v1721_v42, %v857_v63  ;;  %v22450_v8 = vunpack.c.l.bf16 %v19203_v53  ;;  %10041 = vmatprep.subr.bf16.mxu0 %v16230_v24  ;;  %v2033_v39 = vmul.f32 %v1745_v33, %v881_v3  ;;  %v17874_v45 = vpop.eup %17873  ;;  %v16234_v63 = vld [vmem:[#allocation5 + $0x1920] ss:$24 sps:$4 sm:$0xff]  }
 0x126   : > { %v1217_v30 = vmul.f32 0.70710677, %v22881_v18  ;;  %22882 = vst [vmem:[#allocation31_spill] sm:$0xff] %v19242_v0  ;;  %v22883_v51 = vunpack.c.h.bf16 %v19168_v36  ;;  %v1205_v22 = vmul.f32 0.70710677, %v22449_v49  ;;  %9990 = vmatprep.mubr.bf16.mxu0 %v19242_v0  ;;  %v1733_v9 = vadd.f32 1.0, %v17872_v43 }
 0x127   : > { %17883 = verf.f32 %v1193_v19  ;;  %v22884_v19 = vunpack.c.h.bf16 %v19173_v5  ;;  %v1229_v24 = vmul.f32 0.70710677, %v22450_v8  ;;  %v22455_v3 = vunpack.c.h.bf16 %v19240_v27  ;;  %v19259_v42 = vld [vmem:[%s18729_s8 + $0x338] sm:$0xff]  ;;  %9486 = vmatpush1.bf16.msra.mxu1 %v16231_v60 }
 0x128   : > { %v906_v20 = vmul.f32 0.5, %v22883_v51  ;;  %17885 = verf.f32 %v1217_v30  ;;  %v19261_v33 = vpack.c.bf16 %v2033_v39, %v2009_v11  ;;  %v1757_v18 = vadd.f32 1.0, %v17874_v45  ;;  %v19265_v51 = vld [vmem:[%s18729_s8 + $0x398] sm:$0xff]  ;;  %10042 = vmatpush1.bf16.msra.mxu0 %v16228_v56  ;;  %9487 = vmatprep.subr.bf16.mxu1 %v16239_v55  ;;  %v16242_v39 = vld [vmem:[#allocation5 + $0x1954] ss:$24 sps:$4 sm:$0xff]  }
 0x129   : > { %v930_v37 = vmul.f32 0.5, %v22884_v19  ;;  %17887 = verf.f32 %v1205_v22  ;;  %v17876_v43 = vpop.eup %17875  ;;  %v16245_v19 = vld [vmem:[#allocation5 + $0x784] ss:$24 sps:$4 sm:$0xff]   ;;  %v2021_v49 = vmul.f32 %v1733_v9, %v869_v59  ;;  %v22885_v8 = vunpack.c.h.bf16 %v19200_v32  ;;  %10043 = vmatprep.subr.bf16.mxu0 %v16236_v48  ;;  %v16240_v9 = vld [vmem:[#allocation5 + $0x1950] ss:$24 sps:$4 sm:$0xff]  }
 0x12a   : > { %17889 = verf.f32 %v1229_v24  ;;  %v1242_v60 = vmul.f32 0.70710677, %v22455_v3  ;;  %v17878_v11 = vpop.eup %17877  ;;  %9433 = vmatmul.mubr.bf16.gmra.mrb[8].mxu1 %v19261_v33  ;;  %v2045_v22 = vmul.f32 %v1757_v18, %v893_v40  ;;  %v1770_v45 = vadd.f32 1.0, %v17876_v43  ;;  %v16248_v48 = vld [vmem:[#allocation5 + $0x1984] ss:$24 sps:$4 sm:$0xff]  }
 0x12b   : > { %v918_v0 = vmul.f32 0.5, %v22885_v8  ;;  %v22886_v30 = vunpack.c.h.bf16 %v19203_v53  ;;  %v22887_v55 = vunpack.c.h.bf16 %v19246_v44  ;;  %v1794_v8 = vadd.f32 1.0, %v17878_v11  ;;  %9488 = vmatpush1.bf16.msra.mxu1 %v16237_v41  ;;  %v16251_v43 = vld [vmem:[#allocation5 + $0x7b4] ss:$24 sps:$4 sm:$0xff]  }
 0x12c   : > { %17891 = verf.f32 %v1242_v60  ;;  %v19278_v54 = vpack.c.bf16 %v2045_v22, %v2021_v49  ;;  %v2058_v40 = vmul.f32 %v1770_v45, %v906_v20  ;;  %v22460_v18 = vunpack.c.l.bf16 %v19240_v27  ;;  %10044 = vmatpush1.bf16.msra.mxu0 %v16234_v63  ;;  %9489 = vmatprep.subr.bf16.mxu1 %v16245_v19 }
 0x12d   : > { %v942_v56 = vmul.f32 0.5, %v22886_v30  ;;  %v1266_v59 = vmul.f32 0.70710677, %v22887_v55  ;;  %v17880_v30 = vpop.eup %17879  ;;  %v2082_v55 = vmul.f32 %v1794_v8, %v930_v37  ;;  %v22889_v11 = vunpack.c.l.bf16 %v19168_v36  ;;  %10045 = vmatprep.subr.bf16.mxu0 %v16242_v39 }
 0x12e   : > { %22888 = vst [vmem:[#allocation32_spill] sm:$0xff] %v19278_v54  ;;  %v22890_v24 = vunpack.c.l.bf16 %v19173_v5  ;;  %v22891_v41 = vunpack.c.h.bf16 %v19259_v42  ;;  %v17882_v22 = vpop.eup %17881  ;;  %9991 = vmatmul.mubr.bf16.gmra.mrb[8].mxu0 %v19278_v54  ;;  %v1782_v20 = vadd.f32 1.0, %v17880_v30  ;;  %v22892_v63 = vunpack.c.l.bf16 %v19200_v32  ;;  %v16246_v5 = vld [vmem:[#allocation5 + $0x1980] ss:$24 sps:$4 sm:$0xff]   ;;  %v16249_v32 = vld [vmem:[#allocation5 + $0x7b0] ss:$24 sps:$4 sm:$0xff]  }
 0x12f   : > { %17893 = verf.f32 %v1266_v59  ;;  %v905_v60 = vmul.f32 0.5, %v22889_v11  ;;  %v22893_v37 = vunpack.c.h.bf16 %v19265_v51  ;;  %v22461_v36 = vunpack.c.l.bf16 %v19246_v44  ;;  %v19298_v11 = vld [vmem:[%s18729_s8 + $0x3c8] sm:$0xff]  ;;  %9490 = vmatpush1.bf16.msra.mxu1 %v16243_v61 }
 0x130   : > { %v929_v3 = vmul.f32 0.5, %v22890_v24  ;;  %v1254_v49 = vmul.f32 0.70710677, %v22891_v41  ;;  %v917_v19 = vmul.f32 0.5, %v22892_v63  ;;  %v19293_v8 = vpack.c.bf16 %v2082_v55, %v2058_v40  ;;  %10046 = vmatpush1.bf16.msra.mxu0 %v16240_v9  ;;  %9491 = vmatprep.subr.bf16.mxu1 %v16251_v43  ;;  %v16257_v40 = vld [vmem:[#allocation5 + $0x7e4] ss:$24 sps:$4 sm:$0xff]  }
 0x131   : > { %v1278_v45 = vmul.f32 0.70710677, %v22893_v37  ;;  %v17884_v59 = vpop.eup %17883  ;;  %v1806_v24 = vadd.f32 1.0, %v17882_v22  ;;  %v1241_v39 = vmul.f32 0.70710677, %v22460_v18  ;;  %v2070_v41 = vmul.f32 %v1782_v20, %v918_v0  ;;  %10047 = vmatprep.subr.bf16.mxu0 %v16248_v48  ;;  %v19308_v9 = vld [vmem:[%s18729_s8 + $0x428] sm:$0xff] }
 0x132   : > { %17895 = verf.f32 %v1254_v49  ;;  %v17886_v30 = vpop.eup %17885  ;;  %v1769_v63 = vadd.f32 1.0, %v17884_v59  ;;  %v22894_v37 = vunpack.c.l.bf16 %v19203_v53  ;;  %v1265_v22 = vmul.f32 0.70710677, %v22461_v36  ;;  %v16254_v61 = vld [vmem:[#allocation5 + $0x19b4] ss:$24 sps:$4 sm:$0xff]   ;;  %9442 = vmatprep.mubr.bf16.mxu1 %v19293_v8 }
 0x133   : > { %17897 = verf.f32 %v1278_v45  ;;  %v2094_v55 = vmul.f32 %v1806_v24, %v942_v56  ;;  %v1793_v49 = vadd.f32 1.0, %v17886_v30  ;;  %v17888_v18 = vpop.eup %17887  ;;  %v16255_v0 = vld [vmem:[#allocation5 + $0x7e0] ss:$24 sps:$4 sm:$0xff]   ;;  %v22464_v53 = vunpack.c.l.bf16 %v19259_v42  ;;  %v16252_v59 = vld [vmem:[#allocation5 + $0x19b0] ss:$24 sps:$4 sm:$0xff]   ;;  %9492 = vmatpush1.bf16.msra.mxu1 %v16249_v32 }
 0x134   : > { %v941_v54 = vmul.f32 0.5, %v22894_v37  ;;  %17899 = verf.f32 %v1241_v39  ;;  %v2057_v20 = vmul.f32 %v1769_v63, %v905_v60  ;;  %v17890_v43 = vpop.eup %17889  ;;  %v1781_v48 = vadd.f32 1.0, %v17888_v18  ;;  %v16263_v30 = vld [vmem:[#allocation5 + $0x814] ss:$24 sps:$4 sm:$0xff]   ;;  %10048 = vmatpush1.bf16.msra.mxu0 %v16246_v5  ;;  %9493 = vmatprep.subr.bf16.mxu1 %v16257_v40 }
 0x135   : > { %v19311_v24 = vpack.c.bf16 %v2094_v55, %v2070_v41  ;;  %v2081_v39 = vmul.f32 %v1793_v49, %v929_v3  ;;  %17901 = verf.f32 %v1265_v22  ;;  %v1805_v37 = vadd.f32 1.0, %v17890_v43  ;;  %v19325_v49 = vld [vmem:[%s18729_s8 + $0x3f8] sm:$0xff]  ;;  %10049 = vmatprep.subr.bf16.mxu0 %v16254_v61 }
 0x136   : > { %v22896_v60 = vunpack.c.h.bf16 %v19240_v27  ;;  %v22897_v36 = vunpack.c.h.bf16 %v19246_v44  ;;  %v1253_v56 = vmul.f32 0.70710677, %v22464_v53  ;;  %v17892_v29 = vpop.eup %17891  ;;  %v2069_v18 = vmul.f32 %v1781_v48, %v917_v19  ;;  %v16258_v53 = vld [vmem:[#allocation5 + $0x19e0] ss:$24 sps:$4 sm:$0xff]  }
 0x137   : > { %22895 = vst [vmem:[#allocation33_spill] sm:$0xff] %v19311_v24  ;;  %v19319_v3 = vpack.c.bf16 %v2081_v39, %v2057_v20  ;;  %v22898_v41 = vunpack.c.l.bf16 %v19265_v51  ;;  %v22467_v55 = vunpack.c.h.bf16 %v19308_v9  ;;  %10000 = vmatprep.mubr.bf16.mxu0 %v19311_v24  ;;  %v2093_v43 = vmul.f32 %v1805_v37, %v941_v54  ;;  %v19331_v20 = vld [vmem:[%s18729_s8 + $0x458] sm:$0xff]  ;;  %9494 = vmatpush1.bf16.msra.mxu1 %v16255_v0 }
 0x138   : > { %v954_v63 = vmul.f32 0.5, %v22896_v60  ;;  %v978_v45 = vmul.f32 0.5, %v22897_v36  ;;  %v16260_v36 = vld [vmem:[#allocation5 + $0x19e4] ss:$24 sps:$4 sm:$0xff]   ;;  %v1818_v60 = vadd.f32 1.0, %v17892_v29  ;;  %v22899_v5 = vunpack.c.h.bf16 %v19259_v42  ;;  %10050 = vmatpush1.bf16.msra.mxu0 %v16252_v59  ;;  %9495 = vmatprep.subr.bf16.mxu1 %v16263_v30 }
 0x139   : > { %v1277_v32 = vmul.f32 0.70710677, %v22898_v41  ;;  %v17894_v22 = vpop.eup %17893  ;;  %17903 = verf.f32 %v1253_v56  ;;  %9443 = vmatmul.mubr.bf16.gmra.mrb[12].mxu1 %v19319_v3  ;;  %v22900_v39 = vunpack.c.h.bf16 %v19265_v51  ;;  %v22901_v61 = vunpack.c.h.bf16 %v19298_v11  ;;  %v16261_v29 = vld [vmem:[#allocation5 + $0x810] ss:$24 sps:$4 sm:$0xff]   ;;  %10051 = vmatprep.subr.bf16.mxu0 %v16260_v36 }
 0x13a   : > { %v966_v40 = vmul.f32 0.5, %v22899_v5  ;;  %v1842_v19 = vadd.f32 1.0, %v17894_v22  ;;  %v19338_v54 = vpack.c.bf16 %v2093_v43, %v2069_v18  ;;  %v2106_v37 = vmul.f32 %v1818_v60, %v954_v63  ;;  %v16266_v22 = vld [vmem:[#allocation5 + $0x1a14] ss:$24 sps:$4 sm:$0xff]  }
 0x13b   : > { %v990_v48 = vmul.f32 0.5, %v22900_v39  ;;  %17905 = verf.f32 %v1277_v32  ;;  %v1290_v41 = vmul.f32 0.70710677, %v22901_v61  ;;  %v1314_v56 = vmul.f32 0.70710677, %v22467_v55  ;;  %9496 = vmatpush1.bf16.msra.mxu1 %v16261_v29 }
 0x13c   : > { %22902 = vst [vmem:[#allocation34_spill] sm:$0xff] %v19338_v54  ;;  %v22470_v5 = vunpack.c.h.bf16 %v19325_v49  ;;  %v17896_v24 = vpop.eup %17895  ;;  %v2130_v39 = vmul.f32 %v1842_v19, %v978_v45  ;;  %v16269_v32 = vld [vmem:[#allocation5 + $0x844] ss:$24 sps:$4 sm:$0xff]   ;;  %10001 = vmatmul.mubr.bf16.gmra.mrb[12].mxu0 %v19338_v54  ;;  %v22903_v43 = vunpack.c.l.bf16 %v19240_v27  ;;  %v16264_v45 = vld [vmem:[#allocation5 + $0x1a10] ss:$24 sps:$4 sm:$0xff]   ;;  %v22904_v0 = vunpack.c.l.bf16 %v19246_v44 }
 0x13d   : > { %17907 = verf.f32 %v1290_v41  ;;  %v17898_v18 = vpop.eup %17897  ;;  %v1830_v63 = vadd.f32 1.0, %v17896_v24  ;;  %v16267_v41 = vld [vmem:[#allocation5 + $0x840] ss:$24 sps:$4 sm:$0xff]   ;;  %v22905_v36 = vunpack.c.h.bf16 %v19331_v20  ;;  %v16272_v27 = vld [vmem:[#allocation5 + $0x1a44] ss:$24 sps:$4 sm:$0xff]   ;;  %10052 = vmatpush1.bf16.msra.mxu0 %v16258_v53  ;;  %v22906_v44 = vunpack.c.l.bf16 %v19259_v42  ;;  %9497 = vmatprep.subr.bf16.mxu1 %v16269_v32  ;;  %v19365_v53 = vld [vmem:[%s18729_s8 + $0x10] sm:$0xff] }
 0x13e   : > { %v953_v60 = vmul.f32 0.5, %v22903_v43  ;;  %17909 = verf.f32 %v1314_v56  ;;  %v1302_v59 = vmul.f32 0.70710677, %v22470_v5  ;;  %v17900_v30 = vpop.eup %17899  ;;  %v19350_v19 = vpack.c.bf16 %v2130_v39, %v2106_v37  ;;  %v16275_v56 = vld [vmem:[#allocation5 + $0x874] ss:$24 sps:$4 sm:$0xff]   ;;  %10053 = vmatprep.subr.bf16.mxu0 %v16266_v22 }
 0x13f   : > { %v1854_v55 = vadd.f32 1.0, %v17898_v18  ;;  %v977_v61 = vmul.f32 0.5, %v22904_v0  ;;  %v1326_v54 = vmul.f32 0.70710677, %v22905_v36  ;;  %v2118_v24 = vmul.f32 %v1830_v63, %v966_v40  ;;  %v17902_v38 = vpop.eup %17901  ;;  %9498 = vmatpush1.bf16.msra.mxu1 %v16267_v41 }
 0x140   : > { %v1817_v43 = vadd.f32 1.0, %v17900_v30  ;;  %17911 = verf.f32 %v1302_v59  ;;  %v737_v5 = vunpack.c.l.bf16 %v19308_v9  ;;  %9452 = vmatprep.mubr.bf16.mxu1 %v19350_v19  ;;  %v965_v39 = vmul.f32 0.5, %v22906_v44  ;;  %9499 = vmatprep.subr.bf16.mxu1 %v16275_v56 }
 0x141   : > { %v2142_v37 = vmul.f32 %v1854_v55, %v990_v48  ;;  %17913 = verf.f32 %v1326_v54  ;;  %v22907_v29 = vunpack.c.l.bf16 %v19298_v11  ;;  %v1841_v0 = vadd.f32 1.0, %v17902_v38  ;;  %v16270_v55 = vld [vmem:[#allocation5 + $0x1a40] ss:$24 sps:$4 sm:$0xff]   ;;  %v19372_v54 = vld [vmem:[%s18729_s8 + $0x70] sm:$0xff]  ;;  %10054 = vmatpush1.bf16.msra.mxu0 %v16264_v45 }
 0x142   : > { %v2105_v18 = vmul.f32 %v1817_v43, %v953_v60  ;;  %v22908_v63 = vunpack.c.l.bf16 %v19265_v51  ;;  %v1313_v30 = vmul.f32 0.70710677, %v737_v5  ;;  %v22475_v42 = vunpack.c.l.bf16 %v19325_v49  ;;  %v16273_v38 = vld [vmem:[#allocation5 + $0x870] ss:$24 sps:$4 sm:$0xff]   ;;  %10055 = vmatprep.subr.bf16.mxu0 %v16272_v27 }
 0x143   : > { %v1289_v40 = vmul.f32 0.70710677, %v22907_v29  ;;  %v19367_v36 = vpack.c.bf16 %v2142_v37, %v2118_v24  ;;  %v22476_v48 = vunpack.c.l.bf16 %v19331_v20  ;;  %v17904_v22 = vpop.eup %17903  ;;  %v2129_v32 = vmul.f32 %v1841_v0, %v977_v61  ;;  %v16278_v29 = vld [vmem:[#allocation5 + $0x1a74] ss:$24 sps:$4 sm:$0xff]   ;;  %9500 = vmatpush1.bf16.msra.mxu1 %v16273_v38 }
 0x144   : > { %v989_v59 = vmul.f32 0.5, %v22908_v63  ;;  %v22910_v51 = vunpack.c.h.bf16 %v19298_v11  ;;  %v22911_v43 = vunpack.c.h.bf16 %v19308_v9  ;;  %v1829_v37 = vadd.f32 1.0, %v17904_v22  ;;  %v16281_v9 = vld [vmem:[#allocation5 + $0x8a4] ss:$24 sps:$4 sm:$0xff]  }
 0x145   : > { %22909 = vst [vmem:[#allocation35_spill] sm:$0xff] %v19367_v36  ;;  %17915 = verf.f32 %v1289_v40  ;;  %v17906_v24 = vpop.eup %17905  ;;  %10010 = vmatprep.mubr.bf16.mxu0 %v19367_v36  ;;  %v1301_v40 = vmul.f32 0.70710677, %v22475_v42  ;;  %v19383_v0 = vpack.c.bf16 %v2129_v32, %v2105_v18  ;;  %v1325_v45 = vmul.f32 0.70710677, %v22476_v48  ;;  %10056 = vmatpush1.bf16.msra.mxu0 %v16270_v55 }
 0x146   : > { %v1002_v60 = vmul.f32 0.5, %v22910_v51  ;;  %v1026_v44 = vmul.f32 0.5, %v22911_v43  ;;  %17917 = verf.f32 %v1313_v30  ;;  %v1853_v63 = vadd.f32 1.0, %v17906_v24  ;;  %v16276_v43 = vld [vmem:[#allocation5 + $0x1a70] ss:$24 sps:$4 sm:$0xff]   ;;  %10057 = vmatprep.subr.bf16.mxu0 %v16278_v29  ;;  %9501 = vmatprep.subr.bf16.mxu1 %v16281_v9 }
 0x147   : > { %v17908_v22 = vpop.eup %17907  ;;  %v2117_v51 = vmul.f32 %v1829_v37, %v965_v39  ;;  %v16279_v36 = vld [vmem:[#allocation5 + $0x8a0] ss:$24 sps:$4 sm:$0xff]   ;;  %v22912_v42 = vunpack.c.h.bf16 %v19325_v49  ;;  %17919 = verf.f32 %v1301_v40  ;;  %9453 = vmatmul.mubr.bf16.gmra.mrb[16].mxu1 %v19383_v0  ;;  %v22913_v24 = vunpack.c.h.bf16 %v19331_v20  ;;  %v16284_v30 = vld [vmem:[#allocation5 + $0x1aa4] ss:$24 sps:$4 sm:$0xff]   ;;  %v16287_v39 = vld [vmem:[#allocation5 + $0x8d4] ss:$24 sps:$4 sm:$0xff]  }
 0x148   : > { %v17910_v18 = vpop.eup %17909  ;;  %v2141_v56 = vmul.f32 %v1853_v63, %v989_v59  ;;  %v1866_v32 = vadd.f32 1.0, %v17908_v22  ;;  %17921 = verf.f32 %v1325_v45  ;;  %v1025_v41 = vmul.f32 0.5, %v737_v5  ;;  %v16285_v9 = vld [vmem:[#allocation5 + $0x8d0] ss:$24 sps:$4 sm:$0xff]   ;;  %9502 = vmatpush1.bf16.msra.mxu1 %v16279_v36 }
 0x149   : > { %v1014_v61 = vmul.f32 0.5, %v22912_v42  ;;  %v1038_v48 = vmul.f32 0.5, %v22913_v24  ;;  %v1890_v37 = vadd.f32 1.0, %v17910_v18  ;;  %v22914_v42 = vunpack.c.l.bf16 %v19298_v11  ;;  %v19408_v11 = vld [vmem:[%s18729_s8 + $0xa0] sm:$0xff]  ;;  %10058 = vmatpush1.bf16.msra.mxu0 %v16276_v43  ;;  %9503 = vmatprep.subr.bf16.mxu1 %v16287_v39  ;;  %v19430_v39 = vld [vmem:[%s18729_s8 + $0x130] sm:$0xff] }
 0x14a   : > { %v22915_v27 = vunpack.c.l.bf16 %v19365_v53  ;;  %v17912_v59 = vpop.eup %17911  ;;  %v19401_v63 = vpack.c.bf16 %v2141_v56, %v2117_v51  ;;  %v2154_v22 = vmul.f32 %v1866_v32, %v1002_v60  ;;  %v22917_v45 = vunpack.c.h.bf16 %v19365_v53  ;;  %v16282_v60 = vld [vmem:[#allocation5 + $0x1aa0] ss:$24 sps:$4 sm:$0xff]   ;;  %10059 = vmatprep.subr.bf16.mxu0 %v16284_v30 }
 0x14b   : > { %v1001_v40 = vmul.f32 0.5, %v22914_v42  ;;  %v22918_v38 = vunpack.c.l.bf16 %v19372_v54  ;;  %v17914_v5 = vpop.eup %17913  ;;  %v2178_v24 = vmul.f32 %v1890_v37, %v1026_v44  ;;  %v1878_v42 = vadd.f32 1.0, %v17912_v59  ;;  %v16290_v37 = vld [vmem:[#allocation5 + $0x1ad4] ss:$24 sps:$4 sm:$0xff]  }
 0x14c   : > { %v1051_v17 = vmul.f32 0.70710677, %v22915_v27  ;;  %22916 = vst [vmem:[#allocation36_spill] sm:$0xff] %v19401_v63  ;;  %v1052_v55 = vmul.f32 0.70710677, %v22917_v45  ;;  %v22919_v27 = vunpack.c.h.bf16 %v19372_v54  ;;  %10011 = vmatmul.mubr.bf16.gmra.mrb[16].mxu0 %v19401_v63  ;;  %v1902_v29 = vadd.f32 1.0, %v17914_v5  ;;  %9504 = vmatpush1.bf16.msra.mxu1 %v16285_v9 }
 0x14d   : > { %v1075_v18 = vmul.f32 0.70710677, %v22918_v38  ;;  %v22486_v51 = vunpack.c.l.bf16 %v19399_v16  ;;  %v22485_v56 = vunpack.c.h.bf16 %v19399_v16  ;;  %v19415_v45 = vpack.c.bf16 %v2178_v24, %v2154_v22  ;;  %v16293_v5 = vld [vmem:[#allocation5 + $0x904] ss:$24 sps:$4 sm:$0xff]   ;;  %10060 = vmatpush1.bf16.msra.mxu0 %v16282_v60 }
 0x14e   : > { %v1076_v7 = vmul.f32 0.70710677, %v22919_v27  ;;  %17923 = verf.f32 %v1051_v17  ;;  %v2166_v44 = vmul.f32 %v1878_v42, %v1014_v61  ;;  %v22484_v17 = vunpack.c.l.bf16 %v19408_v11  ;;  %v16288_v42 = vld [vmem:[#allocation5 + $0x1ad0] ss:$24 sps:$4 sm:$0xff]   ;;  %10061 = vmatprep.subr.bf16.mxu0 %v16290_v37  ;;  %9566 = vmatprep.subr.bf16.mxu1 %v16293_v5 }
 0x14f   : > { %17925 = verf.f32 %v1052_v55  ;;  %v17916_v32 = vpop.eup %17915  ;;  %v2190_v38 = vmul.f32 %v1902_v29, %v1038_v48  ;;  %v22483_v43 = vunpack.c.h.bf16 %v19408_v11  ;;  %9462 = vmatprep.mubr.bf16.mxu1 %v19415_v45  ;;  %v22920_v36 = vunpack.c.l.bf16 %v19325_v49  ;;  %v19427_v27 = vld [vmem:[%s18729_s8 + $0xd0] sm:$0xff] }
 0x150   : > { %17927 = verf.f32 %v1075_v18  ;;  %v17918_v59 = vpop.eup %17917  ;;  %v1865_v55 = vadd.f32 1.0, %v17916_v32  ;;  %v22921_v18 = vunpack.c.l.bf16 %v19331_v20  ;;  %v22922_v48 = vunpack.c.l.bf16 %v19365_v53 }
 0x151   : > { %17929 = verf.f32 %v1076_v7  ;;  %v1889_v61 = vadd.f32 1.0, %v17918_v59  ;;  %v1013_v22 = vmul.f32 0.5, %v22920_v36  ;;  %v19432_v7 = vpack.c.bf16 %v2190_v38, %v2166_v44  ;;  %v19439_v36 = vld [vmem:[%s18729_s8 + $0x100] sm:$0xff]  ;;  %v17920_v20 = vpop.eup %17919  ;;  %10062 = vmatpush1.bf16.msra.mxu0 %v16288_v42 }
 0x152   : > { %v1037_v24 = vmul.f32 0.5, %v22921_v18  ;;  %v763_v30 = vmul.f32 0.5, %v22922_v48  ;;  %v2153_v29 = vmul.f32 %v1865_v55, %v1001_v40  ;;  %v22924_v32 = vunpack.c.h.bf16 %v19365_v53  ;;  %v17922_v40 = vpop.eup %17921  ;;  %v16296_v55 = vld [vmem:[#allocation5 + $0x1b04] ss:$24 sps:$4 sm:$0xff]  }
 0x153   : > { %22923 = vst [vmem:[#allocation37_spill] sm:$0xff] %v19432_v7  ;;  %v1063_v49 = vmul.f32 0.70710677, %v22486_v51  ;;  %v2177_v18 = vmul.f32 %v1889_v61, %v1025_v41  ;;  %v1064_v48 = vmul.f32 0.70710677, %v22485_v56  ;;  %10020 = vmatprep.mubr.bf16.mxu0 %v19432_v7  ;;  %v1877_v38 = vadd.f32 1.0, %v17920_v20  ;;  %10124 = vmatprep.subr.bf16.mxu0 %v16296_v55 }
 0x154   : > { %v764_v59 = vmul.f32 0.5, %v22924_v32  ;;  %v1087_v44 = vmul.f32 0.70710677, %v22484_v17  ;;  %v1088_v53 = vmul.f32 0.70710677, %v22483_v43  ;;  %v524_v41 = vunpack.c.h.bf16 %v19427_v27  ;;  %v19453_v32 = vld [vmem:[%s18729_s8 + $0x160] sm:$0xff] }
 0x155   : > { %17931 = verf.f32 %v1063_v49  ;;  %v548_v60 = vunpack.c.h.bf16 %v19430_v39  ;;  %v19450_v9 = vpack.c.bf16 %v2177_v18, %v2153_v29  ;;  %v1901_v61 = vadd.f32 1.0, %v17922_v40 }
 0x156   : > { %17933 = verf.f32 %v1064_v48  ;;  %v2165_v17 = vmul.f32 %v1877_v38, %v1013_v22  ;;  %v22925_v56 = vunpack.c.l.bf16 %v19372_v54  ;;  %v22926_v37 = vunpack.c.h.bf16 %v19372_v54 }
 0x157   : > { %17935 = verf.f32 %v1087_v44  ;;  %9463 = vmatmul.mubr.bf16.gmra.mrb[20].mxu1 %v19450_v9  ;;  %v2189_v29 = vmul.f32 %v1901_v61, %v1037_v24  ;;  %v1100_v5 = vmul.f32 0.70710677, %v524_v41  ;;  %v1124_v18 = vmul.f32 0.70710677, %v548_v60 }
 0x158   : > { %v787_v20 = vmul.f32 0.5, %v22925_v56  ;;  %v788_v49 = vmul.f32 0.5, %v22926_v37  ;;  %v17924_v51 = vpop.eup %17923  ;;  %17937 = verf.f32 %v1088_v53  ;;  %v22927_v40 = vunpack.c.l.bf16 %v19399_v16 }
 0x159   : > { %v17926_v48 = vpop.eup %17925  ;;  %v1627_v22 = vadd.f32 1.0, %v17924_v51  ;;  %v560_v56 = vunpack.c.h.bf16 %v19453_v32  ;;  %v22928_v54 = vunpack.c.h.bf16 %v19439_v36  ;;  %v19466_v37 = vpack.c.bf16 %v2189_v29, %v2165_v17 }
 0x15a   : > { %v775_v43 = vmul.f32 0.5, %v22927_v40  ;;  %v17928_v44 = vpop.eup %17927  ;;  %v1628_v7 = vadd.f32 1.0, %v17926_v48  ;;  %17939 = verf.f32 %v1100_v5  ;;  %v22491_v24 = vunpack.c.l.bf16 %v19427_v27 }
 0x15b   : > { %v1112_v38 = vmul.f32 0.70710677, %v22928_v54  ;;  %22929 = vst [vmem:[#allocation38_spill] sm:$0xff] %v19466_v37  ;;  %v17930_v42 = vpop.eup %17929  ;;  %v22930_v53 = vunpack.c.h.bf16 %v19399_v16  ;;  %v1651_v63 = vadd.f32 1.0, %v17928_v44  ;;  %v1915_v40 = vmul.f32 %v1627_v22, %v763_v30  ;;  %10021 = vmatmul.mubr.bf16.gmra.mrb[20].mxu0 %v19466_v37  ;;  %v16291_v30 = vld [vmem:[#allocation5 + $0x900] ss:$24 sps:$4 sm:$0xff]  }
 0x15c   : > { %17941 = verf.f32 %v1124_v18  ;;  %v1652_v51 = vadd.f32 1.0, %v17930_v42  ;;  %v1916_v55 = vmul.f32 %v1628_v7, %v764_v59  ;;  %v1136_v54 = vmul.f32 0.70710677, %v560_v56  ;;  %v19480_v59 = vld [vmem:[%s18729_s8 + $0x190] sm:$0xff]  ;;  %v19494_v18 = vld [vmem:[%s18729_s8 + $0x1c0] sm:$0xff] }
 0x15d   : > { %v776_v61 = vmul.f32 0.5, %v22930_v53  ;;  %17943 = verf.f32 %v1112_v38  ;;  %v22931_v17 = vunpack.c.l.bf16 %v19408_v11  ;;  %v1939_v5 = vmul.f32 %v1651_v63, %v787_v20 }
 0x15e   : > { %v22494_v48 = vunpack.c.l.bf16 %v19430_v39  ;;  %v1099_v16 = vmul.f32 0.70710677, %v22491_v24  ;;  %v1940_v44 = vmul.f32 %v1652_v51, %v788_v49  ;;  %17945 = verf.f32 %v1136_v54  ;;  %v19489_v49 = vld [vmem:[%s18729_s8 + $0x1f0] sm:$0xff] }
 0x15f   : > { %v799_v29 = vmul.f32 0.5, %v22931_v17  ;;  %v17932_v22 = vpop.eup %17931  ;;  %v22932_v38 = vunpack.c.h.bf16 %v19408_v11  ;;  %v19484_v63 = vpack.c.bf16 %v1939_v5, %v1915_v40  ;;  %v16299_v17 = vld [vmem:[#allocation5 + $0x934] ss:$24 sps:$4 sm:$0xff]   ;;  %v812_v24 = vmul.f32 0.5, %v524_v41 }
 0x160   : > { %v1123_v20 = vmul.f32 0.70710677, %v22494_v48  ;;  %17947 = verf.f32 %v1099_v16  ;;  %v17934_v53 = vpop.eup %17933  ;;  %v19491_v51 = vpack.c.bf16 %v1940_v44, %v1916_v55  ;;  %v1639_v54 = vadd.f32 1.0, %v17932_v22 }
 0x161   : > { %v800_v42 = vmul.f32 0.5, %v22932_v38  ;;  %v836_v7 = vmul.f32 0.5, %v548_v60  ;;  %v17936_v37 = vpop.eup %17935  ;;  %v1640_v11 = vadd.f32 1.0, %v17934_v53  ;;  %v22933_v40 = vunpack.c.l.bf16 %v19439_v36 }
 0x162   : > { %17949 = verf.f32 %v1123_v20  ;;  %v22934_v16 = vunpack.c.l.bf16 %v19453_v32  ;;  %v17938_v48 = vpop.eup %17937  ;;  %9505 = vmatprep.mubr.bf16.mxu1 %v19491_v51  ;;  %v1663_v55 = vadd.f32 1.0, %v17936_v37  ;;  %v1927_v44 = vmul.f32 %v1639_v54, %v775_v43  ;;  %v16305_v37 = vld [vmem:[#allocation5 + $0x964] ss:$24 sps:$4 sm:$0xff]   ;;  %v16303_v54 = vld [vmem:[#allocation5 + $0x960] ss:$24 sps:$4 sm:$0xff]  }
 0x163   : > { %v1111_v5 = vmul.f32 0.70710677, %v22933_v40  ;;  %v22505_v41 = vunpack.c.h.bf16 %v19480_v59  ;;  %v1664_v22 = vadd.f32 1.0, %v17938_v48  ;;  %v1928_v50 = vmul.f32 %v1640_v11, %v776_v61  ;;  %9506 = vmatmul.mubr.bf16.vlgmr.msra.gmra.mrb[0].mxu1 %v19484_v63  ;;  %v19507_v40 = vld [vmem:[%s18729_s8 + $0x220] sm:$0xff] }
 0x164   : > { %v1135_v38 = vmul.f32 0.70710677, %v22934_v16  ;;  %v22935_v20 = vunpack.c.h.bf16 %v19439_v36  ;;  %v17940_v16 = vpop.eup %17939  ;;  %9567 = vmatpush1.bf16.msra.mxu1 %v16291_v30  ;;  %v1951_v62 = vmul.f32 %v1663_v55, %v799_v29  ;;  %v848_v43 = vmul.f32 0.5, %v560_v56 }
 0x165   : > { %17951 = verf.f32 %v1111_v5  ;;  %v1952_v48 = vmul.f32 %v1664_v22, %v800_v42  ;;  %9568 = vmatprep.subr.bf16.mxu1 %v16299_v17  ;;  %v1676_v61 = vadd.f32 1.0, %v17940_v16  ;;  %v1148_v11 = vmul.f32 0.70710677, %v22505_v41  ;;  %v16294_v42 = vld [vmem:[#allocation5 + $0x1b00] ss:$24 sps:$4 sm:$0xff]  }
 0x166   : > { %v824_v53 = vmul.f32 0.5, %v22935_v20  ;;  %17953 = verf.f32 %v1135_v38  ;;  %v17942_v60 = vpop.eup %17941  ;;  %v22936_v5 = vunpack.c.h.bf16 %v19489_v49  ;;  %v19514_v52 = vpack.c.bf16 %v1951_v62, %v1927_v44  ;;  %v16302_v17 = vld [vmem:[#allocation5 + $0x1b34] ss:$24 sps:$4 sm:$0xff]  }
 0x167   : > { %v17944_v47 = vpop.eup %17943  ;;  %v1700_v29 = vadd.f32 1.0, %v17942_v60  ;;  %v22938_v30 = vunpack.c.l.bf16 %v19427_v27  ;;  %v22508_v38 = vunpack.c.h.bf16 %v19507_v40  ;;  %v19519_v55 = vpack.c.bf16 %v1952_v48, %v1928_v50  ;;  %v16300_v50 = vld [vmem:[#allocation5 + $0x1b30] ss:$24 sps:$4 sm:$0xff]   ;;  %v16311_v48 = vld [vmem:[#allocation5 + $0x994] ss:$24 sps:$4 sm:$0xff]  }
 0x168   : > { %v1172_v20 = vmul.f32 0.70710677, %v22936_v5  ;;  %22937 = vst [vmem:[#allocation39_spill] sm:$0xff] %v19514_v52  ;;  %v1964_v22 = vmul.f32 %v1676_v61, %v812_v24  ;;  %v1688_v16 = vadd.f32 1.0, %v17944_v47  ;;  %17955 = verf.f32 %v1148_v11  ;;  %v17946_v41 = vpop.eup %17945  ;;  %9569 = vmatpush1.bf16.msra.mxu1 %v16297_v35 }
 0x169   : > { %v811_v56 = vmul.f32 0.5, %v22938_v30  ;;  %22939 = vst [vmem:[#allocation40_spill] sm:$0xff] %v19519_v55  ;;  %v1988_v5 = vmul.f32 %v1700_v29, %v836_v7  ;;  %v22940_v62 = vunpack.c.l.bf16 %v19430_v39  ;;  %v22941_v27 = vunpack.c.h.bf16 %v19494_v18  ;;  %10063 = vmatprep.mubr.bf16.mxu0 %v19519_v55  ;;  %9570 = vmatprep.subr.bf16.mxu1 %v16305_v37  ;;  %v16308_v39 = vld [vmem:[#allocation5 + $0x1b64] ss:$24 sps:$4 sm:$0xff]  }
 0x16a   : > { %17957 = verf.f32 %v1172_v20  ;;  %v17948_v30 = vpop.eup %17947  ;;  %v1712_v24 = vadd.f32 1.0, %v17946_v41  ;;  %v1976_v47 = vmul.f32 %v1688_v16, %v824_v53  ;;  %v1184_v35 = vmul.f32 0.70710677, %v22508_v38  ;;  %10064 = vmatmul.mubr.bf16.vlgmr.msra.gmra.mrb[0].mxu0 %v19514_v52  ;;  %v16329_v52 = vld [vmem:[#allocation5 + $0xa24] ss:$24 sps:$4 sm:$0xff]  }
 0x16b   : > { %v835_v44 = vmul.f32 0.5, %v22940_v62  ;;  %v1160_v60 = vmul.f32 0.70710677, %v22941_v27  ;;  %v22507_v7 = vunpack.c.l.bf16 %v19480_v59  ;;  %v19530_v61 = vpack.c.bf16 %v1988_v5, %v1964_v22  ;;  %10125 = vmatpush1.bf16.msra.mxu0 %v16294_v42  ;;  %v19538_v62 = vld [vmem:[%s18729_s8 + $0x250] sm:$0xff]  ;;  %v16306_v42 = vld [vmem:[#allocation5 + $0x1b60] ss:$24 sps:$4 sm:$0xff]  }
 0x16c   : > { %v1675_v11 = vadd.f32 1.0, %v17948_v30  ;;  %v22506_v20 = vunpack.c.l.bf16 %v19489_v49  ;;  %v17950_v29 = vpop.eup %17949  ;;  %v2000_v37 = vmul.f32 %v1712_v24, %v848_v43  ;;  %v22943_v41 = vunpack.c.l.bf16 %v19439_v36  ;;  %10126 = vmatprep.subr.bf16.mxu0 %v16302_v17  ;;  %9571 = vmatpush1.bf16.msra.mxu1 %v16303_v54  ;;  %v16309_v22 = vld [vmem:[#allocation5 + $0x990] ss:$24 sps:$4 sm:$0xff]   ;;  %v16317_v24 = vld [vmem:[#allocation5 + $0x9c4] ss:$24 sps:$4 sm:$0xff]  }
 0x16d   : > { %22942 = vst [vmem:[#allocation41_spill] sm:$0xff] %v19530_v61  ;;  %17959 = verf.f32 %v1160_v60  ;;  %v1147_v16 = vmul.f32 0.70710677, %v22507_v7  ;;  %v1699_v5 = vadd.f32 1.0, %v17950_v29  ;;  %v22944_v60 = vunpack.c.l.bf16 %v19453_v32  ;;  %9572 = vmatprep.subr.bf16.mxu1 %v16311_v48  ;;  %9515 = vmatprep.mubr.bf16.mxu1 %v19530_v61  ;;  %v16315_v29 = vld [vmem:[#allocation5 + $0x9c0] ss:$24 sps:$4 sm:$0xff]  }
 0x16e   : > { %v823_v53 = vmul.f32 0.5, %v22943_v41  ;;  %17961 = verf.f32 %v1184_v35  ;;  %v1963_v27 = vmul.f32 %v1675_v11, %v811_v56  ;;  %v1171_v43 = vmul.f32 0.70710677, %v22506_v20  ;;  %v19550_v56 = vld [vmem:[%s18729_s8 + $0x2b0] sm:$0xff]  ;;  %v16476_v61 = vld [vmem:[#allocation5 + $0x20a4] ss:$24 sps:$4 sm:$0xff]  }
 0x16f   : > { %v847_v30 = vmul.f32 0.5, %v22944_v60  ;;  %v17952_v36 = vpop.eup %17951  ;;  %v19545_v35 = vpack.c.bf16 %v2000_v37, %v1976_v47  ;;  %17963 = verf.f32 %v1147_v16  ;;  %v22512_v54 = vunpack.c.l.bf16 %v19494_v18  ;;  %v16314_v11 = vld [vmem:[#allocation5 + $0x1b94] ss:$24 sps:$4 sm:$0xff]   ;;  %10127 = vmatpush1.bf16.msra.mxu0 %v16300_v50 }
 0x170   : > { %v22511_v17 = vunpack.c.l.bf16 %v19507_v40  ;;  %v17954_v32 = vpop.eup %17953  ;;  %v1987_v41 = vmul.f32 %v1699_v5, %v835_v44  ;;  %v1687_v60 = vadd.f32 1.0, %v17952_v36  ;;  %17965 = verf.f32 %v1171_v43  ;;  %10128 = vmatprep.subr.bf16.mxu0 %v16308_v39  ;;  %9573 = vmatpush1.bf16.msra.mxu1 %v16309_v22  ;;  %v16323_v44 = vld [vmem:[#allocation5 + $0x9f4] ss:$24 sps:$4 sm:$0xff]  }
 0x171   : > { %22945 = vst [vmem:[#allocation42_spill] sm:$0xff] %v19545_v35  ;;  %10073 = vmatprep.mubr.bf16.mxu0 %v19545_v35  ;;  %v1711_v47 = vadd.f32 1.0, %v17954_v32  ;;  %v22946_v37 = vunpack.c.h.bf16 %v19480_v59  ;;  %v22947_v20 = vunpack.c.h.bf16 %v19489_v49  ;;  %v1159_v38 = vmul.f32 0.70710677, %v22512_v54  ;;  %v19566_v32 = vld [vmem:[%s18729_s8 + $0x280] sm:$0xff]  ;;  %9574 = vmatprep.subr.bf16.mxu1 %v16317_v24 }
 0x172   : > { %v19560_v5 = vpack.c.bf16 %v1987_v41, %v1963_v27  ;;  %v1975_v43 = vmul.f32 %v1687_v60, %v823_v53  ;;  %v1183_v50 = vmul.f32 0.70710677, %v22511_v17  ;;  %v22517_v36 = vunpack.c.h.bf16 %v19550_v56  ;;  %v19573_v27 = vld [vmem:[%s18729_s8 + $0x2e0] sm:$0xff]  ;;  %v16312_v24 = vld [vmem:[#allocation5 + $0x1b90] ss:$24 sps:$4 sm:$0xff]  }
 0x173   : > { %v860_v16 = vmul.f32 0.5, %v22946_v37  ;;  %v884_v7 = vmul.f32 0.5, %v22947_v20  ;;  %v17956_v37 = vpop.eup %17955  ;;  %v1999_v20 = vmul.f32 %v1711_v47, %v847_v30  ;;  %v22949_v48 = vunpack.c.h.bf16 %v19494_v18  ;;  %10129 = vmatpush1.bf16.msra.mxu0 %v16306_v42 }
 0x174   : > { %22948 = vst [vmem:[#allocation43_spill] sm:$0xff] %v19560_v5  ;;  %17967 = verf.f32 %v1159_v38  ;;  %v22950_v39 = vunpack.c.h.bf16 %v19538_v62  ;;  %v17958_v53 = vpop.eup %17957  ;;  %9516 = vmatmul.mubr.bf16.gmra.mrb[4].mxu1 %v19560_v5  ;;  %v1724_v41 = vadd.f32 1.0, %v17956_v37  ;;  %v22951_v60 = vunpack.c.h.bf16 %v19507_v40  ;;  %10130 = vmatprep.subr.bf16.mxu0 %v16314_v11  ;;  %v16321_v37 = vld [vmem:[#allocation5 + $0x9f0] ss:$24 sps:$4 sm:$0xff]  }
 0x175   : > { %v872_v35 = vmul.f32 0.5, %v22949_v48  ;;  %17969 = verf.f32 %v1183_v50  ;;  %v1220_v30 = vmul.f32 0.70710677, %v22517_v36  ;;  %v16320_v48 = vld [vmem:[#allocation5 + $0x1bc4] ss:$24 sps:$4 sm:$0xff]   ;;  %v19580_v38 = vpack.c.bf16 %v1999_v20, %v1975_v43  ;;  %9575 = vmatpush1.bf16.msra.mxu1 %v16315_v29 }
 0x176   : > { %v1196_v22 = vmul.f32 0.70710677, %v22950_v39  ;;  %v896_v17 = vmul.f32 0.5, %v22951_v60  ;;  %v1748_v47 = vadd.f32 1.0, %v17958_v53  ;;  %v22520_v39 = vunpack.c.h.bf16 %v19566_v32  ;;  %9576 = vmatprep.subr.bf16.mxu1 %v16323_v44 }
 0x177   : > { %22952 = vst [vmem:[#allocation44_spill] sm:$0xff] %v19580_v38  ;;  %v17960_v54 = vpop.eup %17959  ;;  %v2012_v55 = vmul.f32 %v1724_v41, %v860_v16  ;;  %v22953_v50 = vunpack.c.l.bf16 %v19480_v59  ;;  %v22521_v42 = vunpack.c.h.bf16 %v19573_v27  ;;  %10074 = vmatmul.mubr.bf16.gmra.mrb[4].mxu0 %v19580_v38  ;;  %v22954_v59 = vunpack.c.l.bf16 %v19489_v49  ;;  %v16335_v49 = vld [vmem:[#allocation5 + $0xa54] ss:$24 sps:$4 sm:$0xff]  }
 0x178   : > { %17971 = verf.f32 %v1196_v22  ;;  %v17962_v36 = vpop.eup %17961  ;;  %v2036_v43 = vmul.f32 %v1748_v47, %v884_v7  ;;  %v1736_v20 = vadd.f32 1.0, %v17960_v54  ;;  %v1208_v11 = vmul.f32 0.70710677, %v22520_v39  ;;  %v16326_v22 = vld [vmem:[#allocation5 + $0x1bf4] ss:$24 sps:$4 sm:$0xff]   ;;  %10131 = vmatpush1.bf16.msra.mxu0 %v16312_v24 }
 0x179   : > { %v859_v60 = vmul.f32 0.5, %v22953_v50  ;;  %17973 = verf.f32 %v1220_v30  ;;  %v1760_v16 = vadd.f32 1.0, %v17962_v36  ;;  %v883_v53 = vmul.f32 0.5, %v22954_v59  ;;  %v17964_v44 = vpop.eup %17963  ;;  %v16327_v7 = vld [vmem:[#allocation5 + $0xa20] ss:$24 sps:$4 sm:$0xff]   ;;  %10132 = vmatprep.subr.bf16.mxu0 %v16320_v48  ;;  %9577 = vmatpush1.bf16.msra.mxu1 %v16321_v37  ;;  %v19602_v24 = vld [vmem:[%s18729_s8 + $0x310] sm:$0xff] }
 0x17a   : > { %v1232_v41 = vmul.f32 0.70710677, %v22521_v42  ;;  %v19595_v54 = vpack.c.bf16 %v2036_v43, %v2012_v55  ;;  %v2024_v47 = vmul.f32 %v1736_v20, %v872_v35  ;;  %v22956_v50 = vunpack.c.l.bf16 %v19494_v18  ;;  %v17966_v36 = vpop.eup %17965  ;;  %v16324_v55 = vld [vmem:[#allocation5 + $0x1bf0] ss:$24 sps:$4 sm:$0xff]   ;;  %9578 = vmatprep.subr.bf16.mxu1 %v16329_v52  ;;  %v16332_v20 = vld [vmem:[#allocation5 + $0x1c24] ss:$24 sps:$4 sm:$0xff]  }
 0x17b   : > { %17975 = verf.f32 %v1208_v11  ;;  %v2048_v59 = vmul.f32 %v1760_v16, %v896_v17  ;;  %v1723_v29 = vadd.f32 1.0, %v17964_v44  ;;  %v22957_v42 = vunpack.c.l.bf16 %v19507_v40  ;;  %v16333_v40 = vld [vmem:[#allocation5 + $0xa50] ss:$24 sps:$4 sm:$0xff]  }
 0x17c   : > { %22955 = vst [vmem:[#allocation45_spill] sm:$0xff] %v19595_v54  ;;  %v871_v39 = vmul.f32 0.5, %v22956_v50  ;;  %17977 = verf.f32 %v1232_v41  ;;  %9525 = vmatprep.mubr.bf16.mxu1 %v19595_v54  ;;  %v1747_v18 = vadd.f32 1.0, %v17966_v36  ;;  %v22958_v35 = vunpack.c.l.bf16 %v19538_v62  ;;  %v19616_v44 = vld [vmem:[%s18729_s8 + $0x370] sm:$0xff]  ;;  %10133 = vmatpush1.bf16.msra.mxu0 %v16318_v10  ;;  %v16380_v54 = vld [vmem:[#allocation5 + $0x1da4] ss:$24 sps:$4 sm:$0xff]  }
 0x17d   : > { %v895_v30 = vmul.f32 0.5, %v22957_v42  ;;  %v22959_v48 = vunpack.c.l.bf16 %v19550_v56  ;;  %v22522_v17 = vunpack.c.l.bf16 %v19566_v32  ;;  %v19610_v42 = vpack.c.bf16 %v2048_v59, %v2024_v47  ;;  %10134 = vmatprep.subr.bf16.mxu0 %v16326_v22  ;;  %9579 = vmatpush1.bf16.msra.mxu1 %v16327_v7  ;;  %v19630_v7 = vld [vmem:[%s18729_s8 + $0x340] sm:$0xff] }
 0x17e   : > { %v1195_v43 = vmul.f32 0.70710677, %v22958_v35  ;;  %v2011_v11 = vmul.f32 %v1723_v29, %v859_v60  ;;  %v22961_v16 = vunpack.c.h.bf16 %v19538_v62  ;;  %v22523_v52 = vunpack.c.l.bf16 %v19573_v27  ;;  %v17968_v50 = vpop.eup %17967  ;;  %v16341_v60 = vld [vmem:[#allocation5 + $0xa84] ss:$24 sps:$4 sm:$0xff]   ;;  %9580 = vmatprep.subr.bf16.mxu1 %v16335_v49  ;;  %v16338_v49 = vld [vmem:[#allocation5 + $0x1c54] ss:$24 sps:$4 sm:$0xff]  }
 0x17f   : > { %v1219_v37 = vmul.f32 0.70710677, %v22959_v48  ;;  %22960 = vst [vmem:[#allocation46_spill] sm:$0xff] %v19610_v42  ;;  %v2035_v36 = vmul.f32 %v1747_v18, %v883_v53  ;;  %v1207_v35 = vmul.f32 0.70710677, %v22522_v17  ;;  %v17970_v47 = vpop.eup %17969  ;;  %v1735_v29 = vadd.f32 1.0, %v17968_v50  ;;  %10083 = vmatprep.mubr.bf16.mxu0 %v19610_v42 }
 0x180   : > { %v908_v41 = vmul.f32 0.5, %v22961_v16  ;;  %17979 = verf.f32 %v1195_v43  ;;  %v22962_v59 = vunpack.c.h.bf16 %v19550_v56  ;;  %v1231_v10 = vmul.f32 0.70710677, %v22523_v52  ;;  %v19633_v50 = vld [vmem:[%s18729_s8 + $0x3a0] sm:$0xff]  ;;  %10135 = vmatpush1.bf16.msra.mxu0 %v16324_v55 }
 0x181   : > { %17981 = verf.f32 %v1219_v37  ;;  %v19626_v18 = vpack.c.bf16 %v2035_v36, %v2011_v11  ;;  %v1759_v43 = vadd.f32 1.0, %v17970_v47  ;;  %v2023_v37 = vmul.f32 %v1735_v29, %v871_v39  ;;  %10136 = vmatprep.subr.bf16.mxu0 %v16332_v20  ;;  %9581 = vmatpush1.bf16.msra.mxu1 %v16333_v40  ;;  %v16339_v39 = vld [vmem:[#allocation5 + $0xa80] ss:$24 sps:$4 sm:$0xff]  }
 0x182   : > { %v932_v16 = vmul.f32 0.5, %v22962_v59  ;;  %v17972_v53 = vpop.eup %17971  ;;  %17983 = verf.f32 %v1207_v35  ;;  %v16330_v59 = vld [vmem:[#allocation5 + $0x1c20] ss:$24 sps:$4 sm:$0xff]   ;;  %v22964_v52 = vunpack.c.h.bf16 %v19566_v32  ;;  %v22965_v35 = vunpack.c.h.bf16 %v19573_v27  ;;  %9582 = vmatprep.subr.bf16.mxu1 %v16341_v60 }
 0x183   : > { %22963 = vst [vmem:[#allocation47_spill] sm:$0xff] %v19626_v18  ;;  %v17974_v17 = vpop.eup %17973  ;;  %v1772_v48 = vadd.f32 1.0, %v17972_v53  ;;  %17985 = verf.f32 %v1231_v10  ;;  %9526 = vmatmul.mubr.bf16.gmra.mrb[8].mxu1 %v19626_v18  ;;  %v2047_v11 = vmul.f32 %v1759_v43, %v895_v30  ;;  %v22966_v22 = vunpack.c.h.bf16 %v19602_v24  ;;  %v16336_v30 = vld [vmem:[#allocation5 + $0x1c50] ss:$24 sps:$4 sm:$0xff]   ;;  %v16347_v43 = vld [vmem:[#allocation5 + $0xab4] ss:$24 sps:$4 sm:$0xff]  }
 0x184   : > { %v920_v38 = vmul.f32 0.5, %v22964_v52  ;;  %v1796_v36 = vadd.f32 1.0, %v17974_v17  ;;  %v944_v47 = vmul.f32 0.5, %v22965_v35  ;;  %v22967_v53 = vunpack.c.h.bf16 %v19616_v44  ;;  %10137 = vmatpush1.bf16.msra.mxu0 %v16330_v59 }
 0x185   : > { %v1244_v42 = vmul.f32 0.70710677, %v22966_v22  ;;  %v2060_v29 = vmul.f32 %v1772_v48, %v908_v41  ;;  %v17976_v58 = vpop.eup %17975  ;;  %v19646_v17 = vpack.c.bf16 %v2047_v11, %v2023_v37  ;;  %v22532_v20 = vunpack.c.l.bf16 %v19602_v24  ;;  %v16344_v22 = vld [vmem:[#allocation5 + $0x1c84] ss:$24 sps:$4 sm:$0xff]   ;;  %10138 = vmatprep.subr.bf16.mxu0 %v16338_v49  ;;  %9583 = vmatpush1.bf16.msra.mxu1 %v16339_v39  ;;  %v16350_v39 = vld [vmem:[#allocation5 + $0x1cb4] ss:$24 sps:$4 sm:$0xff]  }
 0x186   : > { %v1268_v52 = vmul.f32 0.70710677, %v22967_v53  ;;  %v2084_v35 = vmul.f32 %v1796_v36, %v932_v16  ;;  %v17978_v40 = vpop.eup %17977  ;;  %v1784_v41 = vadd.f32 1.0, %v17976_v58  ;;  %v22969_v48 = vunpack.c.l.bf16 %v19538_v62  ;;  %v16345_v58 = vld [vmem:[#allocation5 + $0xab0] ss:$24 sps:$4 sm:$0xff]   ;;  %9584 = vmatprep.subr.bf16.mxu1 %v16347_v43 }
 0x187   : > { %22968 = vst [vmem:[#allocation48_spill] sm:$0xff] %v19646_v17  ;;  %17987 = verf.f32 %v1244_v42  ;;  %v22970_v55 = vunpack.c.l.bf16 %v19550_v56  ;;  %v1808_v60 = vadd.f32 1.0, %v17978_v40  ;;  %v22972_v37 = vunpack.c.h.bf16 %v19630_v7  ;;  %10084 = vmatmul.mubr.bf16.gmra.mrb[8].mxu0 %v19646_v17  ;;  %v16351_v40 = vld [vmem:[#allocation5 + $0xae0] ss:$24 sps:$4 sm:$0xff]   ;;  %v19677_v49 = vld [vmem:[%s18729_s8 + $0x3d0] sm:$0xff] }
 0x188   : > { %v907_v53 = vmul.f32 0.5, %v22969_v48  ;;  %17989 = verf.f32 %v1268_v52  ;;  %v19653_v10 = vpack.c.bf16 %v2084_v35, %v2060_v29  ;;  %v22973_v42 = vunpack.c.h.bf16 %v19633_v50  ;;  %v16342_v52 = vld [vmem:[#allocation5 + $0x1c80] ss:$24 sps:$4 sm:$0xff]   ;;  %10139 = vmatpush1.bf16.msra.mxu0 %v16336_v30 }
 0x189   : > { %v931_v18 = vmul.f32 0.5, %v22970_v55  ;;  %v1256_v16 = vmul.f32 0.70710677, %v22972_v37  ;;  %v2072_v36 = vmul.f32 %v1784_v41, %v920_v38  ;;  %v22974_v62 = vunpack.c.l.bf16 %v19566_v32  ;;  %v16353_v55 = vld [vmem:[#allocation5 + $0xae4] ss:$24 sps:$4 sm:$0xff]   ;;  %10140 = vmatprep.subr.bf16.mxu0 %v16344_v22  ;;  %9585 = vmatpush1.bf16.msra.mxu1 %v16345_v58 }
 0x18a   : > { %22971 = vst [vmem:[#allocation49_spill] sm:$0xff] %v19653_v10  ;;  %v1280_v11 = vmul.f32 0.70710677, %v22973_v42  ;;  %v22533_v56 = vunpack.c.l.bf16 %v19616_v44  ;;  %v1243_v59 = vmul.f32 0.70710677, %v22532_v20  ;;  %v17980_v29 = vpop.eup %17979  ;;  %v2096_v35 = vmul.f32 %v1808_v60, %v944_v47  ;;  %9535 = vmatprep.mubr.bf16.mxu1 %v19653_v10  ;;  %9586 = vmatprep.subr.bf16.mxu1 %v16353_v55 }
 0x18b   : > { %v919_v48 = vmul.f32 0.5, %v22974_v62  ;;  %17991 = verf.f32 %v1256_v16  ;;  %v17982_v32 = vpop.eup %17981  ;;  %v1771_v41 = vadd.f32 1.0, %v17980_v29  ;;  %v22975_v37 = vunpack.c.l.bf16 %v19573_v27  ;;  %v16359_v62 = vld [vmem:[#allocation5 + $0xb14] ss:$24 sps:$4 sm:$0xff]   ;;  %v19683_v27 = vld [vmem:[%s18729_s8 + $0x400] sm:$0xff] }
 0x18c   : > { %17993 = verf.f32 %v1280_v11  ;;  %v1267_v47 = vmul.f32 0.70710677, %v22533_v56  ;;  %v17984_v43 = vpop.eup %17983  ;;  %v19672_v60 = vpack.c.bf16 %v2096_v35, %v2072_v36  ;;  %v1795_v16 = vadd.f32 1.0, %v17982_v32  ;;  %v19680_v29 = vld [vmem:[%s18729_s8 + $0x430] sm:$0xff]  ;;  %v19688_v32 = vld [vmem:[%s18729_s8 + $0x460] sm:$0xff]  ;;  %10141 = vmatpush1.bf16.msra.mxu0 %v16342_v52 }
 0x18d   : > { %v943_v42 = vmul.f32 0.5, %v22975_v37  ;;  %v22977_v20 = vunpack.c.h.bf16 %v19602_v24  ;;  %17995 = verf.f32 %v1243_v59  ;;  %v17986_v11 = vpop.eup %17985  ;;  %v2059_v37 = vmul.f32 %v1771_v41, %v907_v53  ;;  %v16348_v58 = vld [vmem:[#allocation5 + $0x1cb0] ss:$24 sps:$4 sm:$0xff]   ;;  %v16356_v55 = vld [vmem:[#allocation5 + $0x1ce4] ss:$24 sps:$4 sm:$0xff]   ;;  %10142 = vmatprep.subr.bf16.mxu0 %v16350_v39  ;;  %9587 = vmatpush1.bf16.msra.mxu1 %v16351_v40 }
 0x18e   : > { %22976 = vst [vmem:[#allocation50_spill] sm:$0xff] %v19672_v60  ;;  %v1783_v30 = vadd.f32 1.0, %v17984_v43  ;;  %v22978_v36 = vunpack.c.h.bf16 %v19616_v44  ;;  %17997 = verf.f32 %v1267_v47  ;;  %10093 = vmatprep.mubr.bf16.mxu0 %v19672_v60  ;;  %v1807_v59 = vadd.f32 1.0, %v17986_v11  ;;  %9588 = vmatprep.subr.bf16.mxu1 %v16359_v62  ;;  %v16354_v62 = vld [vmem:[#allocation5 + $0x1ce0] ss:$24 sps:$4 sm:$0xff]  }
 0x18f   : > { %v956_v38 = vmul.f32 0.5, %v22977_v20  ;;  %v2083_v20 = vmul.f32 %v1795_v16, %v931_v18  ;;  %v22979_v56 = vunpack.c.l.bf16 %v19630_v7  ;;  %v22980_v10 = vunpack.c.l.bf16 %v19633_v50 }
 0x190   : > { %v980_v35 = vmul.f32 0.5, %v22978_v36  ;;  %v2071_v53 = vmul.f32 %v1783_v30, %v919_v48  ;;  %v22540_v41 = vunpack.c.h.bf16 %v19677_v49  ;;  %v2095_v18 = vmul.f32 %v1807_v59, %v943_v42  ;;  %10143 = vmatpush1.bf16.msra.mxu0 %v16348_v58 }
 0x191   : > { %v1255_v17 = vmul.f32 0.70710677, %v22979_v56  ;;  %v1279_v22 = vmul.f32 0.70710677, %v22980_v10  ;;  %v17988_v36 = vpop.eup %17987  ;;  %v19698_v60 = vpack.c.bf16 %v2083_v20, %v2059_v37  ;;  %v22541_v56 = vunpack.c.h.bf16 %v19688_v32  ;;  %v16357_v10 = vld [vmem:[#allocation5 + $0xb10] ss:$24 sps:$4 sm:$0xff]   ;;  %10144 = vmatprep.subr.bf16.mxu0 %v16356_v55 }
 0x192   : > { %v17990_v16 = vpop.eup %17989  ;;  %v1820_v48 = vadd.f32 1.0, %v17988_v36  ;;  %v22982_v11 = vunpack.c.h.bf16 %v19630_v7  ;;  %v22983_v43 = vunpack.c.h.bf16 %v19633_v50  ;;  %v19706_v52 = vpack.c.bf16 %v2095_v18, %v2071_v53  ;;  %v16365_v20 = vld [vmem:[#allocation5 + $0xb44] ss:$24 sps:$4 sm:$0xff]   ;;  %9589 = vmatpush1.bf16.msra.mxu1 %v16357_v10 }
 0x193   : > { %22981 = vst [vmem:[#allocation51_spill] sm:$0xff] %v19698_v60  ;;  %17999 = verf.f32 %v1255_v17  ;;  %9536 = vmatmul.mubr.bf16.gmra.mrb[12].mxu1 %v19698_v60  ;;  %v1844_v17 = vadd.f32 1.0, %v17990_v16  ;;  %v1292_v42 = vmul.f32 0.70710677, %v22540_v41  ;;  %v22985_v39 = vunpack.c.h.bf16 %v19680_v29  ;;  %9590 = vmatprep.subr.bf16.mxu1 %v16365_v20  ;;  %v19731_v60 = vld [vmem:[%s18729_s8 + $0x18] sm:$0xff] }
 0x194   : > { %v968_v30 = vmul.f32 0.5, %v22982_v11  ;;  %v992_v47 = vmul.f32 0.5, %v22983_v43  ;;  %18001 = verf.f32 %v1279_v22  ;;  %22984 = vst [vmem:[#allocation52_spill] sm:$0xff] %v19706_v52  ;;  %v2108_v37 = vmul.f32 %v1820_v48, %v956_v38  ;;  %10094 = vmatmul.mubr.bf16.gmra.mrb[12].mxu0 %v19706_v52  ;;  %v16371_v52 = vld [vmem:[#allocation5 + $0xb74] ss:$24 sps:$4 sm:$0xff]  }
 0x195   : > { %v1316_v40 = vmul.f32 0.70710677, %v22985_v39  ;;  %v22986_v59 = vunpack.c.l.bf16 %v19602_v24  ;;  %v22987_v43 = vunpack.c.l.bf16 %v19616_v44  ;;  %v22988_v11 = vunpack.c.h.bf16 %v19683_v27  ;;  %v17992_v18 = vpop.eup %17991  ;;  %v16362_v24 = vld [vmem:[#allocation5 + $0x1d14] ss:$24 sps:$4 sm:$0xff]   ;;  %10145 = vmatpush1.bf16.msra.mxu0 %v16354_v62 }
 0x196   : > { %v2132_v16 = vmul.f32 %v1844_v17, %v980_v35  ;;  %18003 = verf.f32 %v1292_v42  ;;  %v1328_v41 = vmul.f32 0.70710677, %v22541_v56  ;;  %v17994_v48 = vpop.eup %17993  ;;  %v1832_v44 = vadd.f32 1.0, %v17992_v18  ;;  %v16360_v35 = vld [vmem:[#allocation5 + $0x1d10] ss:$24 sps:$4 sm:$0xff]   ;;  %10146 = vmatprep.subr.bf16.mxu0 %v16362_v24 }
 0x197   : > { %v955_v36 = vmul.f32 0.5, %v22986_v59  ;;  %v979_v22 = vmul.f32 0.5, %v22987_v43  ;;  %v1304_v53 = vmul.f32 0.70710677, %v22988_v11  ;;  %18005 = verf.f32 %v1316_v40  ;;  %v17996_v58 = vpop.eup %17995  ;;  %v16363_v42 = vld [vmem:[#allocation5 + $0xb40] ss:$24 sps:$4 sm:$0xff]  }
 0x198   : > { %v19724_v17 = vpack.c.bf16 %v2132_v16, %v2108_v37  ;;  %v1856_v43 = vadd.f32 1.0, %v17994_v48  ;;  %v22990_v11 = vunpack.c.l.bf16 %v19630_v7  ;;  %v17998_v56 = vpop.eup %17997  ;;  %v2120_v18 = vmul.f32 %v1832_v44, %v968_v30  ;;  %v16368_v40 = vld [vmem:[#allocation5 + $0x1d44] ss:$24 sps:$4 sm:$0xff]   ;;  %9591 = vmatpush1.bf16.msra.mxu1 %v16363_v42 }
 0x199   : > { %18007 = verf.f32 %v1304_v53  ;;  %v1819_v38 = vadd.f32 1.0, %v17996_v58  ;;  %v22991_v39 = vunpack.c.l.bf16 %v19633_v50  ;;  %v1843_v7 = vadd.f32 1.0, %v17998_v56  ;;  %v16369_v56 = vld [vmem:[#allocation5 + $0xb70] ss:$24 sps:$4 sm:$0xff]   ;;  %9592 = vmatprep.subr.bf16.mxu1 %v16371_v52  ;;  %10147 = vmatpush1.bf16.msra.mxu0 %v16360_v35 }
 0x19a   : > { %22989 = vst [vmem:[#allocation53_spill] sm:$0xff] %v19724_v17  ;;  %v967_v55 = vmul.f32 0.5, %v22990_v11  ;;  %18009 = verf.f32 %v1328_v41  ;;  %9545 = vmatprep.mubr.bf16.mxu1 %v19724_v17  ;;  %v2144_v10 = vmul.f32 %v1856_v43, %v992_v47  ;;  %v22992_v37 = vunpack.c.l.bf16 %v19677_v49  ;;  %v19746_v43 = vld [vmem:[%s18729_s8 + $0x78] sm:$0xff]  ;;  %10148 = vmatprep.subr.bf16.mxu0 %v16368_v40  ;;  %v16383_v40 = vld [vmem:[#allocation5 + $0xbd4] ss:$24 sps:$4 sm:$0xff]  }
 0x19b   : > { %v991_v59 = vmul.f32 0.5, %v22991_v39  ;;  %v22993_v30 = vunpack.c.l.bf16 %v19680_v29  ;;  %v2107_v16 = vmul.f32 %v1819_v38, %v955_v36  ;;  %v22994_v50 = vunpack.c.h.bf16 %v19677_v49 }
 0x19c   : > { %v1291_v53 = vmul.f32 0.70710677, %v22992_v37  ;;  %v22546_v41 = vunpack.c.l.bf16 %v19688_v32  ;;  %v22995_v62 = vunpack.c.l.bf16 %v19683_v27  ;;  %v19743_v58 = vpack.c.bf16 %v2144_v10, %v2120_v18  ;;  %v16377_v10 = vld [vmem:[#allocation5 + $0xba4] ss:$24 sps:$4 sm:$0xff]   ;;  %9593 = vmatpush1.bf16.msra.mxu1 %v16369_v56 }
 0x19d   : > { %v1315_v20 = vmul.f32 0.70710677, %v22993_v30  ;;  %v1004_v48 = vmul.f32 0.5, %v22994_v50  ;;  %v18000_v39 = vpop.eup %17999  ;;  %v2131_v47 = vmul.f32 %v1843_v7, %v979_v22  ;;  %v22551_v24 = vunpack.c.l.bf16 %v19731_v60  ;;  %v16366_v22 = vld [vmem:[#allocation5 + $0x1d40] ss:$24 sps:$4 sm:$0xff]   ;;  %9594 = vmatprep.subr.bf16.mxu1 %v16377_v10 }
 0x19e   : > { %v1303_v44 = vmul.f32 0.70710677, %v22995_v62  ;;  %22996 = vst [vmem:[#allocation54_spill] sm:$0xff] %v19743_v58  ;;  %18011 = verf.f32 %v1291_v53  ;;  %v18002_v36 = vpop.eup %18001  ;;  %v1831_v38 = vadd.f32 1.0, %v18000_v39  ;;  %v22997_v11 = vunpack.c.h.bf16 %v19680_v29  ;;  %10103 = vmatprep.mubr.bf16.mxu0 %v19743_v58  ;;  %v16374_v53 = vld [vmem:[#allocation5 + $0x1d74] ss:$24 sps:$4 sm:$0xff]   ;;  %10149 = vmatpush1.bf16.msra.mxu0 %v16366_v22 }
 0x19f   : > { %18013 = verf.f32 %v1315_v20  ;;  %v1327_v30 = vmul.f32 0.70710677, %v22546_v41  ;;  %v19754_v42 = vpack.c.bf16 %v2131_v47, %v2107_v16  ;;  %v1855_v18 = vadd.f32 1.0, %v18002_v36  ;;  %v16375_v50 = vld [vmem:[#allocation5 + $0xba0] ss:$24 sps:$4 sm:$0xff]   ;;  %10150 = vmatprep.subr.bf16.mxu0 %v16374_v53 }
 0x1a0   : > { %v1028_v37 = vmul.f32 0.5, %v22997_v11  ;;  %18015 = verf.f32 %v1303_v44  ;;  %v22556_v7 = vunpack.c.h.bf16 %v19731_v60  ;;  %v2119_v52 = vmul.f32 %v1831_v38, %v967_v55  ;;  %v18004_v62 = vpop.eup %18003  ;;  %v16372_v39 = vld [vmem:[#allocation5 + $0x1d70] ss:$24 sps:$4 sm:$0xff]   ;;  %9595 = vmatpush1.bf16.msra.mxu1 %v16375_v50  ;;  %v19794_v50 = vld [vmem:[%s18729_s8 + $0xd8] sm:$0xff] }
 0x1a1   : > { %22998 = vst [vmem:[#allocation55_spill] sm:$0xff] %v19754_v42  ;;  %18017 = verf.f32 %v1327_v30  ;;  %9546 = vmatmul.mubr.bf16.gmra.mrb[16].mxu1 %v19754_v42  ;;  %v2143_v16 = vmul.f32 %v1855_v18, %v991_v59  ;;  %v22999_v47 = vunpack.c.h.bf16 %v19683_v27  ;;  %v23000_v36 = vunpack.c.h.bf16 %v19688_v32  ;;  %v19767_v38 = vld [vmem:[%s18729_s8 + $0x48] sm:$0xff]  ;;  %v18006_v30 = vpop.eup %18005  ;;  %9596 = vmatprep.subr.bf16.mxu1 %v16383_v40 }
 0x1a2   : > { %v1053_v55 = vmul.f32 0.70710677, %v22551_v24  ;;  %v1868_v41 = vadd.f32 1.0, %v18004_v62  ;;  %v23001_v35 = vunpack.c.l.bf16 %v19677_v49  ;;  %v23002_v18 = vunpack.c.l.bf16 %v19680_v29  ;;  %v19782_v49 = vld [vmem:[%s18729_s8 + $0xa8] sm:$0xff]  ;;  %10151 = vmatpush1.bf16.msra.mxu0 %v16372_v39 }
 0x1a3   : > { %v1016_v44 = vmul.f32 0.5, %v22999_v47  ;;  %v1040_v11 = vmul.f32 0.5, %v23000_v36  ;;  %v1054_v47 = vmul.f32 0.70710677, %v22556_v7  ;;  %v18008_v36 = vpop.eup %18007  ;;  %v19775_v58 = vpack.c.bf16 %v2143_v16, %v2119_v52  ;;  %v16378_v16 = vld [vmem:[#allocation5 + $0x1da0] ss:$24 sps:$4 sm:$0xff]   ;;  %10152 = vmatprep.subr.bf16.mxu0 %v16380_v54 }
 0x1a4   : > { %v1003_v59 = vmul.f32 0.5, %v23001_v35  ;;  %v1027_v20 = vmul.f32 0.5, %v23002_v18  ;;  %v1892_v42 = vadd.f32 1.0, %v18006_v30  ;;  %v23004_v24 = vunpack.c.l.bf16 %v19746_v43  ;;  %v18010_v35 = vpop.eup %18009  ;;  %v16381_v30 = vld [vmem:[#allocation5 + $0xbd0] ss:$24 sps:$4 sm:$0xff]  }
 0x1a5   : > { %23003 = vst [vmem:[#allocation56_spill] sm:$0xff] %v19775_v58  ;;  %v23005_v56 = vunpack.c.h.bf16 %v19746_v43  ;;  %v2156_v29 = vmul.f32 %v1868_v41, %v1004_v48  ;;  %v1880_v18 = vadd.f32 1.0, %v18008_v36  ;;  %18019 = verf.f32 %v1053_v55  ;;  %10104 = vmatmul.mubr.bf16.gmra.mrb[16].mxu0 %v19775_v58  ;;  %v16386_v7 = vld [vmem:[#allocation5 + $0x1dd4] ss:$24 sps:$4 sm:$0xff]   ;;  %9597 = vmatpush1.bf16.msra.mxu1 %v16381_v30 }
 0x1a6   : > { %v1077_v17 = vmul.f32 0.70710677, %v23004_v24  ;;  %v22558_v52 = vunpack.c.l.bf16 %v19767_v38  ;;  %v2180_v22 = vmul.f32 %v1892_v42, %v1028_v37  ;;  %v1904_v10 = vadd.f32 1.0, %v18010_v35  ;;  %10153 = vmatpush1.bf16.msra.mxu0 %v16378_v16 }
 0x1a7   : > { %v1078_v62 = vmul.f32 0.70710677, %v23005_v56  ;;  %18021 = verf.f32 %v1054_v47  ;;  %v22557_v24 = vunpack.c.h.bf16 %v19767_v38  ;;  %v2168_v56 = vmul.f32 %v1880_v18, %v1016_v44  ;;  %v16389_v44 = vld [vmem:[#allocation5 + $0xc04] ss:$24 sps:$4 sm:$0xff]   ;;  %10154 = vmatprep.subr.bf16.mxu0 %v16386_v7 }
 0x1a8   : > { %18023 = verf.f32 %v1077_v17  ;;  %v22560_v48 = vunpack.c.l.bf16 %v19782_v49  ;;  %v22559_v41 = vunpack.c.h.bf16 %v19782_v49  ;;  %v18012_v53 = vpop.eup %18011  ;;  %v19789_v55 = vpack.c.bf16 %v2180_v22, %v2156_v29  ;;  %9659 = vmatprep.subr.bf16.mxu1 %v16389_v44 }
 0x1a9   : > { %v2192_v37 = vmul.f32 %v1904_v10, %v1040_v11  ;;  %v23007_v42 = vunpack.c.l.bf16 %v19683_v27  ;;  %18025 = verf.f32 %v1078_v62  ;;  %v18014_v17 = vpop.eup %18013  ;;  %v1867_v36 = vadd.f32 1.0, %v18012_v53  ;;  %v19803_v27 = vld [vmem:[%s18729_s8 + $0x138] sm:$0xff]  ;;  %v19813_v53 = vld [vmem:[%s18729_s8 + $0x108] sm:$0xff] }
 0x1aa   : > { %23006 = vst [vmem:[#allocation57_spill] sm:$0xff] %v19789_v55  ;;  %v23008_v35 = vunpack.c.l.bf16 %v19688_v32  ;;  %v23009_v39 = vunpack.c.l.bf16 %v19731_v60  ;;  %v23010_v11 = vunpack.c.h.bf16 %v19731_v60  ;;  %v18016_v40 = vpop.eup %18015  ;;  %9555 = vmatprep.mubr.bf16.mxu1 %v19789_v55  ;;  %v1891_v10 = vadd.f32 1.0, %v18014_v17  ;;  %v16390_v55 = vld [vmem:[#allocation5 + $0x1e00] ss:$24 sps:$4 sm:$0xff]  }
 0x1ab   : > { %v1015_v47 = vmul.f32 0.5, %v23007_v42  ;;  %v19806_v62 = vpack.c.bf16 %v2192_v37, %v2168_v56  ;;  %v1065_v54 = vmul.f32 0.70710677, %v22558_v52  ;;  %v1066_v32 = vmul.f32 0.70710677, %v22557_v24  ;;  %v18018_v42 = vpop.eup %18017 }
 0x1ac   : > { %v1039_v18 = vmul.f32 0.5, %v23008_v35  ;;  %v765_v29 = vmul.f32 0.5, %v23009_v39  ;;  %v766_v22 = vmul.f32 0.5, %v23010_v11  ;;  %v2155_v35 = vmul.f32 %v1867_v36, %v1003_v59  ;;  %v16384_v11 = vld [vmem:[#allocation5 + $0x1dd0] ss:$24 sps:$4 sm:$0xff]  }
 0x1ad   : > { %23011 = vst [vmem:[#allocation58_spill] sm:$0xff] %v19806_v62  ;;  %v1879_v60 = vadd.f32 1.0, %v18016_v40  ;;  %v1089_v39 = vmul.f32 0.70710677, %v22560_v48  ;;  %v1090_v56 = vmul.f32 0.70710677, %v22559_v41  ;;  %10113 = vmatprep.mubr.bf16.mxu0 %v19806_v62  ;;  %v2179_v37 = vmul.f32 %v1891_v10, %v1027_v20  ;;  %10155 = vmatpush1.bf16.msra.mxu0 %v16384_v11 }
 0x1ae   : > { %v1903_v17 = vadd.f32 1.0, %v18018_v42  ;;  %18027 = verf.f32 %v1065_v54  ;;  %v526_v24 = vunpack.c.h.bf16 %v19794_v50  ;;  %v16392_v59 = vld [vmem:[#allocation5 + $0x1e04] ss:$24 sps:$4 sm:$0xff]   ;;  %v550_v30 = vunpack.c.h.bf16 %v19803_v27  ;;  %v19823_v36 = vld [vmem:[%s18729_s8 + $0x168] sm:$0xff] }
 0x1af   : > { %v2167_v52 = vmul.f32 %v1879_v60, %v1015_v47  ;;  %18029 = verf.f32 %v1066_v32  ;;  %v22563_v40 = vunpack.c.h.bf16 %v19813_v53  ;;  %v19826_v41 = vpack.c.bf16 %v2179_v37, %v2155_v35  ;;  %v18020_v54 = vpop.eup %18019  ;;  %10217 = vmatprep.subr.bf16.mxu0 %v16392_v59 }
 0x1b0   : > { %v2191_v20 = vmul.f32 %v1903_v17, %v1039_v18  ;;  %v23013_v16 = vunpack.c.l.bf16 %v19746_v43  ;;  %18031 = verf.f32 %v1089_v39  ;;  %v23014_v47 = vunpack.c.h.bf16 %v19746_v43 }
 0x1b1   : > { %23012 = vst [vmem:[#allocation59_spill] sm:$0xff] %v19826_v41  ;;  %18033 = verf.f32 %v1090_v56  ;;  %v1102_v44 = vmul.f32 0.70710677, %v526_v24  ;;  %v1126_v32 = vmul.f32 0.70710677, %v550_v30  ;;  %v18022_v42 = vpop.eup %18021  ;;  %9556 = vmatmul.mubr.bf16.gmra.mrb[20].mxu1 %v19826_v41  ;;  %v23016_v35 = vunpack.c.l.bf16 %v19767_v38 }
 0x1b2   : > { %v789_v10 = vmul.f32 0.5, %v23013_v16  ;;  %v790_v7 = vmul.f32 0.5, %v23014_v47  ;;  %v19833_v60 = vpack.c.bf16 %v2191_v20, %v2167_v52  ;;  %v1629_v37 = vadd.f32 1.0, %v18020_v54  ;;  %v18024_v39 = vpop.eup %18023 }
 0x1b3   : > { %v777_v18 = vmul.f32 0.5, %v23016_v35  ;;  %v562_v17 = vunpack.c.h.bf16 %v19823_v36  ;;  %v1630_v16 = vadd.f32 1.0, %v18022_v42  ;;  %18035 = verf.f32 %v1102_v44  ;;  %v18026_v47 = vpop.eup %18025 }
 0x1b4   : > { %23015 = vst [vmem:[#allocation60_spill] sm:$0xff] %v19833_v60  ;;  %v1114_v43 = vmul.f32 0.70710677, %v22563_v40  ;;  %v22566_v56 = vunpack.c.l.bf16 %v19794_v50  ;;  %10114 = vmatmul.mubr.bf16.gmra.mrb[20].mxu0 %v19833_v60  ;;  %v23017_v52 = vunpack.c.h.bf16 %v19767_v38  ;;  %v1653_v20 = vadd.f32 1.0, %v18024_v39 }
 0x1b5   : > { %v1917_v35 = vmul.f32 %v1629_v37, %v765_v29  ;;  %18037 = verf.f32 %v1126_v32  ;;  %v1654_v54 = vadd.f32 1.0, %v18026_v47  ;;  %v1918_v48 = vmul.f32 %v1630_v16, %v766_v22  ;;  %v19858_v47 = vld [vmem:[%s18729_s8 + $0x198] sm:$0xff]  ;;  %v19866_v22 = vld [vmem:[%s18729_s8 + $0x1c8] sm:$0xff] }
 0x1b6   : > { %v778_v11 = vmul.f32 0.5, %v23017_v52  ;;  %v1138_v62 = vmul.f32 0.70710677, %v562_v17  ;;  %18039 = verf.f32 %v1114_v43  ;;  %v23018_v59 = vunpack.c.l.bf16 %v19782_v49  ;;  %v16387_v52 = vld [vmem:[#allocation5 + $0xc00] ss:$24 sps:$4 sm:$0xff]  }
 0x1b7   : > { %v1941_v42 = vmul.f32 %v1653_v20, %v789_v10  ;;  %v22567_v40 = vunpack.c.l.bf16 %v19803_v27  ;;  %v1101_v60 = vmul.f32 0.70710677, %v22566_v56  ;;  %v1942_v38 = vmul.f32 %v1654_v54, %v790_v7  ;;  %v16395_v10 = vld [vmem:[#allocation5 + $0xc34] ss:$24 sps:$4 sm:$0xff]   ;;  %v19861_v7 = vld [vmem:[%s18729_s8 + $0x1f8] sm:$0xff] }
 0x1b8   : > { %v801_v44 = vmul.f32 0.5, %v23018_v59  ;;  %18041 = verf.f32 %v1138_v62  ;;  %v22570_v29 = vunpack.c.l.bf16 %v19813_v53  ;;  %v18028_v32 = vpop.eup %18027  ;;  %v23019_v37 = vunpack.c.h.bf16 %v19782_v49 }
 0x1b9   : > { %v19853_v16 = vpack.c.bf16 %v1941_v42, %v1917_v35  ;;  %v1125_v43 = vmul.f32 0.70710677, %v22567_v40  ;;  %18043 = verf.f32 %v1101_v60  ;;  %v18030_v62 = vpop.eup %18029  ;;  %v19863_v20 = vpack.c.bf16 %v1942_v38, %v1918_v48 }
 0x1ba   : > { %v802_v39 = vmul.f32 0.5, %v23019_v37  ;;  %v1641_v54 = vadd.f32 1.0, %v18028_v32  ;;  %v814_v59 = vmul.f32 0.5, %v526_v24  ;;  %v838_v56 = vmul.f32 0.5, %v550_v30  ;;  %v18032_v49 = vpop.eup %18031 }
 0x1bb   : > { %23020 = vst [vmem:[#allocation61_spill] sm:$0xff] %v19853_v16  ;;  %23021 = vst [vmem:[#allocation62_spill] sm:$0xff] %v19863_v20  ;;  %v1642_v35 = vadd.f32 1.0, %v18030_v62  ;;  %18045 = verf.f32 %v1125_v43  ;;  %v1113_v42 = vmul.f32 0.70710677, %v22570_v29  ;;  %v23022_v60 = vunpack.c.l.bf16 %v19823_v36  ;;  %v18034_v40 = vpop.eup %18033  ;;  %9598 = vmatprep.mubr.bf16.mxu1 %v19863_v20  ;;  %v19879_v29 = vld [vmem:[%s18729_s8 + $0x228] sm:$0xff] }
 0x1bc   : > { %v1665_v48 = vadd.f32 1.0, %v18032_v49  ;;  %v1929_v38 = vmul.f32 %v1641_v54, %v777_v18  ;;  %v22579_v24 = vunpack.c.h.bf16 %v19858_v47  ;;  %v1666_v32 = vadd.f32 1.0, %v18034_v40  ;;  %9599 = vmatmul.mubr.bf16.vlgmr.msra.gmra.mrb[0].mxu1 %v19853_v16  ;;  %v16393_v20 = vld [vmem:[#allocation5 + $0xc30] ss:$24 sps:$4 sm:$0xff]   ;;  %v16401_v49 = vld [vmem:[#allocation5 + $0xc64] ss:$24 sps:$4 sm:$0xff]  }
 0x1bd   : > { %v1137_v37 = vmul.f32 0.70710677, %v23022_v60  ;;  %v1930_v58 = vmul.f32 %v1642_v35, %v778_v11  ;;  %v23023_v43 = vunpack.c.h.bf16 %v19813_v53  ;;  %18047 = verf.f32 %v1113_v42  ;;  %v18036_v60 = vpop.eup %18035  ;;  %9660 = vmatpush1.bf16.msra.mxu1 %v16387_v52 }
 0x1be   : > { %v1953_v41 = vmul.f32 %v1665_v48, %v801_v44  ;;  %v850_v18 = vmul.f32 0.5, %v562_v17  ;;  %v1954_v40 = vmul.f32 %v1666_v32, %v802_v39  ;;  %9661 = vmatprep.subr.bf16.mxu1 %v16395_v10  ;;  %v1678_v11 = vadd.f32 1.0, %v18036_v60  ;;  %v16398_v39 = vld [vmem:[#allocation5 + $0x1e34] ss:$24 sps:$4 sm:$0xff]   ;;  %v16399_v10 = vld [vmem:[#allocation5 + $0xc60] ss:$24 sps:$4 sm:$0xff]  }
 0x1bf   : > { %v826_v62 = vmul.f32 0.5, %v23023_v43  ;;  %18049 = verf.f32 %v1137_v37  ;;  %v18038_v30 = vpop.eup %18037  ;;  %v1150_v35 = vmul.f32 0.70710677, %v22579_v24  ;;  %v23024_v42 = vunpack.c.h.bf16 %v19861_v7 }
 0x1c0   : > { %v18040_v16 = vpop.eup %18039  ;;  %v19886_v52 = vpack.c.bf16 %v1953_v41, %v1929_v38  ;;  %v1702_v44 = vadd.f32 1.0, %v18038_v30  ;;  %v23026_v17 = vunpack.c.l.bf16 %v19794_v50  ;;  %v22584_v48 = vunpack.c.h.bf16 %v19879_v29 }
 0x1c1   : > { %v1174_v43 = vmul.f32 0.70710677, %v23024_v42  ;;  %v19891_v54 = vpack.c.bf16 %v1954_v40, %v1930_v58  ;;  %v1966_v32 = vmul.f32 %v1678_v11, %v814_v59  ;;  %v1690_v60 = vadd.f32 1.0, %v18040_v16  ;;  %9662 = vmatpush1.bf16.msra.mxu1 %v16393_v20  ;;  %v16396_v58 = vld [vmem:[#allocation5 + $0x1e30] ss:$24 sps:$4 sm:$0xff]  }
 0x1c2   : > { %23025 = vst [vmem:[#allocation63_spill] sm:$0xff] %v19886_v52  ;;  %v813_v37 = vmul.f32 0.5, %v23026_v17  ;;  %18051 = verf.f32 %v1150_v35  ;;  %v18042_v24 = vpop.eup %18041  ;;  %v1990_v42 = vmul.f32 %v1702_v44, %v838_v56  ;;  %v23028_v5 = vunpack.c.l.bf16 %v19803_v27  ;;  %9663 = vmatprep.subr.bf16.mxu1 %v16401_v49  ;;  %v16407_v40 = vld [vmem:[#allocation5 + $0xc94] ss:$24 sps:$4 sm:$0xff]   ;;  %v16405_v27 = vld [vmem:[#allocation5 + $0xc90] ss:$24 sps:$4 sm:$0xff]  }
 0x1c3   : > { %23027 = vst [vmem:[#allocation64_spill] sm:$0xff] %v19891_v54  ;;  %18053 = verf.f32 %v1174_v43  ;;  %v23029_v38 = vunpack.c.h.bf16 %v19866_v22  ;;  %v18044_v30 = vpop.eup %18043  ;;  %10156 = vmatprep.mubr.bf16.mxu0 %v19891_v54  ;;  %v1714_v17 = vadd.f32 1.0, %v18042_v24  ;;  %v1978_v59 = vmul.f32 %v1690_v60, %v826_v62  ;;  %v19910_v60 = vld [vmem:[%s18729_s8 + $0x258] sm:$0xff] }
 0x1c4   : > { %v837_v41 = vmul.f32 0.5, %v23028_v5  ;;  %v1186_v16 = vmul.f32 0.70710677, %v22584_v48  ;;  %v22583_v56 = vunpack.c.l.bf16 %v19858_v47  ;;  %10157 = vmatmul.mubr.bf16.vlgmr.msra.gmra.mrb[0].mxu0 %v19886_v52  ;;  %v16404_v5 = vld [vmem:[#allocation5 + $0x1e64] ss:$24 sps:$4 sm:$0xff]   ;;  %v19902_v20 = vpack.c.bf16 %v1990_v42, %v1966_v32 }
 0x1c5   : > { %v1162_v50 = vmul.f32 0.70710677, %v23029_v38  ;;  %v1677_v11 = vadd.f32 1.0, %v18044_v30  ;;  %v22582_v35 = vunpack.c.l.bf16 %v19861_v7  ;;  %v18046_v49 = vpop.eup %18045  ;;  %10218 = vmatpush1.bf16.msra.mxu0 %v16390_v55  ;;  %v2002_v24 = vmul.f32 %v1714_v17, %v850_v18  ;;  %9664 = vmatpush1.bf16.msra.mxu1 %v16399_v10  ;;  %v16413_v30 = vld [vmem:[#allocation5 + $0xcc4] ss:$24 sps:$4 sm:$0xff]  }
 0x1c6   : > { %23030 = vst [vmem:[#allocation65_spill] sm:$0xff] %v19902_v20  ;;  %v23031_v62 = vunpack.c.l.bf16 %v19813_v53  ;;  %v1149_v44 = vmul.f32 0.70710677, %v22583_v56  ;;  %10219 = vmatprep.subr.bf16.mxu0 %v16398_v39  ;;  %v1701_v32 = vadd.f32 1.0, %v18046_v49  ;;  %v23032_v38 = vunpack.c.l.bf16 %v19823_v36  ;;  %v16402_v53 = vld [vmem:[#allocation5 + $0x1e60] ss:$24 sps:$4 sm:$0xff]   ;;  %9665 = vmatprep.subr.bf16.mxu1 %v16407_v40 }
 0x1c7   : > { %18055 = verf.f32 %v1162_v50  ;;  %v1965_v42 = vmul.f32 %v1677_v11, %v813_v37  ;;  %v1173_v55 = vmul.f32 0.70710677, %v22582_v35  ;;  %v18048_v18 = vpop.eup %18047  ;;  %9608 = vmatprep.mubr.bf16.mxu1 %v19902_v20  ;;  %v19917_v17 = vpack.c.bf16 %v2002_v24, %v1978_v59  ;;  %v19922_v37 = vld [vmem:[%s18729_s8 + $0x2b8] sm:$0xff] }
 0x1c8   : > { %v825_v43 = vmul.f32 0.5, %v23031_v62  ;;  %18057 = verf.f32 %v1186_v16  ;;  %v849_v50 = vmul.f32 0.5, %v23032_v38  ;;  %v22585_v39 = vunpack.c.l.bf16 %v19866_v22  ;;  %v16410_v16 = vld [vmem:[#allocation5 + $0x1e94] ss:$24 sps:$4 sm:$0xff]   ;;  %v16411_v11 = vld [vmem:[#allocation5 + $0xcc0] ss:$24 sps:$4 sm:$0xff]  }
 0x1c9   : > { %23033 = vst [vmem:[#allocation66_spill] sm:$0xff] %v19917_v17  ;;  %18059 = verf.f32 %v1149_v44  ;;  %v22586_v10 = vunpack.c.l.bf16 %v19879_v29  ;;  %v18050_v36 = vpop.eup %18049  ;;  %v1989_v49 = vmul.f32 %v1701_v32, %v837_v41  ;;  %v1689_v62 = vadd.f32 1.0, %v18048_v18  ;;  %10220 = vmatpush1.bf16.msra.mxu0 %v16396_v58  ;;  %10166 = vmatprep.mubr.bf16.mxu0 %v19917_v17  ;;  %v16419_v41 = vld [vmem:[#allocation5 + $0xcf4] ss:$24 sps:$4 sm:$0xff]   ;;  %v16414_v52 = vld [vmem:[#allocation5 + $0x1ec0] ss:$24 sps:$4 sm:$0xff]  }
 0x1ca   : > { %18061 = verf.f32 %v1173_v55  ;;  %v22587_v40 = vunpack.c.h.bf16 %v19910_v60  ;;  %v1713_v59 = vadd.f32 1.0, %v18050_v36  ;;  %v23034_v24 = vunpack.c.h.bf16 %v19858_v47  ;;  %10221 = vmatprep.subr.bf16.mxu0 %v16404_v5  ;;  %9666 = vmatpush1.bf16.msra.mxu1 %v16405_v27  ;;  %v19938_v36 = vld [vmem:[%s18729_s8 + $0x288] sm:$0xff] }
 0x1cb   : > { %v23035_v38 = vunpack.c.h.bf16 %v19861_v7  ;;  %v1161_v56 = vmul.f32 0.70710677, %v22585_v39  ;;  %v19932_v32 = vpack.c.bf16 %v1989_v49, %v1965_v42  ;;  %v1977_v55 = vmul.f32 %v1689_v62, %v825_v43  ;;  %9667 = vmatprep.subr.bf16.mxu1 %v16413_v30  ;;  %v16416_v30 = vld [vmem:[#allocation5 + $0x1ec4] ss:$24 sps:$4 sm:$0xff]  }
 0x1cc   : > { %v862_v44 = vmul.f32 0.5, %v23034_v24  ;;  %v1185_v58 = vmul.f32 0.70710677, %v22586_v10  ;;  %v22590_v18 = vunpack.c.h.bf16 %v19922_v37  ;;  %v19941_v24 = vld [vmem:[%s18729_s8 + $0x2e8] sm:$0xff]  ;;  %v18052_v48 = vpop.eup %18051  ;;  %v23037_v39 = vunpack.c.h.bf16 %v19866_v22 }
 0x1cd   : > { %v886_v35 = vmul.f32 0.5, %v23035_v38  ;;  %23036 = vst [vmem:[#allocation67_spill] sm:$0xff] %v19932_v32  ;;  %v2001_v38 = vmul.f32 %v1713_v59, %v849_v50  ;;  %18063 = verf.f32 %v1161_v56  ;;  %v1198_v27 = vmul.f32 0.70710677, %v22587_v40  ;;  %v18054_v43 = vpop.eup %18053  ;;  %9609 = vmatmul.mubr.bf16.gmra.mrb[4].mxu1 %v19932_v32  ;;  %10222 = vmatpush1.bf16.msra.mxu0 %v16402_v53  ;;  %v16408_v50 = vld [vmem:[#allocation5 + $0x1e90] ss:$24 sps:$4 sm:$0xff]  }
 0x1ce   : > { %v874_v5 = vmul.f32 0.5, %v23037_v39  ;;  %v1726_v42 = vadd.f32 1.0, %v18052_v48  ;;  %v23038_v49 = vunpack.c.h.bf16 %v19879_v29  ;;  %18065 = verf.f32 %v1185_v58  ;;  %10223 = vmatprep.subr.bf16.mxu0 %v16410_v16  ;;  %9668 = vmatpush1.bf16.msra.mxu1 %v16411_v11  ;;  %v16417_v48 = vld [vmem:[#allocation5 + $0xcf0] ss:$24 sps:$4 sm:$0xff]  }
 0x1cf   : > { %v1222_v10 = vmul.f32 0.70710677, %v22590_v18  ;;  %v19952_v59 = vpack.c.bf16 %v2001_v38, %v1977_v55  ;;  %v1750_v56 = vadd.f32 1.0, %v18054_v43  ;;  %18067 = verf.f32 %v1198_v27  ;;  %9669 = vmatprep.subr.bf16.mxu1 %v16419_v41  ;;  %v16425_v55 = vld [vmem:[#allocation5 + $0xd24] ss:$24 sps:$4 sm:$0xff]  }
 0x1d0   : > { %v898_v62 = vmul.f32 0.5, %v23038_v49  ;;  %v22595_v39 = vunpack.c.h.bf16 %v19938_v36  ;;  %v2014_v17 = vmul.f32 %v1726_v42, %v862_v44  ;;  %v23040_v49 = vunpack.c.l.bf16 %v19858_v47  ;;  %v16422_v44 = vld [vmem:[#allocation5 + $0x1ef4] ss:$24 sps:$4 sm:$0xff]   ;;  %v16423_v43 = vld [vmem:[#allocation5 + $0xd20] ss:$24 sps:$4 sm:$0xff]  }
 0x1d1   : > { %23039 = vst [vmem:[#allocation68_spill] sm:$0xff] %v19952_v59  ;;  %v18056_v40 = vpop.eup %18055  ;;  %18069 = verf.f32 %v1222_v10  ;;  %v22596_v18 = vunpack.c.h.bf16 %v19941_v24  ;;  %10167 = vmatmul.mubr.bf16.gmra.mrb[4].mxu0 %v19952_v59  ;;  %v2038_v38 = vmul.f32 %v1750_v56, %v886_v35  ;;  %v23041_v10 = vunpack.c.l.bf16 %v19861_v7  ;;  %v16431_v35 = vld [vmem:[#allocation5 + $0xd54] ss:$24 sps:$4 sm:$0xff]   ;;  %v19974_v41 = vld [vmem:[%s18729_s8 + $0x318] sm:$0xff] }
 0x1d2   : > { %v861_v58 = vmul.f32 0.5, %v23040_v49  ;;  %v18058_v53 = vpop.eup %18057  ;;  %v1738_v27 = vadd.f32 1.0, %v18056_v40  ;;  %v1210_v16 = vmul.f32 0.70710677, %v22595_v39  ;;  %10224 = vmatpush1.bf16.msra.mxu0 %v16408_v50  ;;  %v23043_v39 = vunpack.c.l.bf16 %v19866_v22  ;;  %9670 = vmatpush1.bf16.msra.mxu1 %v16417_v48 }
 0x1d3   : > { %v1762_v47 = vadd.f32 1.0, %v18058_v53  ;;  %v885_v42 = vmul.f32 0.5, %v23041_v10  ;;  %v1234_v49 = vmul.f32 0.70710677, %v22596_v18  ;;  %v18060_v59 = vpop.eup %18059  ;;  %v19967_v40 = vpack.c.bf16 %v2038_v38, %v2014_v17  ;;  %10225 = vmatprep.subr.bf16.mxu0 %v16416_v30  ;;  %9671 = vmatprep.subr.bf16.mxu1 %v16425_v55  ;;  %v19988_v55 = vld [vmem:[%s18729_s8 + $0x378] sm:$0xff] }
 0x1d4   : > { %v2026_v56 = vmul.f32 %v1738_v27, %v874_v5  ;;  %v873_v11 = vmul.f32 0.5, %v23043_v39  ;;  %18071 = verf.f32 %v1210_v16  ;;  %v18062_v53 = vpop.eup %18061  ;;  %v1725_v10 = vadd.f32 1.0, %v18060_v59  ;;  %v16420_v27 = vld [vmem:[#allocation5 + $0x1ef0] ss:$24 sps:$4 sm:$0xff]   ;;  %v16428_v16 = vld [vmem:[#allocation5 + $0x1f24] ss:$24 sps:$4 sm:$0xff]  }
 0x1d5   : > { %23042 = vst [vmem:[#allocation69_spill] sm:$0xff] %v19967_v40  ;;  %v2050_v7 = vmul.f32 %v1762_v47, %v898_v62  ;;  %v23044_v18 = vunpack.c.l.bf16 %v19879_v29  ;;  %18073 = verf.f32 %v1234_v49  ;;  %9618 = vmatprep.mubr.bf16.mxu1 %v19967_v40  ;;  %v1749_v17 = vadd.f32 1.0, %v18062_v53 }
 0x1d6   : > { %v23045_v22 = vunpack.c.l.bf16 %v19910_v60  ;;  %v23046_v50 = vunpack.c.l.bf16 %v19922_v37  ;;  %v22599_v39 = vunpack.c.l.bf16 %v19938_v36  ;;  %v2013_v59 = vmul.f32 %v1725_v10, %v861_v58  ;;  %10226 = vmatpush1.bf16.msra.mxu0 %v16414_v52  ;;  %9672 = vmatpush1.bf16.msra.mxu1 %v16423_v43  ;;  %v16429_v58 = vld [vmem:[#allocation5 + $0xd50] ss:$24 sps:$4 sm:$0xff]  }
 0x1d7   : > { %v897_v54 = vmul.f32 0.5, %v23044_v18  ;;  %v19982_v62 = vpack.c.bf16 %v2050_v7, %v2026_v56  ;;  %v23048_v29 = vunpack.c.h.bf16 %v19910_v60  ;;  %v22600_v48 = vunpack.c.l.bf16 %v19941_v24  ;;  %v18064_v38 = vpop.eup %18063  ;;  %10227 = vmatprep.subr.bf16.mxu0 %v16422_v44  ;;  %9673 = vmatprep.subr.bf16.mxu1 %v16431_v35  ;;  %v20002_v43 = vld [vmem:[%s18729_s8 + $0x348] sm:$0xff] }
 0x1d8   : > { %v1197_v5 = vmul.f32 0.70710677, %v23045_v22  ;;  %v1221_v30 = vmul.f32 0.70710677, %v23046_v50  ;;  %v2037_v47 = vmul.f32 %v1749_v17, %v885_v42  ;;  %v1209_v49 = vmul.f32 0.70710677, %v22599_v39  ;;  %v18066_v53 = vpop.eup %18065 }
 0x1d9   : > { %23047 = vst [vmem:[#allocation70_spill] sm:$0xff] %v19982_v62  ;;  %v910_v18 = vmul.f32 0.5, %v23048_v29  ;;  %v1737_v7 = vadd.f32 1.0, %v18064_v38  ;;  %v23049_v10 = vunpack.c.h.bf16 %v19922_v37  ;;  %v1233_v52 = vmul.f32 0.70710677, %v22600_v48  ;;  %v18068_v42 = vpop.eup %18067  ;;  %10176 = vmatprep.mubr.bf16.mxu0 %v19982_v62  ;;  %v20005_v29 = vld [vmem:[%s18729_s8 + $0x3a8] sm:$0xff] }
 0x1da   : > { %18075 = verf.f32 %v1197_v5  ;;  %v16437_v17 = vld [vmem:[#allocation5 + $0xd84] ss:$24 sps:$4 sm:$0xff]   ;;  %v19998_v5 = vpack.c.bf16 %v2037_v47, %v2013_v59  ;;  %v1761_v50 = vadd.f32 1.0, %v18066_v53  ;;  %v1774_v39 = vadd.f32 1.0, %v18068_v42  ;;  %10228 = vmatpush1.bf16.msra.mxu0 %v16420_v27  ;;  %v16434_v56 = vld [vmem:[#allocation5 + $0x1f54] ss:$24 sps:$4 sm:$0xff]   ;;  %9674 = vmatpush1.bf16.msra.mxu1 %v16429_v58 }
 0x1db   : > { %v934_v22 = vmul.f32 0.5, %v23049_v10  ;;  %18077 = verf.f32 %v1221_v30  ;;  %v18070_v38 = vpop.eup %18069  ;;  %v16426_v30 = vld [vmem:[#allocation5 + $0x1f20] ss:$24 sps:$4 sm:$0xff]   ;;  %v2025_v10 = vmul.f32 %v1737_v7, %v873_v11  ;;  %v23051_v48 = vunpack.c.h.bf16 %v19938_v36  ;;  %10229 = vmatprep.subr.bf16.mxu0 %v16428_v16  ;;  %9675 = vmatprep.subr.bf16.mxu1 %v16437_v17 }
 0x1dc   : > { %23050 = vst [vmem:[#allocation71_spill] sm:$0xff] %v19998_v5  ;;  %18079 = verf.f32 %v1209_v49  ;;  %9619 = vmatmul.mubr.bf16.gmra.mrb[8].mxu1 %v19998_v5  ;;  %v2049_v59 = vmul.f32 %v1761_v50, %v897_v54  ;;  %v1798_v47 = vadd.f32 1.0, %v18070_v38  ;;  %v23052_v49 = vunpack.c.h.bf16 %v19941_v24  ;;  %v16435_v11 = vld [vmem:[#allocation5 + $0xd80] ss:$24 sps:$4 sm:$0xff]   ;;  %v16432_v54 = vld [vmem:[#allocation5 + $0x1f50] ss:$24 sps:$4 sm:$0xff]  }
 0x1dd   : > { %v922_v35 = vmul.f32 0.5, %v23051_v48  ;;  %18081 = verf.f32 %v1233_v52  ;;  %v23053_v44 = vunpack.c.h.bf16 %v19974_v41  ;;  %v2062_v7 = vmul.f32 %v1774_v39, %v910_v18  ;;  %v16443_v38 = vld [vmem:[#allocation5 + $0xdb4] ss:$24 sps:$4 sm:$0xff]  }
 0x1de   : > { %v946_v53 = vmul.f32 0.5, %v23052_v49  ;;  %v23054_v42 = vunpack.c.h.bf16 %v19988_v55  ;;  %v18072_v5 = vpop.eup %18071  ;;  %v20018_v50 = vpack.c.bf16 %v2049_v59, %v2025_v10  ;;  %v2086_v49 = vmul.f32 %v1798_v47, %v934_v22  ;;  %10230 = vmatpush1.bf16.msra.mxu0 %v16426_v30  ;;  %9676 = vmatpush1.bf16.msra.mxu1 %v16435_v11 }
 0x1df   : > { %v1246_v62 = vmul.f32 0.70710677, %v23053_v44  ;;  %v22607_v16 = vunpack.c.l.bf16 %v19974_v41  ;;  %v18074_v58 = vpop.eup %18073  ;;  %v16440_v44 = vld [vmem:[#allocation5 + $0x1f84] ss:$24 sps:$4 sm:$0xff]   ;;  %v1786_v39 = vadd.f32 1.0, %v18072_v5  ;;  %v23056_v18 = vunpack.c.l.bf16 %v19910_v60  ;;  %10231 = vmatprep.subr.bf16.mxu0 %v16434_v56  ;;  %9677 = vmatprep.subr.bf16.mxu1 %v16443_v38 }
 0x1e0   : > { %v1270_v48 = vmul.f32 0.70710677, %v23054_v42  ;;  %23055 = vst [vmem:[#allocation72_spill] sm:$0xff] %v20018_v50  ;;  %v23057_v27 = vunpack.c.l.bf16 %v19922_v37  ;;  %v20025_v52 = vpack.c.bf16 %v2086_v49, %v2062_v7  ;;  %v1810_v17 = vadd.f32 1.0, %v18074_v58  ;;  %v16441_v5 = vld [vmem:[#allocation5 + $0xdb0] ss:$24 sps:$4 sm:$0xff]   ;;  %10177 = vmatmul.mubr.bf16.gmra.mrb[8].mxu0 %v20018_v50 }
 0x1e1   : > { %18083 = verf.f32 %v1246_v62  ;;  %v909_v42 = vmul.f32 0.5, %v23056_v18  ;;  %v23059_v10 = vunpack.c.h.bf16 %v20002_v43  ;;  %v23060_v62 = vunpack.c.h.bf16 %v20005_v29  ;;  %v16446_v49 = vld [vmem:[#allocation5 + $0x1fb4] ss:$24 sps:$4 sm:$0xff]   ;;  %v16447_v58 = vld [vmem:[#allocation5 + $0xde0] ss:$24 sps:$4 sm:$0xff]  }
 0x1e2   : > { %v933_v40 = vmul.f32 0.5, %v23057_v27  ;;  %18085 = verf.f32 %v1270_v48  ;;  %23058 = vst [vmem:[#allocation73_spill] sm:$0xff] %v20025_v52  ;;  %v2074_v47 = vmul.f32 %v1786_v39, %v922_v35  ;;  %v23061_v60 = vunpack.c.l.bf16 %v19938_v36  ;;  %v16438_v48 = vld [vmem:[#allocation5 + $0x1f80] ss:$24 sps:$4 sm:$0xff]   ;;  %v16449_v27 = vld [vmem:[#allocation5 + $0xde4] ss:$24 sps:$4 sm:$0xff]   ;;  %9628 = vmatprep.mubr.bf16.mxu1 %v20025_v52  ;;  %10232 = vmatpush1.bf16.msra.mxu0 %v16432_v54 }
 0x1e3   : > { %v1258_v22 = vmul.f32 0.70710677, %v23059_v10  ;;  %v1282_v59 = vmul.f32 0.70710677, %v23060_v62  ;;  %v22608_v37 = vunpack.c.l.bf16 %v19988_v55  ;;  %v1245_v30 = vmul.f32 0.70710677, %v22607_v16  ;;  %10233 = vmatprep.subr.bf16.mxu0 %v16440_v44  ;;  %9678 = vmatpush1.bf16.msra.mxu1 %v16441_v5 }
 0x1e4   : > { %v921_v18 = vmul.f32 0.5, %v23061_v60  ;;  %v18076_v7 = vpop.eup %18075  ;;  %v2098_v56 = vmul.f32 %v1810_v17, %v946_v53  ;;  %v23062_v10 = vunpack.c.l.bf16 %v19941_v24  ;;  %v20045_v53 = vld [vmem:[%s18729_s8 + $0x3d8] sm:$0xff]  ;;  %v16455_v36 = vld [vmem:[#allocation5 + $0xe14] ss:$24 sps:$4 sm:$0xff]   ;;  %v23065_v50 = vunpack.c.h.bf16 %v19988_v55  ;;  %9679 = vmatprep.subr.bf16.mxu1 %v16449_v27  ;;  %v16444_v27 = vld [vmem:[#allocation5 + $0x1fb0] ss:$24 sps:$4 sm:$0xff]  }
 0x1e5   : > { %18087 = verf.f32 %v1258_v22  ;;  %v18078_v11 = vpop.eup %18077  ;;  %v1773_v39 = vadd.f32 1.0, %v18076_v7  ;;  %v1269_v38 = vmul.f32 0.70710677, %v22608_v37  ;;  %v20048_v17 = vld [vmem:[%s18729_s8 + $0x438] sm:$0xff]  ;;  %v23064_v7 = vunpack.c.h.bf16 %v19974_v41  ;;  %v20055_v24 = vld [vmem:[%s18729_s8 + $0x408] sm:$0xff] }
 0x1e6   : > { %v945_v62 = vmul.f32 0.5, %v23062_v10  ;;  %18089 = verf.f32 %v1282_v59  ;;  %v18080_v22 = vpop.eup %18079  ;;  %v20050_v60 = vpack.c.bf16 %v2098_v56, %v2074_v47  ;;  %v1797_v16 = vadd.f32 1.0, %v18078_v11  ;;  %v20060_v54 = vld [vmem:[%s18729_s8 + $0x468] sm:$0xff]  ;;  %10234 = vmatpush1.bf16.msra.mxu0 %v16438_v48 }
 0x1e7   : > { %v958_v35 = vmul.f32 0.5, %v23064_v7  ;;  %18091 = verf.f32 %v1245_v30  ;;  %v18082_v59 = vpop.eup %18081  ;;  %v2061_v10 = vmul.f32 %v1773_v39, %v909_v42  ;;  %v1785_v37 = vadd.f32 1.0, %v18080_v22  ;;  %v16452_v22 = vld [vmem:[#allocation5 + $0x1fe4] ss:$24 sps:$4 sm:$0xff]   ;;  %10235 = vmatprep.subr.bf16.mxu0 %v16446_v49  ;;  %9680 = vmatpush1.bf16.msra.mxu1 %v16447_v58 }
 0x1e8   : > { %23063 = vst [vmem:[#allocation74_spill] sm:$0xff] %v20050_v60  ;;  %v982_v52 = vmul.f32 0.5, %v23065_v50  ;;  %18093 = verf.f32 %v1269_v38  ;;  %10186 = vmatprep.mubr.bf16.mxu0 %v20050_v60  ;;  %v2085_v47 = vmul.f32 %v1797_v16, %v933_v40  ;;  %v1809_v56 = vadd.f32 1.0, %v18082_v59  ;;  %9681 = vmatprep.subr.bf16.mxu1 %v16455_v36  ;;  %v16450_v36 = vld [vmem:[#allocation5 + $0x1fe0] ss:$24 sps:$4 sm:$0xff]  }
 0x1e9   : > { %v23066_v30 = vunpack.c.l.bf16 %v20002_v43  ;;  %v23067_v7 = vunpack.c.l.bf16 %v20005_v29  ;;  %v2073_v5 = vmul.f32 %v1785_v37, %v921_v18  ;;  %v22615_v42 = vunpack.c.h.bf16 %v20045_v53  ;;  %v16453_v18 = vld [vmem:[#allocation5 + $0xe10] ss:$24 sps:$4 sm:$0xff]  }
 0x1ea   : > { %v20070_v60 = vpack.c.bf16 %v2085_v47, %v2061_v10  ;;  %v2097_v40 = vmul.f32 %v1809_v56, %v945_v62  ;;  %v22616_v16 = vunpack.c.h.bf16 %v20060_v54  ;;  %v23070_v50 = vunpack.c.h.bf16 %v20005_v29  ;;  %v16461_v56 = vld [vmem:[#allocation5 + $0xe44] ss:$24 sps:$4 sm:$0xff]   ;;  %10236 = vmatpush1.bf16.msra.mxu0 %v16444_v27 }
 0x1eb   : > { %v1257_v11 = vmul.f32 0.70710677, %v23066_v30  ;;  %v1281_v44 = vmul.f32 0.70710677, %v23067_v7  ;;  %v18084_v38 = vpop.eup %18083  ;;  %v23069_v30 = vunpack.c.h.bf16 %v20002_v43  ;;  %v1294_v10 = vmul.f32 0.70710677, %v22615_v42  ;;  %10237 = vmatprep.subr.bf16.mxu0 %v16452_v22  ;;  %9682 = vmatpush1.bf16.msra.mxu1 %v16453_v18 }
 0x1ec   : > { %23068 = vst [vmem:[#allocation75_spill] sm:$0xff] %v20070_v60  ;;  %v18086_v59 = vpop.eup %18085  ;;  %v1822_v37 = vadd.f32 1.0, %v18084_v38  ;;  %v994_v39 = vmul.f32 0.5, %v23070_v50  ;;  %9629 = vmatmul.mubr.bf16.gmra.mrb[12].mxu1 %v20070_v60  ;;  %v20078_v48 = vpack.c.bf16 %v2097_v40, %v2073_v5  ;;  %v23072_v49 = vunpack.c.h.bf16 %v20048_v17  ;;  %9683 = vmatprep.subr.bf16.mxu1 %v16461_v56 }
 0x1ed   : > { %18095 = verf.f32 %v1257_v11  ;;  %v970_v7 = vmul.f32 0.5, %v23069_v30  ;;  %v1846_v62 = vadd.f32 1.0, %v18086_v59  ;;  %v23073_v11 = vunpack.c.l.bf16 %v19974_v41  ;;  %v16458_v41 = vld [vmem:[#allocation5 + $0x2014] ss:$24 sps:$4 sm:$0xff]  }
 0x1ee   : > { %18097 = verf.f32 %v1281_v44  ;;  %23071 = vst [vmem:[#allocation76_spill] sm:$0xff] %v20078_v48  ;;  %v1318_v58 = vmul.f32 0.70710677, %v23072_v49  ;;  %v2110_v47 = vmul.f32 %v1822_v37, %v958_v35  ;;  %v23074_v50 = vunpack.c.l.bf16 %v19988_v55  ;;  %10187 = vmatmul.mubr.bf16.gmra.mrb[12].mxu0 %v20078_v48  ;;  %v20103_v48 = vld [vmem:[%s18729_s8 + $0x20] sm:$0xff] }
 0x1ef   : > { %v957_v38 = vmul.f32 0.5, %v23073_v11  ;;  %v23075_v30 = vunpack.c.h.bf16 %v20055_v24  ;;  %v18088_v40 = vpop.eup %18087  ;;  %v2134_v59 = vmul.f32 %v1846_v62, %v982_v52  ;;  %18099 = verf.f32 %v1294_v10  ;;  %v16456_v52 = vld [vmem:[#allocation5 + $0x2010] ss:$24 sps:$4 sm:$0xff]   ;;  %v16459_v10 = vld [vmem:[#allocation5 + $0xe40] ss:$24 sps:$4 sm:$0xff]   ;;  %10238 = vmatpush1.bf16.msra.mxu0 %v16450_v36 }
 0x1f0   : > { %v981_v44 = vmul.f32 0.5, %v23074_v50  ;;  %v1330_v42 = vmul.f32 0.70710677, %v22616_v16  ;;  %v18090_v37 = vpop.eup %18089  ;;  %v1834_v55 = vadd.f32 1.0, %v18088_v40  ;;  %18101 = verf.f32 %v1318_v58  ;;  %v16467_v11 = vld [vmem:[#allocation5 + $0xe74] ss:$24 sps:$4 sm:$0xff]   ;;  %10239 = vmatprep.subr.bf16.mxu0 %v16458_v41  ;;  %9684 = vmatpush1.bf16.msra.mxu1 %v16459_v10 }
 0x1f1   : > { %v1306_v5 = vmul.f32 0.70710677, %v23075_v30  ;;  %v18092_v27 = vpop.eup %18091  ;;  %v20096_v62 = vpack.c.bf16 %v2134_v59, %v2110_v47  ;;  %v1858_v50 = vadd.f32 1.0, %v18090_v37  ;;  %v23077_v30 = vunpack.c.l.bf16 %v20002_v43  ;;  %v16464_v59 = vld [vmem:[#allocation5 + $0x2044] ss:$24 sps:$4 sm:$0xff]   ;;  %9685 = vmatprep.subr.bf16.mxu1 %v16467_v11 }
 0x1f2   : > { %v18094_v16 = vpop.eup %18093  ;;  %v2122_v40 = vmul.f32 %v1834_v55, %v970_v7  ;;  %v1821_v58 = vadd.f32 1.0, %v18092_v27  ;;  %v23078_v49 = vunpack.c.l.bf16 %v20005_v29  ;;  %v23079_v43 = vunpack.c.l.bf16 %v20045_v53 }
 0x1f3   : > { %23076 = vst [vmem:[#allocation77_spill] sm:$0xff] %v20096_v62  ;;  %v969_v22 = vmul.f32 0.5, %v23077_v30  ;;  %18103 = verf.f32 %v1306_v5  ;;  %9638 = vmatprep.mubr.bf16.mxu1 %v20096_v62  ;;  %v2146_v18 = vmul.f32 %v1858_v50, %v994_v39  ;;  %v1845_v47 = vadd.f32 1.0, %v18094_v16  ;;  %v16462_v16 = vld [vmem:[#allocation5 + $0x2040] ss:$24 sps:$4 sm:$0xff]   ;;  %10240 = vmatpush1.bf16.msra.mxu0 %v16456_v52  ;;  %v20132_v52 = vld [vmem:[%s18729_s8 + $0x50] sm:$0xff] }
 0x1f4   : > { %v993_v35 = vmul.f32 0.5, %v23078_v49  ;;  %18105 = verf.f32 %v1330_v42  ;;  %v1293_v5 = vmul.f32 0.70710677, %v23079_v43  ;;  %v23080_v56 = vunpack.c.l.bf16 %v20048_v17  ;;  %v20118_v30 = vld [vmem:[%s18729_s8 + $0x80] sm:$0xff]  ;;  %v16465_v43 = vld [vmem:[#allocation5 + $0xe70] ss:$24 sps:$4 sm:$0xff]   ;;  %10241 = vmatprep.subr.bf16.mxu0 %v16464_v59 }
 0x1f5   : > { %v2109_v29 = vmul.f32 %v1821_v58, %v957_v38  ;;  %v23081_v37 = vunpack.c.h.bf16 %v20045_v53  ;;  %v22619_v55 = vunpack.c.l.bf16 %v20060_v54  ;;  %v23082_v36 = vunpack.c.l.bf16 %v20055_v24  ;;  %9686 = vmatpush1.bf16.msra.mxu1 %v16465_v43 }
 0x1f6   : > { %v1317_v7 = vmul.f32 0.70710677, %v23080_v56  ;;  %v20115_v27 = vpack.c.bf16 %v2146_v18, %v2122_v40  ;;  %v2133_v50 = vmul.f32 %v1845_v47, %v981_v44  ;;  %18107 = verf.f32 %v1293_v5  ;;  %v16470_v18 = vld [vmem:[#allocation5 + $0x2074] ss:$24 sps:$4 sm:$0xff]   ;;  %v16473_v47 = vld [vmem:[#allocation5 + $0xea4] ss:$24 sps:$4 sm:$0xff]  }
 0x1f7   : > { %v1006_v42 = vmul.f32 0.5, %v23081_v37  ;;  %v1305_v49 = vmul.f32 0.70710677, %v23082_v36  ;;  %v18096_v39 = vpop.eup %18095  ;;  %v22628_v41 = vunpack.c.l.bf16 %v20103_v48  ;;  %v23084_v56 = vunpack.c.h.bf16 %v20048_v17  ;;  %v16471_v36 = vld [vmem:[#allocation5 + $0xea0] ss:$24 sps:$4 sm:$0xff]   ;;  %10242 = vmatpush1.bf16.msra.mxu0 %v16462_v16  ;;  %9687 = vmatprep.subr.bf16.mxu1 %v16473_v47 }
 0x1f8   : > { %23083 = vst [vmem:[#allocation78_spill] sm:$0xff] %v20115_v27  ;;  %v18098_v38 = vpop.eup %18097  ;;  %v1833_v58 = vadd.f32 1.0, %v18096_v39  ;;  %18109 = verf.f32 %v1317_v7  ;;  %v1329_v40 = vmul.f32 0.70710677, %v22619_v55  ;;  %10196 = vmatprep.mubr.bf16.mxu0 %v20115_v27  ;;  %v20126_v44 = vpack.c.bf16 %v2133_v50, %v2109_v29  ;;  %v16468_v50 = vld [vmem:[#allocation5 + $0x2070] ss:$24 sps:$4 sm:$0xff]   ;;  %10243 = vmatprep.subr.bf16.mxu0 %v16470_v18 }
 0x1f9   : > { %v1030_v37 = vmul.f32 0.5, %v23084_v56  ;;  %v1857_v10 = vadd.f32 1.0, %v18098_v38  ;;  %18111 = verf.f32 %v1305_v49  ;;  %v480_v5 = vunpack.c.h.bf16 %v20103_v48  ;;  %v18100_v56 = vpop.eup %18099  ;;  %9688 = vmatpush1.bf16.msra.mxu1 %v16471_v36  ;;  %v16485_v36 = vld [vmem:[#allocation5 + $0xf04] ss:$24 sps:$4 sm:$0xff]  }
 0x1fa   : > { %23085 = vst [vmem:[#allocation79_spill] sm:$0xff] %v20126_v44  ;;  %v2121_v11 = vmul.f32 %v1833_v58, %v969_v22  ;;  %18113 = verf.f32 %v1329_v40  ;;  %9639 = vmatmul.mubr.bf16.gmra.mrb[16].mxu1 %v20126_v44  ;;  %v23086_v49 = vunpack.c.h.bf16 %v20055_v24  ;;  %v23087_v55 = vunpack.c.h.bf16 %v20060_v54  ;;  %v16479_v22 = vld [vmem:[#allocation5 + $0xed4] ss:$24 sps:$4 sm:$0xff]   ;;  %v18102_v39 = vpop.eup %18101 }
 0x1fb   : > { %v2145_v29 = vmul.f32 %v1857_v10, %v993_v35  ;;  %v1055_v58 = vmul.f32 0.70710677, %v22628_v41  ;;  %v20142_v40 = vld [vmem:[%s18729_s8 + $0xb0] sm:$0xff]  ;;  %v1870_v7 = vadd.f32 1.0, %v18100_v56  ;;  %v23088_v27 = vunpack.c.l.bf16 %v20045_v53  ;;  %10244 = vmatpush1.bf16.msra.mxu0 %v16468_v50  ;;  %9689 = vmatprep.subr.bf16.mxu1 %v16479_v22 }
 0x1fc   : > { %v1018_v38 = vmul.f32 0.5, %v23086_v49  ;;  %v1042_v59 = vmul.f32 0.5, %v23087_v55  ;;  %v23089_v35 = vunpack.c.l.bf16 %v20048_v17  ;;  %v1056_v62 = vmul.f32 0.70710677, %v480_v5  ;;  %10245 = vmatprep.subr.bf16.mxu0 %v16476_v61 }
 0x1fd   : > { %v1005_v44 = vmul.f32 0.5, %v23088_v27  ;;  %v18104_v49 = vpop.eup %18103  ;;  %v20148_v60 = vpack.c.bf16 %v2145_v29, %v2121_v11  ;;  %v1894_v55 = vadd.f32 1.0, %v18102_v39  ;;  %v23091_v41 = vunpack.c.l.bf16 %v20118_v30  ;;  %v16477_v29 = vld [vmem:[#allocation5 + $0xed0] ss:$24 sps:$4 sm:$0xff]  }
 0x1fe   : > { %v1029_v10 = vmul.f32 0.5, %v23089_v35  ;;  %v23092_v20 = vunpack.c.h.bf16 %v20118_v30  ;;  %v18106_v56 = vpop.eup %18105  ;;  %v2158_v53 = vmul.f32 %v1870_v7, %v1006_v42  ;;  %v1882_v27 = vadd.f32 1.0, %v18104_v49  ;;  %9690 = vmatpush1.bf16.msra.mxu1 %v16477_v29 }
 0x1ff   : > { %23090 = vst [vmem:[#allocation80_spill] sm:$0xff] %v20148_v60  ;;  %v1079_v32 = vmul.f32 0.70710677, %v23091_v41  ;;  %18115 = verf.f32 %v1055_v58  ;;  %v491_v17 = vunpack.c.l.bf16 %v20132_v52  ;;  %10197 = vmatmul.mubr.bf16.gmra.mrb[16].mxu0 %v20148_v60  ;;  %v2182_v11 = vmul.f32 %v1894_v55, %v1030_v37  ;;  %v16474_v41 = vld [vmem:[#allocation5 + $0x20a0] ss:$24 sps:$4 sm:$0xff]   ;;  %9752 = vmatprep.subr.bf16.mxu1 %v16485_v36 }
 0x200   : > { %v1080_v43 = vmul.f32 0.70710677, %v23092_v20  ;;  %v1906_v16 = vadd.f32 1.0, %v18106_v56  ;;  %18117 = verf.f32 %v1056_v62  ;;  %v492_v47 = vunpack.c.h.bf16 %v20132_v52  ;;  %v18108_v18 = vpop.eup %18107  ;;  %10246 = vmatpush1.bf16.msra.mxu0 %v16474_v41  ;;  %v16489_v60 = vld [vmem:[#allocation5 + $0xf30] ss:$24 sps:$4 sm:$0xff]  }
 0x201   : > { %v2170_v39 = vmul.f32 %v1882_v27, %v1018_v38  ;;  %18119 = verf.f32 %v1079_v32  ;;  %v515_v20 = vunpack.c.l.bf16 %v20142_v40  ;;  %v22635_v42 = vunpack.c.h.bf16 %v20142_v40  ;;  %v16482_v38 = vld [vmem:[#allocation5 + $0x20d4] ss:$24 sps:$4 sm:$0xff]   ;;  %v20168_v27 = vld [vmem:[%s18729_s8 + $0xe0] sm:$0xff] }
 0x202   : > { %v20159_v7 = vpack.c.bf16 %v2182_v11, %v2158_v53  ;;  %v2194_v37 = vmul.f32 %v1906_v16, %v1042_v59  ;;  %v23093_v62 = vunpack.c.l.bf16 %v20055_v24  ;;  %18121 = verf.f32 %v1080_v43  ;;  %v18110_v32 = vpop.eup %18109  ;;  %v20171_v59 = vld [vmem:[%s18729_s8 + $0x140] sm:$0xff]  ;;  %v20181_v11 = vld [vmem:[%s18729_s8 + $0x110] sm:$0xff]  ;;  %10247 = vmatprep.subr.bf16.mxu0 %v16482_v38 }
 0x203   : > { %v1869_v35 = vadd.f32 1.0, %v18108_v18  ;;  %v23094_v49 = vunpack.c.l.bf16 %v20060_v54  ;;  %v23095_v56 = vunpack.c.l.bf16 %v20103_v48  ;;  %v768_v53 = vmul.f32 0.5, %v480_v5  ;;  %v18112_v24 = vpop.eup %18111 }
 0x204   : > { %v1017_v58 = vmul.f32 0.5, %v23093_v62  ;;  %9648 = vmatprep.mubr.bf16.mxu1 %v20159_v7  ;;  %v20174_v22 = vpack.c.bf16 %v2194_v37, %v2170_v39  ;;  %v1893_v43 = vadd.f32 1.0, %v18110_v32  ;;  %v1067_v61 = vmul.f32 0.70710677, %v491_v17  ;;  %v18114_v48 = vpop.eup %18113  ;;  %v16480_v32 = vld [vmem:[#allocation5 + $0x20d0] ss:$24 sps:$4 sm:$0xff]  }
 0x205   : > { %v1041_v55 = vmul.f32 0.5, %v23094_v49  ;;  %v767_v50 = vmul.f32 0.5, %v23095_v56  ;;  %v1068_v54 = vmul.f32 0.70710677, %v492_v47  ;;  %v2157_v5 = vmul.f32 %v1869_v35, %v1005_v44  ;;  %v16488_v49 = vld [vmem:[#allocation5 + $0x2104] ss:$24 sps:$4 sm:$0xff]   ;;  %10248 = vmatpush1.bf16.msra.mxu0 %v16480_v32 }
 0x206   : > { %23096 = vst [vmem:[#allocation81_spill] sm:$0xff] %v20174_v22  ;;  %v1881_v16 = vadd.f32 1.0, %v18112_v24  ;;  %v1091_v18 = vmul.f32 0.70710677, %v515_v20  ;;  %v1092_v39 = vmul.f32 0.70710677, %v22635_v42  ;;  %10206 = vmatprep.mubr.bf16.mxu0 %v20174_v22  ;;  %v2181_v37 = vmul.f32 %v1893_v43, %v1029_v10  ;;  %10310 = vmatprep.subr.bf16.mxu0 %v16488_v49 }
 0x207   : > { %v1905_v62 = vadd.f32 1.0, %v18114_v48  ;;  %18123 = verf.f32 %v1067_v61  ;;  %v528_v56 = vunpack.c.h.bf16 %v20168_v27  ;;  %v552_v29 = vunpack.c.h.bf16 %v20171_v59  ;;  %v20191_v35 = vld [vmem:[%s18729_s8 + $0x170] sm:$0xff] }
 0x208   : > { %v2169_v44 = vmul.f32 %v1881_v16, %v1017_v58  ;;  %18125 = verf.f32 %v1068_v54  ;;  %v22636_v24 = vunpack.c.h.bf16 %v20181_v11  ;;  %v20194_v42 = vpack.c.bf16 %v2181_v37, %v2157_v5 }
 0x209   : > { %v2193_v10 = vmul.f32 %v1905_v62, %v1041_v55  ;;  %v23097_v41 = vunpack.c.l.bf16 %v20118_v30  ;;  %18127 = verf.f32 %v1091_v18  ;;  %v18116_v61 = vpop.eup %18115  ;;  %v23098_v48 = vunpack.c.h.bf16 %v20118_v30 }
 0x20a   : > { %18129 = verf.f32 %v1092_v39  ;;  %v1104_v38 = vmul.f32 0.70710677, %v528_v56  ;;  %v1128_v36 = vmul.f32 0.70710677, %v552_v29  ;;  %v18118_v54 = vpop.eup %18117  ;;  %9649 = vmatmul.mubr.bf16.gmra.mrb[20].mxu1 %v20194_v42  ;;  %v779_v55 = vmul.f32 0.5, %v491_v17 }
 0x20b   : > { %v791_v43 = vmul.f32 0.5, %v23097_v41  ;;  %v792_v58 = vmul.f32 0.5, %v23098_v48  ;;  %v20201_v16 = vpack.c.bf16 %v2193_v10, %v2169_v44  ;;  %v1631_v5 = vadd.f32 1.0, %v18116_v61  ;;  %v18120_v18 = vpop.eup %18119 }
 0x20c   : > { %v564_v37 = vunpack.c.h.bf16 %v20191_v35  ;;  %v1632_v62 = vadd.f32 1.0, %v18118_v54  ;;  %18131 = verf.f32 %v1104_v38  ;;  %v1116_v30 = vmul.f32 0.70710677, %v22636_v24  ;;  %v18122_v41 = vpop.eup %18121 }
 0x20d   : > { %23099 = vst [vmem:[#allocation82_spill] sm:$0xff] %v20201_v16  ;;  %v22637_v39 = vunpack.c.l.bf16 %v20168_v27  ;;  %10207 = vmatmul.mubr.bf16.gmra.mrb[20].mxu0 %v20201_v16  ;;  %v780_v32 = vmul.f32 0.5, %v492_v47  ;;  %v1655_v44 = vadd.f32 1.0, %v18120_v18  ;;  %v1919_v17 = vmul.f32 %v1631_v5, %v767_v50  ;;  %v16483_v47 = vld [vmem:[#allocation5 + $0xf00] ss:$24 sps:$4 sm:$0xff]  }
 0x20e   : > { %18133 = verf.f32 %v1128_v36  ;;  %v1656_v10 = vadd.f32 1.0, %v18122_v41  ;;  %v1920_v61 = vmul.f32 %v1632_v62, %v768_v53  ;;  %v1140_v48 = vmul.f32 0.70710677, %v564_v37  ;;  %v20234_v53 = vld [vmem:[%s18729_s8 + $0x1d0] sm:$0xff] }
 0x20f   : > { %18135 = verf.f32 %v1116_v30  ;;  %v803_v49 = vmul.f32 0.5, %v515_v20  ;;  %v1943_v38 = vmul.f32 %v1655_v44, %v791_v43  ;;  %v22638_v54 = vunpack.c.l.bf16 %v20171_v59  ;;  %v16491_v43 = vld [vmem:[#allocation5 + $0xf34] ss:$24 sps:$4 sm:$0xff]   ;;  %v20226_v30 = vld [vmem:[%s18729_s8 + $0x1a0] sm:$0xff] }
 0x210   : > { %v1103_v24 = vmul.f32 0.70710677, %v22637_v39  ;;  %v1944_v52 = vmul.f32 %v1656_v10, %v792_v58  ;;  %18137 = verf.f32 %v1140_v48  ;;  %v22641_v50 = vunpack.c.l.bf16 %v20181_v11  ;;  %v20229_v58 = vld [vmem:[%s18729_s8 + $0x200] sm:$0xff] }
 0x211   : > { %v18124_v36 = vpop.eup %18123  ;;  %v23100_v5 = vunpack.c.h.bf16 %v20142_v40  ;;  %v20221_v20 = vpack.c.bf16 %v1943_v38, %v1919_v17  ;;  %v1127_v62 = vmul.f32 0.70710677, %v22638_v54  ;;  %v816_v48 = vmul.f32 0.5, %v528_v56 }
 0x212   : > { %18139 = verf.f32 %v1103_v24  ;;  %v18126_v41 = vpop.eup %18125  ;;  %v20231_v44 = vpack.c.bf16 %v1944_v52, %v1920_v61  ;;  %v1643_v10 = vadd.f32 1.0, %v18124_v36  ;;  %v840_v39 = vmul.f32 0.5, %v552_v29 }
 0x213   : > { %v804_v18 = vmul.f32 0.5, %v23100_v5  ;;  %23101 = vst [vmem:[#allocation83_spill] sm:$0xff] %v20221_v20  ;;  %v18128_v40 = vpop.eup %18127  ;;  %v1644_v17 = vadd.f32 1.0, %v18126_v41  ;;  %18141 = verf.f32 %v1127_v62  ;;  %v1115_v38 = vmul.f32 0.70710677, %v22641_v50  ;;  %v20247_v50 = vld [vmem:[%s18729_s8 + $0x230] sm:$0xff] }
 0x214   : > { %23102 = vst [vmem:[#allocation84_spill] sm:$0xff] %v20231_v44  ;;  %v23103_v24 = vunpack.c.l.bf16 %v20191_v35  ;;  %v18130_v54 = vpop.eup %18129  ;;  %9691 = vmatprep.mubr.bf16.mxu1 %v20231_v44  ;;  %v1667_v61 = vadd.f32 1.0, %v18128_v40  ;;  %v1931_v52 = vmul.f32 %v1643_v10, %v779_v55  ;;  %v22650_v56 = vunpack.c.h.bf16 %v20226_v30  ;;  %v16497_v40 = vld [vmem:[#allocation5 + $0xf64] ss:$24 sps:$4 sm:$0xff]   ;;  %v16495_v10 = vld [vmem:[#allocation5 + $0xf60] ss:$24 sps:$4 sm:$0xff]  }
 0x215   : > { %v1668_v36 = vadd.f32 1.0, %v18130_v54  ;;  %v1932_v16 = vmul.f32 %v1644_v17, %v780_v32  ;;  %9692 = vmatmul.mubr.bf16.vlgmr.msra.gmra.mrb[0].mxu1 %v20221_v20  ;;  %v23104_v62 = vunpack.c.h.bf16 %v20181_v11  ;;  %18143 = verf.f32 %v1115_v38 }
 0x216   : > { %v1139_v5 = vmul.f32 0.70710677, %v23103_v24  ;;  %v18132_v24 = vpop.eup %18131  ;;  %9753 = vmatpush1.bf16.msra.mxu1 %v16483_v47  ;;  %v1955_v22 = vmul.f32 %v1667_v61, %v803_v49  ;;  %v852_v55 = vmul.f32 0.5, %v564_v37  ;;  %v1152_v17 = vmul.f32 0.70710677, %v22650_v56 }
 0x217   : > { %v828_v41 = vmul.f32 0.5, %v23104_v62  ;;  %v1956_v54 = vmul.f32 %v1668_v36, %v804_v18  ;;  %9754 = vmatprep.subr.bf16.mxu1 %v16491_v43  ;;  %v1680_v32 = vadd.f32 1.0, %v18132_v24  ;;  %v23105_v38 = vunpack.c.h.bf16 %v20229_v58  ;;  %v16486_v18 = vld [vmem:[#allocation5 + $0x2100] ss:$24 sps:$4 sm:$0xff]   ;;  %v16494_v43 = vld [vmem:[#allocation5 + $0x2134] ss:$24 sps:$4 sm:$0xff]  }
 0x218   : > { %18145 = verf.f32 %v1139_v5  ;;  %v18134_v29 = vpop.eup %18133  ;;  %v20254_v44 = vpack.c.bf16 %v1955_v22, %v1931_v52  ;;  %v23107_v47 = vunpack.c.l.bf16 %v20168_v27  ;;  %v22653_v5 = vunpack.c.h.bf16 %v20247_v50 }
 0x219   : > { %v1176_v62 = vmul.f32 0.70710677, %v23105_v38  ;;  %v18136_v20 = vpop.eup %18135  ;;  %v1704_v49 = vadd.f32 1.0, %v18134_v29  ;;  %v20259_v61 = vpack.c.bf16 %v1956_v54, %v1932_v16  ;;  %v1968_v36 = vmul.f32 %v1680_v32, %v816_v48  ;;  %v16503_v16 = vld [vmem:[#allocation5 + $0xf94] ss:$24 sps:$4 sm:$0xff]  }
 0x21a   : > { %23106 = vst [vmem:[#allocation85_spill] sm:$0xff] %v20254_v44  ;;  %v815_v37 = vmul.f32 0.5, %v23107_v47  ;;  %v1692_v24 = vadd.f32 1.0, %v18136_v20  ;;  %18147 = verf.f32 %v1152_v17  ;;  %v18138_v56 = vpop.eup %18137  ;;  %9755 = vmatpush1.bf16.msra.mxu1 %v16489_v60  ;;  %v23109_v22 = vunpack.c.l.bf16 %v20171_v59  ;;  %v16492_v59 = vld [vmem:[#allocation5 + $0x2130] ss:$24 sps:$4 sm:$0xff]  }
 0x21b   : > { %23108 = vst [vmem:[#allocation86_spill] sm:$0xff] %v20259_v61  ;;  %v1992_v38 = vmul.f32 %v1704_v49, %v840_v39  ;;  %18149 = verf.f32 %v1176_v62  ;;  %v23110_v27 = vunpack.c.h.bf16 %v20234_v53  ;;  %10249 = vmatprep.mubr.bf16.mxu0 %v20259_v61  ;;  %9756 = vmatprep.subr.bf16.mxu1 %v16497_v40  ;;  %v1716_v54 = vadd.f32 1.0, %v18138_v56  ;;  %v16500_v40 = vld [vmem:[#allocation5 + $0x2164] ss:$24 sps:$4 sm:$0xff]   ;;  %v16510_v61 = vld [vmem:[#allocation5 + $0x21c0] ss:$24 sps:$4 sm:$0xff]  }
 0x21c   : > { %v839_v52 = vmul.f32 0.5, %v23109_v22  ;;  %v18140_v47 = vpop.eup %18139  ;;  %v1980_v48 = vmul.f32 %v1692_v24, %v828_v41  ;;  %v1188_v60 = vmul.f32 0.70710677, %v22653_v5  ;;  %v22652_v39 = vunpack.c.l.bf16 %v20226_v30  ;;  %10250 = vmatmul.mubr.bf16.vlgmr.msra.gmra.mrb[0].mxu0 %v20254_v44  ;;  %v20278_v22 = vld [vmem:[%s18729_s8 + $0x260] sm:$0xff] }
 0x21d   : > { %v1164_v29 = vmul.f32 0.70710677, %v23110_v27  ;;  %v20270_v20 = vpack.c.bf16 %v1992_v38, %v1968_v36  ;;  %v1679_v32 = vadd.f32 1.0, %v18140_v47  ;;  %v22651_v17 = vunpack.c.l.bf16 %v20229_v58  ;;  %v18142_v62 = vpop.eup %18141  ;;  %10311 = vmatpush1.bf16.msra.mxu0 %v16486_v18  ;;  %v16501_v36 = vld [vmem:[#allocation5 + $0xf90] ss:$24 sps:$4 sm:$0xff]  }
 0x21e   : > { %v2004_v56 = vmul.f32 %v1716_v54, %v852_v55  ;;  %v23112_v41 = vunpack.c.l.bf16 %v20181_v11  ;;  %v1151_v24 = vmul.f32 0.70710677, %v22652_v39  ;;  %10312 = vmatprep.subr.bf16.mxu0 %v16494_v43  ;;  %9757 = vmatpush1.bf16.msra.mxu1 %v16495_v10  ;;  %v1703_v38 = vadd.f32 1.0, %v18142_v62  ;;  %v16498_v47 = vld [vmem:[#allocation5 + $0x2160] ss:$24 sps:$4 sm:$0xff]  }
 0x21f   : > { %23111 = vst [vmem:[#allocation87_spill] sm:$0xff] %v20270_v20  ;;  %18151 = verf.f32 %v1164_v29  ;;  %v1967_v27 = vmul.f32 %v1679_v32, %v815_v37  ;;  %v23113_v29 = vunpack.c.l.bf16 %v20191_v35  ;;  %v1175_v55 = vmul.f32 0.70710677, %v22651_v17  ;;  %v18144_v11 = vpop.eup %18143  ;;  %9758 = vmatprep.subr.bf16.mxu1 %v16503_v16  ;;  %v16509_v54 = vld [vmem:[#allocation5 + $0xfc4] ss:$24 sps:$4 sm:$0xff]   ;;  %9701 = vmatprep.mubr.bf16.mxu1 %v20270_v20 }
 0x220   : > { %v827_v49 = vmul.f32 0.5, %v23112_v41  ;;  %18153 = verf.f32 %v1188_v60  ;;  %v20285_v60 = vpack.c.bf16 %v2004_v56, %v1980_v48  ;;  %v22657_v10 = vunpack.c.l.bf16 %v20234_v53  ;;  %v20290_v37 = vld [vmem:[%s18729_s8 + $0x2c0] sm:$0xff]  ;;  %v16506_v32 = vld [vmem:[#allocation5 + $0x2194] ss:$24 sps:$4 sm:$0xff]  }
 0x221   : > { %v851_v18 = vmul.f32 0.5, %v23113_v29  ;;  %18155 = verf.f32 %v1151_v24  ;;  %v22656_v43 = vunpack.c.l.bf16 %v20247_v50  ;;  %v16507_v62 = vld [vmem:[#allocation5 + $0xfc0] ss:$24 sps:$4 sm:$0xff]   ;;  %v1991_v41 = vmul.f32 %v1703_v38, %v839_v52  ;;  %10313 = vmatpush1.bf16.msra.mxu0 %v16492_v59  ;;  %v16515_v17 = vld [vmem:[#allocation5 + $0xff4] ss:$24 sps:$4 sm:$0xff]  }
 0x222   : > { %23114 = vst [vmem:[#allocation88_spill] sm:$0xff] %v20285_v60  ;;  %v18146_v35 = vpop.eup %18145  ;;  %v1691_v29 = vadd.f32 1.0, %v18144_v11  ;;  %18157 = verf.f32 %v1175_v55  ;;  %10259 = vmatprep.mubr.bf16.mxu0 %v20285_v60  ;;  %v23115_v56 = vunpack.c.h.bf16 %v20226_v30  ;;  %v23116_v39 = vunpack.c.h.bf16 %v20229_v58  ;;  %10314 = vmatprep.subr.bf16.mxu0 %v16500_v40 }
 0x223   : > { %v1715_v48 = vadd.f32 1.0, %v18146_v35  ;;  %v1163_v52 = vmul.f32 0.70710677, %v22657_v10  ;;  %9759 = vmatpush1.bf16.msra.mxu1 %v16501_v36  ;;  %v20300_v38 = vpack.c.bf16 %v1991_v41, %v1967_v27  ;;  %v1187_v59 = vmul.f32 0.70710677, %v22656_v43  ;;  %v20306_v35 = vld [vmem:[%s18729_s8 + $0x290] sm:$0xff] }
 0x224   : > { %v864_v24 = vmul.f32 0.5, %v23115_v56  ;;  %v888_v5 = vmul.f32 0.5, %v23116_v39  ;;  %v1979_v55 = vmul.f32 %v1691_v29, %v827_v49  ;;  %v22660_v11 = vunpack.c.h.bf16 %v20290_v37  ;;  %v18148_v56 = vpop.eup %18147  ;;  %9760 = vmatprep.subr.bf16.mxu1 %v16509_v54  ;;  %v20313_v27 = vld [vmem:[%s18729_s8 + $0x2f0] sm:$0xff]  ;;  %v16512_v10 = vld [vmem:[#allocation5 + $0x21c4] ss:$24 sps:$4 sm:$0xff]  }
 0x225   : > { %23117 = vst [vmem:[#allocation89_spill] sm:$0xff] %v20300_v38  ;;  %v2003_v16 = vmul.f32 %v1715_v48, %v851_v18  ;;  %v23118_v39 = vunpack.c.h.bf16 %v20234_v53  ;;  %18159 = verf.f32 %v1163_v52  ;;  %v23119_v40 = vunpack.c.h.bf16 %v20278_v22  ;;  %v18150_v49 = vpop.eup %18149  ;;  %9702 = vmatmul.mubr.bf16.gmra.mrb[4].mxu1 %v20300_v38  ;;  %10315 = vmatpush1.bf16.msra.mxu0 %v16498_v47  ;;  %v16504_v54 = vld [vmem:[#allocation5 + $0x2190] ss:$24 sps:$4 sm:$0xff]  }
 0x226   : > { %v1728_v41 = vadd.f32 1.0, %v18148_v56  ;;  %v23120_v29 = vunpack.c.h.bf16 %v20247_v50  ;;  %18161 = verf.f32 %v1187_v59  ;;  %v1224_v18 = vmul.f32 0.70710677, %v22660_v11  ;;  %10316 = vmatprep.subr.bf16.mxu0 %v16506_v32  ;;  %v16513_v56 = vld [vmem:[#allocation5 + $0xff0] ss:$24 sps:$4 sm:$0xff]  }
 0x227   : > { %v876_v60 = vmul.f32 0.5, %v23118_v39  ;;  %v1200_v36 = vmul.f32 0.70710677, %v23119_v40  ;;  %v20320_v48 = vpack.c.bf16 %v2003_v16, %v1979_v55  ;;  %v1752_v52 = vadd.f32 1.0, %v18150_v49  ;;  %9761 = vmatpush1.bf16.msra.mxu1 %v16507_v62  ;;  %v16521_v16 = vld [vmem:[#allocation5 + $0x1024] ss:$24 sps:$4 sm:$0xff]  }
 0x228   : > { %v900_v43 = vmul.f32 0.5, %v23120_v29  ;;  %v22665_v39 = vunpack.c.h.bf16 %v20306_v35  ;;  %v2016_v44 = vmul.f32 %v1728_v41, %v864_v24  ;;  %v23122_v29 = vunpack.c.l.bf16 %v20226_v30  ;;  %9762 = vmatprep.subr.bf16.mxu1 %v16515_v17  ;;  %v16518_v24 = vld [vmem:[#allocation5 + $0x21f4] ss:$24 sps:$4 sm:$0xff]   ;;  %v16519_v49 = vld [vmem:[#allocation5 + $0x1020] ss:$24 sps:$4 sm:$0xff]  }
 0x229   : > { %23121 = vst [vmem:[#allocation90_spill] sm:$0xff] %v20320_v48  ;;  %18163 = verf.f32 %v1200_v36  ;;  %v18152_v40 = vpop.eup %18151  ;;  %v22666_v11 = vunpack.c.h.bf16 %v20313_v27  ;;  %10260 = vmatmul.mubr.bf16.gmra.mrb[4].mxu0 %v20320_v48  ;;  %v2040_v55 = vmul.f32 %v1752_v52, %v888_v5  ;;  %v23123_v41 = vunpack.c.l.bf16 %v20229_v58  ;;  %v16527_v5 = vld [vmem:[#allocation5 + $0x1054] ss:$24 sps:$4 sm:$0xff]   ;;  %v20342_v17 = vld [vmem:[%s18729_s8 + $0x320] sm:$0xff] }
 0x22a   : > { %v863_v59 = vmul.f32 0.5, %v23122_v29  ;;  %18165 = verf.f32 %v1224_v18  ;;  %v18154_v47 = vpop.eup %18153  ;;  %v1740_v36 = vadd.f32 1.0, %v18152_v40  ;;  %v1212_v32 = vmul.f32 0.70710677, %v22665_v39  ;;  %10317 = vmatpush1.bf16.msra.mxu0 %v16504_v54  ;;  %v16516_v54 = vld [vmem:[#allocation5 + $0x21f0] ss:$24 sps:$4 sm:$0xff]  }
 0x22b   : > { %v1764_v30 = vadd.f32 1.0, %v18154_v47  ;;  %v887_v18 = vmul.f32 0.5, %v23123_v41  ;;  %v1236_v29 = vmul.f32 0.70710677, %v22666_v11  ;;  %v18156_v48 = vpop.eup %18155  ;;  %v20335_v52 = vpack.c.bf16 %v2040_v55, %v2016_v44  ;;  %10318 = vmatprep.subr.bf16.mxu0 %v16512_v10  ;;  %9763 = vmatpush1.bf16.msra.mxu1 %v16513_v56 }
 0x22c   : > { %v2028_v40 = vmul.f32 %v1740_v36, %v876_v60  ;;  %v23125_v39 = vunpack.c.l.bf16 %v20234_v53  ;;  %18167 = verf.f32 %v1212_v32  ;;  %v18158_v47 = vpop.eup %18157  ;;  %v1727_v41 = vadd.f32 1.0, %v18156_v48  ;;  %9764 = vmatprep.subr.bf16.mxu1 %v16521_v16  ;;  %v16524_v48 = vld [vmem:[#allocation5 + $0x2224] ss:$24 sps:$4 sm:$0xff]  }
 0x22d   : > { %23124 = vst [vmem:[#allocation91_spill] sm:$0xff] %v20335_v52  ;;  %v2052_v58 = vmul.f32 %v1764_v30, %v900_v43  ;;  %v23126_v11 = vunpack.c.l.bf16 %v20247_v50  ;;  %18169 = verf.f32 %v1236_v29  ;;  %9711 = vmatprep.mubr.bf16.mxu1 %v20335_v52  ;;  %v1751_v44 = vadd.f32 1.0, %v18158_v47  ;;  %v20356_v36 = vld [vmem:[%s18729_s8 + $0x380] sm:$0xff]  ;;  %v16525_v30 = vld [vmem:[#allocation5 + $0x1050] ss:$24 sps:$4 sm:$0xff]  }
 0x22e   : > { %v875_v62 = vmul.f32 0.5, %v23125_v39  ;;  %v23127_v53 = vunpack.c.l.bf16 %v20278_v22  ;;  %v23128_v10 = vunpack.c.l.bf16 %v20290_v37  ;;  %v22669_v43 = vunpack.c.l.bf16 %v20306_v35  ;;  %10319 = vmatpush1.bf16.msra.mxu0 %v16510_v61 }
 0x22f   : > { %v899_v38 = vmul.f32 0.5, %v23126_v11  ;;  %v20350_v50 = vpack.c.bf16 %v2052_v58, %v2028_v40  ;;  %v2015_v11 = vmul.f32 %v1727_v41, %v863_v59  ;;  %v23130_v56 = vunpack.c.h.bf16 %v20278_v22  ;;  %v18160_v32 = vpop.eup %18159  ;;  %10320 = vmatprep.subr.bf16.mxu0 %v16518_v24  ;;  %9765 = vmatpush1.bf16.msra.mxu1 %v16519_v49  ;;  %v16533_v59 = vld [vmem:[#allocation5 + $0x1084] ss:$24 sps:$4 sm:$0xff]   ;;  %v20370_v49 = vld [vmem:[%s18729_s8 + $0x350] sm:$0xff] }
 0x230   : > { %v1199_v60 = vmul.f32 0.70710677, %v23127_v53  ;;  %v1223_v39 = vmul.f32 0.70710677, %v23128_v10  ;;  %v22670_v16 = vunpack.c.l.bf16 %v20313_v27  ;;  %v2039_v29 = vmul.f32 %v1751_v44, %v887_v18  ;;  %v18162_v40 = vpop.eup %18161  ;;  %9766 = vmatprep.subr.bf16.mxu1 %v16527_v5 }
 0x231   : > { %23129 = vst [vmem:[#allocation92_spill] sm:$0xff] %v20350_v50  ;;  %v912_v55 = vmul.f32 0.5, %v23130_v56  ;;  %v1211_v47 = vmul.f32 0.70710677, %v22669_v43  ;;  %v1739_v58 = vadd.f32 1.0, %v18160_v32  ;;  %v23131_v41 = vunpack.c.h.bf16 %v20290_v37  ;;  %10269 = vmatprep.mubr.bf16.mxu0 %v20350_v50  ;;  %v20373_v56 = vld [vmem:[%s18729_s8 + $0x3b0] sm:$0xff] }
 0x232   : > { %18171 = verf.f32 %v1199_v60  ;;  %v1235_v61 = vmul.f32 0.70710677, %v22670_v16  ;;  %v20366_v44 = vpack.c.bf16 %v2039_v29, %v2015_v11  ;;  %v1763_v60 = vadd.f32 1.0, %v18162_v40  ;;  %10321 = vmatpush1.bf16.msra.mxu0 %v16516_v54  ;;  %v16530_v50 = vld [vmem:[#allocation5 + $0x2254] ss:$24 sps:$4 sm:$0xff]  }
 0x233   : > { %v936_v10 = vmul.f32 0.5, %v23131_v41  ;;  %18173 = verf.f32 %v1223_v39  ;;  %v18164_v18 = vpop.eup %18163  ;;  %v16522_v41 = vld [vmem:[#allocation5 + $0x2220] ss:$24 sps:$4 sm:$0xff]   ;;  %v2027_v39 = vmul.f32 %v1739_v58, %v875_v62  ;;  %v23133_v16 = vunpack.c.h.bf16 %v20306_v35  ;;  %10322 = vmatprep.subr.bf16.mxu0 %v16524_v48  ;;  %9767 = vmatpush1.bf16.msra.mxu1 %v16525_v30  ;;  %v16539_v30 = vld [vmem:[#allocation5 + $0x10b4] ss:$24 sps:$4 sm:$0xff]  }
 0x234   : > { %23132 = vst [vmem:[#allocation93_spill] sm:$0xff] %v20366_v44  ;;  %18175 = verf.f32 %v1211_v47  ;;  %v18166_v32 = vpop.eup %18165  ;;  %v1776_v43 = vadd.f32 1.0, %v18164_v18  ;;  %9712 = vmatmul.mubr.bf16.gmra.mrb[8].mxu1 %v20366_v44  ;;  %v2051_v5 = vmul.f32 %v1763_v60, %v899_v38  ;;  %v23134_v29 = vunpack.c.h.bf16 %v20313_v27  ;;  %v16528_v38 = vld [vmem:[#allocation5 + $0x2250] ss:$24 sps:$4 sm:$0xff]   ;;  %v16531_v60 = vld [vmem:[#allocation5 + $0x1080] ss:$24 sps:$4 sm:$0xff]   ;;  %9768 = vmatprep.subr.bf16.mxu1 %v16533_v59 }
 0x235   : > { %v924_v53 = vmul.f32 0.5, %v23133_v16  ;;  %18177 = verf.f32 %v1235_v61  ;;  %v1800_v11 = vadd.f32 1.0, %v18166_v32  ;;  %v23135_v40 = vunpack.c.h.bf16 %v20342_v17 }
 0x236   : > { %v948_v47 = vmul.f32 0.5, %v23134_v29  ;;  %v2064_v62 = vmul.f32 %v1776_v43, %v912_v55  ;;  %v23136_v58 = vunpack.c.h.bf16 %v20356_v36  ;;  %v18168_v61 = vpop.eup %18167  ;;  %v20386_v32 = vpack.c.bf16 %v2051_v5, %v2027_v39  ;;  %10323 = vmatpush1.bf16.msra.mxu0 %v16522_v41 }
 0x237   : > { %v1248_v24 = vmul.f32 0.70710677, %v23135_v40  ;;  %v2088_v29 = vmul.f32 %v1800_v11, %v936_v10  ;;  %v22675_v48 = vunpack.c.l.bf16 %v20342_v17  ;;  %v18170_v40 = vpop.eup %18169  ;;  %v1788_v43 = vadd.f32 1.0, %v18168_v61  ;;  %10324 = vmatprep.subr.bf16.mxu0 %v16530_v50  ;;  %v16536_v11 = vld [vmem:[#allocation5 + $0x2284] ss:$24 sps:$4 sm:$0xff]   ;;  %9769 = vmatpush1.bf16.msra.mxu1 %v16531_v60 }
 0x238   : > { %v1272_v18 = vmul.f32 0.70710677, %v23136_v58  ;;  %23137 = vst [vmem:[#allocation94_spill] sm:$0xff] %v20386_v32  ;;  %v23138_v55 = vunpack.c.l.bf16 %v20278_v22  ;;  %v23139_v16 = vunpack.c.l.bf16 %v20290_v37  ;;  %v1812_v59 = vadd.f32 1.0, %v18170_v40  ;;  %10270 = vmatmul.mubr.bf16.gmra.mrb[8].mxu0 %v20386_v32  ;;  %9770 = vmatprep.subr.bf16.mxu1 %v16539_v30  ;;  %v20417_v30 = vld [vmem:[%s18729_s8 + $0x3e0] sm:$0xff] }
 0x239   : > { %18179 = verf.f32 %v1248_v24  ;;  %v20393_v54 = vpack.c.bf16 %v2088_v29, %v2064_v62  ;;  %v23141_v39 = vunpack.c.h.bf16 %v20370_v49  ;;  %v23142_v24 = vunpack.c.h.bf16 %v20373_v56  ;;  %v16537_v29 = vld [vmem:[#allocation5 + $0x10b0] ss:$24 sps:$4 sm:$0xff]  }
 0x23a   : > { %v911_v58 = vmul.f32 0.5, %v23138_v55  ;;  %v935_v44 = vmul.f32 0.5, %v23139_v16  ;;  %18181 = verf.f32 %v1272_v18  ;;  %v2076_v22 = vmul.f32 %v1788_v43, %v924_v53  ;;  %v16534_v16 = vld [vmem:[#allocation5 + $0x2280] ss:$24 sps:$4 sm:$0xff]   ;;  %v16542_v43 = vld [vmem:[#allocation5 + $0x22b4] ss:$24 sps:$4 sm:$0xff]   ;;  %10325 = vmatpush1.bf16.msra.mxu0 %v16528_v38 }
 0x23b   : > { %23140 = vst [vmem:[#allocation95_spill] sm:$0xff] %v20393_v54  ;;  %v1260_v10 = vmul.f32 0.70710677, %v23141_v39  ;;  %v1284_v5 = vmul.f32 0.70710677, %v23142_v24  ;;  %v23143_v61 = vunpack.c.l.bf16 %v20306_v35  ;;  %v22676_v18 = vunpack.c.l.bf16 %v20356_v36  ;;  %9721 = vmatprep.mubr.bf16.mxu1 %v20393_v54  ;;  %10326 = vmatprep.subr.bf16.mxu0 %v16536_v11 }
 0x23c   : > { %v1247_v41 = vmul.f32 0.70710677, %v22675_v48  ;;  %v18172_v62 = vpop.eup %18171  ;;  %v2100_v40 = vmul.f32 %v1812_v59, %v948_v47  ;;  %v16545_v39 = vld [vmem:[#allocation5 + $0x10e4] ss:$24 sps:$4 sm:$0xff]   ;;  %v23144_v24 = vunpack.c.l.bf16 %v20313_v27  ;;  %v23146_v48 = vunpack.c.h.bf16 %v20342_v17  ;;  %v20423_v27 = vld [vmem:[%s18729_s8 + $0x410] sm:$0xff]  ;;  %9771 = vmatpush1.bf16.msra.mxu1 %v16537_v29 }
 0x23d   : > { %v923_v37 = vmul.f32 0.5, %v23143_v61  ;;  %18183 = verf.f32 %v1260_v10  ;;  %v18174_v35 = vpop.eup %18173  ;;  %v1775_v55 = vadd.f32 1.0, %v18172_v62  ;;  %v1271_v47 = vmul.f32 0.70710677, %v22676_v18  ;;  %v20420_v62 = vld [vmem:[%s18729_s8 + $0x440] sm:$0xff]  ;;  %9772 = vmatprep.subr.bf16.mxu1 %v16545_v39 }
 0x23e   : > { %v947_v60 = vmul.f32 0.5, %v23144_v24  ;;  %18185 = verf.f32 %v1284_v5  ;;  %v18176_v59 = vpop.eup %18175  ;;  %v20412_v10 = vpack.c.bf16 %v2100_v40, %v2076_v22  ;;  %v1799_v61 = vadd.f32 1.0, %v18174_v35  ;;  %v20428_v22 = vld [vmem:[%s18729_s8 + $0x470] sm:$0xff]  ;;  %v16543_v11 = vld [vmem:[#allocation5 + $0x10e0] ss:$24 sps:$4 sm:$0xff]   ;;  %10327 = vmatpush1.bf16.msra.mxu0 %v16534_v16 }
 0x23f   : > { %v960_v53 = vmul.f32 0.5, %v23146_v48  ;;  %18187 = verf.f32 %v1247_v41  ;;  %v18178_v5 = vpop.eup %18177  ;;  %v2063_v24 = vmul.f32 %v1775_v55, %v911_v58  ;;  %v1787_v18 = vadd.f32 1.0, %v18176_v59  ;;  %v16540_v59 = vld [vmem:[#allocation5 + $0x22b0] ss:$24 sps:$4 sm:$0xff]   ;;  %10328 = vmatprep.subr.bf16.mxu0 %v16542_v43  ;;  %v16548_v39 = vld [vmem:[#allocation5 + $0x22e4] ss:$24 sps:$4 sm:$0xff]  }
 0x240   : > { %23145 = vst [vmem:[#allocation96_spill] sm:$0xff] %v20412_v10  ;;  %v23147_v50 = vunpack.c.h.bf16 %v20356_v36  ;;  %18189 = verf.f32 %v1271_v47  ;;  %10279 = vmatprep.mubr.bf16.mxu0 %v20412_v10  ;;  %v2087_v48 = vmul.f32 %v1799_v61, %v935_v44  ;;  %v1811_v41 = vadd.f32 1.0, %v18178_v5  ;;  %v16551_v5 = vld [vmem:[#allocation5 + $0x1114] ss:$24 sps:$4 sm:$0xff]   ;;  %9773 = vmatpush1.bf16.msra.mxu1 %v16543_v11 }
 0x241   : > { %v23148_v40 = vunpack.c.l.bf16 %v20370_v49  ;;  %v23149_v32 = vunpack.c.l.bf16 %v20373_v56  ;;  %v2075_v58 = vmul.f32 %v1787_v18, %v923_v37  ;;  %v23151_v18 = vunpack.c.h.bf16 %v20370_v49  ;;  %9774 = vmatprep.subr.bf16.mxu1 %v16551_v5  ;;  %v16552_v5 = vld [vmem:[#allocation5 + $0x2310] ss:$24 sps:$4 sm:$0xff]  }
 0x242   : > { %v984_v38 = vmul.f32 0.5, %v23147_v50  ;;  %v20438_v44 = vpack.c.bf16 %v2087_v48, %v2063_v24  ;;  %v2099_v61 = vmul.f32 %v1811_v41, %v947_v60  ;;  %v23152_v50 = vunpack.c.h.bf16 %v20373_v56  ;;  %10329 = vmatpush1.bf16.msra.mxu0 %v16540_v59  ;;  %v20471_v59 = vld [vmem:[%s18729_s8 + $0x28] sm:$0xff] }
 0x243   : > { %v1259_v35 = vmul.f32 0.70710677, %v23148_v40  ;;  %v1283_v54 = vmul.f32 0.70710677, %v23149_v32  ;;  %v18180_v29 = vpop.eup %18179  ;;  %v972_v55 = vmul.f32 0.5, %v23151_v18  ;;  %v23154_v24 = vunpack.c.h.bf16 %v20417_v30  ;;  %10330 = vmatprep.subr.bf16.mxu0 %v16548_v39 }
 0x244   : > { %23150 = vst [vmem:[#allocation97_spill] sm:$0xff] %v20438_v44  ;;  %v18182_v32 = vpop.eup %18181  ;;  %v1824_v37 = vadd.f32 1.0, %v18180_v29  ;;  %v996_v47 = vmul.f32 0.5, %v23152_v50  ;;  %9722 = vmatmul.mubr.bf16.gmra.mrb[12].mxu1 %v20438_v44  ;;  %v20446_v16 = vpack.c.bf16 %v2099_v61, %v2075_v58  ;;  %v23155_v41 = vunpack.c.h.bf16 %v20420_v62  ;;  %v16560_v44 = vld [vmem:[#allocation5 + $0x2344] ss:$24 sps:$4 sm:$0xff]  }
 0x245   : > { %18191 = verf.f32 %v1259_v35  ;;  %v1848_v60 = vadd.f32 1.0, %v18182_v32  ;;  %v1296_v48 = vmul.f32 0.70710677, %v23154_v24  ;;  %v16549_v35 = vld [vmem:[#allocation5 + $0x1110] ss:$24 sps:$4 sm:$0xff]   ;;  %v23156_v18 = vunpack.c.l.bf16 %v20342_v17 }
 0x246   : > { %18193 = verf.f32 %v1283_v54  ;;  %23153 = vst [vmem:[#allocation98_spill] sm:$0xff] %v20446_v16  ;;  %v1320_v43 = vmul.f32 0.70710677, %v23155_v41  ;;  %v2112_v29 = vmul.f32 %v1824_v37, %v960_v53  ;;  %v23157_v50 = vunpack.c.l.bf16 %v20356_v36  ;;  %v16546_v32 = vld [vmem:[#allocation5 + $0x22e0] ss:$24 sps:$4 sm:$0xff]   ;;  %10280 = vmatmul.mubr.bf16.gmra.mrb[12].mxu0 %v20446_v16  ;;  %9775 = vmatpush1.bf16.msra.mxu1 %v16549_v35 }
 0x247   : > { %v959_v40 = vmul.f32 0.5, %v23156_v18  ;;  %v23158_v10 = vunpack.c.h.bf16 %v20423_v27  ;;  %v18184_v61 = vpop.eup %18183  ;;  %v2136_v24 = vmul.f32 %v1848_v60, %v984_v38  ;;  %18195 = verf.f32 %v1296_v48  ;;  %v16554_v17 = vld [vmem:[#allocation5 + $0x2314] ss:$24 sps:$4 sm:$0xff]   ;;  %v16557_v18 = vld [vmem:[#allocation5 + $0x1144] ss:$24 sps:$4 sm:$0xff]   ;;  %10331 = vmatpush1.bf16.msra.mxu0 %v16546_v32 }
 0x248   : > { %v983_v54 = vmul.f32 0.5, %v23157_v50  ;;  %v23159_v41 = vunpack.c.h.bf16 %v20428_v22  ;;  %v18186_v37 = vpop.eup %18185  ;;  %v1836_v36 = vadd.f32 1.0, %v18184_v61  ;;  %18197 = verf.f32 %v1320_v43  ;;  %v16555_v50 = vld [vmem:[#allocation5 + $0x1140] ss:$24 sps:$4 sm:$0xff]   ;;  %10332 = vmatprep.subr.bf16.mxu0 %v16554_v17  ;;  %9776 = vmatprep.subr.bf16.mxu1 %v16557_v18  ;;  %v16566_v18 = vld [vmem:[#allocation5 + $0x2374] ss:$24 sps:$4 sm:$0xff]  }
 0x249   : > { %v1308_v58 = vmul.f32 0.70710677, %v23158_v10  ;;  %v18188_v38 = vpop.eup %18187  ;;  %v20464_v60 = vpack.c.bf16 %v2136_v24, %v2112_v29  ;;  %v1860_v48 = vadd.f32 1.0, %v18186_v37  ;;  %v23162_v43 = vunpack.c.l.bf16 %v20373_v56  ;;  %v16561_v56 = vld [vmem:[#allocation5 + $0x1170] ss:$24 sps:$4 sm:$0xff]  }
 0x24a   : > { %v1332_v11 = vmul.f32 0.70710677, %v23159_v41  ;;  %v23161_v41 = vunpack.c.l.bf16 %v20370_v49  ;;  %v18190_v39 = vpop.eup %18189  ;;  %v2124_v61 = vmul.f32 %v1836_v36, %v972_v55  ;;  %v1823_v16 = vadd.f32 1.0, %v18188_v38  ;;  %v16563_v36 = vld [vmem:[#allocation5 + $0x1174] ss:$24 sps:$4 sm:$0xff]   ;;  %9777 = vmatpush1.bf16.msra.mxu1 %v16555_v50 }
 0x24b   : > { %23160 = vst [vmem:[#allocation99_spill] sm:$0xff] %v20464_v60  ;;  %18199 = verf.f32 %v1308_v58  ;;  %v995_v10 = vmul.f32 0.5, %v23162_v43  ;;  %9731 = vmatprep.mubr.bf16.mxu1 %v20464_v60  ;;  %v2148_v29 = vmul.f32 %v1860_v48, %v996_v47  ;;  %v1847_v24 = vadd.f32 1.0, %v18190_v39  ;;  %10333 = vmatpush1.bf16.msra.mxu0 %v16552_v5  ;;  %v20500_v5 = vld [vmem:[%s18729_s8 + $0x58] sm:$0xff] }
 0x24c   : > { %v971_v53 = vmul.f32 0.5, %v23161_v41  ;;  %18201 = verf.f32 %v1332_v11  ;;  %v23163_v49 = vunpack.c.l.bf16 %v20417_v30  ;;  %v23164_v35 = vunpack.c.l.bf16 %v20420_v62  ;;  %10334 = vmatprep.subr.bf16.mxu0 %v16560_v44  ;;  %9778 = vmatprep.subr.bf16.mxu1 %v16563_v36  ;;  %v16575_v36 = vld [vmem:[#allocation5 + $0x11d4] ss:$24 sps:$4 sm:$0xff]  }
 0x24d   : > { %v2111_v37 = vmul.f32 %v1823_v16, %v959_v40  ;;  %v23165_v11 = vunpack.c.h.bf16 %v20417_v30  ;;  %v23166_v47 = vunpack.c.l.bf16 %v20423_v27  ;;  %v20483_v39 = vpack.c.bf16 %v2148_v29, %v2124_v61 }
 0x24e   : > { %v1295_v58 = vmul.f32 0.70710677, %v23163_v49  ;;  %v1319_v55 = vmul.f32 0.70710677, %v23164_v35  ;;  %v2135_v43 = vmul.f32 %v1847_v24, %v983_v54  ;;  %v16558_v49 = vld [vmem:[#allocation5 + $0x2340] ss:$24 sps:$4 sm:$0xff]   ;;  %v22695_v40 = vunpack.c.l.bf16 %v20471_v59  ;;  %9779 = vmatpush1.bf16.msra.mxu1 %v16561_v56 }
 0x24f   : > { %v1008_v38 = vmul.f32 0.5, %v23165_v11  ;;  %v1307_v48 = vmul.f32 0.70710677, %v23166_v47  ;;  %v18192_v41 = vpop.eup %18191  ;;  %23167 = vst [vmem:[#allocation100_spill] sm:$0xff] %v20483_v39  ;;  %v20486_v35 = vld [vmem:[%s18729_s8 + $0x88] sm:$0xff]  ;;  %v23168_v11 = vunpack.c.h.bf16 %v20420_v62  ;;  %v23169_v47 = vunpack.c.l.bf16 %v20428_v22  ;;  %10289 = vmatprep.mubr.bf16.mxu0 %v20483_v39  ;;  %10335 = vmatpush1.bf16.msra.mxu0 %v16558_v49 }
 0x250   : > { %18203 = verf.f32 %v1295_v58  ;;  %v18194_v16 = vpop.eup %18193  ;;  %v1835_v17 = vadd.f32 1.0, %v18192_v41  ;;  %v20494_v54 = vpack.c.bf16 %v2135_v43, %v2111_v37  ;;  %v16569_v24 = vld [vmem:[#allocation5 + $0x11a4] ss:$24 sps:$4 sm:$0xff]   ;;  %v16567_v41 = vld [vmem:[#allocation5 + $0x11a0] ss:$24 sps:$4 sm:$0xff]   ;;  %v23173_v58 = vunpack.c.l.bf16 %v20417_v30  ;;  %10336 = vmatprep.subr.bf16.mxu0 %v16566_v18 }
 0x251   : > { %v1032_v32 = vmul.f32 0.5, %v23168_v11  ;;  %18205 = verf.f32 %v1319_v55  ;;  %v1331_v61 = vmul.f32 0.70710677, %v23169_v47  ;;  %v1859_v29 = vadd.f32 1.0, %v18194_v16  ;;  %v18196_v47 = vpop.eup %18195  ;;  %v16564_v43 = vld [vmem:[#allocation5 + $0x2370] ss:$24 sps:$4 sm:$0xff]   ;;  %9780 = vmatprep.subr.bf16.mxu1 %v16569_v24 }
 0x252   : > { %23170 = vst [vmem:[#allocation101_spill] sm:$0xff] %v20494_v54  ;;  %18207 = verf.f32 %v1307_v48  ;;  %v2123_v50 = vmul.f32 %v1835_v17, %v971_v53  ;;  %9732 = vmatmul.mubr.bf16.gmra.mrb[16].mxu1 %v20494_v54  ;;  %v23171_v48 = vunpack.c.h.bf16 %v20423_v27  ;;  %v23172_v53 = vunpack.c.h.bf16 %v20428_v22  ;;  %v18198_v11 = vpop.eup %18197  ;;  %v16570_v24 = vld [vmem:[#allocation5 + $0x23a0] ss:$24 sps:$4 sm:$0xff]  }
 0x253   : > { %18209 = verf.f32 %v1331_v61  ;;  %v2147_v37 = vmul.f32 %v1859_v29, %v995_v10  ;;  %v1057_v17 = vmul.f32 0.70710677, %v22695_v40  ;;  %v20510_v61 = vld [vmem:[%s18729_s8 + $0xb8] sm:$0xff]  ;;  %v1872_v55 = vadd.f32 1.0, %v18196_v47  ;;  %9781 = vmatpush1.bf16.msra.mxu1 %v16567_v41  ;;  %10337 = vmatpush1.bf16.msra.mxu0 %v16564_v43  ;;  %v20537_v41 = vld [vmem:[%s18729_s8 + $0x148] sm:$0xff] }
 0x254   : > { %v1020_v16 = vmul.f32 0.5, %v23171_v48  ;;  %v1044_v44 = vmul.f32 0.5, %v23172_v53  ;;  %v1007_v39 = vmul.f32 0.5, %v23173_v58  ;;  %v23174_v10 = vunpack.c.l.bf16 %v20420_v62  ;;  %9782 = vmatprep.subr.bf16.mxu1 %v16575_v36 }
 0x255   : > { %v23175_v48 = vunpack.c.h.bf16 %v20471_v59  ;;  %v18200_v60 = vpop.eup %18199  ;;  %v20518_v53 = vpack.c.bf16 %v2147_v37, %v2123_v50  ;;  %v1896_v52 = vadd.f32 1.0, %v18198_v11  ;;  %v23177_v40 = vunpack.c.l.bf16 %v20486_v35  ;;  %v16573_v11 = vld [vmem:[#allocation5 + $0x11d0] ss:$24 sps:$4 sm:$0xff]  }
 0x256   : > { %v1031_v29 = vmul.f32 0.5, %v23174_v10  ;;  %v23178_v56 = vunpack.c.h.bf16 %v20486_v35  ;;  %v18202_v30 = vpop.eup %18201  ;;  %v2160_v58 = vmul.f32 %v1872_v55, %v1008_v38  ;;  %v1884_v62 = vadd.f32 1.0, %v18200_v60  ;;  %v16572_v10 = vld [vmem:[#allocation5 + $0x23a4] ss:$24 sps:$4 sm:$0xff]   ;;  %v16578_v38 = vld [vmem:[#allocation5 + $0x23d4] ss:$24 sps:$4 sm:$0xff]  }
 0x257   : > { %v1058_v54 = vmul.f32 0.70710677, %v23175_v48  ;;  %23176 = vst [vmem:[#allocation102_spill] sm:$0xff] %v20518_v53  ;;  %v1081_v20 = vmul.f32 0.70710677, %v23177_v40  ;;  %18211 = verf.f32 %v1057_v17  ;;  %v22699_v48 = vunpack.c.l.bf16 %v20500_v5  ;;  %10290 = vmatmul.mubr.bf16.gmra.mrb[16].mxu0 %v20518_v53  ;;  %v20530_v17 = vld [vmem:[%s18729_s8 + $0xe8] sm:$0xff]  ;;  %10338 = vmatprep.subr.bf16.mxu0 %v16572_v10 }
 0x258   : > { %v1082_v47 = vmul.f32 0.70710677, %v23178_v56  ;;  %v2184_v49 = vmul.f32 %v1896_v52, %v1032_v32  ;;  %v1908_v50 = vadd.f32 1.0, %v18202_v30  ;;  %v22698_v40 = vunpack.c.h.bf16 %v20500_v5  ;;  %v16581_v55 = vld [vmem:[#allocation5 + $0xc] ss:$24 sps:$4 sm:$0xff]   ;;  %9783 = vmatpush1.bf16.msra.mxu1 %v16573_v11  ;;  %10339 = vmatpush1.bf16.msra.mxu0 %v16570_v24 }
 0x259   : > { %18213 = verf.f32 %v1058_v54  ;;  %v2172_v37 = vmul.f32 %v1884_v62, %v1020_v16  ;;  %v23180_v56 = vunpack.c.l.bf16 %v20423_v27  ;;  %v23181_v18 = vunpack.c.l.bf16 %v20428_v22  ;;  %10340 = vmatprep.subr.bf16.mxu0 %v16578_v38  ;;  %10403 = vmatprep.subr.bf16.mxu1 %v16581_v55 }
 0x25a   : > { %18215 = verf.f32 %v1081_v20  ;;  %v18204_v52 = vpop.eup %18203  ;;  %v20532_v32 = vpack.c.bf16 %v2184_v49, %v2160_v58  ;;  %v2196_v54 = vmul.f32 %v1908_v50, %v1044_v44  ;;  %v20540_v20 = vld [vmem:[%s18729_s8 + $0x118] sm:$0xff]  ;;  %v23182_v43 = vunpack.c.l.bf16 %v20471_v59 }
 0x25b   : > { %v1019_v30 = vmul.f32 0.5, %v23180_v56  ;;  %18217 = verf.f32 %v1082_v47  ;;  %v18206_v16 = vpop.eup %18205  ;;  %v1871_v62 = vadd.f32 1.0, %v18204_v52  ;;  %v1043_v60 = vmul.f32 0.5, %v23181_v18 }
 0x25c   : > { %23179 = vst [vmem:[#allocation103_spill] sm:$0xff] %v20532_v32  ;;  %v769_v58 = vmul.f32 0.5, %v23182_v43  ;;  %v23183_v44 = vunpack.c.h.bf16 %v20471_v59  ;;  %v18208_v27 = vpop.eup %18207  ;;  %9741 = vmatprep.mubr.bf16.mxu1 %v20532_v32  ;;  %v20549_v36 = vpack.c.bf16 %v2196_v54, %v2172_v37  ;;  %v1895_v47 = vadd.f32 1.0, %v18206_v16  ;;  %v16576_v16 = vld [vmem:[#allocation5 + $0x23d0] ss:$24 sps:$4 sm:$0xff]  }
 0x25d   : > { %v1069_v50 = vmul.f32 0.70710677, %v22699_v48  ;;  %v1070_v22 = vmul.f32 0.70710677, %v22698_v40  ;;  %v18210_v18 = vpop.eup %18209  ;;  %v2159_v10 = vmul.f32 %v1871_v62, %v1007_v39  ;;  %v1883_v52 = vadd.f32 1.0, %v18208_v27  ;;  %v20563_v62 = vld [vmem:[%s18729_s8 + $0x178] sm:$0xff]  ;;  %10341 = vmatpush1.bf16.msra.mxu0 %v16576_v16 }
 0x25e   : > { %v770_v49 = vmul.f32 0.5, %v23183_v44  ;;  %23184 = vst [vmem:[#allocation104_spill] sm:$0xff] %v20549_v36  ;;  %v23185_v56 = vunpack.c.l.bf16 %v20510_v61  ;;  %v23186_v43 = vunpack.c.h.bf16 %v20510_v61  ;;  %10299 = vmatprep.mubr.bf16.mxu0 %v20549_v36  ;;  %v2183_v37 = vmul.f32 %v1895_v47, %v1031_v29  ;;  %v16584_v39 = vld [vmem:[#allocation5 + $0x14] ss:$24 sps:$4 sm:$0xff]  }
 0x25f   : > { %v1907_v54 = vadd.f32 1.0, %v18210_v18  ;;  %18219 = verf.f32 %v1069_v50  ;;  %v530_v40 = vunpack.c.h.bf16 %v20530_v17  ;;  %v2171_v48 = vmul.f32 %v1883_v52, %v1019_v30  ;;  %11519 = vmatprep.subr.bf16.mxu0 %v16584_v39 }
 0x260   : > { %v1093_v59 = vmul.f32 0.70710677, %v23185_v56  ;;  %v1094_v44 = vmul.f32 0.70710677, %v23186_v43  ;;  %18221 = verf.f32 %v1070_v22  ;;  %v554_v11 = vunpack.c.h.bf16 %v20537_v41 }
 0x261   : > { %v22702_v27 = vunpack.c.h.bf16 %v20540_v20  ;;  %v20566_v56 = vpack.c.bf16 %v2183_v37, %v2159_v10  ;;  %v2195_v29 = vmul.f32 %v1907_v54, %v1043_v60  ;;  %v23188_v24 = vunpack.c.l.bf16 %v20486_v35  ;;  %v18212_v50 = vpop.eup %18211 }
 0x262   : > { %18223 = verf.f32 %v1093_v59  ;;  %v23189_v30 = vunpack.c.h.bf16 %v20486_v35  ;;  %v1106_v55 = vmul.f32 0.70710677, %v530_v40  ;;  %v1130_v22 = vmul.f32 0.70710677, %v554_v11 }
 0x263   : > { %23187 = vst [vmem:[#allocation105_spill] sm:$0xff] %v20566_v56  ;;  %v793_v47 = vmul.f32 0.5, %v23188_v24  ;;  %18225 = verf.f32 %v1094_v44  ;;  %v18214_v18 = vpop.eup %18213  ;;  %9742 = vmatmul.mubr.bf16.gmra.mrb[20].mxu1 %v20566_v56  ;;  %v20573_v52 = vpack.c.bf16 %v2195_v29, %v2171_v48  ;;  %v23191_v10 = vunpack.c.l.bf16 %v20500_v5  ;;  %v20619_v56 = vld [vmem:[%s18729_s8 + $0x238] sm:$0xff] }
 0x264   : > { %v794_v38 = vmul.f32 0.5, %v23189_v30  ;;  %v1633_v43 = vadd.f32 1.0, %v18212_v50  ;;  %v566_v37 = vunpack.c.h.bf16 %v20563_v62  ;;  %v18216_v59 = vpop.eup %18215  ;;  %v1634_v54 = vadd.f32 1.0, %v18214_v18 }
 0x265   : > { %23190 = vst [vmem:[#allocation106_spill] sm:$0xff] %v20573_v52  ;;  %v781_v60 = vmul.f32 0.5, %v23191_v10  ;;  %18227 = verf.f32 %v1106_v55  ;;  %v1118_v35 = vmul.f32 0.70710677, %v22702_v27  ;;  %v22705_v44 = vunpack.c.l.bf16 %v20530_v17  ;;  %v18218_v24 = vpop.eup %18217  ;;  %10300 = vmatmul.mubr.bf16.gmra.mrb[20].mxu0 %v20573_v52 }
 0x266   : > { %v23192_v48 = vunpack.c.h.bf16 %v20500_v5  ;;  %v1657_v29 = vadd.f32 1.0, %v18216_v59  ;;  %v1921_v30 = vmul.f32 %v1633_v43, %v769_v58  ;;  %18229 = verf.f32 %v1130_v22 }
 0x267   : > { %v1658_v50 = vadd.f32 1.0, %v18218_v24  ;;  %v1922_v10 = vmul.f32 %v1634_v54, %v770_v49  ;;  %v1142_v36 = vmul.f32 0.70710677, %v566_v37  ;;  %18231 = verf.f32 %v1118_v35  ;;  %v20598_v24 = vld [vmem:[%s18729_s8 + $0x1a8] sm:$0xff]  ;;  %v20606_v49 = vld [vmem:[%s18729_s8 + $0x1d8] sm:$0xff] }
 0x268   : > { %v782_v16 = vmul.f32 0.5, %v23192_v48  ;;  %v23193_v39 = vunpack.c.l.bf16 %v20510_v61  ;;  %v1945_v18 = vmul.f32 %v1657_v29, %v793_v47  ;;  %v22706_v27 = vunpack.c.l.bf16 %v20537_v41  ;;  %v16579_v48 = vld [vmem:[#allocation5 + $0x8] ss:$24 sps:$4 sm:$0xff]   ;;  %v16587_v47 = vld [vmem:[#allocation5 + $0x3c] ss:$24 sps:$4 sm:$0xff]  }
 0x269   : > { %v1105_v52 = vmul.f32 0.70710677, %v22705_v44  ;;  %v1946_v5 = vmul.f32 %v1658_v50, %v794_v38  ;;  %18233 = verf.f32 %v1142_v36  ;;  %v22709_v58 = vunpack.c.l.bf16 %v20540_v20  ;;  %v18220_v22 = vpop.eup %18219  ;;  %v20601_v38 = vld [vmem:[%s18729_s8 + $0x208] sm:$0xff] }
 0x26a   : > { %v805_v55 = vmul.f32 0.5, %v23193_v39  ;;  %v23194_v43 = vunpack.c.h.bf16 %v20510_v61  ;;  %v20593_v54 = vpack.c.bf16 %v1945_v18, %v1921_v30  ;;  %v1129_v35 = vmul.f32 0.70710677, %v22706_v27  ;;  %v18222_v36 = vpop.eup %18221 }
 0x26b   : > { %18235 = verf.f32 %v1105_v52  ;;  %v20603_v29 = vpack.c.bf16 %v1946_v5, %v1922_v10  ;;  %v1645_v50 = vadd.f32 1.0, %v18220_v22  ;;  %v818_v39 = vmul.f32 0.5, %v530_v40 }
 0x26c   : > { %v806_v59 = vmul.f32 0.5, %v23194_v43  ;;  %23195 = vst [vmem:[#allocation107_spill] sm:$0xff] %v20593_v54  ;;  %v842_v44 = vmul.f32 0.5, %v554_v11  ;;  %v18224_v61 = vpop.eup %18223  ;;  %v1646_v30 = vadd.f32 1.0, %v18222_v36  ;;  %18237 = verf.f32 %v1129_v35  ;;  %v16585_v35 = vld [vmem:[#allocation5 + $0x38] ss:$24 sps:$4 sm:$0xff]  }
 0x26d   : > { %23196 = vst [vmem:[#allocation108_spill] sm:$0xff] %v20603_v29  ;;  %v1117_v18 = vmul.f32 0.70710677, %v22709_v58  ;;  %v23197_v52 = vunpack.c.l.bf16 %v20563_v62  ;;  %v18226_v27 = vpop.eup %18225  ;;  %9784 = vmatprep.mubr.bf16.mxu1 %v20603_v29  ;;  %v1669_v10 = vadd.f32 1.0, %v18224_v61  ;;  %v1933_v5 = vmul.f32 %v1645_v50, %v781_v60  ;;  %v16593_v60 = vld [vmem:[#allocation5 + $0x6c] ss:$24 sps:$4 sm:$0xff]  }
 0x26e   : > { %v22718_v40 = vunpack.c.h.bf16 %v20598_v24  ;;  %v1670_v22 = vadd.f32 1.0, %v18226_v27  ;;  %v1934_v53 = vmul.f32 %v1646_v30, %v782_v16  ;;  %9785 = vmatmul.mubr.bf16.vlgmr.msra.gmra.mrb[0].mxu1 %v20593_v54  ;;  %v23198_v36 = vunpack.c.h.bf16 %v20540_v20 }
 0x26f   : > { %v1141_v43 = vmul.f32 0.70710677, %v23197_v52  ;;  %18239 = verf.f32 %v1117_v18  ;;  %v18228_v52 = vpop.eup %18227  ;;  %v1957_v32 = vmul.f32 %v1669_v10, %v805_v55  ;;  %10404 = vmatpush1.bf16.msra.mxu1 %v16579_v48  ;;  %v854_v61 = vmul.f32 0.5, %v566_v37 }
 0x270   : > { %v830_v58 = vmul.f32 0.5, %v23198_v36  ;;  %v18230_v11 = vpop.eup %18229  ;;  %v1958_v27 = vmul.f32 %v1670_v22, %v806_v59  ;;  %10405 = vmatprep.subr.bf16.mxu1 %v16587_v47  ;;  %v1682_v16 = vadd.f32 1.0, %v18228_v52  ;;  %v1154_v30 = vmul.f32 0.70710677, %v22718_v40  ;;  %v16582_v59 = vld [vmem:[#allocation5 + $0x10] ss:$24 sps:$4 sm:$0xff]  }
 0x271   : > { %18241 = verf.f32 %v1141_v43  ;;  %v23199_v36 = vunpack.c.h.bf16 %v20601_v38  ;;  %v18232_v54 = vpop.eup %18231  ;;  %v20626_v29 = vpack.c.bf16 %v1957_v32, %v1933_v5  ;;  %v1706_v55 = vadd.f32 1.0, %v18230_v11  ;;  %v16590_v40 = vld [vmem:[#allocation5 + $0x44] ss:$24 sps:$4 sm:$0xff]  }
 0x272   : > { %v23201_v37 = vunpack.c.l.bf16 %v20530_v17  ;;  %v22721_v43 = vunpack.c.h.bf16 %v20619_v56  ;;  %v20631_v10 = vpack.c.bf16 %v1958_v27, %v1934_v53  ;;  %v1970_v47 = vmul.f32 %v1682_v16, %v818_v39  ;;  %v16588_v53 = vld [vmem:[#allocation5 + $0x40] ss:$24 sps:$4 sm:$0xff]   ;;  %v16596_v16 = vld [vmem:[#allocation5 + $0x74] ss:$24 sps:$4 sm:$0xff]  }
 0x273   : > { %v1178_v18 = vmul.f32 0.70710677, %v23199_v36  ;;  %23200 = vst [vmem:[#allocation109_spill] sm:$0xff] %v20626_v29  ;;  %v1694_v22 = vadd.f32 1.0, %v18232_v54  ;;  %18243 = verf.f32 %v1154_v30  ;;  %v18234_v52 = vpop.eup %18233  ;;  %10406 = vmatpush1.bf16.msra.mxu1 %v16585_v35  ;;  %v1994_v50 = vmul.f32 %v1706_v55, %v842_v44  ;;  %v16591_v39 = vld [vmem:[#allocation5 + $0x68] ss:$24 sps:$4 sm:$0xff]  }
 0x274   : > { %v817_v48 = vmul.f32 0.5, %v23201_v37  ;;  %23202 = vst [vmem:[#allocation110_spill] sm:$0xff] %v20631_v10  ;;  %v23203_v36 = vunpack.c.l.bf16 %v20537_v41  ;;  %v23204_v5 = vunpack.c.h.bf16 %v20606_v49  ;;  %10342 = vmatprep.mubr.bf16.mxu0 %v20631_v10  ;;  %v1718_v27 = vadd.f32 1.0, %v18234_v52  ;;  %10407 = vmatprep.subr.bf16.mxu1 %v16593_v60  ;;  %v16599_v30 = vld [vmem:[#allocation5 + $0x9c] ss:$24 sps:$4 sm:$0xff]  }
 0x275   : > { %18245 = verf.f32 %v1178_v18  ;;  %v18236_v11 = vpop.eup %18235  ;;  %v1982_v37 = vmul.f32 %v1694_v22, %v830_v58  ;;  %v1190_v54 = vmul.f32 0.70710677, %v22721_v43  ;;  %v22720_v44 = vunpack.c.l.bf16 %v20598_v24  ;;  %10343 = vmatmul.mubr.bf16.vlgmr.msra.gmra.mrb[0].mxu0 %v20626_v29 }
 0x276   : > { %v841_v32 = vmul.f32 0.5, %v23203_v36  ;;  %v1166_v17 = vmul.f32 0.70710677, %v23204_v5  ;;  %v20642_v41 = vpack.c.bf16 %v1994_v50, %v1970_v47  ;;  %v1681_v35 = vadd.f32 1.0, %v18236_v11  ;;  %v18238_v55 = vpop.eup %18237  ;;  %11520 = vmatpush1.bf16.msra.mxu0 %v16582_v59  ;;  %v20650_v36 = vld [vmem:[%s18729_s8 + $0x268] sm:$0xff] }
 0x277   : > { %v22719_v18 = vunpack.c.l.bf16 %v20601_v38  ;;  %v2006_v58 = vmul.f32 %v1718_v27, %v854_v61  ;;  %v23205_v60 = vunpack.c.l.bf16 %v20540_v20  ;;  %v1153_v52 = vmul.f32 0.70710677, %v22720_v44  ;;  %11521 = vmatprep.subr.bf16.mxu0 %v16590_v40  ;;  %v16597_v59 = vld [vmem:[#allocation5 + $0x98] ss:$24 sps:$4 sm:$0xff]   ;;  %10408 = vmatpush1.bf16.msra.mxu1 %v16591_v39 }
 0x278   : > { %18247 = verf.f32 %v1166_v17  ;;  %9794 = vmatprep.mubr.bf16.mxu1 %v20642_v41  ;;  %v1705_v50 = vadd.f32 1.0, %v18238_v55  ;;  %v1969_v47 = vmul.f32 %v1681_v35, %v817_v48  ;;  %v23206_v5 = vunpack.c.l.bf16 %v20563_v62  ;;  %v16594_v27 = vld [vmem:[#allocation5 + $0x70] ss:$24 sps:$4 sm:$0xff]   ;;  %10409 = vmatprep.subr.bf16.mxu1 %v16599_v30  ;;  %v16602_v55 = vld [vmem:[#allocation5 + $0xa4] ss:$24 sps:$4 sm:$0xff]  }
 0x279   : > { %v829_v22 = vmul.f32 0.5, %v23205_v60  ;;  %18249 = verf.f32 %v1190_v54  ;;  %v1177_v20 = vmul.f32 0.70710677, %v22719_v18  ;;  %v18240_v61 = vpop.eup %18239  ;;  %v20657_v11 = vpack.c.bf16 %v2006_v58, %v1982_v37  ;;  %v20662_v60 = vld [vmem:[%s18729_s8 + $0x2c8] sm:$0xff] }
 0x27a   : > { %v853_v17 = vmul.f32 0.5, %v23206_v5  ;;  %18251 = verf.f32 %v1153_v52  ;;  %v22723_v54 = vunpack.c.l.bf16 %v20606_v49  ;;  %v22722_v40 = vunpack.c.l.bf16 %v20619_v56  ;;  %v16605_v5 = vld [vmem:[#allocation5 + $0xcc] ss:$24 sps:$4 sm:$0xff]   ;;  %11522 = vmatpush1.bf16.msra.mxu0 %v16588_v53 }
 0x27b   : > { %23207 = vst [vmem:[#allocation111_spill] sm:$0xff] %v20657_v11  ;;  %v18242_v48 = vpop.eup %18241  ;;  %v1993_v35 = vmul.f32 %v1705_v50, %v841_v32  ;;  %v1693_v62 = vadd.f32 1.0, %v18240_v61  ;;  %18253 = verf.f32 %v1177_v20  ;;  %10352 = vmatprep.mubr.bf16.mxu0 %v20657_v11  ;;  %v23208_v58 = vunpack.c.h.bf16 %v20598_v24  ;;  %11523 = vmatprep.subr.bf16.mxu0 %v16596_v16  ;;  %v16603_v20 = vld [vmem:[#allocation5 + $0xc8] ss:$24 sps:$4 sm:$0xff]  }
 0x27c   : > { %v1717_v39 = vadd.f32 1.0, %v18242_v48  ;;  %v23209_v18 = vunpack.c.h.bf16 %v20601_v38  ;;  %v1165_v32 = vmul.f32 0.70710677, %v22723_v54  ;;  %v1189_v53 = vmul.f32 0.70710677, %v22722_v40  ;;  %v20678_v48 = vld [vmem:[%s18729_s8 + $0x298] sm:$0xff]  ;;  %10410 = vmatpush1.bf16.msra.mxu1 %v16597_v59 }
 0x27d   : > { %v866_v52 = vmul.f32 0.5, %v23208_v58  ;;  %v20672_v30 = vpack.c.bf16 %v1993_v35, %v1969_v47  ;;  %v1981_v50 = vmul.f32 %v1693_v62, %v829_v22  ;;  %v22731_v61 = vunpack.c.h.bf16 %v20662_v60  ;;  %v18244_v58 = vpop.eup %18243  ;;  %v20685_v22 = vld [vmem:[%s18729_s8 + $0x2f8] sm:$0xff]  ;;  %10411 = vmatprep.subr.bf16.mxu1 %v16605_v5 }
 0x27e   : > { %v890_v44 = vmul.f32 0.5, %v23209_v18  ;;  %v2005_v43 = vmul.f32 %v1717_v39, %v853_v17  ;;  %v23211_v18 = vunpack.c.h.bf16 %v20606_v49  ;;  %18255 = verf.f32 %v1165_v32  ;;  %v16611_v17 = vld [vmem:[#allocation5 + $0xfc] ss:$24 sps:$4 sm:$0xff]   ;;  %11524 = vmatpush1.bf16.msra.mxu0 %v16594_v27  ;;  %v16600_v32 = vld [vmem:[#allocation5 + $0xa0] ss:$24 sps:$4 sm:$0xff]  }
 0x27f   : > { %23210 = vst [vmem:[#allocation112_spill] sm:$0xff] %v20672_v30  ;;  %v23212_v47 = vunpack.c.h.bf16 %v20650_v36  ;;  %v18246_v16 = vpop.eup %18245  ;;  %9795 = vmatmul.mubr.bf16.gmra.mrb[4].mxu1 %v20672_v30  ;;  %v1730_v62 = vadd.f32 1.0, %v18244_v58  ;;  %v23213_v40 = vunpack.c.h.bf16 %v20619_v56  ;;  %18257 = verf.f32 %v1189_v53  ;;  %11525 = vmatprep.subr.bf16.mxu0 %v16602_v55  ;;  %v16608_v53 = vld [vmem:[#allocation5 + $0xd4] ss:$24 sps:$4 sm:$0xff]   ;;  %v20800_v30 = vld [vmem:[%s18729_s8 + $0x478] sm:$0xff] }
 0x280   : > { %v878_v37 = vmul.f32 0.5, %v23211_v18  ;;  %v1226_v59 = vmul.f32 0.70710677, %v22731_v61  ;;  %v20692_v39 = vpack.c.bf16 %v2005_v43, %v1981_v50  ;;  %v1754_v18 = vadd.f32 1.0, %v18246_v16  ;;  %v16606_v50 = vld [vmem:[#allocation5 + $0xd0] ss:$24 sps:$4 sm:$0xff]   ;;  %10412 = vmatpush1.bf16.msra.mxu1 %v16603_v20 }
 0x281   : > { %v1202_v35 = vmul.f32 0.70710677, %v23212_v47  ;;  %v902_v54 = vmul.f32 0.5, %v23213_v40  ;;  %v22730_v47 = vunpack.c.h.bf16 %v20678_v48  ;;  %v2018_v58 = vmul.f32 %v1730_v62, %v866_v52  ;;  %10413 = vmatprep.subr.bf16.mxu1 %v16611_v17  ;;  %v16614_v62 = vld [vmem:[#allocation5 + $0x104] ss:$24 sps:$4 sm:$0xff]  }
 0x282   : > { %23214 = vst [vmem:[#allocation113_spill] sm:$0xff] %v20692_v39  ;;  %v18248_v11 = vpop.eup %18247  ;;  %v23215_v29 = vunpack.c.l.bf16 %v20598_v24  ;;  %v22734_v5 = vunpack.c.h.bf16 %v20685_v22  ;;  %10353 = vmatmul.mubr.bf16.gmra.mrb[4].mxu0 %v20692_v39  ;;  %v2042_v43 = vmul.f32 %v1754_v18, %v890_v44  ;;  %v23216_v24 = vunpack.c.l.bf16 %v20601_v38  ;;  %v16615_v38 = vld [vmem:[#allocation5 + $0x128] ss:$24 sps:$4 sm:$0xff]  }
 0x283   : > { %18259 = verf.f32 %v1202_v35  ;;  %v18250_v10 = vpop.eup %18249  ;;  %v1742_v27 = vadd.f32 1.0, %v18248_v11  ;;  %v16609_v35 = vld [vmem:[#allocation5 + $0xf8] ss:$24 sps:$4 sm:$0xff]   ;;  %v1214_v16 = vmul.f32 0.70710677, %v22730_v47  ;;  %11526 = vmatpush1.bf16.msra.mxu0 %v16600_v32  ;;  %v23218_v61 = vunpack.c.l.bf16 %v20606_v49  ;;  %v20714_v44 = vld [vmem:[%s18729_s8 + $0x328] sm:$0xff] }
 0x284   : > { %v865_v40 = vmul.f32 0.5, %v23215_v29  ;;  %18261 = verf.f32 %v1226_v59  ;;  %v1766_v52 = vadd.f32 1.0, %v18250_v10  ;;  %v889_v29 = vmul.f32 0.5, %v23216_v24  ;;  %v16617_v11 = vld [vmem:[#allocation5 + $0x12c] ss:$24 sps:$4 sm:$0xff]   ;;  %v18252_v20 = vpop.eup %18251  ;;  %11527 = vmatprep.subr.bf16.mxu0 %v16608_v53  ;;  %10414 = vmatpush1.bf16.msra.mxu1 %v16609_v35 }
 0x285   : > { %v1238_v59 = vmul.f32 0.70710677, %v22734_v5  ;;  %v20707_v18 = vpack.c.bf16 %v2042_v43, %v2018_v58  ;;  %v2030_v47 = vmul.f32 %v1742_v27, %v878_v37  ;;  %v877_v10 = vmul.f32 0.5, %v23218_v61  ;;  %v18254_v24 = vpop.eup %18253  ;;  %v16612_v37 = vld [vmem:[#allocation5 + $0x100] ss:$24 sps:$4 sm:$0xff]   ;;  %10415 = vmatprep.subr.bf16.mxu1 %v16617_v11 }
 0x286   : > { %18263 = verf.f32 %v1214_v16  ;;  %v2054_v17 = vmul.f32 %v1766_v52, %v902_v54  ;;  %v1729_v55 = vadd.f32 1.0, %v18252_v20  ;;  %v23219_v39 = vunpack.c.l.bf16 %v20619_v56  ;;  %v16623_v52 = vld [vmem:[#allocation5 + $0x15c] ss:$24 sps:$4 sm:$0xff]  }
 0x287   : > { %23217 = vst [vmem:[#allocation114_spill] sm:$0xff] %v20707_v18  ;;  %18265 = verf.f32 %v1238_v59  ;;  %9804 = vmatprep.mubr.bf16.mxu1 %v20707_v18  ;;  %v1753_v32 = vadd.f32 1.0, %v18254_v24  ;;  %v23220_v49 = vunpack.c.l.bf16 %v20650_v36  ;;  %v23221_v58 = vunpack.c.l.bf16 %v20662_v60  ;;  %v20728_v59 = vld [vmem:[%s18729_s8 + $0x388] sm:$0xff]  ;;  %11528 = vmatpush1.bf16.msra.mxu0 %v16606_v50 }
 0x288   : > { %v901_v5 = vmul.f32 0.5, %v23219_v39  ;;  %v22735_v43 = vunpack.c.l.bf16 %v20678_v48  ;;  %v20722_v56 = vpack.c.bf16 %v2054_v17, %v2030_v47  ;;  %v2017_v39 = vmul.f32 %v1729_v55, %v865_v40  ;;  %v18256_v35 = vpop.eup %18255  ;;  %11529 = vmatprep.subr.bf16.mxu0 %v16614_v62  ;;  %10416 = vmatpush1.bf16.msra.mxu1 %v16615_v38 }
 0x289   : > { %v1201_v61 = vmul.f32 0.70710677, %v23220_v49  ;;  %v1225_v54 = vmul.f32 0.70710677, %v23221_v58  ;;  %v23223_v53 = vunpack.c.h.bf16 %v20650_v36  ;;  %v22738_v16 = vunpack.c.l.bf16 %v20685_v22  ;;  %v16620_v49 = vld [vmem:[#allocation5 + $0x134] ss:$24 sps:$4 sm:$0xff]   ;;  %v18258_v40 = vpop.eup %18257  ;;  %10417 = vmatprep.subr.bf16.mxu1 %v16623_v52 }
 0x28a   : > { %23222 = vst [vmem:[#allocation115_spill] sm:$0xff] %v20722_v56  ;;  %v2041_v20 = vmul.f32 %v1753_v32, %v889_v29  ;;  %v1213_v24 = vmul.f32 0.70710677, %v22735_v43  ;;  %10362 = vmatprep.mubr.bf16.mxu0 %v20722_v56  ;;  %v1741_v55 = vadd.f32 1.0, %v18256_v35  ;;  %v23224_v11 = vunpack.c.h.bf16 %v20662_v60  ;;  %v16621_v29 = vld [vmem:[#allocation5 + $0x158] ss:$24 sps:$4 sm:$0xff]  }
 0x28b   : > { %v914_v27 = vmul.f32 0.5, %v23223_v53  ;;  %18267 = verf.f32 %v1201_v61  ;;  %v1237_v50 = vmul.f32 0.70710677, %v22738_v16  ;;  %v1765_v58 = vadd.f32 1.0, %v18258_v40  ;;  %v20742_v43 = vld [vmem:[%s18729_s8 + $0x358] sm:$0xff]  ;;  %11530 = vmatpush1.bf16.msra.mxu0 %v16612_v37 }
 0x28c   : > { %v938_v17 = vmul.f32 0.5, %v23224_v11  ;;  %18269 = verf.f32 %v1225_v54  ;;  %v20738_v61 = vpack.c.bf16 %v2041_v20, %v2017_v39  ;;  %v20745_v35 = vld [vmem:[%s18729_s8 + $0x3b8] sm:$0xff]  ;;  %v2029_v47 = vmul.f32 %v1741_v55, %v877_v10  ;;  %v16629_v16 = vld [vmem:[#allocation5 + $0x18c] ss:$24 sps:$4 sm:$0xff]   ;;  %v16618_v40 = vld [vmem:[#allocation5 + $0x130] ss:$24 sps:$4 sm:$0xff]   ;;  %11531 = vmatprep.subr.bf16.mxu0 %v16620_v49  ;;  %10418 = vmatpush1.bf16.msra.mxu1 %v16621_v29 }
 0x28d   : > { %v18260_v32 = vpop.eup %18259  ;;  %18271 = verf.f32 %v1213_v24  ;;  %v23226_v54 = vunpack.c.h.bf16 %v20678_v48  ;;  %v2053_v39 = vmul.f32 %v1765_v58, %v901_v5  ;;  %v23227_v20 = vunpack.c.h.bf16 %v20685_v22  ;;  %v16626_v55 = vld [vmem:[#allocation5 + $0x164] ss:$24 sps:$4 sm:$0xff]   ;;  %v16624_v52 = vld [vmem:[#allocation5 + $0x160] ss:$24 sps:$4 sm:$0xff]   ;;  %10419 = vmatprep.subr.bf16.mxu1 %v16629_v16 }
 0x28e   : > { %23225 = vst [vmem:[#allocation116_spill] sm:$0xff] %v20738_v61  ;;  %v18262_v62 = vpop.eup %18261  ;;  %v1778_v11 = vadd.f32 1.0, %v18260_v32  ;;  %18273 = verf.f32 %v1237_v50  ;;  %9805 = vmatmul.mubr.bf16.gmra.mrb[8].mxu1 %v20738_v61  ;;  %v23228_v53 = vunpack.c.h.bf16 %v20714_v44  ;;  %v23229_v32 = vunpack.c.h.bf16 %v20728_v59 }
 0x28f   : > { %v926_v56 = vmul.f32 0.5, %v23226_v54  ;;  %v1802_v38 = vadd.f32 1.0, %v18262_v62  ;;  %v950_v24 = vmul.f32 0.5, %v23227_v20  ;;  %v20758_v37 = vpack.c.bf16 %v2053_v39, %v2029_v47  ;;  %v16627_v20 = vld [vmem:[#allocation5 + $0x188] ss:$24 sps:$4 sm:$0xff]   ;;  %11532 = vmatpush1.bf16.msra.mxu0 %v16618_v40 }
 0x290   : > { %v1250_v18 = vmul.f32 0.70710677, %v23228_v53  ;;  %v2066_v10 = vmul.f32 %v1778_v11, %v914_v27  ;;  %v1274_v50 = vmul.f32 0.70710677, %v23229_v32  ;;  %v18264_v5 = vpop.eup %18263  ;;  %v22743_v62 = vunpack.c.l.bf16 %v20714_v44  ;;  %v16635_v54 = vld [vmem:[#allocation5 + $0x1bc] ss:$24 sps:$4 sm:$0xff]   ;;  %11533 = vmatprep.subr.bf16.mxu0 %v16626_v55  ;;  %10420 = vmatpush1.bf16.msra.mxu1 %v16627_v20 }
 0x291   : > { %23230 = vst [vmem:[#allocation117_spill] sm:$0xff] %v20758_v37  ;;  %v2090_v58 = vmul.f32 %v1802_v38, %v938_v17  ;;  %v18266_v53 = vpop.eup %18265  ;;  %v1790_v27 = vadd.f32 1.0, %v18264_v5  ;;  %v23231_v49 = vunpack.c.l.bf16 %v20650_v36  ;;  %v23232_v32 = vunpack.c.l.bf16 %v20662_v60  ;;  %10363 = vmatmul.mubr.bf16.gmra.mrb[8].mxu0 %v20758_v37  ;;  %v20781_v40 = vld [vmem:[%s18729_s8 + $0x3e8] sm:$0xff]  ;;  %v20791_v55 = vld [vmem:[%s18729_s8 + $0x418] sm:$0xff]  ;;  %10421 = vmatprep.subr.bf16.mxu1 %v16635_v54 }
 0x292   : > { %18275 = verf.f32 %v1250_v18  ;;  %v1814_v18 = vadd.f32 1.0, %v18266_v53  ;;  %v23234_v17 = vunpack.c.h.bf16 %v20742_v43  ;;  %v23235_v39 = vunpack.c.h.bf16 %v20745_v35 }
 0x293   : > { %v913_v11 = vmul.f32 0.5, %v23231_v49  ;;  %v937_v61 = vmul.f32 0.5, %v23232_v32  ;;  %18277 = verf.f32 %v1274_v50  ;;  %v20766_v47 = vpack.c.bf16 %v2090_v58, %v2066_v10  ;;  %v16632_v10 = vld [vmem:[#allocation5 + $0x194] ss:$24 sps:$4 sm:$0xff]   ;;  %11534 = vmatpush1.bf16.msra.mxu0 %v16624_v52  ;;  %v16636_v52 = vld [vmem:[#allocation5 + $0x1c0] ss:$24 sps:$4 sm:$0xff]  }
 0x294   : > { %v1262_v29 = vmul.f32 0.70710677, %v23234_v17  ;;  %v1286_v36 = vmul.f32 0.70710677, %v23235_v39  ;;  %v2078_v38 = vmul.f32 %v1790_v27, %v926_v56  ;;  %v23236_v60 = vunpack.c.l.bf16 %v20678_v48  ;;  %v16633_v27 = vld [vmem:[#allocation5 + $0x1b8] ss:$24 sps:$4 sm:$0xff]   ;;  %11535 = vmatprep.subr.bf16.mxu0 %v16632_v10 }
 0x295   : > { %23233 = vst [vmem:[#allocation118_spill] sm:$0xff] %v20766_v47  ;;  %v22744_v16 = vunpack.c.l.bf16 %v20728_v59  ;;  %v1249_v50 = vmul.f32 0.70710677, %v22743_v62  ;;  %v18268_v58 = vpop.eup %18267  ;;  %9814 = vmatprep.mubr.bf16.mxu1 %v20766_v47  ;;  %v2102_v53 = vmul.f32 %v1814_v18, %v950_v24  ;;  %v23237_v17 = vunpack.c.l.bf16 %v20685_v22  ;;  %v16630_v62 = vld [vmem:[#allocation5 + $0x190] ss:$24 sps:$4 sm:$0xff]   ;;  %10422 = vmatpush1.bf16.msra.mxu1 %v16633_v27 }
 0x296   : > { %v925_v5 = vmul.f32 0.5, %v23236_v60  ;;  %18279 = verf.f32 %v1262_v29  ;;  %v18270_v49 = vpop.eup %18269  ;;  %v1777_v32 = vadd.f32 1.0, %v18268_v58  ;;  %v20788_v24 = vld [vmem:[%s18729_s8 + $0x448] sm:$0xff]  ;;  %v23239_v58 = vunpack.c.h.bf16 %v20714_v44  ;;  %v16638_v47 = vld [vmem:[#allocation5 + $0x1c4] ss:$24 sps:$4 sm:$0xff]   ;;  %s18420_s8 = scalar_lea.vmem %s22375_s9, 4608 }
 0x297   : > { %v949_v39 = vmul.f32 0.5, %v23237_v17  ;;  %18281 = verf.f32 %v1286_v36  ;;  %v1273_v60 = vmul.f32 0.70710677, %v22744_v16  ;;  %v18272_v18 = vpop.eup %18271  ;;  %v20793_v29 = vpack.c.bf16 %v2102_v53, %v2078_v38  ;;  %v16641_v22 = vld [vmem:[#allocation5 + $0x1ec] ss:$24 sps:$4 sm:$0xff]   ;;  %11536 = vmatpush1.bf16.msra.mxu0 %v16630_v62  ;;  %p18421_p2 = scmp.ne.s32.totalorder %s22375_s9, %s18420_s8 }
 0x298   : > { %v1801_v48 = vadd.f32 1.0, %v18270_v49  ;;  %v962_v56 = vmul.f32 0.5, %v23239_v58  ;;  %18283 = verf.f32 %v1249_v50  ;;  %v18274_v36 = vpop.eup %18273  ;;  %v2065_v17 = vmul.f32 %v1777_v32, %v913_v11  ;;  %10423 = vmatprep.subr.bf16.mxu1 %v16641_v22  ;;  %11537 = vmatprep.subr.bf16.mxu0 %v16638_v47 }
 0x299   : > { %23238 = vst [vmem:[#allocation119_spill] sm:$0xff] %v20793_v29  ;;  %v1789_v16 = vadd.f32 1.0, %v18272_v18  ;;  %v23240_v20 = vunpack.c.h.bf16 %v20728_v59  ;;  %18285 = verf.f32 %v1273_v60  ;;  %10372 = vmatprep.mubr.bf16.mxu0 %v20793_v29  ;;  %v1813_v53 = vadd.f32 1.0, %v18274_v36  ;;  %p18422_p0 = pnand %p18421_p2, %p23512_p3 }
 0x29a   : > { %v2089_v38 = vmul.f32 %v1801_v48, %v937_v61  ;;  %v23241_v49 = vunpack.c.l.bf16 %v20742_v43  ;;  %v23242_v54 = vunpack.c.l.bf16 %v20745_v35  ;;  %v22754_v32 = vunpack.c.h.bf16 %v20781_v40 }
 0x29b   : > { %v986_v37 = vmul.f32 0.5, %v23240_v20  ;;  %v2077_v11 = vmul.f32 %v1789_v16, %v925_v5  ;;  %v22753_v60 = vunpack.c.h.bf16 %v20788_v24  ;;  %v16639_v20 = vld [vmem:[#allocation5 + $0x1e8] ss:$24 sps:$4 sm:$0xff]   ;;  %v2101_v48 = vmul.f32 %v1813_v53, %v949_v39  ;;  %11538 = vmatpush1.bf16.msra.mxu0 %v16636_v52  ;;  %p18423_p10 = pneg %p18422_p0 }
 0x29c   : > { %v1261_v50 = vmul.f32 0.70710677, %v23241_v49  ;;  %v1285_v58 = vmul.f32 0.70710677, %v23242_v54  ;;  %v18276_v29 = vpop.eup %18275  ;;  %v20810_v61 = vpack.c.bf16 %v2089_v38, %v2065_v17  ;;  %v22755_v36 = vunpack.c.h.bf16 %v20800_v30  ;;  %v16647_v49 = vld [vmem:[#allocation5 + $0x21c] ss:$24 sps:$4 sm:$0xff]   ;;  %10424 = vmatpush1.bf16.msra.mxu1 %v16639_v20 }
 0x29d   : > { %v18278_v10 = vpop.eup %18277  ;;  %v1826_v5 = vadd.f32 1.0, %v18276_v29  ;;  %v23243_v16 = vunpack.c.h.bf16 %v20742_v43  ;;  %v16644_v54 = vld [vmem:[#allocation5 + $0x1f4] ss:$24 sps:$4 sm:$0xff]   ;;  %v20816_v18 = vpack.c.bf16 %v2101_v48, %v2077_v11  ;;  %v1298_v39 = vmul.f32 0.70710677, %v22754_v32  ;;  %10425 = vmatprep.subr.bf16.mxu1 %v16647_v49 }
 0x29e   : > { %18287 = verf.f32 %v1261_v50  ;;  %9815 = vmatmul.mubr.bf16.gmra.mrb[12].mxu1 %v20810_v61  ;;  %v1850_v17 = vadd.f32 1.0, %v18278_v10  ;;  %v1322_v22 = vmul.f32 0.70710677, %v22753_v60  ;;  %v23244_v29 = vunpack.c.h.bf16 %v20745_v35  ;;  %v16645_v11 = vld [vmem:[#allocation5 + $0x218] ss:$24 sps:$4 sm:$0xff]   ;;  %11539 = vmatprep.subr.bf16.mxu0 %v16644_v54 }
 0x29f   : > { %v974_v27 = vmul.f32 0.5, %v23243_v16  ;;  %18289 = verf.f32 %v1285_v58  ;;  %v2114_v38 = vmul.f32 %v1826_v5, %v962_v56  ;;  %v23245_v50 = vunpack.c.l.bf16 %v20714_v44  ;;  %10373 = vmatmul.mubr.bf16.gmra.mrb[12].mxu0 %v20816_v18  ;;  %v16653_v5 = vld [vmem:[#allocation5 + $0x24c] ss:$24 sps:$4 sm:$0xff]   ;;  %v16651_v49 = vld [vmem:[#allocation5 + $0x248] ss:$24 sps:$4 sm:$0xff]  }
 0x2a0   : > { %v998_v53 = vmul.f32 0.5, %v23244_v29  ;;  %v23246_v58 = vunpack.c.h.bf16 %v20791_v55  ;;  %v18280_v48 = vpop.eup %18279  ;;  %v2138_v47 = vmul.f32 %v1850_v17, %v986_v37  ;;  %18291 = verf.f32 %v1298_v39  ;;  %v16650_v60 = vld [vmem:[#allocation5 + $0x224] ss:$24 sps:$4 sm:$0xff]   ;;  %10426 = vmatpush1.bf16.msra.mxu1 %v16645_v11 }
 0x2a1   : > { %v961_v62 = vmul.f32 0.5, %v23245_v50  ;;  %v1334_v10 = vmul.f32 0.70710677, %v22755_v36  ;;  %v18282_v29 = vpop.eup %18281  ;;  %v1838_v44 = vadd.f32 1.0, %v18280_v48  ;;  %18293 = verf.f32 %v1322_v22  ;;  %v16659_v22 = vld [vmem:[#allocation5 + $0x27c] ss:$24 sps:$4 sm:$0xff]   ;;  %10427 = vmatprep.subr.bf16.mxu1 %v16653_v5 }
 0x2a2   : > { %v1310_v16 = vmul.f32 0.70710677, %v23246_v58  ;;  %v16642_v58 = vld [vmem:[#allocation5 + $0x1f0] ss:$24 sps:$4 sm:$0xff]   ;;  %v18284_v32 = vpop.eup %18283  ;;  %v20834_v37 = vpack.c.bf16 %v2138_v47, %v2114_v38  ;;  %v1862_v17 = vadd.f32 1.0, %v18282_v29  ;;  %v23247_v39 = vunpack.c.l.bf16 %v20728_v59 }
 0x2a3   : > { %v18286_v56 = vpop.eup %18285  ;;  %v2126_v48 = vmul.f32 %v1838_v44, %v974_v27  ;;  %v1825_v52 = vadd.f32 1.0, %v18284_v32  ;;  %v23248_v38 = vunpack.c.l.bf16 %v20781_v40  ;;  %v23249_v29 = vunpack.c.l.bf16 %v20788_v24  ;;  %11540 = vmatpush1.bf16.msra.mxu0 %v16642_v58  ;;  %v16657_v5 = vld [vmem:[#allocation5 + $0x278] ss:$24 sps:$4 sm:$0xff]  }
 0x2a4   : > { %v985_v36 = vmul.f32 0.5, %v23247_v39  ;;  %18295 = verf.f32 %v1310_v16  ;;  %9824 = vmatprep.mubr.bf16.mxu1 %v20834_v37  ;;  %v2150_v20 = vmul.f32 %v1862_v17, %v998_v53  ;;  %v1849_v50 = vadd.f32 1.0, %v18286_v56  ;;  %11541 = vmatprep.subr.bf16.mxu0 %v16650_v60 }
 0x2a5   : > { %18297 = verf.f32 %v1334_v10  ;;  %v1297_v47 = vmul.f32 0.70710677, %v23248_v38  ;;  %v1321_v59 = vmul.f32 0.70710677, %v23249_v29  ;;  %v2113_v16 = vmul.f32 %v1825_v52, %v961_v62  ;;  %v16648_v10 = vld [vmem:[#allocation5 + $0x220] ss:$24 sps:$4 sm:$0xff]   ;;  %10428 = vmatpush1.bf16.msra.mxu1 %v16651_v49 }
 0x2a6   : > { %v23250_v54 = vunpack.c.l.bf16 %v20742_v43  ;;  %v22756_v32 = vunpack.c.l.bf16 %v20800_v30  ;;  %v23251_v27 = vunpack.c.l.bf16 %v20791_v55  ;;  %v20848_v56 = vpack.c.bf16 %v2150_v20, %v2126_v48  ;;  %v16656_v62 = vld [vmem:[#allocation5 + $0x254] ss:$24 sps:$4 sm:$0xff]   ;;  %10429 = vmatprep.subr.bf16.mxu1 %v16659_v22  ;;  %v16654_v48 = vld [vmem:[#allocation5 + $0x250] ss:$24 sps:$4 sm:$0xff]  }
 0x2a7   : > { %v2137_v44 = vmul.f32 %v1849_v50, %v985_v36  ;;  %v23252_v17 = vunpack.c.l.bf16 %v20745_v35  ;;  %18299 = verf.f32 %v1297_v47  ;;  %v16665_v35 = vld [vmem:[#allocation5 + $0x2ac] ss:$24 sps:$4 sm:$0xff]   ;;  %v23253_v60 = vunpack.c.h.bf16 %v20781_v40  ;;  %11542 = vmatpush1.bf16.msra.mxu0 %v16648_v10 }
 0x2a8   : > { %v973_v39 = vmul.f32 0.5, %v23250_v54  ;;  %v1309_v11 = vmul.f32 0.70710677, %v23251_v27  ;;  %v18288_v53 = vpop.eup %18287  ;;  %18301 = verf.f32 %v1321_v59  ;;  %v1333_v29 = vmul.f32 0.70710677, %v22756_v32  ;;  %10382 = vmatprep.mubr.bf16.mxu0 %v20848_v56  ;;  %11543 = vmatprep.subr.bf16.mxu0 %v16656_v62 }
 0x2a9   : > { %v997_v38 = vmul.f32 0.5, %v23252_v17  ;;  %v18290_v43 = vpop.eup %18289  ;;  %v1837_v52 = vadd.f32 1.0, %v18288_v53  ;;  %v20855_v58 = vpack.c.bf16 %v2137_v44, %v2113_v16  ;;  %v1010_v50 = vmul.f32 0.5, %v23253_v60  ;;  %v16662_v16 = vld [vmem:[#allocation5 + $0x284] ss:$24 sps:$4 sm:$0xff]   ;;  %10430 = vmatpush1.bf16.msra.mxu1 %v16657_v5 }
 0x2aa   : > { %v1861_v20 = vadd.f32 1.0, %v18290_v43  ;;  %18303 = verf.f32 %v1309_v11  ;;  %v18292_v47 = vpop.eup %18291  ;;  %v23254_v49 = vunpack.c.h.bf16 %v20788_v24  ;;  %v23255_v22 = vunpack.c.h.bf16 %v20791_v55  ;;  %v16663_v53 = vld [vmem:[#allocation5 + $0x2a8] ss:$24 sps:$4 sm:$0xff]   ;;  %10431 = vmatprep.subr.bf16.mxu1 %v16665_v35  ;;  %v16668_v5 = vld [vmem:[#allocation5 + $0x2b4] ss:$24 sps:$4 sm:$0xff]  }
 0x2ab   : > { %v2125_v36 = vmul.f32 %v1837_v52, %v973_v39  ;;  %18305 = verf.f32 %v1333_v29  ;;  %9825 = vmatmul.mubr.bf16.gmra.mrb[16].mxu1 %v20855_v58  ;;  %v18294_v27 = vpop.eup %18293  ;;  %v1874_v11 = vadd.f32 1.0, %v18292_v47  ;;  %v23256_v43 = vunpack.c.h.bf16 %v20800_v30  ;;  %11544 = vmatpush1.bf16.msra.mxu0 %v16654_v48  ;;  %v16660_v60 = vld [vmem:[#allocation5 + $0x280] ss:$24 sps:$4 sm:$0xff]  }
 0x2ac   : > { %v2149_v59 = vmul.f32 %v1861_v20, %v997_v38  ;;  %v1034_v54 = vmul.f32 0.5, %v23254_v49  ;;  %v1022_v39 = vmul.f32 0.5, %v23255_v22  ;;  %v1898_v10 = vadd.f32 1.0, %v18294_v27  ;;  %v16671_v38 = vld [vmem:[#allocation5 + $0x2dc] ss:$24 sps:$4 sm:$0xff]   ;;  %11545 = vmatprep.subr.bf16.mxu0 %v16662_v16 }
 0x2ad   : > { %v1046_v52 = vmul.f32 0.5, %v23256_v43  ;;  %v2162_v20 = vmul.f32 %v1874_v11, %v1010_v50  ;;  %10432 = vmatpush1.bf16.msra.mxu1 %v16663_v53  ;;  %v16669_v27 = vld [vmem:[#allocation5 + $0x2d8] ss:$24 sps:$4 sm:$0xff]   ;;  %v23258_v50 = vunpack.c.l.bf16 %v20788_v24  ;;  %v16677_v11 = vld [vmem:[#allocation5 + $0x30c] ss:$24 sps:$4 sm:$0xff]   ;;  %v23259_v16 = vunpack.c.l.bf16 %v20791_v55 }
 0x2ae   : > { %v18296_v44 = vpop.eup %18295  ;;  %v20864_v17 = vpack.c.bf16 %v2149_v59, %v2125_v36  ;;  %v2186_v47 = vmul.f32 %v1898_v10, %v1034_v54  ;;  %v23257_v36 = vunpack.c.l.bf16 %v20781_v40  ;;  %10433 = vmatprep.subr.bf16.mxu1 %v16671_v38  ;;  %v16674_v24 = vld [vmem:[#allocation5 + $0x2e4] ss:$24 sps:$4 sm:$0xff]  }
 0x2af   : > { %v18298_v29 = vpop.eup %18297  ;;  %v1886_v62 = vadd.f32 1.0, %v18296_v44  ;;  %v1033_v48 = vmul.f32 0.5, %v23258_v50  ;;  %v1021_v10 = vmul.f32 0.5, %v23259_v16  ;;  %11546 = vmatpush1.bf16.msra.mxu0 %v16660_v60  ;;  %v16686_v50 = vld [vmem:[#allocation5 + $0x344] ss:$24 sps:$4 sm:$0xff]  }
 0x2b0   : > { %10383 = vmatmul.mubr.bf16.gmra.mrb[16].mxu0 %v20864_v17  ;;  %v1910_v49 = vadd.f32 1.0, %v18298_v29  ;;  %v1009_v59 = vmul.f32 0.5, %v23257_v36  ;;  %v20871_v35 = vpack.c.bf16 %v2186_v47, %v2162_v20  ;;  %11547 = vmatprep.subr.bf16.mxu0 %v16668_v5  ;;  %v16672_v36 = vld [vmem:[#allocation5 + $0x2e0] ss:$24 sps:$4 sm:$0xff]   ;;  %v16695_v16 = vld [vmem:[#allocation5 + $0x39c] ss:$24 sps:$4 sm:$0xff]  }
 0x2b1   : > { %v2174_v22 = vmul.f32 %v1886_v62, %v1022_v39  ;;  %v18300_v43 = vpop.eup %18299  ;;  %v16666_v39 = vld [vmem:[#allocation5 + $0x2b0] ss:$24 sps:$4 sm:$0xff]   ;;  %10434 = vmatpush1.bf16.msra.mxu1 %v16669_v27  ;;  %v16683_v27 = vld [vmem:[#allocation5 + $0x33c] ss:$24 sps:$4 sm:$0xff]  }
 0x2b2   : > { %v2198_v32 = vmul.f32 %v1910_v49, %v1046_v52  ;;  %v18302_v44 = vpop.eup %18301  ;;  %v1873_v54 = vadd.f32 1.0, %v18300_v43  ;;  %9834 = vmatprep.mubr.bf16.mxu1 %v20871_v35  ;;  %v23260_v52 = vunpack.c.l.bf16 %v20800_v30  ;;  %10496 = vmatprep.subr.bf16.mxu1 %v16677_v11  ;;  %v16680_v30 = vld [vmem:[#allocation5 + $0x314] ss:$24 sps:$4 sm:$0xff]   ;;  %v16678_v43 = vld [vmem:[#allocation5 + $0x310] ss:$24 sps:$4 sm:$0xff]  }
 0x2b3   : > { %v1897_v29 = vadd.f32 1.0, %v18302_v44  ;;  %11548 = vmatpush1.bf16.msra.mxu0 %v16666_v39  ;;  %v16689_v11 = vld [vmem:[#allocation5 + $0x36c] ss:$24 sps:$4 sm:$0xff]   ;;  %v16684_v44 = vld [vmem:[#allocation5 + $0x340] ss:$24 sps:$4 sm:$0xff]  }
 0x2b4   : > { %v18304_v40 = vpop.eup %18303  ;;  %v20878_v53 = vpack.c.bf16 %v2198_v32, %v2174_v22  ;;  %v1045_v20 = vmul.f32 0.5, %v23260_v52  ;;  %v2161_v62 = vmul.f32 %v1873_v54, %v1009_v59  ;;  %11549 = vmatprep.subr.bf16.mxu0 %v16674_v24  ;;  %v16675_v59 = vld [vmem:[#allocation5 + $0x308] ss:$24 sps:$4 sm:$0xff]   ;;  %v16698_v39 = vld [vmem:[#allocation5 + $0x3a4] ss:$24 sps:$4 sm:$0xff]  }
 0x2b5   : > { %v18306_v38 = vpop.eup %18305  ;;  %v1885_v47 = vadd.f32 1.0, %v18304_v40  ;;  %v2185_v55 = vmul.f32 %v1897_v29, %v1033_v48  ;;  %v16681_v48 = vld [vmem:[#allocation5 + $0x338] ss:$24 sps:$4 sm:$0xff]   ;;  %v16687_v54 = vld [vmem:[#allocation5 + $0x368] ss:$24 sps:$4 sm:$0xff]  }
 0x2b6   : > { %10392 = vmatprep.mubr.bf16.mxu0 %v20878_v53  ;;  %v1909_v60 = vadd.f32 1.0, %v18306_v38  ;;  %v16701_v40 = vld [vmem:[#allocation5 + $0x3cc] ss:$24 sps:$4 sm:$0xff]   ;;  %v16699_v52 = vld [vmem:[#allocation5 + $0x3c8] ss:$24 sps:$4 sm:$0xff]  }
 0x2b7   : > { %v2173_v49 = vmul.f32 %v1885_v47, %v1021_v10  ;;  %v20883_v32 = vpack.c.bf16 %v2185_v55, %v2161_v62  ;;  %11550 = vmatpush1.bf16.msra.mxu0 %v16672_v36  ;;  %v16690_v10 = vld [vmem:[#allocation5 + $0x370] ss:$24 sps:$4 sm:$0xff]   ;;  %v16704_v29 = vld [vmem:[#allocation5 + $0x3d4] ss:$24 sps:$4 sm:$0xff]   ;;  %v16710_v38 = vld [vmem:[#allocation5 + $0x404] ss:$24 sps:$4 sm:$0xff]  }
 0x2b8   : > { %v2197_v22 = vmul.f32 %v1909_v60, %v1045_v20  ;;  %11612 = vmatprep.subr.bf16.mxu0 %v16680_v30  ;;  %v16707_v20 = vld [vmem:[#allocation5 + $0x3fc] ss:$24 sps:$4 sm:$0xff]   ;;  %v16702_v24 = vld [vmem:[#allocation5 + $0x3d0] ss:$24 sps:$4 sm:$0xff]  }
 0x2b9   : > { %9835 = vmatmul.mubr.bf16.gmra.mrb[20].mxu1 %v20883_v32  ;;  %v16705_v62 = vld [vmem:[#allocation5 + $0x3f8] ss:$24 sps:$4 sm:$0xff]   ;;  %v16716_v47 = vld [vmem:[#allocation5 + $0x434] ss:$24 sps:$4 sm:$0xff]   ;;  %v16711_v55 = vld [vmem:[#allocation5 + $0x428] ss:$24 sps:$4 sm:$0xff]  }
 0x2ba   : > { %v20886_v5 = vpack.c.bf16 %v2197_v22, %v2173_v49  ;;  %10435 = vmatprep.mubr.bf16.mxu1 %v18781_v46  ;;  %v16719_v60 = vld [vmem:[#allocation5 + $0x45c] ss:$24 sps:$4 sm:$0xff]   ;;  %v16714_v49 = vld [vmem:[#allocation5 + $0x430] ss:$24 sps:$4 sm:$0xff]  }
 0x2bb   : > { %v16722_v36 = vld [vmem:[#allocation5 + $0x464] ss:$24 sps:$4 sm:$0xff]   ;;  %v16717_v22 = vld [vmem:[#allocation5 + $0x458] ss:$24 sps:$4 sm:$0xff]   ;;  %v16728_v30 = vld [vmem:[#allocation5 + $0x494] ss:$24 sps:$4 sm:$0xff]  }
 0x2bc   : > { %10393 = vmatmul.mubr.bf16.gmra.mrb[20].mxu0 %v20886_v5 }
 0x2bd   : > { %11551 = vmatprep.mubr.bf16.mxu0 %v18781_v46  ;;  %v16692_v46 = vld [vmem:[#allocation5 + $0x374] ss:$24 sps:$4 sm:$0xff]  }
 0x2c1   : > { %10436 = vmatmul.mubr.bf16.vlgmr.msra.gmra.mrb[24].mxu1 %v18797_v2 }
 0x2c2   : > { %10497 = vmatpush1.bf16.msra.mxu1 %v16675_v59  ;;  %10445 = vmatprep.mubr.bf16.mxu1 %v18867_v23  ;;  %v16723_v59 = vld [vmem:[#allocation5 + $0x488] ss:$24 sps:$4 sm:$0xff]  }
 0x2c3   : > { %10498 = vmatprep.subr.bf16.mxu1 %v16683_v27  ;;  %v16731_v27 = vld [vmem:[#allocation5 + $0x4bc] ss:$24 sps:$4 sm:$0xff]  }
 0x2c4   : > { %11552 = vmatmul.mubr.bf16.vlgmr.msra.gmra.mrb[24].mxu0 %v18797_v2  ;;  %v16693_v2 = vld [vmem:[#allocation5 + $0x398] ss:$24 sps:$4 sm:$0xff]  }
 0x2c5   : > { %11613 = vmatpush1.bf16.msra.mxu0 %v16678_v43  ;;  %11561 = vmatprep.mubr.bf16.mxu0 %v18867_v23  ;;  %v16696_v23 = vld [vmem:[#allocation5 + $0x3a0] ss:$24 sps:$4 sm:$0xff]   ;;  %v16726_v43 = vld [vmem:[#allocation5 + $0x490] ss:$24 sps:$4 sm:$0xff]  }
 0x2c6   : > { %11614 = vmatprep.subr.bf16.mxu0 %v16686_v50  ;;  %10499 = vmatpush1.bf16.msra.mxu1 %v16681_v48  ;;  %v16734_v50 = vld [vmem:[#allocation5 + $0x4c4] ss:$24 sps:$4 sm:$0xff]   ;;  %v16729_v48 = vld [vmem:[#allocation5 + $0x4b8] ss:$24 sps:$4 sm:$0xff]  }
 0x2c7   : > { %10500 = vmatprep.subr.bf16.mxu1 %v16689_v11  ;;  %v16737_v11 = vld [vmem:[#allocation5 + $0x4ec] ss:$24 sps:$4 sm:$0xff]  }
 0x2c9   : > { %11615 = vmatpush1.bf16.msra.mxu0 %v16684_v44  ;;  %10446 = vmatmul.mubr.bf16.gmra.mrb[28].mxu1 %v18891_v57  ;;  %v16740_v44 = vld [vmem:[#allocation5 + $0x4f4] ss:$24 sps:$4 sm:$0xff]  }
 0x2ca   : > { %11616 = vmatprep.subr.bf16.mxu0 %v16692_v46  ;;  %10501 = vmatpush1.bf16.msra.mxu1 %v16687_v54  ;;  %v16743_v46 = vld [vmem:[#allocation5 + $0x51c] ss:$24 sps:$4 sm:$0xff]   ;;  %v16738_v54 = vld [vmem:[#allocation5 + $0x4f0] ss:$24 sps:$4 sm:$0xff]  }
 0x2cb   : > { %10455 = vmatprep.mubr.bf16.mxu1 %v18911_v1  ;;  %10502 = vmatprep.subr.bf16.mxu1 %v16695_v16  ;;  %v16746_v16 = vld [vmem:[#allocation5 + $0x524] ss:$24 sps:$4 sm:$0xff]  }
 0x2cc   : > { %11562 = vmatmul.mubr.bf16.gmra.mrb[28].mxu0 %v18891_v57  ;;  %v16713_v57 = vld [vmem:[#allocation5 + $0x42c] ss:$24 sps:$4 sm:$0xff]  }
 0x2cd   : > { %11617 = vmatpush1.bf16.msra.mxu0 %v16690_v10  ;;  %11571 = vmatprep.mubr.bf16.mxu0 %v18911_v1  ;;  %v16708_v1 = vld [vmem:[#allocation5 + $0x400] ss:$24 sps:$4 sm:$0xff]  }
 0x2ce   : > { %11618 = vmatprep.subr.bf16.mxu0 %v16698_v39  ;;  %10503 = vmatpush1.bf16.msra.mxu1 %v16693_v2  ;;  %v16741_v10 = vld [vmem:[#allocation5 + $0x518] ss:$24 sps:$4 sm:$0xff]   ;;  %v16749_v39 = vld [vmem:[#allocation5 + $0x54c] ss:$24 sps:$4 sm:$0xff]  }
 0x2cf   : > { %10504 = vmatprep.subr.bf16.mxu1 %v16701_v40  ;;  %v16744_v2 = vld [vmem:[#allocation5 + $0x520] ss:$24 sps:$4 sm:$0xff]   ;;  %v16755_v40 = vld [vmem:[#allocation5 + $0x57c] ss:$24 sps:$4 sm:$0xff]  }
 0x2d1   : > { %11619 = vmatpush1.bf16.msra.mxu0 %v16696_v23  ;;  %10456 = vmatmul.mubr.bf16.gmra.mrb[32].mxu1 %v18929_v6  ;;  %v16750_v23 = vld [vmem:[#allocation5 + $0x550] ss:$24 sps:$4 sm:$0xff]  }
 0x2d2   : > { %11620 = vmatprep.subr.bf16.mxu0 %v16704_v29  ;;  %10505 = vmatpush1.bf16.msra.mxu1 %v16699_v52  ;;  %v16753_v29 = vld [vmem:[#allocation5 + $0x578] ss:$24 sps:$4 sm:$0xff]   ;;  %v16758_v52 = vld [vmem:[#allocation5 + $0x584] ss:$24 sps:$4 sm:$0xff]  }
 0x2d3   : > { %10465 = vmatprep.mubr.bf16.mxu1 %v18962_v28  ;;  %10506 = vmatprep.subr.bf16.mxu1 %v16707_v20  ;;  %v16761_v20 = vld [vmem:[#allocation5 + $0x5ac] ss:$24 sps:$4 sm:$0xff]  }
 0x2d4   : > { %11572 = vmatmul.mubr.bf16.gmra.mrb[32].mxu0 %v18929_v6  ;;  %v16725_v6 = vld [vmem:[#allocation5 + $0x48c] ss:$24 sps:$4 sm:$0xff]  }
 0x2d5   : > { %11621 = vmatpush1.bf16.msra.mxu0 %v16702_v24  ;;  %11581 = vmatprep.mubr.bf16.mxu0 %v18962_v28  ;;  %v16720_v28 = vld [vmem:[#allocation5 + $0x460] ss:$24 sps:$4 sm:$0xff]  }
 0x2d6   : > { %11622 = vmatprep.subr.bf16.mxu0 %v16710_v38  ;;  %10507 = vmatpush1.bf16.msra.mxu1 %v16705_v62  ;;  %v16756_v24 = vld [vmem:[#allocation5 + $0x580] ss:$24 sps:$4 sm:$0xff]   ;;  %v16764_v38 = vld [vmem:[#allocation5 + $0x5b4] ss:$24 sps:$4 sm:$0xff]  }
 0x2d7   : > { %10508 = vmatprep.subr.bf16.mxu1 %v16713_v57  ;;  %v16767_v62 = vld [vmem:[#allocation5 + $0x5dc] ss:$24 sps:$4 sm:$0xff]  }
 0x2d8   : > { %v16770_v57 = vld [vmem:[#allocation5 + $0x5e4] ss:$24 sps:$4 sm:$0xff]  }
 0x2d9   : > { %11623 = vmatpush1.bf16.msra.mxu0 %v16708_v1  ;;  %10466 = vmatmul.mubr.bf16.gmra.mrb[36].mxu1 %v19003_v31  ;;  %v16765_v1 = vld [vmem:[#allocation5 + $0x5d8] ss:$24 sps:$4 sm:$0xff]  }
 0x2da   : > { %11624 = vmatprep.subr.bf16.mxu0 %v16716_v47  ;;  %10509 = vmatpush1.bf16.msra.mxu1 %v16711_v55  ;;  %v16773_v47 = vld [vmem:[#allocation5 + $0x60c] ss:$24 sps:$4 sm:$0xff]   ;;  %v16768_v55 = vld [vmem:[#allocation5 + $0x5e0] ss:$24 sps:$4 sm:$0xff]  }
 0x2db   : > { %10475 = vmatprep.mubr.bf16.mxu1 %v19024_v12  ;;  %10510 = vmatprep.subr.bf16.mxu1 %v16719_v60  ;;  %v16771_v60 = vld [vmem:[#allocation5 + $0x608] ss:$24 sps:$4 sm:$0xff]  }
 0x2dc   : > { %11582 = vmatmul.mubr.bf16.gmra.mrb[36].mxu0 %v19003_v31  ;;  %v16732_v31 = vld [vmem:[#allocation5 + $0x4c0] ss:$24 sps:$4 sm:$0xff]  }
 0x2dd   : > { %11625 = vmatpush1.bf16.msra.mxu0 %v16714_v49  ;;  %11591 = vmatprep.mubr.bf16.mxu0 %v19024_v12  ;;  %v16735_v12 = vld [vmem:[#allocation5 + $0x4e8] ss:$24 sps:$4 sm:$0xff]   ;;  %v16776_v49 = vld [vmem:[#allocation5 + $0x614] ss:$24 sps:$4 sm:$0xff]  }
 0x2de   : > { %11626 = vmatprep.subr.bf16.mxu0 %v16722_v36  ;;  %10511 = vmatpush1.bf16.msra.mxu1 %v16717_v22  ;;  %v16779_v36 = vld [vmem:[#allocation5 + $0x63c] ss:$24 sps:$4 sm:$0xff]   ;;  %v16774_v22 = vld [vmem:[#allocation5 + $0x610] ss:$24 sps:$4 sm:$0xff]  }
 0x2df   : > { %10512 = vmatprep.subr.bf16.mxu1 %v16725_v6  ;;  %v16782_v6 = vld [vmem:[#allocation5 + $0x644] ss:$24 sps:$4 sm:$0xff]  }
 0x2e1   : > { %11627 = vmatpush1.bf16.msra.mxu0 %v16720_v28  ;;  %10476 = vmatmul.mubr.bf16.gmra.mrb[40].mxu1 %v19046_v26  ;;  %v16777_v28 = vld [vmem:[#allocation5 + $0x638] ss:$24 sps:$4 sm:$0xff]  }
 0x2e2   : > { %11628 = vmatprep.subr.bf16.mxu0 %v16728_v30  ;;  %10513 = vmatpush1.bf16.msra.mxu1 %v16723_v59  ;;  %v16780_v30 = vld [vmem:[#allocation5 + $0x640] ss:$24 sps:$4 sm:$0xff]   ;;  %v16785_v59 = vld [vmem:[#allocation5 + $0x66c] ss:$24 sps:$4 sm:$0xff]  }
 0x2e3   : > { %10485 = vmatprep.mubr.bf16.mxu1 %v19070_v34  ;;  %10514 = vmatprep.subr.bf16.mxu1 %v16731_v27  ;;  %v16788_v27 = vld [vmem:[#allocation5 + $0x674] ss:$24 sps:$4 sm:$0xff]  }
 0x2e4   : > { %11592 = vmatmul.mubr.bf16.gmra.mrb[40].mxu0 %v19046_v26  ;;  %v16752_v26 = vld [vmem:[#allocation5 + $0x554] ss:$24 sps:$4 sm:$0xff]  }
 0x2e5   : > { %11629 = vmatpush1.bf16.msra.mxu0 %v16726_v43  ;;  %11601 = vmatprep.mubr.bf16.mxu0 %v19070_v34  ;;  %v16747_v34 = vld [vmem:[#allocation5 + $0x548] ss:$24 sps:$4 sm:$0xff]  }
 0x2e6   : > { %11630 = vmatprep.subr.bf16.mxu0 %v16734_v50  ;;  %10515 = vmatpush1.bf16.msra.mxu1 %v16729_v48  ;;  %v16783_v43 = vld [vmem:[#allocation5 + $0x668] ss:$24 sps:$4 sm:$0xff]   ;;  %v16791_v50 = vld [vmem:[#allocation5 + $0x69c] ss:$24 sps:$4 sm:$0xff]  }
 0x2e7   : > { %10516 = vmatprep.subr.bf16.mxu1 %v16737_v11  ;;  %v16786_v48 = vld [vmem:[#allocation5 + $0x670] ss:$24 sps:$4 sm:$0xff]   ;;  %v16794_v11 = vld [vmem:[#allocation5 + $0x6a4] ss:$24 sps:$4 sm:$0xff]  }
 0x2e9   : > { %11631 = vmatpush1.bf16.msra.mxu0 %v16732_v31  ;;  %10486 = vmatmul.mubr.bf16.gmra.mrb[44].mxu1 %v19098_v14  ;;  %v16789_v31 = vld [vmem:[#allocation5 + $0x698] ss:$24 sps:$4 sm:$0xff]  }
 0x2ea   : > { %11632 = vmatprep.subr.bf16.mxu0 %v16740_v44  ;;  %10517 = vmatpush1.bf16.msra.mxu1 %v16735_v12  ;;  %v16797_v12 = vld [vmem:[#allocation5 + $0x6cc] ss:$24 sps:$4 sm:$0xff]   ;;  %v16795_v44 = vld [vmem:[#allocation5 + $0x6c8] ss:$24 sps:$4 sm:$0xff]  }
 0x2eb   : > { %10528 = vmatprep.mubr.bf16.mxu1 %v19126_v15  ;;  %10518 = vmatprep.subr.bf16.mxu1 %v16743_v46  ;;  %v16798_v46 = vld [vmem:[#allocation5 + $0x6d0] ss:$24 sps:$4 sm:$0xff]  }
 0x2ec   : > { %11602 = vmatmul.mubr.bf16.gmra.mrb[44].mxu0 %v19098_v14  ;;  %v16759_v14 = vld [vmem:[#allocation5 + $0x5a8] ss:$24 sps:$4 sm:$0xff]  }
 0x2ed   : > { %11633 = vmatpush1.bf16.msra.mxu0 %v16738_v54  ;;  %11644 = vmatprep.mubr.bf16.mxu0 %v19126_v15  ;;  %v16762_v15 = vld [vmem:[#allocation5 + $0x5b0] ss:$24 sps:$4 sm:$0xff]   ;;  %v16803_v54 = vld [vmem:[#allocation5 + $0x6fc] ss:$24 sps:$4 sm:$0xff]  }
 0x2ee   : > { %11634 = vmatprep.subr.bf16.mxu0 %v16746_v16  ;;  %10519 = vmatpush1.bf16.msra.mxu1 %v16741_v10  ;;  %v16806_v16 = vld [vmem:[#allocation5 + $0x704] ss:$24 sps:$4 sm:$0xff]   ;;  %v16801_v10 = vld [vmem:[#allocation5 + $0x6f8] ss:$24 sps:$4 sm:$0xff]  }
 0x2ef   : > { %10520 = vmatprep.subr.bf16.mxu1 %v16749_v39  ;;  %v16804_v39 = vld [vmem:[#allocation5 + $0x700] ss:$24 sps:$4 sm:$0xff]  }
 0x2f1   : > { %11635 = vmatpush1.bf16.msra.mxu0 %v16744_v2  ;;  %v16809_v2 = vld [vmem:[#allocation5 + $0x72c] ss:$24 sps:$4 sm:$0xff]  }
 0x2f2   : > { %11636 = vmatprep.subr.bf16.mxu0 %v16752_v26  ;;  %10521 = vmatpush1.bf16.msra.mxu1 %v16747_v34  ;;  %v16815_v26 = vld [vmem:[#allocation5 + $0x75c] ss:$24 sps:$4 sm:$0xff]   ;;  %v16810_v34 = vld [vmem:[#allocation5 + $0x730] ss:$24 sps:$4 sm:$0xff]  }
 0x2f3   : > { %10522 = vmatprep.subr.bf16.mxu1 %v16755_v40  ;;  %v16818_v40 = vld [vmem:[#allocation5 + $0x764] ss:$24 sps:$4 sm:$0xff]  }
 0x2f5   : > { %11637 = vmatpush1.bf16.msra.mxu0 %v16750_v23  ;;  %v16813_v23 = vld [vmem:[#allocation5 + $0x758] ss:$24 sps:$4 sm:$0xff]  }
 0x2f6   : > { %11638 = vmatprep.subr.bf16.mxu0 %v16758_v52  ;;  %10523 = vmatpush1.bf16.msra.mxu1 %v16753_v29  ;;  %v16824_v29 = vld [vmem:[#allocation5 + $0x794] ss:$24 sps:$4 sm:$0xff]   ;;  %v16819_v52 = vld [vmem:[#allocation5 + $0x788] ss:$24 sps:$4 sm:$0xff]  }
 0x2f7   : > { %10524 = vmatprep.subr.bf16.mxu1 %v16761_v20  ;;  %v16827_v20 = vld [vmem:[#allocation5 + $0x7bc] ss:$24 sps:$4 sm:$0xff]  }
 0x2f9   : > { %11639 = vmatpush1.bf16.msra.mxu0 %v16756_v24  ;;  %v16822_v24 = vld [vmem:[#allocation5 + $0x790] ss:$24 sps:$4 sm:$0xff]  }
 0x2fa   : > { %11640 = vmatprep.subr.bf16.mxu0 %v16764_v38  ;;  %10525 = vmatpush1.bf16.msra.mxu1 %v16759_v14  ;;  %v16825_v38 = vld [vmem:[#allocation5 + $0x7b8] ss:$24 sps:$4 sm:$0xff]   ;;  %v16830_v14 = vld [vmem:[#allocation5 + $0x7c4] ss:$24 sps:$4 sm:$0xff]  }
 0x2fb   : > { %10526 = vmatprep.subr.bf16.mxu1 %v16767_v62  ;;  %v16833_v62 = vld [vmem:[#allocation5 + $0x7ec] ss:$24 sps:$4 sm:$0xff]  }
 0x2fd   : > { %11641 = vmatpush1.bf16.msra.mxu0 %v16762_v15  ;;  %v16836_v15 = vld [vmem:[#allocation5 + $0x7f4] ss:$24 sps:$4 sm:$0xff]  }
 0x2fe   : > { %11642 = vmatprep.subr.bf16.mxu0 %v16770_v57  ;;  %10527 = vmatpush1.bf16.msra.mxu1 %v16765_v1  ;;  %v16839_v57 = vld [vmem:[#allocation5 + $0x81c] ss:$24 sps:$4 sm:$0xff]   ;;  %v16834_v1 = vld [vmem:[#allocation5 + $0x7f0] ss:$24 sps:$4 sm:$0xff]  }
 0x2ff   : > { %10589 = vmatprep.subr.bf16.mxu1 %v16773_v47  ;;  %v16837_v47 = vld [vmem:[#allocation5 + $0x818] ss:$24 sps:$4 sm:$0xff]  }
 0x301   : > { %11643 = vmatpush1.bf16.msra.mxu0 %v16768_v55  ;;  %10529 = vmatmul.mubr.bf16.vlgmr.msra.gmra.mrb[24].mxu1 %v19120_v13  ;;  %v16842_v55 = vld [vmem:[#allocation5 + $0x824] ss:$24 sps:$4 sm:$0xff]  }
 0x302   : > { %11705 = vmatprep.subr.bf16.mxu0 %v16776_v49  ;;  %10590 = vmatpush1.bf16.msra.mxu1 %v16771_v60  ;;  %v16845_v60 = vld [vmem:[#allocation5 + $0x84c] ss:$24 sps:$4 sm:$0xff]  }
 0x303   : > { %10538 = vmatprep.mubr.bf16.mxu1 %v19164_v21  ;;  %10591 = vmatprep.subr.bf16.mxu1 %v16779_v36  ;;  %v16848_v49 = vld [vmem:[#allocation5 + $0x854] ss:$24 sps:$4 sm:$0xff]  }
 0x304   : > { %11645 = vmatmul.mubr.bf16.vlgmr.msra.gmra.mrb[24].mxu0 %v19120_v13  ;;  %v16792_v13 = vld [vmem:[#allocation5 + $0x6a0] ss:$24 sps:$4 sm:$0xff]   ;;  %v16851_v36 = vld [vmem:[#allocation5 + $0x87c] ss:$24 sps:$4 sm:$0xff]  }
 0x305   : > { %11706 = vmatpush1.bf16.msra.mxu0 %v16774_v22  ;;  %11654 = vmatprep.mubr.bf16.mxu0 %v19164_v21  ;;  %v16800_v21 = vld [vmem:[#allocation5 + $0x6d4] ss:$24 sps:$4 sm:$0xff]   ;;  %v16846_v22 = vld [vmem:[#allocation5 + $0x850] ss:$24 sps:$4 sm:$0xff]  }
 0x306   : > { %11707 = vmatprep.subr.bf16.mxu0 %v16782_v6  ;;  %10592 = vmatpush1.bf16.msra.mxu1 %v16777_v28  ;;  %v16849_v6 = vld [vmem:[#allocation5 + $0x878] ss:$24 sps:$4 sm:$0xff]   ;;  %v16854_v28 = vld [vmem:[#allocation5 + $0x884] ss:$24 sps:$4 sm:$0xff]  }
 0x307   : > { %10593 = vmatprep.subr.bf16.mxu1 %v16785_v59  ;;  %v16855_v59 = vld [vmem:[#allocation5 + $0x8a8] ss:$24 sps:$4 sm:$0xff]  }
 0x309   : > { %11708 = vmatpush1.bf16.msra.mxu0 %v16780_v30  ;;  %10539 = vmatmul.mubr.bf16.gmra.mrb[28].mxu1 %v19193_v25  ;;  %v16857_v30 = vld [vmem:[#allocation5 + $0x8ac] ss:$24 sps:$4 sm:$0xff]  }
 0x30a   : > { %11709 = vmatprep.subr.bf16.mxu0 %v16788_v27  ;;  %10594 = vmatpush1.bf16.msra.mxu1 %v16783_v43  ;;  %v16860_v27 = vld [vmem:[#allocation5 + $0x8b4] ss:$24 sps:$4 sm:$0xff]  }
 0x30b   : > { %10548 = vmatprep.mubr.bf16.mxu1 %v19227_v4  ;;  %10595 = vmatprep.subr.bf16.mxu1 %v16791_v50  ;;  %v16863_v43 = vld [vmem:[#allocation5 + $0x8dc] ss:$24 sps:$4 sm:$0xff]   ;;  %v16861_v50 = vld [vmem:[#allocation5 + $0x8d8] ss:$24 sps:$4 sm:$0xff]  }
 0x30c   : > { %11655 = vmatmul.mubr.bf16.gmra.mrb[28].mxu0 %v19193_v25  ;;  %v16812_v25 = vld [vmem:[#allocation5 + $0x734] ss:$24 sps:$4 sm:$0xff]  }
 0x30d   : > { %11710 = vmatpush1.bf16.msra.mxu0 %v16786_v48  ;;  %11664 = vmatprep.mubr.bf16.mxu0 %v19227_v4  ;;  %v16807_v4 = vld [vmem:[#allocation5 + $0x728] ss:$24 sps:$4 sm:$0xff]   ;;  %v16866_v48 = vld [vmem:[#allocation5 + $0x8e4] ss:$24 sps:$4 sm:$0xff]  }
 0x30e   : > { %11711 = vmatprep.subr.bf16.mxu0 %v16794_v11  ;;  %10596 = vmatpush1.bf16.msra.mxu1 %v16789_v31  ;;  %v16869_v31 = vld [vmem:[#allocation5 + $0x90c] ss:$24 sps:$4 sm:$0xff]   ;;  %v16864_v11 = vld [vmem:[#allocation5 + $0x8e0] ss:$24 sps:$4 sm:$0xff]  }
 0x30f   : > { %10597 = vmatprep.subr.bf16.mxu1 %v16797_v12  ;;  %v16872_v12 = vld [vmem:[#allocation5 + $0x914] ss:$24 sps:$4 sm:$0xff]  }
 0x311   : > { %11712 = vmatpush1.bf16.msra.mxu0 %v16792_v13  ;;  %10549 = vmatmul.mubr.bf16.gmra.mrb[32].mxu1 %v19261_v33  ;;  %v16867_v13 = vld [vmem:[#allocation5 + $0x908] ss:$24 sps:$4 sm:$0xff]  }
 0x312   : > { %11713 = vmatprep.subr.bf16.mxu0 %v16800_v21  ;;  %10598 = vmatpush1.bf16.msra.mxu1 %v16795_v44  ;;  %v3497_v21 = vlaneseq  ;;  %v16875_v44 = vld [vmem:[#allocation5 + $0x93c] ss:$24 sps:$4 sm:$0xff]  }
 0x313   : > { %10558 = vmatprep.mubr.bf16.mxu1 %v19293_v8  ;;  %10599 = vmatprep.subr.bf16.mxu1 %v16803_v54  ;;  %v16873_v54 = vld [vmem:[#allocation5 + $0x938] ss:$24 sps:$4 sm:$0xff]  }
 0x314   : > { %11665 = vmatmul.mubr.bf16.gmra.mrb[32].mxu0 %v19261_v33  ;;  %v16821_v33 = vld [vmem:[#allocation5 + $0x78c] ss:$24 sps:$4 sm:$0xff]  }
 0x315   : > { %11714 = vmatpush1.bf16.msra.mxu0 %v16798_v46  ;;  %11674 = vmatprep.mubr.bf16.mxu0 %v19293_v8  ;;  %v16816_v8 = vld [vmem:[#allocation5 + $0x760] ss:$24 sps:$4 sm:$0xff]   ;;  %v16870_v46 = vld [vmem:[#allocation5 + $0x910] ss:$24 sps:$4 sm:$0xff]  }
 0x316   : > { %11715 = vmatprep.subr.bf16.mxu0 %v16806_v16  ;;  %10600 = vmatpush1.bf16.msra.mxu1 %v16801_v10  ;;  %v16878_v16 = vld [vmem:[#allocation5 + $0x944] ss:$24 sps:$4 sm:$0xff]   ;;  %v20939_v10 = vshrl.u32 %v3497_v21, 7  ;;  %v16908_v21 = vld [vmem:[#allocation5 + $0xa34] ss:$24 sps:$4 sm:$0xff]  }
 0x317   : > { %10601 = vmatprep.subr.bf16.mxu1 %v16809_v2  ;;  %v16876_v2 = vld [vmem:[#allocation5 + $0x940] ss:$24 sps:$4 sm:$0xff]  }
 0x319   : > { %11716 = vmatpush1.bf16.msra.mxu0 %v16804_v39  ;;  %10559 = vmatmul.mubr.bf16.gmra.mrb[36].mxu1 %v19319_v3  ;;  %v16881_v39 = vld [vmem:[#allocation5 + $0x96c] ss:$24 sps:$4 sm:$0xff]  }
 0x31a   : > { %11717 = vmatprep.subr.bf16.mxu0 %v16812_v25  ;;  %10602 = vmatpush1.bf16.msra.mxu1 %v16807_v4  ;;  %v23261_v25 = vld [vmem:[#allocation41_spill] sm:$0xff]  ;;  %v16879_v4 = vld [vmem:[#allocation5 + $0x968] ss:$24 sps:$4 sm:$0xff]  }
 0x31b   : > { %10568 = vmatprep.mubr.bf16.mxu1 %v19350_v19  ;;  %10603 = vmatprep.subr.bf16.mxu1 %v16815_v26  ;;  %v16884_v26 = vld [vmem:[#allocation5 + $0x974] ss:$24 sps:$4 sm:$0xff]  }
 0x31c   : > { %11675 = vmatmul.mubr.bf16.gmra.mrb[36].mxu0 %v19319_v3  ;;  %v16828_v3 = vld [vmem:[#allocation5 + $0x7c0] ss:$24 sps:$4 sm:$0xff]  }
 0x31d   : > { %11718 = vmatpush1.bf16.msra.mxu0 %v16810_v34  ;;  %11684 = vmatprep.mubr.bf16.mxu0 %v19350_v19  ;;  %v16831_v19 = vld [vmem:[#allocation5 + $0x7e8] ss:$24 sps:$4 sm:$0xff]   ;;  %v20945_v34 = vsub.s32 0, %v20939_v10 }
 0x31e   : > { %11719 = vmatprep.subr.bf16.mxu0 %v16818_v40  ;;  %10604 = vmatpush1.bf16.msra.mxu1 %v16813_v23  ;;  %v16887_v40 = vld [vmem:[#allocation5 + $0x99c] ss:$24 sps:$4 sm:$0xff]   ;;  %v3495_v23 = vld [vmem:[%s22423_s2] sm:$0x3f] }
 0x31f   : > { %10605 = vmatprep.subr.bf16.mxu1 %v16821_v33  ;;  %23262 = vst [vmem:[#allocation41_spill] sm:$0xff] %v20945_v34  ;;  %v20952_v33 = vsub.s32 1, %v20939_v10 }
 0x321   : > { %11720 = vmatpush1.bf16.msra.mxu0 %v16816_v8  ;;  %10569 = vmatmul.mubr.bf16.gmra.mrb[40].mxu1 %v19383_v0  ;;  %23263 = vst [vmem:[#allocation120_spill] sm:$0xff] %v20952_v33  ;;  %v16885_v8 = vld [vmem:[#allocation5 + $0x998] ss:$24 sps:$4 sm:$0xff]  }
 0x322   : > { %11721 = vmatprep.subr.bf16.mxu0 %v16824_v29  ;;  %10606 = vmatpush1.bf16.msra.mxu1 %v16819_v52  ;;  %v20955_v29 = vrot.slane %v3495_v23, %v20945_v34 }
 0x323   : > { %10578 = vmatprep.mubr.bf16.mxu1 %v19415_v45  ;;  %10607 = vmatprep.subr.bf16.mxu1 %v16827_v20  ;;  %v16890_v20 = vld [vmem:[#allocation5 + $0x9a4] ss:$24 sps:$4 sm:$0xff]  }
 0x324   : > { %11685 = vmatmul.mubr.bf16.gmra.mrb[40].mxu0 %v19383_v0  ;;  %v16840_v0 = vld [vmem:[#allocation5 + $0x820] ss:$24 sps:$4 sm:$0xff]  }
 0x325   : > { %11722 = vmatpush1.bf16.msra.mxu0 %v16822_v24  ;;  %11694 = vmatprep.mubr.bf16.mxu0 %v19415_v45  ;;  %v16843_v45 = vld [vmem:[#allocation5 + $0x848] ss:$24 sps:$4 sm:$0xff]   ;;  %v16893_v24 = vld [vmem:[#allocation5 + $0x9cc] ss:$24 sps:$4 sm:$0xff]  }
 0x326   : > { %11723 = vmatprep.subr.bf16.mxu0 %v16830_v14  ;;  %10608 = vmatpush1.bf16.msra.mxu1 %v16825_v38  ;;  %v20958_v38 = vrot.slane %v3495_v23, %v20952_v33  ;;  %v23268_v23 = vld [vmem:[#allocation51_spill] sm:$0xff]  ;;  %v12645_v33 = vld [vmem:[%s18742_s19 + $0x50] sm:$0xff] }
 0x327   : > { %10609 = vmatprep.subr.bf16.mxu1 %v16833_v62  ;;  %v23264_v62 = vld [vmem:[#allocation43_spill] sm:$0xff] }
 0x329   : > { %11724 = vmatpush1.bf16.msra.mxu0 %v16828_v3  ;;  %10579 = vmatmul.mubr.bf16.gmra.mrb[44].mxu1 %v19450_v9 }
 0x32a   : > { %11725 = vmatprep.subr.bf16.mxu0 %v16836_v15  ;;  %10610 = vmatpush1.bf16.msra.mxu1 %v16831_v19  ;;  %v23265_v19 = vld [vmem:[#allocation45_spill] sm:$0xff] }
 0x32b   : > { %10621 = vmatprep.mubr.bf16.mxu1 %v19491_v51  ;;  %10611 = vmatprep.subr.bf16.mxu1 %v16839_v57  ;;  %v16888_v57 = vld [vmem:[#allocation5 + $0x9a0] ss:$24 sps:$4 sm:$0xff]  }
 0x32c   : > { %11695 = vmatmul.mubr.bf16.gmra.mrb[44].mxu0 %v19450_v9  ;;  %v16852_v9 = vld [vmem:[#allocation5 + $0x880] ss:$24 sps:$4 sm:$0xff]  }
 0x32d   : > { %11726 = vmatpush1.bf16.msra.mxu0 %v16834_v1  ;;  %11737 = vmatprep.mubr.bf16.mxu0 %v19491_v51  ;;  %v16858_v51 = vld [vmem:[#allocation5 + $0x8b0] ss:$24 sps:$4 sm:$0xff]  }
 0x32e   : > { %11727 = vmatprep.subr.bf16.mxu0 %v16842_v55  ;;  %10612 = vmatpush1.bf16.msra.mxu1 %v16837_v47  ;;  %v16891_v1 = vld [vmem:[#allocation5 + $0x9c8] ss:$24 sps:$4 sm:$0xff]   ;;  %v16896_v47 = vld [vmem:[#allocation5 + $0x9d4] ss:$24 sps:$4 sm:$0xff]  }
 0x32f   : > { %10613 = vmatprep.subr.bf16.mxu1 %v16845_v60 }
 0x331   : > { %11728 = vmatpush1.bf16.msra.mxu0 %v16840_v0  ;;  %v16899_v0 = vld [vmem:[#allocation5 + $0x9fc] ss:$24 sps:$4 sm:$0xff]  }
 0x332   : > { %11729 = vmatprep.subr.bf16.mxu0 %v16848_v49  ;;  %10614 = vmatpush1.bf16.msra.mxu1 %v16843_v45 }
 0x333   : > { %10615 = vmatprep.subr.bf16.mxu1 %v16851_v36 }
 0x335   : > { %11730 = vmatpush1.bf16.msra.mxu0 %v16846_v22  ;;  %v16894_v22 = vld [vmem:[#allocation5 + $0x9d0] ss:$24 sps:$4 sm:$0xff]  }
 0x336   : > { %11731 = vmatprep.subr.bf16.mxu0 %v16854_v28  ;;  %10616 = vmatpush1.bf16.msra.mxu1 %v16849_v6 }
 0x337   : > { %10617 = vmatprep.subr.bf16.mxu1 %v16857_v30  ;;  %v16897_v30 = vld [vmem:[#allocation5 + $0x9f8] ss:$24 sps:$4 sm:$0xff]  }
 0x339   : > { %11732 = vmatpush1.bf16.msra.mxu0 %v16852_v9 }
 0x33a   : > { %11733 = vmatprep.subr.bf16.mxu0 %v16860_v27  ;;  %10618 = vmatpush1.bf16.msra.mxu1 %v16855_v59  ;;  %v16902_v59 = vld [vmem:[#allocation5 + $0xa04] ss:$24 sps:$4 sm:$0xff]  }
 0x33b   : > { %10619 = vmatprep.subr.bf16.mxu1 %v16863_v43  ;;  %v16905_v43 = vld [vmem:[#allocation5 + $0xa2c] ss:$24 sps:$4 sm:$0xff]  }
 0x33d   : > { %11734 = vmatpush1.bf16.msra.mxu0 %v16858_v51  ;;  %v23266_v51 = vld [vmem:[#allocation47_spill] sm:$0xff] }
 0x33e   : > { %11735 = vmatprep.subr.bf16.mxu0 %v16866_v48  ;;  %10620 = vmatpush1.bf16.msra.mxu1 %v16861_v50 }
 0x33f   : > { %10682 = vmatprep.subr.bf16.mxu1 %v16869_v31  ;;  %v23267_v31 = vld [vmem:[#allocation49_spill] sm:$0xff] }
 0x341   : > { %11736 = vmatpush1.bf16.msra.mxu0 %v16864_v11  ;;  %10622 = vmatmul.mubr.bf16.vlgmr.msra.gmra.mrb[24].mxu1 %v19484_v63  ;;  %v9786_v52 = vpop.f32.mrb[0].mxu1 }
 0x342   : > { %11798 = vmatprep.subr.bf16.mxu0 %v16872_v12  ;;  %10683 = vmatpush1.bf16.msra.mxu1 %v16867_v13  ;;  %v9788_v14 = vpop.f32.mrb[1].mxu1  ;;  %v15061_v55 = vadd.f32 %v9786_v52, %v20955_v29  ;;  %v16900_v13 = vld [vmem:[#allocation5 + $0xa00] ss:$24 sps:$4 sm:$0xff]  }
 0x343   : > { %10631 = vmatprep.mubr.bf16.mxu1 %v23261_v25  ;;  %10684 = vmatprep.subr.bf16.mxu1 %v16875_v44  ;;  %v9790_v3 = vpop.f32.mrb[2].mxu1  ;;  %v15063_v60 = vadd.f32 %v9788_v14, %v20958_v38  ;;  %v16903_v12 = vld [vmem:[#allocation5 + $0xa28] ss:$24 sps:$4 sm:$0xff]   ;;  %v16911_v44 = vld [vmem:[#allocation5 + $0xa5c] ss:$24 sps:$4 sm:$0xff]  }
 0x344   : > { %11738 = vmatmul.mubr.bf16.vlgmr.msra.gmra.mrb[24].mxu0 %v19484_v63  ;;  %v16882_v63 = vld [vmem:[#allocation5 + $0x970] ss:$24 sps:$4 sm:$0xff]   ;;  %v9792_v15 = vpop.f32.mrb[3].mxu1  ;;  %v15065_v45 = vadd.f32 %v9790_v3, %v20955_v29 }
 0x345   : > { %11799 = vmatpush1.bf16.msra.mxu0 %v16870_v46  ;;  %11747 = vmatprep.mubr.bf16.mxu0 %v23261_v25  ;;  %v15067_v36 = vadd.f32 %v9792_v15, %v20958_v38 }
 0x346   : > { %11800 = vmatprep.subr.bf16.mxu0 %v16878_v16  ;;  %10685 = vmatpush1.bf16.msra.mxu1 %v16873_v54  ;;  %v16906_v54 = vld [vmem:[#allocation5 + $0xa30] ss:$24 sps:$4 sm:$0xff]  }
 0x347   : > { %10686 = vmatprep.subr.bf16.mxu1 %v16881_v39 }
 0x348   : > { %v10344_v49 = vpop.f32.mrb[0].mxu0 }
 0x349   : > { %11801 = vmatpush1.bf16.msra.mxu0 %v16876_v2  ;;  %10632 = vmatmul.mubr.bf16.gmra.mrb[28].mxu1 %v23264_v62  ;;  %v20968_v6 = vadd.f32 %v15061_v55, %v10344_v49  ;;  %v10346_v28 = vpop.f32.mrb[1].mxu0  ;;  %v16909_v2 = vld [vmem:[#allocation5 + $0xa58] ss:$24 sps:$4 sm:$0xff]   ;;  %v16920_v55 = vld [vmem:[#allocation5 + $0xa94] ss:$24 sps:$4 sm:$0xff]  }
 0x34a   : > { %11802 = vmatprep.subr.bf16.mxu0 %v16884_v26  ;;  %10687 = vmatpush1.bf16.msra.mxu1 %v16879_v4  ;;  %v20970_v9 = vadd.f32 %v15063_v60, %v10346_v28  ;;  %v10348_v27 = vpop.f32.mrb[2].mxu0  ;;  %v16914_v4 = vld [vmem:[#allocation5 + $0xa64] ss:$24 sps:$4 sm:$0xff]   ;;  %v16921_v49 = vld [vmem:[#allocation5 + $0xab8] ss:$24 sps:$4 sm:$0xff]  }
 0x34b   : > { %10641 = vmatprep.mubr.bf16.mxu1 %v23265_v19  ;;  %10688 = vmatprep.subr.bf16.mxu1 %v16887_v40  ;;  %v20973_v50 = vadd.f32 %v15065_v45, %v10348_v27  ;;  %v10350_v48 = vpop.f32.mrb[3].mxu0  ;;  %v16917_v40 = vld [vmem:[#allocation5 + $0xa8c] ss:$24 sps:$4 sm:$0xff]   ;;  %v16923_v60 = vld [vmem:[#allocation5 + $0xabc] ss:$24 sps:$4 sm:$0xff]  }
 0x34c   : > { %11748 = vmatmul.mubr.bf16.gmra.mrb[28].mxu0 %v23264_v62  ;;  %v20976_v11 = vadd.f32 %v15067_v36, %v10350_v48  ;;  %v16918_v45 = vld [vmem:[#allocation5 + $0xa90] ss:$24 sps:$4 sm:$0xff]   ;;  %v16926_v36 = vld [vmem:[#allocation5 + $0xac4] ss:$24 sps:$4 sm:$0xff]   ;;  %v16924_v27 = vld [vmem:[#allocation5 + $0xac0] ss:$24 sps:$4 sm:$0xff]  }
 0x34d   : > { %11803 = vmatpush1.bf16.msra.mxu0 %v16882_v63  ;;  %11757 = vmatprep.mubr.bf16.mxu0 %v23265_v19  ;;  %v16912_v19 = vld [vmem:[#allocation5 + $0xa60] ss:$24 sps:$4 sm:$0xff]  }
 0x34e   : > { %11804 = vmatprep.subr.bf16.mxu0 %v16890_v20  ;;  %10689 = vmatpush1.bf16.msra.mxu1 %v16885_v8  ;;  %v23269_v20 = vld [vmem:[#allocation53_spill] sm:$0xff]  ;;  %v23270_v28 = vld [vmem:[#allocation55_spill] sm:$0xff] }
 0x34f   : > { %10690 = vmatprep.subr.bf16.mxu1 %v16893_v24 }
 0x351   : > { %11805 = vmatpush1.bf16.msra.mxu0 %v16888_v57  ;;  %10642 = vmatmul.mubr.bf16.gmra.mrb[32].mxu1 %v23266_v51  ;;  %v16915_v57 = vld [vmem:[#allocation5 + $0xa88] ss:$24 sps:$4 sm:$0xff]  }
 0x352   : > { %11806 = vmatprep.subr.bf16.mxu0 %v16896_v47  ;;  %10691 = vmatpush1.bf16.msra.mxu1 %v16891_v1  ;;  %v9796_v46 = vpop.f32.mrb[4].mxu1 }
 0x353   : > { %10651 = vmatprep.mubr.bf16.mxu1 %v23267_v31  ;;  %10692 = vmatprep.subr.bf16.mxu1 %v16899_v0  ;;  %v15069_v16 = vadd.f32 %v9796_v46, %v20955_v29  ;;  %v9798_v39 = vpop.f32.mrb[5].mxu1 }
 0x354   : > { %11758 = vmatmul.mubr.bf16.gmra.mrb[32].mxu0 %v23266_v51  ;;  %v15071_v25 = vadd.f32 %v9798_v39, %v20958_v38  ;;  %v9800_v26 = vpop.f32.mrb[6].mxu1  ;;  %v16930_v39 = vld [vmem:[#allocation5 + $0xaf0] ss:$24 sps:$4 sm:$0xff]  }
 0x355   : > { %11807 = vmatpush1.bf16.msra.mxu0 %v16894_v22  ;;  %11767 = vmatprep.mubr.bf16.mxu0 %v23267_v31  ;;  %v10354_v63 = vpop.f32.mrb[4].mxu0  ;;  %v15073_v8 = vadd.f32 %v9800_v26, %v20955_v29  ;;  %v9802_v52 = vpop.f32.mrb[7].mxu1  ;;  %v16929_v22 = vld [vmem:[#allocation5 + $0xaec] ss:$24 sps:$4 sm:$0xff]  }
 0x356   : > { %11808 = vmatprep.subr.bf16.mxu0 %v16902_v59  ;;  %10693 = vmatpush1.bf16.msra.mxu1 %v16897_v30  ;;  %v20985_v24 = vadd.f32 %v15069_v16, %v10354_v63  ;;  %v10356_v14 = vpop.f32.mrb[5].mxu0  ;;  %v15075_v62 = vadd.f32 %v9802_v52, %v20958_v38  ;;  %v23271_v30 = vld [vmem:[#allocation57_spill] sm:$0xff]  ;;  %v16938_v26 = vld [vmem:[#allocation5 + $0xb24] ss:$24 sps:$4 sm:$0xff]  }
 0x357   : > { %10694 = vmatprep.subr.bf16.mxu1 %v16905_v43  ;;  %v20989_v3 = vadd.f32 %v15071_v25, %v10356_v14  ;;  %v10358_v15 = vpop.f32.mrb[6].mxu0  ;;  %v16927_v43 = vld [vmem:[#allocation5 + $0xae8] ss:$24 sps:$4 sm:$0xff]   ;;  %v16932_v31 = vld [vmem:[#allocation5 + $0xaf4] ss:$24 sps:$4 sm:$0xff]   ;;  %v23273_v52 = vld [vmem:[#allocation62_spill] sm:$0xff] }
 0x358   : > { %v20992_v1 = vadd.f32 %v15073_v8, %v10358_v15  ;;  %v10360_v47 = vpop.f32.mrb[7].mxu0  ;;  %v16939_v15 = vld [vmem:[#allocation5 + $0xb48] ss:$24 sps:$4 sm:$0xff]  }
 0x359   : > { %11809 = vmatpush1.bf16.msra.mxu0 %v16900_v13  ;;  %10652 = vmatmul.mubr.bf16.gmra.mrb[36].mxu1 %v23268_v23  ;;  %v20994_v0 = vadd.f32 %v15075_v62, %v10360_v47  ;;  %v16935_v13 = vld [vmem:[#allocation5 + $0xb1c] ss:$24 sps:$4 sm:$0xff]  }
 0x35a   : > { %11810 = vmatprep.subr.bf16.mxu0 %v16908_v21  ;;  %10695 = vmatpush1.bf16.msra.mxu1 %v16903_v12  ;;  %v16947_v47 = vld [vmem:[#allocation5 + $0xb7c] ss:$24 sps:$4 sm:$0xff]  }
 0x35b   : > { %10661 = vmatprep.mubr.bf16.mxu1 %v23269_v20  ;;  %10696 = vmatprep.subr.bf16.mxu1 %v16911_v44 }
 0x35c   : > { %11768 = vmatmul.mubr.bf16.gmra.mrb[36].mxu0 %v23268_v23  ;;  %v23272_v23 = vld [vmem:[#allocation59_spill] sm:$0xff] }
 0x35d   : > { %11811 = vmatpush1.bf16.msra.mxu0 %v16906_v54  ;;  %11777 = vmatprep.mubr.bf16.mxu0 %v23269_v20 }
 0x35e   : > { %11812 = vmatprep.subr.bf16.mxu0 %v16914_v4  ;;  %10697 = vmatpush1.bf16.msra.mxu1 %v16909_v2  ;;  %v16933_v2 = vld [vmem:[#allocation5 + $0xb18] ss:$24 sps:$4 sm:$0xff]  }
 0x35f   : > { %10698 = vmatprep.subr.bf16.mxu1 %v16917_v40  ;;  %v16941_v40 = vld [vmem:[#allocation5 + $0xb4c] ss:$24 sps:$4 sm:$0xff]  }
 0x361   : > { %11813 = vmatpush1.bf16.msra.mxu0 %v16912_v19  ;;  %10662 = vmatmul.mubr.bf16.gmra.mrb[40].mxu1 %v23270_v28  ;;  %v9806_v59 = vpop.f32.mrb[8].mxu1  ;;  %v16936_v19 = vld [vmem:[#allocation5 + $0xb20] ss:$24 sps:$4 sm:$0xff]  }
 0x362   : > { %11814 = vmatprep.subr.bf16.mxu0 %v16920_v55  ;;  %10699 = vmatpush1.bf16.msra.mxu1 %v16915_v57  ;;  %v15077_v51 = vadd.f32 %v9806_v59, %v20955_v29  ;;  %v9808_v48 = vpop.f32.mrb[9].mxu1  ;;  %v16944_v57 = vld [vmem:[#allocation5 + $0xb54] ss:$24 sps:$4 sm:$0xff]   ;;  %v16942_v55 = vld [vmem:[#allocation5 + $0xb50] ss:$24 sps:$4 sm:$0xff]  }
 0x363   : > { %10671 = vmatprep.mubr.bf16.mxu1 %v23271_v30  ;;  %10700 = vmatprep.subr.bf16.mxu1 %v16923_v60  ;;  %v15079_v12 = vadd.f32 %v9808_v48, %v20958_v38  ;;  %v9810_v21 = vpop.f32.mrb[10].mxu1  ;;  %v16945_v60 = vld [vmem:[#allocation5 + $0xb78] ss:$24 sps:$4 sm:$0xff]  }
 0x364   : > { %11778 = vmatmul.mubr.bf16.gmra.mrb[40].mxu0 %v23270_v28  ;;  %v15081_v44 = vadd.f32 %v9810_v21, %v20955_v29  ;;  %v9812_v46 = vpop.f32.mrb[11].mxu1  ;;  %v10364_v54 = vpop.f32.mrb[8].mxu0  ;;  %v16951_v21 = vld [vmem:[#allocation5 + $0xba8] ss:$24 sps:$4 sm:$0xff]  }
 0x365   : > { %11815 = vmatpush1.bf16.msra.mxu0 %v16918_v45  ;;  %11787 = vmatprep.mubr.bf16.mxu0 %v23271_v30  ;;  %v15083_v16 = vadd.f32 %v9812_v46, %v20958_v38  ;;  %v21004_v25 = vadd.f32 %v15077_v51, %v10364_v54  ;;  %v10366_v4 = vpop.f32.mrb[9].mxu0  ;;  %v16950_v45 = vld [vmem:[#allocation5 + $0xb84] ss:$24 sps:$4 sm:$0xff]   ;;  %v16956_v51 = vld [vmem:[#allocation5 + $0xbb4] ss:$24 sps:$4 sm:$0xff]  }
 0x366   : > { %11816 = vmatprep.subr.bf16.mxu0 %v16926_v36  ;;  %10701 = vmatpush1.bf16.msra.mxu1 %v16921_v49  ;;  %v21007_v63 = vadd.f32 %v15079_v12, %v10366_v4  ;;  %v10368_v8 = vpop.f32.mrb[10].mxu0  ;;  %v16953_v49 = vld [vmem:[#allocation5 + $0xbac] ss:$24 sps:$4 sm:$0xff]  }
 0x367   : > { %10702 = vmatprep.subr.bf16.mxu1 %v16929_v22  ;;  %v21010_v20 = vadd.f32 %v15081_v44, %v10368_v8  ;;  %v10370_v14 = vpop.f32.mrb[11].mxu0  ;;  %v16959_v44 = vld [vmem:[#allocation5 + $0xbdc] ss:$24 sps:$4 sm:$0xff]   ;;  %v16965_v8 = vld [vmem:[#allocation5 + $0xc0c] ss:$24 sps:$4 sm:$0xff]  }
 0x368   : > { %v21013_v62 = vadd.f32 %v15083_v16, %v10370_v14  ;;  %v16963_v14 = vld [vmem:[#allocation5 + $0xc08] ss:$24 sps:$4 sm:$0xff]  }
 0x369   : > { %11817 = vmatpush1.bf16.msra.mxu0 %v16924_v27  ;;  %10672 = vmatmul.mubr.bf16.gmra.mrb[44].mxu1 %v23272_v23 }
 0x36a   : > { %11818 = vmatprep.subr.bf16.mxu0 %v16932_v31  ;;  %10703 = vmatpush1.bf16.msra.mxu1 %v16927_v43  ;;  %v16948_v43 = vld [vmem:[#allocation5 + $0xb80] ss:$24 sps:$4 sm:$0xff]  }
 0x36b   : > { %10714 = vmatprep.mubr.bf16.mxu1 %v23273_v52  ;;  %10704 = vmatprep.subr.bf16.mxu1 %v16935_v13 }
 0x36c   : > { %11788 = vmatmul.mubr.bf16.gmra.mrb[44].mxu0 %v23272_v23  ;;  %v16962_v23 = vld [vmem:[#allocation5 + $0xbe4] ss:$24 sps:$4 sm:$0xff]  }
 0x36d   : > { %11819 = vmatpush1.bf16.msra.mxu0 %v16930_v39  ;;  %11830 = vmatprep.mubr.bf16.mxu0 %v23273_v52  ;;  %v16960_v52 = vld [vmem:[#allocation5 + $0xbe0] ss:$24 sps:$4 sm:$0xff]  }
 0x36e   : > { %11820 = vmatprep.subr.bf16.mxu0 %v16938_v26  ;;  %10705 = vmatpush1.bf16.msra.mxu1 %v16933_v2  ;;  %v16954_v26 = vld [vmem:[#allocation5 + $0xbb0] ss:$24 sps:$4 sm:$0xff]  }
 0x36f   : > { %10706 = vmatprep.subr.bf16.mxu1 %v16941_v40  ;;  %v16957_v40 = vld [vmem:[#allocation5 + $0xbd8] ss:$24 sps:$4 sm:$0xff]  }
 0x371   : > { %11821 = vmatpush1.bf16.msra.mxu0 %v16936_v19  ;;  %v9816_v36 = vpop.f32.mrb[12].mxu1  ;;  %v16968_v19 = vld [vmem:[#allocation5 + $0xc14] ss:$24 sps:$4 sm:$0xff]  }
 0x372   : > { %11822 = vmatprep.subr.bf16.mxu0 %v16944_v57  ;;  %10707 = vmatpush1.bf16.msra.mxu1 %v16939_v15  ;;  %v15085_v22 = vadd.f32 %v9816_v36, %v20955_v29  ;;  %v9818_v28 = vpop.f32.mrb[13].mxu1  ;;  %v10374_v30 = vpop.f32.mrb[12].mxu0  ;;  %v16971_v15 = vld [vmem:[#allocation5 + $0xc3c] ss:$24 sps:$4 sm:$0xff]  }
 0x373   : > { %10708 = vmatprep.subr.bf16.mxu1 %v16947_v47  ;;  %v15087_v59 = vadd.f32 %v9818_v28, %v20958_v38  ;;  %v9820_v27 = vpop.f32.mrb[14].mxu1  ;;  %v10376_v31 = vpop.f32.mrb[13].mxu0  ;;  %v16974_v36 = vld [vmem:[#allocation5 + $0xc44] ss:$24 sps:$4 sm:$0xff]  }
 0x374   : > { %v21018_v48 = vadd.f32 %v15085_v22, %v10374_v30  ;;  %v15089_v13 = vadd.f32 %v9820_v27, %v20955_v29  ;;  %v9822_v12 = vpop.f32.mrb[15].mxu1  ;;  %v10378_v54 = vpop.f32.mrb[14].mxu0  ;;  %v23274_v30 = vld [vmem:[#allocation61_spill] sm:$0xff]  ;;  %v16977_v27 = vld [vmem:[#allocation5 + $0xc6c] ss:$24 sps:$4 sm:$0xff]  }
 0x375   : > { %11823 = vmatpush1.bf16.msra.mxu0 %v16942_v55  ;;  %v21021_v46 = vadd.f32 %v15087_v59, %v10376_v31  ;;  %v15091_v16 = vadd.f32 %v9822_v12, %v20958_v38  ;;  %v10380_v2 = vpop.f32.mrb[15].mxu0  ;;  %v16969_v59 = vld [vmem:[#allocation5 + $0xc38] ss:$24 sps:$4 sm:$0xff]  }
 0x376   : > { %11824 = vmatprep.subr.bf16.mxu0 %v16950_v45  ;;  %10709 = vmatpush1.bf16.msra.mxu1 %v16945_v60  ;;  %v21024_v39 = vadd.f32 %v15089_v13, %v10378_v54  ;;  %v23275_v31 = vld [vmem:[#allocation65_spill] sm:$0xff]  ;;  %v16972_v54 = vld [vmem:[#allocation5 + $0xc40] ss:$24 sps:$4 sm:$0xff]  }
 0x377   : > { %10710 = vmatprep.subr.bf16.mxu1 %v16953_v49  ;;  %v21026_v4 = vadd.f32 %v15091_v16, %v10380_v2  ;;  %v16966_v49 = vld [vmem:[#allocation5 + $0xc10] ss:$24 sps:$4 sm:$0xff]  }
 0x378   : > { %v16975_v16 = vld [vmem:[#allocation5 + $0xc68] ss:$24 sps:$4 sm:$0xff]  }
 0x379   : > { %11825 = vmatpush1.bf16.msra.mxu0 %v16948_v43 }
 0x37a   : > { %11826 = vmatprep.subr.bf16.mxu0 %v16956_v51  ;;  %10711 = vmatpush1.bf16.msra.mxu1 %v16951_v21 }
 0x37b   : > { %10712 = vmatprep.subr.bf16.mxu1 %v16959_v44 }
 0x37d   : > { %11827 = vmatpush1.bf16.msra.mxu0 %v16954_v26 }
 0x37e   : > { %11828 = vmatprep.subr.bf16.mxu0 %v16962_v23  ;;  %v9826_v57 = vpop.f32.mrb[16].mxu1  ;;  %10713 = vmatpush1.bf16.msra.mxu1 %v16957_v40  ;;  %v16980_v40 = vld [vmem:[#allocation5 + $0xc74] ss:$24 sps:$4 sm:$0xff]  }
 0x37f   : > { %v15093_v47 = vadd.f32 %v9826_v57, %v20955_v29  ;;  %v9828_v55 = vpop.f32.mrb[17].mxu1  ;;  %10775 = vmatprep.subr.bf16.mxu1 %v16965_v8  ;;  %v16983_v23 = vld [vmem:[#allocation5 + $0xc9c] ss:$24 sps:$4 sm:$0xff]   ;;  %v23276_v57 = vld [vmem:[#allocation67_spill] sm:$0xff] }
 0x380   : > { %v15095_v60 = vadd.f32 %v9828_v55, %v20958_v38  ;;  %v9830_v45 = vpop.f32.mrb[18].mxu1 }
 0x381   : > { %11829 = vmatpush1.bf16.msra.mxu0 %v16960_v52  ;;  %v15097_v22 = vadd.f32 %v9830_v45, %v20955_v29  ;;  %v9832_v28 = vpop.f32.mrb[19].mxu1  ;;  %10715 = vmatmul.mubr.bf16.vlgmr.msra.gmra.mrb[24].mxu1 %v23274_v30  ;;  %v16978_v52 = vld [vmem:[#allocation5 + $0xc70] ss:$24 sps:$4 sm:$0xff]  }
 0x382   : > { %11891 = vmatprep.subr.bf16.mxu0 %v16968_v19  ;;  %v15099_v51 = vadd.f32 %v9832_v28, %v20958_v38  ;;  %10776 = vmatpush1.bf16.msra.mxu1 %v16963_v14  ;;  %v16981_v14 = vld [vmem:[#allocation5 + $0xc98] ss:$24 sps:$4 sm:$0xff]   ;;  %v16986_v19 = vld [vmem:[#allocation5 + $0xca4] ss:$24 sps:$4 sm:$0xff]   ;;  %v16987_v45 = vld [vmem:[#allocation5 + $0xcc8] ss:$24 sps:$4 sm:$0xff]  }
 0x383   : > { %v10384_v43 = vpop.f32.mrb[16].mxu0  ;;  %10724 = vmatprep.mubr.bf16.mxu1 %v23275_v31  ;;  %10777 = vmatprep.subr.bf16.mxu1 %v16971_v15  ;;  %v16989_v15 = vld [vmem:[#allocation5 + $0xccc] ss:$24 sps:$4 sm:$0xff]   ;;  %v16995_v28 = vld [vmem:[#allocation5 + $0xcfc] ss:$24 sps:$4 sm:$0xff]  }
 0x384   : > { %v21034_v13 = vadd.f32 %v15093_v47, %v10384_v43  ;;  %v10386_v12 = vpop.f32.mrb[17].mxu0  ;;  %11831 = vmatmul.mubr.bf16.vlgmr.msra.gmra.mrb[24].mxu0 %v23274_v30  ;;  %v23277_v47 = vld [vmem:[#allocation69_spill] sm:$0xff] }
 0x385   : > { %v21037_v21 = vadd.f32 %v15095_v60, %v10386_v12  ;;  %v10388_v44 = vpop.f32.mrb[18].mxu0  ;;  %11892 = vmatpush1.bf16.msra.mxu0 %v16966_v49  ;;  %11840 = vmatprep.mubr.bf16.mxu0 %v23275_v31  ;;  %v16984_v60 = vld [vmem:[#allocation5 + $0xca0] ss:$24 sps:$4 sm:$0xff]  }
 0x386   : > { %v21040_v2 = vadd.f32 %v15097_v22, %v10388_v44  ;;  %v10390_v26 = vpop.f32.mrb[19].mxu0  ;;  %11893 = vmatprep.subr.bf16.mxu0 %v16974_v36  ;;  %10778 = vmatpush1.bf16.msra.mxu1 %v16969_v59  ;;  %v16992_v22 = vld [vmem:[#allocation5 + $0xcd4] ss:$24 sps:$4 sm:$0xff]  }
 0x387   : > { %v21042_v8 = vadd.f32 %v15099_v51, %v10390_v26  ;;  %10779 = vmatprep.subr.bf16.mxu1 %v16977_v27  ;;  %v16990_v26 = vld [vmem:[#allocation5 + $0xcd0] ss:$24 sps:$4 sm:$0xff]  }
 0x389   : > { %11894 = vmatpush1.bf16.msra.mxu0 %v16972_v54  ;;  %10725 = vmatmul.mubr.bf16.gmra.mrb[28].mxu1 %v23276_v57 }
 0x38a   : > { %11895 = vmatprep.subr.bf16.mxu0 %v16980_v40  ;;  %10780 = vmatpush1.bf16.msra.mxu1 %v16975_v16  ;;  %v16993_v40 = vld [vmem:[#allocation5 + $0xcf8] ss:$24 sps:$4 sm:$0xff]  }
 0x38b   : > { %10734 = vmatprep.mubr.bf16.mxu1 %v23277_v47  ;;  %10781 = vmatprep.subr.bf16.mxu1 %v16983_v23 }
 0x38c   : > { %11841 = vmatmul.mubr.bf16.gmra.mrb[28].mxu0 %v23276_v57  ;;  %v9836_v55 = vpop.f32.mrb[20].mxu1  ;;  %v23278_v57 = vld [vmem:[#allocation71_spill] sm:$0xff] }
 0x38d   : > { %11896 = vmatpush1.bf16.msra.mxu0 %v16978_v52  ;;  %11850 = vmatprep.mubr.bf16.mxu0 %v23277_v47  ;;  %v15101_v49 = vadd.f32 %v9836_v55, %v20955_v29  ;;  %v9838_v36 = vpop.f32.mrb[21].mxu1  ;;  %v17004_v55 = vld [vmem:[#allocation5 + $0xd34] ss:$24 sps:$4 sm:$0xff]  }
 0x38e   : > { %11897 = vmatprep.subr.bf16.mxu0 %v16986_v19  ;;  %v15103_v59 = vadd.f32 %v9838_v36, %v20958_v38  ;;  %v9840_v27 = vpop.f32.mrb[22].mxu1  ;;  %10782 = vmatpush1.bf16.msra.mxu1 %v16981_v14  ;;  %v16998_v14 = vld [vmem:[#allocation5 + $0xd04] ss:$24 sps:$4 sm:$0xff]   ;;  %v17005_v36 = vld [vmem:[#allocation5 + $0xd58] ss:$24 sps:$4 sm:$0xff]  }
 0x38f   : > { %v10394_v30 = vpop.f32.mrb[20].mxu0  ;;  %v15105_v31 = vadd.f32 %v9840_v27, %v20955_v29  ;;  %v9842_v12 = vpop.f32.mrb[23].mxu1  ;;  %10783 = vmatprep.subr.bf16.mxu1 %v16989_v15  ;;  %v17001_v19 = vld [vmem:[#allocation5 + $0xd2c] ss:$24 sps:$4 sm:$0xff]   ;;  %v23279_v29 = vld [vmem:[#allocation73_spill] sm:$0xff] }
 0x390   : > { %v21050_v43 = vadd.f32 %v15101_v49, %v10394_v30  ;;  %v10396_v51 = vpop.f32.mrb[21].mxu0  ;;  %v15107_v16 = vadd.f32 %v9842_v12, %v20958_v38  ;;  %v16996_v38 = vld [vmem:[#allocation5 + $0xd00] ss:$24 sps:$4 sm:$0xff]   ;;  %v17002_v49 = vld [vmem:[#allocation5 + $0xd30] ss:$24 sps:$4 sm:$0xff]  }
 0x391   : > { %v21053_v44 = vadd.f32 %v15103_v59, %v10396_v51  ;;  %v10398_v54 = vpop.f32.mrb[22].mxu0  ;;  %11898 = vmatpush1.bf16.msra.mxu0 %v16984_v60  ;;  %10735 = vmatmul.mubr.bf16.gmra.mrb[32].mxu1 %v23278_v57  ;;  %v16999_v15 = vld [vmem:[#allocation5 + $0xd28] ss:$24 sps:$4 sm:$0xff]   ;;  %v17007_v60 = vld [vmem:[#allocation5 + $0xd5c] ss:$24 sps:$4 sm:$0xff]  }
 0x392   : > { %v21056_v23 = vadd.f32 %v15105_v31, %v10398_v54  ;;  %v10400_v52 = vpop.f32.mrb[23].mxu0  ;;  %11899 = vmatprep.subr.bf16.mxu0 %v16992_v22  ;;  %10784 = vmatpush1.bf16.msra.mxu1 %v16987_v45  ;;  %v17010_v22 = vld [vmem:[#allocation5 + $0xd64] ss:$24 sps:$4 sm:$0xff]   ;;  %v17008_v59 = vld [vmem:[#allocation5 + $0xd60] ss:$24 sps:$4 sm:$0xff]  }
 0x393   : > { %v21059_v47 = vadd.f32 %v15107_v16, %v10400_v52  ;;  %10744 = vmatprep.mubr.bf16.mxu1 %v23279_v29  ;;  %10785 = vmatprep.subr.bf16.mxu1 %v16995_v28  ;;  %v17013_v45 = vld [vmem:[#allocation5 + $0xd8c] ss:$24 sps:$4 sm:$0xff]   ;;  %v23281_v28 = vld [vmem:[#allocation77_spill] sm:$0xff]  ;;  %v17011_v27 = vld [vmem:[#allocation5 + $0xd88] ss:$24 sps:$4 sm:$0xff]  }
 0x394   : > { %11851 = vmatmul.mubr.bf16.gmra.mrb[32].mxu0 %v23278_v57  ;;  %v23280_v30 = vld [vmem:[#allocation75_spill] sm:$0xff]  ;;  %v17016_v51 = vld [vmem:[#allocation5 + $0xd94] ss:$24 sps:$4 sm:$0xff]   ;;  %v17014_v12 = vld [vmem:[#allocation5 + $0xd90] ss:$24 sps:$4 sm:$0xff]  }
 0x395   : > { %11900 = vmatpush1.bf16.msra.mxu0 %v16990_v26  ;;  %11860 = vmatprep.mubr.bf16.mxu0 %v23279_v29  ;;  %v17019_v31 = vld [vmem:[#allocation5 + $0xdbc] ss:$24 sps:$4 sm:$0xff]   ;;  %v17017_v54 = vld [vmem:[#allocation5 + $0xdb8] ss:$24 sps:$4 sm:$0xff]   ;;  %v17025_v26 = vld [vmem:[#allocation5 + $0xdec] ss:$24 sps:$4 sm:$0xff]  }
 0x396   : > { %11901 = vmatprep.subr.bf16.mxu0 %v16998_v14  ;;  %10786 = vmatpush1.bf16.msra.mxu1 %v16993_v40  ;;  %v17022_v16 = vld [vmem:[#allocation5 + $0xdc4] ss:$24 sps:$4 sm:$0xff]   ;;  %v17020_v52 = vld [vmem:[#allocation5 + $0xdc0] ss:$24 sps:$4 sm:$0xff]   ;;  %v17026_v29 = vld [vmem:[#allocation5 + $0xdf0] ss:$24 sps:$4 sm:$0xff]  }
 0x397   : > { %10787 = vmatprep.subr.bf16.mxu1 %v17001_v19  ;;  %v23282_v40 = vld [vmem:[#allocation79_spill] sm:$0xff]  ;;  %v17028_v19 = vld [vmem:[#allocation5 + $0xdf4] ss:$24 sps:$4 sm:$0xff]  }
 0x398   : > { %v17023_v14 = vld [vmem:[#allocation5 + $0xde8] ss:$24 sps:$4 sm:$0xff]   ;;  %v17031_v57 = vld [vmem:[#allocation5 + $0xe1c] ss:$24 sps:$4 sm:$0xff]  }
 0x399   : > { %11902 = vmatpush1.bf16.msra.mxu0 %v16996_v38  ;;  %10745 = vmatmul.mubr.bf16.gmra.mrb[36].mxu1 %v23280_v30  ;;  %v17029_v38 = vld [vmem:[#allocation5 + $0xe18] ss:$24 sps:$4 sm:$0xff]  }
 0x39a   : > { %11903 = vmatprep.subr.bf16.mxu0 %v17004_v55  ;;  %10788 = vmatpush1.bf16.msra.mxu1 %v16999_v15  ;;  %v17034_v15 = vld [vmem:[#allocation5 + $0xe24] ss:$24 sps:$4 sm:$0xff]  }
 0x39b   : > { %10754 = vmatprep.mubr.bf16.mxu1 %v23281_v28  ;;  %10789 = vmatprep.subr.bf16.mxu1 %v17007_v60  ;;  %v17037_v55 = vld [vmem:[#allocation5 + $0xe4c] ss:$24 sps:$4 sm:$0xff]  }
 0x39c   : > { %11861 = vmatmul.mubr.bf16.gmra.mrb[36].mxu0 %v23280_v30  ;;  %v23283_v60 = vld [vmem:[#allocation84_spill] sm:$0xff]  ;;  %v17041_v30 = vld [vmem:[#allocation5 + $0xe78] ss:$24 sps:$4 sm:$0xff]  }
 0x39d   : > { %11904 = vmatpush1.bf16.msra.mxu0 %v17002_v49  ;;  %11870 = vmatprep.mubr.bf16.mxu0 %v23281_v28  ;;  %v17035_v49 = vld [vmem:[#allocation5 + $0xe48] ss:$24 sps:$4 sm:$0xff]   ;;  %v17046_v28 = vld [vmem:[#allocation5 + $0xe84] ss:$24 sps:$4 sm:$0xff]  }
 0x39e   : > { %11905 = vmatprep.subr.bf16.mxu0 %v17010_v22  ;;  %10790 = vmatpush1.bf16.msra.mxu1 %v17005_v36  ;;  %v17040_v36 = vld [vmem:[#allocation5 + $0xe54] ss:$24 sps:$4 sm:$0xff]  }
 0x39f   : > { %10791 = vmatprep.subr.bf16.mxu1 %v17013_v45  ;;  %v17043_v22 = vld [vmem:[#allocation5 + $0xe7c] ss:$24 sps:$4 sm:$0xff]   ;;  %v17038_v45 = vld [vmem:[#allocation5 + $0xe50] ss:$24 sps:$4 sm:$0xff]  }
 0x3a1   : > { %11906 = vmatpush1.bf16.msra.mxu0 %v17008_v59  ;;  %10755 = vmatmul.mubr.bf16.gmra.mrb[40].mxu1 %v23282_v40  ;;  %v17049_v59 = vld [vmem:[#allocation5 + $0xeac] ss:$24 sps:$4 sm:$0xff]  }
 0x3a2   : > { %11907 = vmatprep.subr.bf16.mxu0 %v17016_v51  ;;  %10792 = vmatpush1.bf16.msra.mxu1 %v17011_v27  ;;  %v17047_v27 = vld [vmem:[#allocation5 + $0xea8] ss:$24 sps:$4 sm:$0xff]   ;;  %v17052_v51 = vld [vmem:[#allocation5 + $0xeb4] ss:$24 sps:$4 sm:$0xff]  }
 0x3a3   : > { %10764 = vmatprep.mubr.bf16.mxu1 %v20159_v7  ;;  %10793 = vmatprep.subr.bf16.mxu1 %v17019_v31  ;;  %v17055_v31 = vld [vmem:[#allocation5 + $0xedc] ss:$24 sps:$4 sm:$0xff]  }
 0x3a4   : > { %11871 = vmatmul.mubr.bf16.gmra.mrb[40].mxu0 %v23282_v40  ;;  %v17056_v40 = vld [vmem:[#allocation5 + $0xee0] ss:$24 sps:$4 sm:$0xff]  }
 0x3a5   : > { %11908 = vmatpush1.bf16.msra.mxu0 %v17014_v12  ;;  %11880 = vmatprep.mubr.bf16.mxu0 %v20159_v7  ;;  %v17032_v7 = vld [vmem:[#allocation5 + $0xe20] ss:$24 sps:$4 sm:$0xff]   ;;  %v17050_v12 = vld [vmem:[#allocation5 + $0xeb0] ss:$24 sps:$4 sm:$0xff]  }
 0x3a6   : > { %11909 = vmatprep.subr.bf16.mxu0 %v17022_v16  ;;  %10794 = vmatpush1.bf16.msra.mxu1 %v17017_v54  ;;  %v17053_v54 = vld [vmem:[#allocation5 + $0xed8] ss:$24 sps:$4 sm:$0xff]   ;;  %v17058_v16 = vld [vmem:[#allocation5 + $0xee4] ss:$24 sps:$4 sm:$0xff]  }
 0x3a7   : > { %10795 = vmatprep.subr.bf16.mxu1 %v17025_v26  ;;  %v17061_v26 = vld [vmem:[#allocation5 + $0xf0c] ss:$24 sps:$4 sm:$0xff]  }
 0x3a9   : > { %11910 = vmatpush1.bf16.msra.mxu0 %v17020_v52  ;;  %10765 = vmatmul.mubr.bf16.gmra.mrb[44].mxu1 %v20194_v42  ;;  %v17059_v52 = vld [vmem:[#allocation5 + $0xf08] ss:$24 sps:$4 sm:$0xff]  }
 0x3aa   : > { %11911 = vmatprep.subr.bf16.mxu0 %v17028_v19  ;;  %10796 = vmatpush1.bf16.msra.mxu1 %v17023_v14  ;;  %v17064_v14 = vld [vmem:[#allocation5 + $0xf14] ss:$24 sps:$4 sm:$0xff]  }
 0x3ab   : > { %10807 = vmatprep.mubr.bf16.mxu1 %v23283_v60  ;;  %10797 = vmatprep.subr.bf16.mxu1 %v17031_v57  ;;  %v17067_v19 = vld [vmem:[#allocation5 + $0xf3c] ss:$24 sps:$4 sm:$0xff]   ;;  %v17062_v57 = vld [vmem:[#allocation5 + $0xf10] ss:$24 sps:$4 sm:$0xff]  }
 0x3ac   : > { %11881 = vmatmul.mubr.bf16.gmra.mrb[44].mxu0 %v20194_v42  ;;  %v17044_v42 = vld [vmem:[#allocation5 + $0xe80] ss:$24 sps:$4 sm:$0xff]  }
 0x3ad   : > { %11912 = vmatpush1.bf16.msra.mxu0 %v17026_v29  ;;  %11923 = vmatprep.mubr.bf16.mxu0 %v23283_v60  ;;  %v17065_v29 = vld [vmem:[#allocation5 + $0xf38] ss:$24 sps:$4 sm:$0xff]   ;;  %v23285_v60 = vld [vmem:[#allocation87_spill] sm:$0xff] }
 0x3ae   : > { %11913 = vmatprep.subr.bf16.mxu0 %v17034_v15  ;;  %10798 = vmatpush1.bf16.msra.mxu1 %v17029_v38  ;;  %v17070_v38 = vld [vmem:[#allocation5 + $0xf44] ss:$24 sps:$4 sm:$0xff]  }
 0x3af   : > { %10799 = vmatprep.subr.bf16.mxu1 %v17037_v55  ;;  %v23284_v15 = vld [vmem:[#allocation83_spill] sm:$0xff] }
 0x3b0   : > { %v17073_v55 = vld [vmem:[#allocation5 + $0xf6c] ss:$24 sps:$4 sm:$0xff]  }
 0x3b1   : > { %11914 = vmatpush1.bf16.msra.mxu0 %v17032_v7  ;;  %v17068_v7 = vld [vmem:[#allocation5 + $0xf40] ss:$24 sps:$4 sm:$0xff]  }
 0x3b2   : > { %11915 = vmatprep.subr.bf16.mxu0 %v17040_v36  ;;  %10800 = vmatpush1.bf16.msra.mxu1 %v17035_v49  ;;  %v17071_v49 = vld [vmem:[#allocation5 + $0xf68] ss:$24 sps:$4 sm:$0xff]   ;;  %v17076_v36 = vld [vmem:[#allocation5 + $0xf74] ss:$24 sps:$4 sm:$0xff]  }
 0x3b3   : > { %10801 = vmatprep.subr.bf16.mxu1 %v17043_v22  ;;  %v17079_v22 = vld [vmem:[#allocation5 + $0xf9c] ss:$24 sps:$4 sm:$0xff]  }
 0x3b5   : > { %11916 = vmatpush1.bf16.msra.mxu0 %v17038_v45  ;;  %v17074_v45 = vld [vmem:[#allocation5 + $0xf70] ss:$24 sps:$4 sm:$0xff]  }
 0x3b6   : > { %11917 = vmatprep.subr.bf16.mxu0 %v17046_v28  ;;  %10802 = vmatpush1.bf16.msra.mxu1 %v17041_v30  ;;  %v17077_v30 = vld [vmem:[#allocation5 + $0xf98] ss:$24 sps:$4 sm:$0xff]   ;;  %v17082_v28 = vld [vmem:[#allocation5 + $0xfa4] ss:$24 sps:$4 sm:$0xff]  }
 0x3b7   : > { %10803 = vmatprep.subr.bf16.mxu1 %v17049_v59  ;;  %v17085_v59 = vld [vmem:[#allocation5 + $0xfcc] ss:$24 sps:$4 sm:$0xff]  }
 0x3b9   : > { %11918 = vmatpush1.bf16.msra.mxu0 %v17044_v42  ;;  %v23286_v42 = vld [vmem:[#allocation89_spill] sm:$0xff] }
 0x3ba   : > { %11919 = vmatprep.subr.bf16.mxu0 %v17052_v51  ;;  %10804 = vmatpush1.bf16.msra.mxu1 %v17047_v27  ;;  %v23287_v27 = vld [vmem:[#allocation91_spill] sm:$0xff] }
 0x3bb   : > { %10805 = vmatprep.subr.bf16.mxu1 %v17055_v31  ;;  %v17080_v51 = vld [vmem:[#allocation5 + $0xfa0] ss:$24 sps:$4 sm:$0xff]  }
 0x3bc   : > { %v17083_v31 = vld [vmem:[#allocation5 + $0xfc8] ss:$24 sps:$4 sm:$0xff]  }
 0x3bd   : > { %11920 = vmatpush1.bf16.msra.mxu0 %v17050_v12  ;;  %v17088_v12 = vld [vmem:[#allocation5 + $0xfd4] ss:$24 sps:$4 sm:$0xff]  }
 0x3be   : > { %11921 = vmatprep.subr.bf16.mxu0 %v17058_v16  ;;  %10806 = vmatpush1.bf16.msra.mxu1 %v17053_v54  ;;  %v17091_v54 = vld [vmem:[#allocation5 + $0xffc] ss:$24 sps:$4 sm:$0xff]   ;;  %v17086_v16 = vld [vmem:[#allocation5 + $0xfd0] ss:$24 sps:$4 sm:$0xff]  }
 0x3bf   : > { %10868 = vmatprep.subr.bf16.mxu1 %v17061_v26  ;;  %v17089_v26 = vld [vmem:[#allocation5 + $0xff8] ss:$24 sps:$4 sm:$0xff]  }
 0x3c1   : > { %11922 = vmatpush1.bf16.msra.mxu0 %v17056_v40  ;;  %10808 = vmatmul.mubr.bf16.vlgmr.msra.gmra.mrb[24].mxu1 %v23284_v15  ;;  %v17094_v40 = vld [vmem:[#allocation5 + $0x1004] ss:$24 sps:$4 sm:$0xff]  }
 0x3c2   : > { %11984 = vmatprep.subr.bf16.mxu0 %v17064_v14  ;;  %10869 = vmatpush1.bf16.msra.mxu1 %v17059_v52  ;;  %v17097_v52 = vld [vmem:[#allocation5 + $0x102c] ss:$24 sps:$4 sm:$0xff]   ;;  %v23288_v14 = vld [vmem:[#allocation93_spill] sm:$0xff] }
 0x3c3   : > { %10817 = vmatprep.mubr.bf16.mxu1 %v23285_v60  ;;  %10870 = vmatprep.subr.bf16.mxu1 %v17067_v19  ;;  %v23289_v19 = vld [vmem:[#allocation95_spill] sm:$0xff] }
 0x3c4   : > { %11924 = vmatmul.mubr.bf16.vlgmr.msra.gmra.mrb[24].mxu0 %v23284_v15  ;;  %v17103_v15 = vld [vmem:[#allocation5 + $0x105c] ss:$24 sps:$4 sm:$0xff]  }
 0x3c5   : > { %11985 = vmatpush1.bf16.msra.mxu0 %v17062_v57  ;;  %11933 = vmatprep.mubr.bf16.mxu0 %v23285_v60  ;;  %v17092_v57 = vld [vmem:[#allocation5 + $0x1000] ss:$24 sps:$4 sm:$0xff]  }
 0x3c6   : > { %11986 = vmatprep.subr.bf16.mxu0 %v17070_v38  ;;  %10871 = vmatpush1.bf16.msra.mxu1 %v17065_v29  ;;  %v17095_v29 = vld [vmem:[#allocation5 + $0x1028] ss:$24 sps:$4 sm:$0xff]   ;;  %v17100_v38 = vld [vmem:[#allocation5 + $0x1034] ss:$24 sps:$4 sm:$0xff]   ;;  %v17101_v60 = vld [vmem:[#allocation5 + $0x1058] ss:$24 sps:$4 sm:$0xff]  }
 0x3c7   : > { %10872 = vmatprep.subr.bf16.mxu1 %v17073_v55  ;;  %v17098_v55 = vld [vmem:[#allocation5 + $0x1030] ss:$24 sps:$4 sm:$0xff]  }
 0x3c9   : > { %11987 = vmatpush1.bf16.msra.mxu0 %v17068_v7  ;;  %10818 = vmatmul.mubr.bf16.gmra.mrb[28].mxu1 %v23286_v42  ;;  %v17106_v7 = vld [vmem:[#allocation5 + $0x1064] ss:$24 sps:$4 sm:$0xff]  }
 0x3ca   : > { %11988 = vmatprep.subr.bf16.mxu0 %v17076_v36  ;;  %10873 = vmatpush1.bf16.msra.mxu1 %v17071_v49  ;;  %v17109_v49 = vld [vmem:[#allocation5 + $0x108c] ss:$24 sps:$4 sm:$0xff]   ;;  %v23290_v36 = vld [vmem:[#allocation97_spill] sm:$0xff] }
 0x3cb   : > { %10827 = vmatprep.mubr.bf16.mxu1 %v23287_v27  ;;  %10874 = vmatprep.subr.bf16.mxu1 %v17079_v22  ;;  %v23291_v22 = vld [vmem:[#allocation99_spill] sm:$0xff] }
 0x3cc   : > { %11934 = vmatmul.mubr.bf16.gmra.mrb[28].mxu0 %v23286_v42  ;;  %v17110_v42 = vld [vmem:[#allocation5 + $0x1090] ss:$24 sps:$4 sm:$0xff]  }
 0x3cd   : > { %11989 = vmatpush1.bf16.msra.mxu0 %v17074_v45  ;;  %11943 = vmatprep.mubr.bf16.mxu0 %v23287_v27  ;;  %v17104_v45 = vld [vmem:[#allocation5 + $0x1060] ss:$24 sps:$4 sm:$0xff]  }
 0x3ce   : > { %11990 = vmatprep.subr.bf16.mxu0 %v17082_v28  ;;  %10875 = vmatpush1.bf16.msra.mxu1 %v17077_v30  ;;  %v17107_v30 = vld [vmem:[#allocation5 + $0x1088] ss:$24 sps:$4 sm:$0xff]   ;;  %v17112_v28 = vld [vmem:[#allocation5 + $0x1094] ss:$24 sps:$4 sm:$0xff]   ;;  %v17113_v27 = vld [vmem:[#allocation5 + $0x10b8] ss:$24 sps:$4 sm:$0xff]  }
 0x3cf   : > { %10876 = vmatprep.subr.bf16.mxu1 %v17085_v59  ;;  %v17115_v59 = vld [vmem:[#allocation5 + $0x10bc] ss:$24 sps:$4 sm:$0xff]  }
 0x3d1   : > { %11991 = vmatpush1.bf16.msra.mxu0 %v17080_v51  ;;  %10828 = vmatmul.mubr.bf16.gmra.mrb[32].mxu1 %v23288_v14  ;;  %v17118_v51 = vld [vmem:[#allocation5 + $0x10c4] ss:$24 sps:$4 sm:$0xff]  }
 0x3d2   : > { %11992 = vmatprep.subr.bf16.mxu0 %v17088_v12  ;;  %10877 = vmatpush1.bf16.msra.mxu1 %v17083_v31  ;;  %v17121_v31 = vld [vmem:[#allocation5 + $0x10ec] ss:$24 sps:$4 sm:$0xff]   ;;  %v23292_v12 = vld [vmem:[#allocation101_spill] sm:$0xff] }
 0x3d3   : > { %10837 = vmatprep.mubr.bf16.mxu1 %v23289_v19  ;;  %10878 = vmatprep.subr.bf16.mxu1 %v17091_v54  ;;  %v23293_v54 = vld [vmem:[#allocation103_spill] sm:$0xff] }
 0x3d4   : > { %11944 = vmatmul.mubr.bf16.gmra.mrb[32].mxu0 %v23288_v14  ;;  %v17122_v14 = vld [vmem:[#allocation5 + $0x10f0] ss:$24 sps:$4 sm:$0xff]  }
 0x3d5   : > { %11993 = vmatpush1.bf16.msra.mxu0 %v17086_v16  ;;  %11953 = vmatprep.mubr.bf16.mxu0 %v23289_v19  ;;  %v17116_v16 = vld [vmem:[#allocation5 + $0x10c0] ss:$24 sps:$4 sm:$0xff]  }
 0x3d6   : > { %11994 = vmatprep.subr.bf16.mxu0 %v17094_v40  ;;  %10879 = vmatpush1.bf16.msra.mxu1 %v17089_v26  ;;  %v17119_v26 = vld [vmem:[#allocation5 + $0x10e8] ss:$24 sps:$4 sm:$0xff]   ;;  %v17124_v40 = vld [vmem:[#allocation5 + $0x10f4] ss:$24 sps:$4 sm:$0xff]   ;;  %v17125_v19 = vld [vmem:[#allocation5 + $0x1118] ss:$24 sps:$4 sm:$0xff]  }
 0x3d7   : > { %10880 = vmatprep.subr.bf16.mxu1 %v17097_v52  ;;  %v17127_v52 = vld [vmem:[#allocation5 + $0x111c] ss:$24 sps:$4 sm:$0xff]  }
 0x3d9   : > { %11995 = vmatpush1.bf16.msra.mxu0 %v17092_v57  ;;  %10838 = vmatmul.mubr.bf16.gmra.mrb[36].mxu1 %v23290_v36  ;;  %v17130_v57 = vld [vmem:[#allocation5 + $0x1124] ss:$24 sps:$4 sm:$0xff]  }
 0x3da   : > { %11996 = vmatprep.subr.bf16.mxu0 %v17100_v38  ;;  %10881 = vmatpush1.bf16.msra.mxu1 %v17095_v29  ;;  %v17133_v29 = vld [vmem:[#allocation5 + $0x114c] ss:$24 sps:$4 sm:$0xff]   ;;  %v23294_v38 = vld [vmem:[#allocation105_spill] sm:$0xff] }
 0x3db   : > { %10847 = vmatprep.mubr.bf16.mxu1 %v23291_v22  ;;  %10882 = vmatprep.subr.bf16.mxu1 %v17103_v15  ;;  %v23295_v15 = vld [vmem:[#allocation108_spill] sm:$0xff] }
 0x3dc   : > { %11954 = vmatmul.mubr.bf16.gmra.mrb[36].mxu0 %v23290_v36  ;;  %v17134_v36 = vld [vmem:[#allocation5 + $0x1150] ss:$24 sps:$4 sm:$0xff]  }
 0x3dd   : > { %11997 = vmatpush1.bf16.msra.mxu0 %v17098_v55  ;;  %11963 = vmatprep.mubr.bf16.mxu0 %v23291_v22  ;;  %v17128_v55 = vld [vmem:[#allocation5 + $0x1120] ss:$24 sps:$4 sm:$0xff]  }
 0x3de   : > { %11998 = vmatprep.subr.bf16.mxu0 %v17106_v7  ;;  %10883 = vmatpush1.bf16.msra.mxu1 %v17101_v60  ;;  %v17131_v60 = vld [vmem:[#allocation5 + $0x1148] ss:$24 sps:$4 sm:$0xff]   ;;  %v17136_v7 = vld [vmem:[#allocation5 + $0x1154] ss:$24 sps:$4 sm:$0xff]   ;;  %v17137_v22 = vld [vmem:[#allocation5 + $0x1178] ss:$24 sps:$4 sm:$0xff]  }
 0x3df   : > { %10884 = vmatprep.subr.bf16.mxu1 %v17109_v49  ;;  %v17139_v49 = vld [vmem:[#allocation5 + $0x117c] ss:$24 sps:$4 sm:$0xff]  }
 0x3e1   : > { %11999 = vmatpush1.bf16.msra.mxu0 %v17104_v45  ;;  %10848 = vmatmul.mubr.bf16.gmra.mrb[40].mxu1 %v23292_v12  ;;  %v17142_v45 = vld [vmem:[#allocation5 + $0x1184] ss:$24 sps:$4 sm:$0xff]  }
 0x3e2   : > { %12000 = vmatprep.subr.bf16.mxu0 %v17112_v28  ;;  %10885 = vmatpush1.bf16.msra.mxu1 %v17107_v30  ;;  %v17145_v30 = vld [vmem:[#allocation5 + $0x11ac] ss:$24 sps:$4 sm:$0xff]   ;;  %v17140_v28 = vld [vmem:[#allocation5 + $0x1180] ss:$24 sps:$4 sm:$0xff]  }
 0x3e3   : > { %10857 = vmatprep.mubr.bf16.mxu1 %v23293_v54  ;;  %10886 = vmatprep.subr.bf16.mxu1 %v17115_v59  ;;  %v17143_v59 = vld [vmem:[#allocation5 + $0x11a8] ss:$24 sps:$4 sm:$0xff]  }
 0x3e4   : > { %11964 = vmatmul.mubr.bf16.gmra.mrb[40].mxu0 %v23292_v12  ;;  %v17149_v12 = vld [vmem:[#allocation5 + $0x11d8] ss:$24 sps:$4 sm:$0xff]  }
 0x3e5   : > { %12001 = vmatpush1.bf16.msra.mxu0 %v17110_v42  ;;  %11973 = vmatprep.mubr.bf16.mxu0 %v23293_v54  ;;  %v17148_v42 = vld [vmem:[#allocation5 + $0x11b4] ss:$24 sps:$4 sm:$0xff]  }
 0x3e6   : > { %12002 = vmatprep.subr.bf16.mxu0 %v17118_v51  ;;  %10887 = vmatpush1.bf16.msra.mxu1 %v17113_v27  ;;  %v17151_v27 = vld [vmem:[#allocation5 + $0x11dc] ss:$24 sps:$4 sm:$0xff]   ;;  %v17146_v51 = vld [vmem:[#allocation5 + $0x11b0] ss:$24 sps:$4 sm:$0xff]   ;;  %v17157_v54 = vld [vmem:[#allocation5 + $0x120c] ss:$24 sps:$4 sm:$0xff]  }
 0x3e7   : > { %10888 = vmatprep.subr.bf16.mxu1 %v17121_v31  ;;  %v17154_v31 = vld [vmem:[#allocation5 + $0x11e4] ss:$24 sps:$4 sm:$0xff]  }
 0x3e9   : > { %12003 = vmatpush1.bf16.msra.mxu0 %v17116_v16  ;;  %10858 = vmatmul.mubr.bf16.gmra.mrb[44].mxu1 %v23294_v38  ;;  %v17152_v16 = vld [vmem:[#allocation5 + $0x11e0] ss:$24 sps:$4 sm:$0xff]  }
 0x3ea   : > { %12004 = vmatprep.subr.bf16.mxu0 %v17124_v40  ;;  %10889 = vmatpush1.bf16.msra.mxu1 %v17119_v26  ;;  %v17160_v26 = vld [vmem:[#allocation5 + $0x1214] ss:$24 sps:$4 sm:$0xff]   ;;  %v17155_v40 = vld [vmem:[#allocation5 + $0x1208] ss:$24 sps:$4 sm:$0xff]  }
 0x3eb   : > { %10900 = vmatprep.mubr.bf16.mxu1 %v23295_v15  ;;  %10890 = vmatprep.subr.bf16.mxu1 %v17127_v52  ;;  %v17163_v52 = vld [vmem:[#allocation5 + $0x123c] ss:$24 sps:$4 sm:$0xff]  }
 0x3ec   : > { %11974 = vmatmul.mubr.bf16.gmra.mrb[44].mxu0 %v23294_v38  ;;  %v17169_v38 = vld [vmem:[#allocation5 + $0x126c] ss:$24 sps:$4 sm:$0xff]  }
 0x3ed   : > { %12005 = vmatpush1.bf16.msra.mxu0 %v17122_v14  ;;  %12016 = vmatprep.mubr.bf16.mxu0 %v23295_v15  ;;  %v17158_v14 = vld [vmem:[#allocation5 + $0x1210] ss:$24 sps:$4 sm:$0xff]   ;;  %v17164_v15 = vld [vmem:[#allocation5 + $0x1240] ss:$24 sps:$4 sm:$0xff]  }
 0x3ee   : > { %12006 = vmatprep.subr.bf16.mxu0 %v17130_v57  ;;  %10891 = vmatpush1.bf16.msra.mxu1 %v17125_v19  ;;  %v23296_v19 = vld [vmem:[#allocation107_spill] sm:$0xff] }
 0x3ef   : > { %10892 = vmatprep.subr.bf16.mxu1 %v17133_v29  ;;  %v17166_v57 = vld [vmem:[#allocation5 + $0x1244] ss:$24 sps:$4 sm:$0xff]   ;;  %v17161_v29 = vld [vmem:[#allocation5 + $0x1238] ss:$24 sps:$4 sm:$0xff]  }
 0x3f1   : > { %12007 = vmatpush1.bf16.msra.mxu0 %v17128_v55  ;;  %v17172_v55 = vld [vmem:[#allocation5 + $0x1274] ss:$24 sps:$4 sm:$0xff]  }
 0x3f2   : > { %12008 = vmatprep.subr.bf16.mxu0 %v17136_v7  ;;  %10893 = vmatpush1.bf16.msra.mxu1 %v17131_v60  ;;  %v17167_v60 = vld [vmem:[#allocation5 + $0x1268] ss:$24 sps:$4 sm:$0xff]   ;;  %v17175_v7 = vld [vmem:[#allocation5 + $0x129c] ss:$24 sps:$4 sm:$0xff]  }
 0x3f3   : > { %10894 = vmatprep.subr.bf16.mxu1 %v17139_v49  ;;  %v17170_v49 = vld [vmem:[#allocation5 + $0x1270] ss:$24 sps:$4 sm:$0xff]  }
 0x3f5   : > { %12009 = vmatpush1.bf16.msra.mxu0 %v17134_v36  ;;  %v17178_v36 = vld [vmem:[#allocation5 + $0x12a4] ss:$24 sps:$4 sm:$0xff]  }
 0x3f6   : > { %12010 = vmatprep.subr.bf16.mxu0 %v17142_v45  ;;  %10895 = vmatpush1.bf16.msra.mxu1 %v17137_v22  ;;  %v23297_v22 = vld [vmem:[#allocation112_spill] sm:$0xff]  ;;  %v17173_v45 = vld [vmem:[#allocation5 + $0x1298] ss:$24 sps:$4 sm:$0xff]  }
 0x3f7   : > { %10896 = vmatprep.subr.bf16.mxu1 %v17145_v30  ;;  %v23298_v30 = vld [vmem:[#allocation114_spill] sm:$0xff] }
 0x3f9   : > { %12011 = vmatpush1.bf16.msra.mxu0 %v17140_v28  ;;  %v17181_v28 = vld [vmem:[#allocation5 + $0x12cc] ss:$24 sps:$4 sm:$0xff]  }
 0x3fa   : > { %12012 = vmatprep.subr.bf16.mxu0 %v17148_v42  ;;  %10897 = vmatpush1.bf16.msra.mxu1 %v17143_v59  ;;  %v17184_v59 = vld [vmem:[#allocation5 + $0x12d4] ss:$24 sps:$4 sm:$0xff]   ;;  %v17179_v42 = vld [vmem:[#allocation5 + $0x12c8] ss:$24 sps:$4 sm:$0xff]  }
 0x3fb   : > { %10898 = vmatprep.subr.bf16.mxu1 %v17151_v27  ;;  %v17187_v27 = vld [vmem:[#allocation5 + $0x12fc] ss:$24 sps:$4 sm:$0xff]  }
 0x3fd   : > { %12013 = vmatpush1.bf16.msra.mxu0 %v17146_v51  ;;  %v17182_v51 = vld [vmem:[#allocation5 + $0x12d0] ss:$24 sps:$4 sm:$0xff]  }
 0x3fe   : > { %12014 = vmatprep.subr.bf16.mxu0 %v17154_v31  ;;  %10899 = vmatpush1.bf16.msra.mxu1 %v17149_v12  ;;  %v17190_v31 = vld [vmem:[#allocation5 + $0x1304] ss:$24 sps:$4 sm:$0xff]   ;;  %v23299_v12 = vld [vmem:[#allocation116_spill] sm:$0xff] }
 0x3ff   : > { %10961 = vmatprep.subr.bf16.mxu1 %v17157_v54  ;;  %v17185_v54 = vld [vmem:[#allocation5 + $0x12f8] ss:$24 sps:$4 sm:$0xff]  }
 0x401   : > { %12015 = vmatpush1.bf16.msra.mxu0 %v17152_v16  ;;  %10901 = vmatmul.mubr.bf16.vlgmr.msra.gmra.mrb[24].mxu1 %v23296_v19  ;;  %v23300_v16 = vld [vmem:[#allocation118_spill] sm:$0xff] }
 0x402   : > { %12077 = vmatprep.subr.bf16.mxu0 %v17160_v26  ;;  %10962 = vmatpush1.bf16.msra.mxu1 %v17155_v40  ;;  %v17193_v26 = vld [vmem:[#allocation5 + $0x132c] ss:$24 sps:$4 sm:$0xff]   ;;  %v17188_v40 = vld [vmem:[#allocation5 + $0x1300] ss:$24 sps:$4 sm:$0xff]  }
 0x403   : > { %10910 = vmatprep.mubr.bf16.mxu1 %v20642_v41  ;;  %10963 = vmatprep.subr.bf16.mxu1 %v17163_v52  ;;  %v17196_v52 = vld [vmem:[#allocation5 + $0x1334] ss:$24 sps:$4 sm:$0xff]  }
 0x404   : > { %12017 = vmatmul.mubr.bf16.vlgmr.msra.gmra.mrb[24].mxu0 %v23296_v19  ;;  %v17199_v19 = vld [vmem:[#allocation5 + $0x135c] ss:$24 sps:$4 sm:$0xff]  }
 0x405   : > { %12078 = vmatpush1.bf16.msra.mxu0 %v17158_v14  ;;  %12026 = vmatprep.mubr.bf16.mxu0 %v20642_v41  ;;  %v17176_v41 = vld [vmem:[#allocation5 + $0x12a0] ss:$24 sps:$4 sm:$0xff]  }
 0x406   : > { %12079 = vmatprep.subr.bf16.mxu0 %v17166_v57  ;;  %10964 = vmatpush1.bf16.msra.mxu1 %v17161_v29  ;;  %v17191_v14 = vld [vmem:[#allocation5 + $0x1328] ss:$24 sps:$4 sm:$0xff]   ;;  %v17202_v29 = vld [vmem:[#allocation5 + $0x1364] ss:$24 sps:$4 sm:$0xff]  }
 0x407   : > { %10965 = vmatprep.subr.bf16.mxu1 %v17169_v38  ;;  %v17194_v57 = vld [vmem:[#allocation5 + $0x1330] ss:$24 sps:$4 sm:$0xff]  }
 0x408   : > { %v17197_v38 = vld [vmem:[#allocation5 + $0x1358] ss:$24 sps:$4 sm:$0xff]  }
 0x409   : > { %12080 = vmatpush1.bf16.msra.mxu0 %v17164_v15  ;;  %10911 = vmatmul.mubr.bf16.gmra.mrb[28].mxu1 %v23297_v22  ;;  %v17205_v15 = vld [vmem:[#allocation5 + $0x138c] ss:$24 sps:$4 sm:$0xff]  }
 0x40a   : > { %12081 = vmatprep.subr.bf16.mxu0 %v17172_v55  ;;  %10966 = vmatpush1.bf16.msra.mxu1 %v17167_v60  ;;  %v17200_v55 = vld [vmem:[#allocation5 + $0x1360] ss:$24 sps:$4 sm:$0xff]   ;;  %v17208_v60 = vld [vmem:[#allocation5 + $0x1394] ss:$24 sps:$4 sm:$0xff]  }
 0x40b   : > { %10920 = vmatprep.mubr.bf16.mxu1 %v23298_v30  ;;  %10967 = vmatprep.subr.bf16.mxu1 %v17175_v7  ;;  %v17203_v7 = vld [vmem:[#allocation5 + $0x1388] ss:$24 sps:$4 sm:$0xff]  }
 0x40c   : > { %12027 = vmatmul.mubr.bf16.gmra.mrb[28].mxu0 %v23297_v22  ;;  %v17214_v22 = vld [vmem:[#allocation5 + $0x13c4] ss:$24 sps:$4 sm:$0xff]  }
 0x40d   : > { %12082 = vmatpush1.bf16.msra.mxu0 %v17170_v49  ;;  %12036 = vmatprep.mubr.bf16.mxu0 %v23298_v30  ;;  %v17211_v49 = vld [vmem:[#allocation5 + $0x13bc] ss:$24 sps:$4 sm:$0xff]  }
 0x40e   : > { %12083 = vmatprep.subr.bf16.mxu0 %v17178_v36  ;;  %10968 = vmatpush1.bf16.msra.mxu1 %v17173_v45  ;;  %v17206_v36 = vld [vmem:[#allocation5 + $0x1390] ss:$24 sps:$4 sm:$0xff]   ;;  %v17220_v30 = vld [vmem:[#allocation5 + $0x13f4] ss:$24 sps:$4 sm:$0xff]  }
 0x40f   : > { %10969 = vmatprep.subr.bf16.mxu1 %v17181_v28  ;;  %v17209_v45 = vld [vmem:[#allocation5 + $0x13b8] ss:$24 sps:$4 sm:$0xff]   ;;  %v17215_v28 = vld [vmem:[#allocation5 + $0x13e8] ss:$24 sps:$4 sm:$0xff]  }
 0x411   : > { %12084 = vmatpush1.bf16.msra.mxu0 %v17176_v41  ;;  %10921 = vmatmul.mubr.bf16.gmra.mrb[32].mxu1 %v23299_v12  ;;  %v17223_v41 = vld [vmem:[#allocation5 + $0x141c] ss:$24 sps:$4 sm:$0xff]  }
 0x412   : > { %12085 = vmatprep.subr.bf16.mxu0 %v17184_v59  ;;  %10970 = vmatpush1.bf16.msra.mxu1 %v17179_v42  ;;  %v17218_v59 = vld [vmem:[#allocation5 + $0x13f0] ss:$24 sps:$4 sm:$0xff]   ;;  %v17226_v42 = vld [vmem:[#allocation5 + $0x1424] ss:$24 sps:$4 sm:$0xff]  }
 0x413   : > { %10930 = vmatprep.mubr.bf16.mxu1 %v23300_v16  ;;  %10971 = vmatprep.subr.bf16.mxu1 %v17187_v27  ;;  %v17221_v27 = vld [vmem:[#allocation5 + $0x1418] ss:$24 sps:$4 sm:$0xff]  }
 0x414   : > { %12037 = vmatmul.mubr.bf16.gmra.mrb[32].mxu0 %v23299_v12  ;;  %v17227_v12 = vld [vmem:[#allocation5 + $0x1448] ss:$24 sps:$4 sm:$0xff]  }
 0x415   : > { %12086 = vmatpush1.bf16.msra.mxu0 %v17182_v51  ;;  %12046 = vmatprep.mubr.bf16.mxu0 %v23300_v16  ;;  %v23301_v51 = vld [vmem:[#allocation15_spill] sm:$0xff]  ;;  %v17230_v16 = vld [vmem:[#allocation5 + $0x1450] ss:$24 sps:$4 sm:$0xff]  }
 0x416   : > { %12087 = vmatprep.subr.bf16.mxu0 %v17190_v31  ;;  %10972 = vmatpush1.bf16.msra.mxu1 %v17185_v54  ;;  %v17232_v31 = vld [vmem:[#allocation5 + $0x1454] ss:$24 sps:$4 sm:$0xff]  }
 0x417   : > { %10973 = vmatprep.subr.bf16.mxu1 %v17193_v26  ;;  %v17235_v54 = vld [vmem:[#allocation5 + $0x147c] ss:$24 sps:$4 sm:$0xff]  }
 0x418   : > { %v17238_v26 = vld [vmem:[#allocation5 + $0x1484] ss:$24 sps:$4 sm:$0xff]  }
 0x419   : > { %12088 = vmatpush1.bf16.msra.mxu0 %v17188_v40  ;;  %10931 = vmatmul.mubr.bf16.gmra.mrb[36].mxu1 %v20810_v61  ;;  %v17233_v40 = vld [vmem:[#allocation5 + $0x1478] ss:$24 sps:$4 sm:$0xff]  }
 0x41a   : > { %12089 = vmatprep.subr.bf16.mxu0 %v17196_v52  ;;  %10974 = vmatpush1.bf16.msra.mxu1 %v17191_v14  ;;  %v17241_v52 = vld [vmem:[#allocation5 + $0x14ac] ss:$24 sps:$4 sm:$0xff]  }
 0x41b   : > { %10940 = vmatprep.mubr.bf16.mxu1 %v20834_v37  ;;  %10975 = vmatprep.subr.bf16.mxu1 %v17199_v19  ;;  %v17244_v14 = vld [vmem:[#allocation5 + $0x14b4] ss:$24 sps:$4 sm:$0xff]   ;;  %v17239_v19 = vld [vmem:[#allocation5 + $0x14a8] ss:$24 sps:$4 sm:$0xff]  }
 0x41c   : > { %12047 = vmatmul.mubr.bf16.gmra.mrb[36].mxu0 %v20810_v61  ;;  %v17217_v61 = vld [vmem:[#allocation5 + $0x13ec] ss:$24 sps:$4 sm:$0xff]  }
 0x41d   : > { %12090 = vmatpush1.bf16.msra.mxu0 %v17194_v57  ;;  %12056 = vmatprep.mubr.bf16.mxu0 %v20834_v37  ;;  %v17212_v37 = vld [vmem:[#allocation5 + $0x13c0] ss:$24 sps:$4 sm:$0xff]   ;;  %v17247_v57 = vld [vmem:[#allocation5 + $0x14dc] ss:$24 sps:$4 sm:$0xff]  }
 0x41e   : > { %12091 = vmatprep.subr.bf16.mxu0 %v17202_v29  ;;  %10976 = vmatpush1.bf16.msra.mxu1 %v17197_v38  ;;  %v17242_v29 = vld [vmem:[#allocation5 + $0x14b0] ss:$24 sps:$4 sm:$0xff]   ;;  %v17250_v38 = vld [vmem:[#allocation5 + $0x14e4] ss:$24 sps:$4 sm:$0xff]  }
 0x41f   : > { %10977 = vmatprep.subr.bf16.mxu1 %v17205_v15  ;;  %v17245_v15 = vld [vmem:[#allocation5 + $0x14d8] ss:$24 sps:$4 sm:$0xff]  }
 0x421   : > { %12092 = vmatpush1.bf16.msra.mxu0 %v17200_v55  ;;  %10941 = vmatmul.mubr.bf16.gmra.mrb[40].mxu1 %v20855_v58  ;;  %v17253_v55 = vld [vmem:[#allocation5 + $0x150c] ss:$24 sps:$4 sm:$0xff]  }
 0x422   : > { %12093 = vmatprep.subr.bf16.mxu0 %v17208_v60  ;;  %10978 = vmatpush1.bf16.msra.mxu1 %v17203_v7  ;;  %v17248_v60 = vld [vmem:[#allocation5 + $0x14e0] ss:$24 sps:$4 sm:$0xff]   ;;  %v17256_v7 = vld [vmem:[#allocation5 + $0x1514] ss:$24 sps:$4 sm:$0xff]  }
 0x423   : > { %10950 = vmatprep.mubr.bf16.mxu1 %v20871_v35  ;;  %10979 = vmatprep.subr.bf16.mxu1 %v17211_v49  ;;  %v17251_v49 = vld [vmem:[#allocation5 + $0x1508] ss:$24 sps:$4 sm:$0xff]  }
 0x424   : > { %12057 = vmatmul.mubr.bf16.gmra.mrb[40].mxu0 %v20855_v58  ;;  %v17229_v58 = vld [vmem:[#allocation5 + $0x144c] ss:$24 sps:$4 sm:$0xff]  }
 0x425   : > { %12094 = vmatpush1.bf16.msra.mxu0 %v17206_v36  ;;  %12066 = vmatprep.mubr.bf16.mxu0 %v20871_v35  ;;  %v17224_v35 = vld [vmem:[#allocation5 + $0x1420] ss:$24 sps:$4 sm:$0xff]   ;;  %v17259_v36 = vld [vmem:[#allocation5 + $0x153c] ss:$24 sps:$4 sm:$0xff]  }
 0x426   : > { %12095 = vmatprep.subr.bf16.mxu0 %v17214_v22  ;;  %10980 = vmatpush1.bf16.msra.mxu1 %v17209_v45  ;;  %v17254_v22 = vld [vmem:[#allocation5 + $0x1510] ss:$24 sps:$4 sm:$0xff]  }
 0x427   : > { %10981 = vmatprep.subr.bf16.mxu1 %v17217_v61  ;;  %v23302_v45 = vld [vmem:[#allocation16_spill] sm:$0xff]  ;;  %v17262_v61 = vld [vmem:[#allocation5 + $0x1544] ss:$24 sps:$4 sm:$0xff]  }
 0x429   : > { %12096 = vmatpush1.bf16.msra.mxu0 %v17212_v37  ;;  %10951 = vmatmul.mubr.bf16.gmra.mrb[44].mxu1 %v20883_v32  ;;  %v17257_v37 = vld [vmem:[#allocation5 + $0x1538] ss:$24 sps:$4 sm:$0xff]  }
 0x42a   : > { %12097 = vmatprep.subr.bf16.mxu0 %v17220_v30  ;;  %10982 = vmatpush1.bf16.msra.mxu1 %v17215_v28  ;;  %v23303_v30 = vld [vmem:[#allocation17_spill] sm:$0xff]  ;;  %v17265_v28 = vld [vmem:[#allocation5 + $0x156c] ss:$24 sps:$4 sm:$0xff]  }
 0x42b   : > { %10993 = vmatprep.mubr.bf16.mxu1 %v23301_v51  ;;  %10983 = vmatprep.subr.bf16.mxu1 %v17223_v41  ;;  %v17260_v41 = vld [vmem:[#allocation5 + $0x1540] ss:$24 sps:$4 sm:$0xff]  }
 0x42c   : > { %12067 = vmatmul.mubr.bf16.gmra.mrb[44].mxu0 %v20883_v32  ;;  %v17236_v32 = vld [vmem:[#allocation5 + $0x1480] ss:$24 sps:$4 sm:$0xff]  }
 0x42d   : > { %12098 = vmatpush1.bf16.msra.mxu0 %v17218_v59  ;;  %12109 = vmatprep.mubr.bf16.mxu0 %v23301_v51  ;;  %v17268_v59 = vld [vmem:[#allocation5 + $0x1574] ss:$24 sps:$4 sm:$0xff]   ;;  %v17266_v51 = vld [vmem:[#allocation5 + $0x1570] ss:$24 sps:$4 sm:$0xff]  }
 0x42e   : > { %12099 = vmatprep.subr.bf16.mxu0 %v17226_v42  ;;  %10984 = vmatpush1.bf16.msra.mxu1 %v17221_v27  ;;  %v17263_v42 = vld [vmem:[#allocation5 + $0x1568] ss:$24 sps:$4 sm:$0xff]   ;;  %v17271_v27 = vld [vmem:[#allocation5 + $0x159c] ss:$24 sps:$4 sm:$0xff]  }
 0x42f   : > { %10985 = vmatprep.subr.bf16.mxu1 %v17229_v58  ;;  %v17274_v58 = vld [vmem:[#allocation5 + $0x15a4] ss:$24 sps:$4 sm:$0xff]  }
 0x431   : > { %12100 = vmatpush1.bf16.msra.mxu0 %v17224_v35  ;;  %v23304_v35 = vld [vmem:[#allocation18_spill] sm:$0xff] }
 0x432   : > { %12101 = vmatprep.subr.bf16.mxu0 %v17232_v31  ;;  %10986 = vmatpush1.bf16.msra.mxu1 %v17227_v12  ;;  %v17269_v31 = vld [vmem:[#allocation5 + $0x1598] ss:$24 sps:$4 sm:$0xff]   ;;  %v23305_v12 = vld [vmem:[#allocation19_spill] sm:$0xff] }
 0x433   : > { %10987 = vmatprep.subr.bf16.mxu1 %v17235_v54  ;;  %v17277_v54 = vld [vmem:[#allocation5 + $0x15cc] ss:$24 sps:$4 sm:$0xff]  }
 0x435   : > { %12102 = vmatpush1.bf16.msra.mxu0 %v17230_v16  ;;  %v17272_v16 = vld [vmem:[#allocation5 + $0x15a0] ss:$24 sps:$4 sm:$0xff]  }
 0x436   : > { %12103 = vmatprep.subr.bf16.mxu0 %v17238_v26  ;;  %10988 = vmatpush1.bf16.msra.mxu1 %v17233_v40  ;;  %v17280_v26 = vld [vmem:[#allocation5 + $0x15d4] ss:$24 sps:$4 sm:$0xff]   ;;  %v17275_v40 = vld [vmem:[#allocation5 + $0x15c8] ss:$24 sps:$4 sm:$0xff]  }
 0x437   : > { %10989 = vmatprep.subr.bf16.mxu1 %v17241_v52  ;;  %v17283_v52 = vld [vmem:[#allocation5 + $0x15fc] ss:$24 sps:$4 sm:$0xff]  }
 0x439   : > { %12104 = vmatpush1.bf16.msra.mxu0 %v17236_v32  ;;  %v17278_v32 = vld [vmem:[#allocation5 + $0x15d0] ss:$24 sps:$4 sm:$0xff]  }
 0x43a   : > { %12105 = vmatprep.subr.bf16.mxu0 %v17244_v14  ;;  %10990 = vmatpush1.bf16.msra.mxu1 %v17239_v19  ;;  %v17286_v14 = vld [vmem:[#allocation5 + $0x1604] ss:$24 sps:$4 sm:$0xff]   ;;  %v23306_v19 = vld [vmem:[#allocation20_spill] sm:$0xff] }
 0x43b   : > { %10991 = vmatprep.subr.bf16.mxu1 %v17247_v57  ;;  %v17281_v57 = vld [vmem:[#allocation5 + $0x15f8] ss:$24 sps:$4 sm:$0xff]  }
 0x43d   : > { %12106 = vmatpush1.bf16.msra.mxu0 %v17242_v29  ;;  %v23307_v29 = vld [vmem:[#allocation21_spill] sm:$0xff] }
 0x43e   : > { %12107 = vmatprep.subr.bf16.mxu0 %v17250_v38  ;;  %10992 = vmatpush1.bf16.msra.mxu1 %v17245_v15  ;;  %v17289_v38 = vld [vmem:[#allocation5 + $0x162c] ss:$24 sps:$4 sm:$0xff]   ;;  %v17284_v15 = vld [vmem:[#allocation5 + $0x1600] ss:$24 sps:$4 sm:$0xff]  }
 0x43f   : > { %11054 = vmatprep.subr.bf16.mxu1 %v17253_v55  ;;  %v17292_v55 = vld [vmem:[#allocation5 + $0x1634] ss:$24 sps:$4 sm:$0xff]  }
 0x441   : > { %12108 = vmatpush1.bf16.msra.mxu0 %v17248_v60  ;;  %10994 = vmatmul.mubr.bf16.vlgmr.msra.gmra.mrb[24].mxu1 %v23302_v45  ;;  %v17287_v60 = vld [vmem:[#allocation5 + $0x1628] ss:$24 sps:$4 sm:$0xff]  }
 0x442   : > { %12170 = vmatprep.subr.bf16.mxu0 %v17256_v7  ;;  %11055 = vmatpush1.bf16.msra.mxu1 %v17251_v49  ;;  %v17295_v7 = vld [vmem:[#allocation5 + $0x165c] ss:$24 sps:$4 sm:$0xff]   ;;  %v17290_v49 = vld [vmem:[#allocation5 + $0x1630] ss:$24 sps:$4 sm:$0xff]  }
 0x443   : > { %11003 = vmatprep.mubr.bf16.mxu1 %v23303_v30  ;;  %11056 = vmatprep.subr.bf16.mxu1 %v17259_v36  ;;  %v17298_v36 = vld [vmem:[#allocation5 + $0x1664] ss:$24 sps:$4 sm:$0xff]  }
 0x444   : > { %12110 = vmatmul.mubr.bf16.vlgmr.msra.gmra.mrb[24].mxu0 %v23302_v45  ;;  %v17293_v45 = vld [vmem:[#allocation5 + $0x1658] ss:$24 sps:$4 sm:$0xff]  }
 0x445   : > { %12171 = vmatpush1.bf16.msra.mxu0 %v17254_v22  ;;  %12119 = vmatprep.mubr.bf16.mxu0 %v23303_v30  ;;  %v23308_v22 = vld [vmem:[#allocation22_spill] sm:$0xff] }
 0x446   : > { %12172 = vmatprep.subr.bf16.mxu0 %v17262_v61  ;;  %11057 = vmatpush1.bf16.msra.mxu1 %v17257_v37  ;;  %v23309_v61 = vld [vmem:[#allocation23_spill] sm:$0xff] }
 0x447   : > { %11058 = vmatprep.subr.bf16.mxu1 %v17265_v28  ;;  %v17301_v37 = vld [vmem:[#allocation5 + $0x168c] ss:$24 sps:$4 sm:$0xff]   ;;  %v17296_v30 = vld [vmem:[#allocation5 + $0x1660] ss:$24 sps:$4 sm:$0xff]  }
 0x448   : > { %v17304_v28 = vld [vmem:[#allocation5 + $0x1694] ss:$24 sps:$4 sm:$0xff]  }
 0x449   : > { %12173 = vmatpush1.bf16.msra.mxu0 %v17260_v41  ;;  %11004 = vmatmul.mubr.bf16.gmra.mrb[28].mxu1 %v23304_v35  ;;  %v17299_v41 = vld [vmem:[#allocation5 + $0x1688] ss:$24 sps:$4 sm:$0xff]  }
 0x44a   : > { %12174 = vmatprep.subr.bf16.mxu0 %v17268_v59  ;;  %11059 = vmatpush1.bf16.msra.mxu1 %v17263_v42  ;;  %v17307_v59 = vld [vmem:[#allocation5 + $0x16bc] ss:$24 sps:$4 sm:$0xff]   ;;  %v17302_v42 = vld [vmem:[#allocation5 + $0x1690] ss:$24 sps:$4 sm:$0xff]  }
 0x44b   : > { %11013 = vmatprep.mubr.bf16.mxu1 %v23305_v12  ;;  %11060 = vmatprep.subr.bf16.mxu1 %v17271_v27  ;;  %v17310_v27 = vld [vmem:[#allocation5 + $0x16c4] ss:$24 sps:$4 sm:$0xff]  }
 0x44c   : > { %12120 = vmatmul.mubr.bf16.gmra.mrb[28].mxu0 %v23304_v35  ;;  %v23311_v35 = vld [vmem:[#allocation25_spill] sm:$0xff] }
 0x44d   : > { %12175 = vmatpush1.bf16.msra.mxu0 %v17266_v51  ;;  %12129 = vmatprep.mubr.bf16.mxu0 %v23305_v12  ;;  %v23310_v51 = vld [vmem:[#allocation24_spill] sm:$0xff]  ;;  %v17308_v12 = vld [vmem:[#allocation5 + $0x16c0] ss:$24 sps:$4 sm:$0xff]  }
 0x44e   : > { %12176 = vmatprep.subr.bf16.mxu0 %v17274_v58  ;;  %11061 = vmatpush1.bf16.msra.mxu1 %v17269_v31  ;;  %v17305_v58 = vld [vmem:[#allocation5 + $0x16b8] ss:$24 sps:$4 sm:$0xff]   ;;  %v17313_v31 = vld [vmem:[#allocation5 + $0x16ec] ss:$24 sps:$4 sm:$0xff]  }
 0x44f   : > { %11062 = vmatprep.subr.bf16.mxu1 %v17277_v54  ;;  %v17316_v54 = vld [vmem:[#allocation5 + $0x16f4] ss:$24 sps:$4 sm:$0xff]  }
 0x451   : > { %12177 = vmatpush1.bf16.msra.mxu0 %v17272_v16  ;;  %11014 = vmatmul.mubr.bf16.gmra.mrb[32].mxu1 %v23306_v19  ;;  %v17311_v16 = vld [vmem:[#allocation5 + $0x16e8] ss:$24 sps:$4 sm:$0xff]  }
 0x452   : > { %12178 = vmatprep.subr.bf16.mxu0 %v17280_v26  ;;  %11063 = vmatpush1.bf16.msra.mxu1 %v17275_v40  ;;  %v17319_v26 = vld [vmem:[#allocation5 + $0x171c] ss:$24 sps:$4 sm:$0xff]   ;;  %v17314_v40 = vld [vmem:[#allocation5 + $0x16f0] ss:$24 sps:$4 sm:$0xff]  }
 0x453   : > { %11023 = vmatprep.mubr.bf16.mxu1 %v23307_v29  ;;  %11064 = vmatprep.subr.bf16.mxu1 %v17283_v52  ;;  %v17322_v52 = vld [vmem:[#allocation5 + $0x1724] ss:$24 sps:$4 sm:$0xff]  }
 0x454   : > { %12130 = vmatmul.mubr.bf16.gmra.mrb[32].mxu0 %v23306_v19  ;;  %v23313_v19 = vld [vmem:[#allocation28_spill] sm:$0xff] }
 0x455   : > { %12179 = vmatpush1.bf16.msra.mxu0 %v17278_v32  ;;  %12139 = vmatprep.mubr.bf16.mxu0 %v23307_v29  ;;  %v23312_v32 = vld [vmem:[#allocation26_spill] sm:$0xff] }
 0x456   : > { %12180 = vmatprep.subr.bf16.mxu0 %v17286_v14  ;;  %11065 = vmatpush1.bf16.msra.mxu1 %v17281_v57  ;;  %v17317_v14 = vld [vmem:[#allocation5 + $0x1718] ss:$24 sps:$4 sm:$0xff]   ;;  %v17325_v57 = vld [vmem:[#allocation5 + $0x174c] ss:$24 sps:$4 sm:$0xff]  }
 0x457   : > { %11066 = vmatprep.subr.bf16.mxu1 %v17289_v38  ;;  %v17320_v29 = vld [vmem:[#allocation5 + $0x1720] ss:$24 sps:$4 sm:$0xff]   ;;  %v17328_v38 = vld [vmem:[#allocation5 + $0x1754] ss:$24 sps:$4 sm:$0xff]  }
 0x459   : > { %12181 = vmatpush1.bf16.msra.mxu0 %v17284_v15  ;;  %11024 = vmatmul.mubr.bf16.gmra.mrb[36].mxu1 %v23308_v22  ;;  %v17323_v15 = vld [vmem:[#allocation5 + $0x1748] ss:$24 sps:$4 sm:$0xff]  }
 0x45a   : > { %12182 = vmatprep.subr.bf16.mxu0 %v17292_v55  ;;  %11067 = vmatpush1.bf16.msra.mxu1 %v17287_v60  ;;  %v17331_v55 = vld [vmem:[#allocation5 + $0x177c] ss:$24 sps:$4 sm:$0xff]   ;;  %v17326_v60 = vld [vmem:[#allocation5 + $0x1750] ss:$24 sps:$4 sm:$0xff]  }
 0x45b   : > { %11033 = vmatprep.mubr.bf16.mxu1 %v23309_v61  ;;  %11068 = vmatprep.subr.bf16.mxu1 %v17295_v7  ;;  %v17334_v7 = vld [vmem:[#allocation5 + $0x1784] ss:$24 sps:$4 sm:$0xff]  }
 0x45c   : > { %12140 = vmatmul.mubr.bf16.gmra.mrb[36].mxu0 %v23308_v22  ;;  %v17332_v22 = vld [vmem:[#allocation5 + $0x1780] ss:$24 sps:$4 sm:$0xff]  }
 0x45d   : > { %12183 = vmatpush1.bf16.msra.mxu0 %v17290_v49  ;;  %12149 = vmatprep.mubr.bf16.mxu0 %v23309_v61  ;;  %v17329_v49 = vld [vmem:[#allocation5 + $0x1778] ss:$24 sps:$4 sm:$0xff]   ;;  %v17335_v61 = vld [vmem:[#allocation5 + $0x17a8] ss:$24 sps:$4 sm:$0xff]  }
 0x45e   : > { %12184 = vmatprep.subr.bf16.mxu0 %v17298_v36  ;;  %11069 = vmatpush1.bf16.msra.mxu1 %v17293_v45  ;;  %v17337_v36 = vld [vmem:[#allocation5 + $0x17ac] ss:$24 sps:$4 sm:$0xff]  }
 0x45f   : > { %11070 = vmatprep.subr.bf16.mxu1 %v17301_v37  ;;  %v17340_v45 = vld [vmem:[#allocation5 + $0x17b4] ss:$24 sps:$4 sm:$0xff]  }
 0x460   : > { %v17343_v37 = vld [vmem:[#allocation5 + $0x17dc] ss:$24 sps:$4 sm:$0xff]  }
 0x461   : > { %12185 = vmatpush1.bf16.msra.mxu0 %v17296_v30  ;;  %11034 = vmatmul.mubr.bf16.gmra.mrb[40].mxu1 %v23310_v51  ;;  %v17338_v30 = vld [vmem:[#allocation5 + $0x17b0] ss:$24 sps:$4 sm:$0xff]  }
 0x462   : > { %12186 = vmatprep.subr.bf16.mxu0 %v17304_v28  ;;  %11071 = vmatpush1.bf16.msra.mxu1 %v17299_v41  ;;  %v17346_v28 = vld [vmem:[#allocation5 + $0x17e4] ss:$24 sps:$4 sm:$0xff]   ;;  %v17341_v41 = vld [vmem:[#allocation5 + $0x17d8] ss:$24 sps:$4 sm:$0xff]  }
 0x463   : > { %11043 = vmatprep.mubr.bf16.mxu1 %v23311_v35  ;;  %11072 = vmatprep.subr.bf16.mxu1 %v17307_v59  ;;  %v17349_v59 = vld [vmem:[#allocation5 + $0x180c] ss:$24 sps:$4 sm:$0xff]  }
 0x464   : > { %12150 = vmatmul.mubr.bf16.gmra.mrb[40].mxu0 %v23310_v51  ;;  %v17347_v51 = vld [vmem:[#allocation5 + $0x1808] ss:$24 sps:$4 sm:$0xff]  }
 0x465   : > { %12187 = vmatpush1.bf16.msra.mxu0 %v17302_v42  ;;  %12159 = vmatprep.mubr.bf16.mxu0 %v23311_v35  ;;  %v17344_v42 = vld [vmem:[#allocation5 + $0x17e0] ss:$24 sps:$4 sm:$0xff]   ;;  %v17350_v35 = vld [vmem:[#allocation5 + $0x1810] ss:$24 sps:$4 sm:$0xff]  }
 0x466   : > { %12188 = vmatprep.subr.bf16.mxu0 %v17310_v27  ;;  %11073 = vmatpush1.bf16.msra.mxu1 %v17305_v58  ;;  %v17352_v27 = vld [vmem:[#allocation5 + $0x1814] ss:$24 sps:$4 sm:$0xff]  }
 0x467   : > { %11074 = vmatprep.subr.bf16.mxu1 %v17313_v31  ;;  %v17355_v58 = vld [vmem:[#allocation5 + $0x183c] ss:$24 sps:$4 sm:$0xff]   ;;  %v23314_v31 = vld [vmem:[#allocation27_spill] sm:$0xff] }
 0x469   : > { %12189 = vmatpush1.bf16.msra.mxu0 %v17308_v12  ;;  %11044 = vmatmul.mubr.bf16.gmra.mrb[44].mxu1 %v23312_v32  ;;  %v17358_v12 = vld [vmem:[#allocation5 + $0x1844] ss:$24 sps:$4 sm:$0xff]  }
 0x46a   : > { %12190 = vmatprep.subr.bf16.mxu0 %v17316_v54  ;;  %11075 = vmatpush1.bf16.msra.mxu1 %v17311_v16  ;;  %v17353_v54 = vld [vmem:[#allocation5 + $0x1838] ss:$24 sps:$4 sm:$0xff]  }
 0x46b   : > { %11086 = vmatprep.mubr.bf16.mxu1 %v23313_v19  ;;  %11076 = vmatprep.subr.bf16.mxu1 %v17319_v26  ;;  %v23315_v16 = vld [vmem:[#allocation29_spill] sm:$0xff]  ;;  %v17361_v26 = vld [vmem:[#allocation5 + $0x186c] ss:$24 sps:$4 sm:$0xff]  }
 0x46c   : > { %12160 = vmatmul.mubr.bf16.gmra.mrb[44].mxu0 %v23312_v32  ;;  %v17359_v32 = vld [vmem:[#allocation5 + $0x1868] ss:$24 sps:$4 sm:$0xff]  }
 0x46d   : > { %12191 = vmatpush1.bf16.msra.mxu0 %v17314_v40  ;;  %12202 = vmatprep.mubr.bf16.mxu0 %v23313_v19  ;;  %v17356_v40 = vld [vmem:[#allocation5 + $0x1840] ss:$24 sps:$4 sm:$0xff]   ;;  %v17362_v19 = vld [vmem:[#allocation5 + $0x1870] ss:$24 sps:$4 sm:$0xff]  }
 0x46e   : > { %12192 = vmatprep.subr.bf16.mxu0 %v17322_v52  ;;  %11077 = vmatpush1.bf16.msra.mxu1 %v17317_v14  ;;  %v17364_v52 = vld [vmem:[#allocation5 + $0x1874] ss:$24 sps:$4 sm:$0xff]  }
 0x46f   : > { %11078 = vmatprep.subr.bf16.mxu1 %v17325_v57  ;;  %v17367_v14 = vld [vmem:[#allocation5 + $0x189c] ss:$24 sps:$4 sm:$0xff]  }
 0x470   : > { %v17370_v57 = vld [vmem:[#allocation5 + $0x18a4] ss:$24 sps:$4 sm:$0xff]  }
 0x471   : > { %12193 = vmatpush1.bf16.msra.mxu0 %v17320_v29  ;;  %v23316_v29 = vld [vmem:[#allocation30_spill] sm:$0xff] }
 0x472   : > { %12194 = vmatprep.subr.bf16.mxu0 %v17328_v38  ;;  %11079 = vmatpush1.bf16.msra.mxu1 %v17323_v15  ;;  %v17365_v38 = vld [vmem:[#allocation5 + $0x1898] ss:$24 sps:$4 sm:$0xff]   ;;  %v23317_v15 = vld [vmem:[#allocation31_spill] sm:$0xff] }
 0x473   : > { %11080 = vmatprep.subr.bf16.mxu1 %v17331_v55  ;;  %v17373_v55 = vld [vmem:[#allocation5 + $0x18cc] ss:$24 sps:$4 sm:$0xff]  }
 0x475   : > { %12195 = vmatpush1.bf16.msra.mxu0 %v17326_v60  ;;  %v17368_v60 = vld [vmem:[#allocation5 + $0x18a0] ss:$24 sps:$4 sm:$0xff]  }
 0x476   : > { %12196 = vmatprep.subr.bf16.mxu0 %v17334_v7  ;;  %11081 = vmatpush1.bf16.msra.mxu1 %v17329_v49  ;;  %v17376_v7 = vld [vmem:[#allocation5 + $0x18d4] ss:$24 sps:$4 sm:$0xff]   ;;  %v17371_v49 = vld [vmem:[#allocation5 + $0x18c8] ss:$24 sps:$4 sm:$0xff]  }
 0x477   : > { %11082 = vmatprep.subr.bf16.mxu1 %v17337_v36  ;;  %v17379_v36 = vld [vmem:[#allocation5 + $0x18fc] ss:$24 sps:$4 sm:$0xff]  }
 0x479   : > { %12197 = vmatpush1.bf16.msra.mxu0 %v17332_v22  ;;  %v17374_v22 = vld [vmem:[#allocation5 + $0x18d0] ss:$24 sps:$4 sm:$0xff]  }
 0x47a   : > { %12198 = vmatprep.subr.bf16.mxu0 %v17340_v45  ;;  %11083 = vmatpush1.bf16.msra.mxu1 %v17335_v61  ;;  %v17382_v45 = vld [vmem:[#allocation5 + $0x1904] ss:$24 sps:$4 sm:$0xff]   ;;  %v23318_v61 = vld [vmem:[#allocation32_spill] sm:$0xff] }
 0x47b   : > { %11084 = vmatprep.subr.bf16.mxu1 %v17343_v37  ;;  %v17377_v37 = vld [vmem:[#allocation5 + $0x18f8] ss:$24 sps:$4 sm:$0xff]  }
 0x47d   : > { %12199 = vmatpush1.bf16.msra.mxu0 %v17338_v30  ;;  %v23319_v30 = vld [vmem:[#allocation33_spill] sm:$0xff] }
 0x47e   : > { %12200 = vmatprep.subr.bf16.mxu0 %v17346_v28  ;;  %11085 = vmatpush1.bf16.msra.mxu1 %v17341_v41  ;;  %v17385_v28 = vld [vmem:[#allocation5 + $0x192c] ss:$24 sps:$4 sm:$0xff]   ;;  %v17380_v41 = vld [vmem:[#allocation5 + $0x1900] ss:$24 sps:$4 sm:$0xff]  }
 0x47f   : > { %11147 = vmatprep.subr.bf16.mxu1 %v17349_v59  ;;  %v17388_v59 = vld [vmem:[#allocation5 + $0x1934] ss:$24 sps:$4 sm:$0xff]  }
 0x481   : > { %12201 = vmatpush1.bf16.msra.mxu0 %v17344_v42  ;;  %11087 = vmatmul.mubr.bf16.vlgmr.msra.gmra.mrb[24].mxu1 %v23314_v31  ;;  %v17383_v42 = vld [vmem:[#allocation5 + $0x1928] ss:$24 sps:$4 sm:$0xff]  }
 0x482   : > { %12263 = vmatprep.subr.bf16.mxu0 %v17352_v27  ;;  %11148 = vmatpush1.bf16.msra.mxu1 %v17347_v51  ;;  %v17391_v27 = vld [vmem:[#allocation5 + $0x195c] ss:$24 sps:$4 sm:$0xff]   ;;  %v17386_v51 = vld [vmem:[#allocation5 + $0x1930] ss:$24 sps:$4 sm:$0xff]  }
 0x483   : > { %11096 = vmatprep.mubr.bf16.mxu1 %v23315_v16  ;;  %11149 = vmatprep.subr.bf16.mxu1 %v17355_v58  ;;  %v17394_v58 = vld [vmem:[#allocation5 + $0x1964] ss:$24 sps:$4 sm:$0xff]  }
 0x484   : > { %12203 = vmatmul.mubr.bf16.vlgmr.msra.gmra.mrb[24].mxu0 %v23314_v31  ;;  %v17389_v31 = vld [vmem:[#allocation5 + $0x1958] ss:$24 sps:$4 sm:$0xff]  }
 0x485   : > { %12264 = vmatpush1.bf16.msra.mxu0 %v17350_v35  ;;  %12212 = vmatprep.mubr.bf16.mxu0 %v23315_v16  ;;  %v23320_v35 = vld [vmem:[#allocation34_spill] sm:$0xff] }
 0x486   : > { %12265 = vmatprep.subr.bf16.mxu0 %v17358_v12  ;;  %11150 = vmatpush1.bf16.msra.mxu1 %v17353_v54  ;;  %v23321_v12 = vld [vmem:[#allocation35_spill] sm:$0xff] }
 0x487   : > { %11151 = vmatprep.subr.bf16.mxu1 %v17361_v26  ;;  %v17397_v54 = vld [vmem:[#allocation5 + $0x198c] ss:$24 sps:$4 sm:$0xff]   ;;  %v17392_v16 = vld [vmem:[#allocation5 + $0x1960] ss:$24 sps:$4 sm:$0xff]  }
 0x488   : > { %v17400_v26 = vld [vmem:[#allocation5 + $0x1994] ss:$24 sps:$4 sm:$0xff]  }
 0x489   : > { %12266 = vmatpush1.bf16.msra.mxu0 %v17356_v40  ;;  %11097 = vmatmul.mubr.bf16.gmra.mrb[28].mxu1 %v23316_v29  ;;  %v17395_v40 = vld [vmem:[#allocation5 + $0x1988] ss:$24 sps:$4 sm:$0xff]  }
 0x48a   : > { %12267 = vmatprep.subr.bf16.mxu0 %v17364_v52  ;;  %11152 = vmatpush1.bf16.msra.mxu1 %v17359_v32  ;;  %v17403_v52 = vld [vmem:[#allocation5 + $0x19bc] ss:$24 sps:$4 sm:$0xff]   ;;  %v17398_v32 = vld [vmem:[#allocation5 + $0x1990] ss:$24 sps:$4 sm:$0xff]  }
 0x48b   : > { %11106 = vmatprep.mubr.bf16.mxu1 %v23317_v15  ;;  %11153 = vmatprep.subr.bf16.mxu1 %v17367_v14  ;;  %v17406_v14 = vld [vmem:[#allocation5 + $0x19c4] ss:$24 sps:$4 sm:$0xff]  }
 0x48c   : > { %12213 = vmatmul.mubr.bf16.gmra.mrb[28].mxu0 %v23316_v29  ;;  %v23323_v29 = vld [vmem:[#allocation37_spill] sm:$0xff] }
 0x48d   : > { %12268 = vmatpush1.bf16.msra.mxu0 %v17362_v19  ;;  %12222 = vmatprep.mubr.bf16.mxu0 %v23317_v15  ;;  %v23322_v19 = vld [vmem:[#allocation36_spill] sm:$0xff]  ;;  %v17404_v15 = vld [vmem:[#allocation5 + $0x19c0] ss:$24 sps:$4 sm:$0xff]  }
 0x48e   : > { %12269 = vmatprep.subr.bf16.mxu0 %v17370_v57  ;;  %11154 = vmatpush1.bf16.msra.mxu1 %v17365_v38  ;;  %v17401_v57 = vld [vmem:[#allocation5 + $0x19b8] ss:$24 sps:$4 sm:$0xff]   ;;  %v17409_v38 = vld [vmem:[#allocation5 + $0x19ec] ss:$24 sps:$4 sm:$0xff]  }
 0x48f   : > { %11155 = vmatprep.subr.bf16.mxu1 %v17373_v55  ;;  %v17412_v55 = vld [vmem:[#allocation5 + $0x19f4] ss:$24 sps:$4 sm:$0xff]  }
 0x491   : > { %12270 = vmatpush1.bf16.msra.mxu0 %v17368_v60  ;;  %11107 = vmatmul.mubr.bf16.gmra.mrb[32].mxu1 %v23318_v61  ;;  %v17407_v60 = vld [vmem:[#allocation5 + $0x19e8] ss:$24 sps:$4 sm:$0xff]  }
 0x492   : > { %12271 = vmatprep.subr.bf16.mxu0 %v17376_v7  ;;  %11156 = vmatpush1.bf16.msra.mxu1 %v17371_v49  ;;  %v17415_v7 = vld [vmem:[#allocation5 + $0x1a1c] ss:$24 sps:$4 sm:$0xff]   ;;  %v17410_v49 = vld [vmem:[#allocation5 + $0x19f0] ss:$24 sps:$4 sm:$0xff]  }
 0x493   : > { %11116 = vmatprep.mubr.bf16.mxu1 %v23319_v30  ;;  %11157 = vmatprep.subr.bf16.mxu1 %v17379_v36  ;;  %v17418_v36 = vld [vmem:[#allocation5 + $0x1a24] ss:$24 sps:$4 sm:$0xff]  }
 0x494   : > { %12223 = vmatmul.mubr.bf16.gmra.mrb[32].mxu0 %v23318_v61  ;;  %v23325_v61 = vld [vmem:[#allocation40_spill] sm:$0xff] }
 0x495   : > { %12272 = vmatpush1.bf16.msra.mxu0 %v17374_v22  ;;  %12232 = vmatprep.mubr.bf16.mxu0 %v23319_v30  ;;  %v23324_v22 = vld [vmem:[#allocation38_spill] sm:$0xff] }
 0x496   : > { %12273 = vmatprep.subr.bf16.mxu0 %v17382_v45  ;;  %11158 = vmatpush1.bf16.msra.mxu1 %v17377_v37  ;;  %v17413_v45 = vld [vmem:[#allocation5 + $0x1a18] ss:$24 sps:$4 sm:$0xff]   ;;  %v17421_v37 = vld [vmem:[#allocation5 + $0x1a4c] ss:$24 sps:$4 sm:$0xff]  }
 0x497   : > { %11159 = vmatprep.subr.bf16.mxu1 %v17385_v28  ;;  %v17416_v30 = vld [vmem:[#allocation5 + $0x1a20] ss:$24 sps:$4 sm:$0xff]   ;;  %v17424_v28 = vld [vmem:[#allocation5 + $0x1a54] ss:$24 sps:$4 sm:$0xff]  }
 0x499   : > { %12274 = vmatpush1.bf16.msra.mxu0 %v17380_v41  ;;  %11117 = vmatmul.mubr.bf16.gmra.mrb[36].mxu1 %v23320_v35  ;;  %v17419_v41 = vld [vmem:[#allocation5 + $0x1a48] ss:$24 sps:$4 sm:$0xff]  }
 0x49a   : > { %12275 = vmatprep.subr.bf16.mxu0 %v17388_v59  ;;  %11160 = vmatpush1.bf16.msra.mxu1 %v17383_v42  ;;  %v17427_v59 = vld [vmem:[#allocation5 + $0x1a7c] ss:$24 sps:$4 sm:$0xff]   ;;  %v17422_v42 = vld [vmem:[#allocation5 + $0x1a50] ss:$24 sps:$4 sm:$0xff]  }
 0x49b   : > { %11126 = vmatprep.mubr.bf16.mxu1 %v23321_v12  ;;  %11161 = vmatprep.subr.bf16.mxu1 %v17391_v27  ;;  %v17430_v27 = vld [vmem:[#allocation5 + $0x1a84] ss:$24 sps:$4 sm:$0xff]  }
 0x49c   : > { %12233 = vmatmul.mubr.bf16.gmra.mrb[36].mxu0 %v23320_v35  ;;  %v17428_v35 = vld [vmem:[#allocation5 + $0x1a80] ss:$24 sps:$4 sm:$0xff]  }
 0x49d   : > { %12276 = vmatpush1.bf16.msra.mxu0 %v17386_v51  ;;  %12242 = vmatprep.mubr.bf16.mxu0 %v23321_v12  ;;  %v17425_v51 = vld [vmem:[#allocation5 + $0x1a78] ss:$24 sps:$4 sm:$0xff]   ;;  %v17431_v12 = vld [vmem:[#allocation5 + $0x1aa8] ss:$24 sps:$4 sm:$0xff]  }
 0x49e   : > { %12277 = vmatprep.subr.bf16.mxu0 %v17394_v58  ;;  %11162 = vmatpush1.bf16.msra.mxu1 %v17389_v31  ;;  %v17433_v58 = vld [vmem:[#allocation5 + $0x1aac] ss:$24 sps:$4 sm:$0xff]  }
 0x49f   : > { %11163 = vmatprep.subr.bf16.mxu1 %v17397_v54  ;;  %v17436_v31 = vld [vmem:[#allocation5 + $0x1ab4] ss:$24 sps:$4 sm:$0xff]  }
 0x4a0   : > { %v17439_v54 = vld [vmem:[#allocation5 + $0x1adc] ss:$24 sps:$4 sm:$0xff]  }
 0x4a1   : > { %12278 = vmatpush1.bf16.msra.mxu0 %v17392_v16  ;;  %11127 = vmatmul.mubr.bf16.gmra.mrb[40].mxu1 %v23322_v19  ;;  %v17434_v16 = vld [vmem:[#allocation5 + $0x1ab0] ss:$24 sps:$4 sm:$0xff]  }
 0x4a2   : > { %12279 = vmatprep.subr.bf16.mxu0 %v17400_v26  ;;  %11164 = vmatpush1.bf16.msra.mxu1 %v17395_v40  ;;  %v17442_v26 = vld [vmem:[#allocation5 + $0x1ae4] ss:$24 sps:$4 sm:$0xff]   ;;  %v17437_v40 = vld [vmem:[#allocation5 + $0x1ad8] ss:$24 sps:$4 sm:$0xff]  }
 0x4a3   : > { %11136 = vmatprep.mubr.bf16.mxu1 %v23323_v29  ;;  %11165 = vmatprep.subr.bf16.mxu1 %v17403_v52  ;;  %v17445_v52 = vld [vmem:[#allocation5 + $0x1b0c] ss:$24 sps:$4 sm:$0xff]  }
 0x4a4   : > { %12243 = vmatmul.mubr.bf16.gmra.mrb[40].mxu0 %v23322_v19  ;;  %v17443_v19 = vld [vmem:[#allocation5 + $0x1b08] ss:$24 sps:$4 sm:$0xff]  }
 0x4a5   : > { %12280 = vmatpush1.bf16.msra.mxu0 %v17398_v32  ;;  %12252 = vmatprep.mubr.bf16.mxu0 %v23323_v29  ;;  %v17440_v32 = vld [vmem:[#allocation5 + $0x1ae0] ss:$24 sps:$4 sm:$0xff]   ;;  %v17446_v29 = vld [vmem:[#allocation5 + $0x1b10] ss:$24 sps:$4 sm:$0xff]  }
 0x4a6   : > { %12281 = vmatprep.subr.bf16.mxu0 %v17406_v14  ;;  %11166 = vmatpush1.bf16.msra.mxu1 %v17401_v57  ;;  %v17448_v14 = vld [vmem:[#allocation5 + $0x1b14] ss:$24 sps:$4 sm:$0xff]  }
 0x4a7   : > { %11167 = vmatprep.subr.bf16.mxu1 %v17409_v38  ;;  %v17451_v57 = vld [vmem:[#allocation5 + $0x1b3c] ss:$24 sps:$4 sm:$0xff]   ;;  %v23326_v38 = vld [vmem:[#allocation39_spill] sm:$0xff] }
 0x4a9   : > { %12282 = vmatpush1.bf16.msra.mxu0 %v17404_v15  ;;  %11137 = vmatmul.mubr.bf16.gmra.mrb[44].mxu1 %v23324_v22  ;;  %v17454_v15 = vld [vmem:[#allocation5 + $0x1b44] ss:$24 sps:$4 sm:$0xff]  }
 0x4aa   : > { %12283 = vmatprep.subr.bf16.mxu0 %v17412_v55  ;;  %11168 = vmatpush1.bf16.msra.mxu1 %v17407_v60  ;;  %v17449_v55 = vld [vmem:[#allocation5 + $0x1b38] ss:$24 sps:$4 sm:$0xff]  }
 0x4ab   : > { %11179 = vmatprep.mubr.bf16.mxu1 %v23325_v61  ;;  %11169 = vmatprep.subr.bf16.mxu1 %v17415_v7  ;;  %v23327_v60 = vld [vmem:[#allocation42_spill] sm:$0xff]  ;;  %v17457_v7 = vld [vmem:[#allocation5 + $0x1b6c] ss:$24 sps:$4 sm:$0xff]  }
 0x4ac   : > { %12253 = vmatmul.mubr.bf16.gmra.mrb[44].mxu0 %v23324_v22  ;;  %v17455_v22 = vld [vmem:[#allocation5 + $0x1b68] ss:$24 sps:$4 sm:$0xff]  }
 0x4ad   : > { %12284 = vmatpush1.bf16.msra.mxu0 %v17410_v49  ;;  %12295 = vmatprep.mubr.bf16.mxu0 %v23325_v61  ;;  %v17452_v49 = vld [vmem:[#allocation5 + $0x1b40] ss:$24 sps:$4 sm:$0xff]   ;;  %v17458_v61 = vld [vmem:[#allocation5 + $0x1b70] ss:$24 sps:$4 sm:$0xff]  }
 0x4ae   : > { %12285 = vmatprep.subr.bf16.mxu0 %v17418_v36  ;;  %11170 = vmatpush1.bf16.msra.mxu1 %v17413_v45  ;;  %v17460_v36 = vld [vmem:[#allocation5 + $0x1b74] ss:$24 sps:$4 sm:$0xff]  }
 0x4af   : > { %11171 = vmatprep.subr.bf16.mxu1 %v17421_v37  ;;  %v17463_v45 = vld [vmem:[#allocation5 + $0x1b9c] ss:$24 sps:$4 sm:$0xff]  }
 0x4b0   : > { %v17466_v37 = vld [vmem:[#allocation5 + $0x1ba4] ss:$24 sps:$4 sm:$0xff]  }
 0x4b1   : > { %12286 = vmatpush1.bf16.msra.mxu0 %v17416_v30  ;;  %v23328_v30 = vld [vmem:[#allocation44_spill] sm:$0xff] }
 0x4b2   : > { %12287 = vmatprep.subr.bf16.mxu0 %v17424_v28  ;;  %11172 = vmatpush1.bf16.msra.mxu1 %v17419_v41  ;;  %v17461_v28 = vld [vmem:[#allocation5 + $0x1b98] ss:$24 sps:$4 sm:$0xff]  }
 0x4b3   : > { %11173 = vmatprep.subr.bf16.mxu1 %v17427_v59  ;;  %v23329_v41 = vld [vmem:[#allocation46_spill] sm:$0xff]  ;;  %v17469_v59 = vld [vmem:[#allocation5 + $0x1bcc] ss:$24 sps:$4 sm:$0xff]  }
 0x4b5   : > { %12288 = vmatpush1.bf16.msra.mxu0 %v17422_v42  ;;  %v17464_v42 = vld [vmem:[#allocation5 + $0x1ba0] ss:$24 sps:$4 sm:$0xff]  }
 0x4b6   : > { %12289 = vmatprep.subr.bf16.mxu0 %v17430_v27  ;;  %11174 = vmatpush1.bf16.msra.mxu1 %v17425_v51  ;;  %v17472_v27 = vld [vmem:[#allocation5 + $0x1bd4] ss:$24 sps:$4 sm:$0xff]   ;;  %v17467_v51 = vld [vmem:[#allocation5 + $0x1bc8] ss:$24 sps:$4 sm:$0xff]  }
 0x4b7   : > { %11175 = vmatprep.subr.bf16.mxu1 %v17433_v58  ;;  %v17475_v58 = vld [vmem:[#allocation5 + $0x1bfc] ss:$24 sps:$4 sm:$0xff]  }
 0x4b9   : > { %12290 = vmatpush1.bf16.msra.mxu0 %v17428_v35  ;;  %v17470_v35 = vld [vmem:[#allocation5 + $0x1bd0] ss:$24 sps:$4 sm:$0xff]  }
 0x4ba   : > { %12291 = vmatprep.subr.bf16.mxu0 %v17436_v31  ;;  %11176 = vmatpush1.bf16.msra.mxu1 %v17431_v12  ;;  %v17478_v31 = vld [vmem:[#allocation5 + $0x1c04] ss:$24 sps:$4 sm:$0xff]   ;;  %v23330_v12 = vld [vmem:[#allocation48_spill] sm:$0xff] }
 0x4bb   : > { %11177 = vmatprep.subr.bf16.mxu1 %v17439_v54  ;;  %v17473_v54 = vld [vmem:[#allocation5 + $0x1bf8] ss:$24 sps:$4 sm:$0xff]  }
 0x4bd   : > { %12292 = vmatpush1.bf16.msra.mxu0 %v17434_v16  ;;  %v23331_v16 = vld [vmem:[#allocation50_spill] sm:$0xff] }
 0x4be   : > { %12293 = vmatprep.subr.bf16.mxu0 %v17442_v26  ;;  %11178 = vmatpush1.bf16.msra.mxu1 %v17437_v40  ;;  %v17481_v26 = vld [vmem:[#allocation5 + $0x1c2c] ss:$24 sps:$4 sm:$0xff]   ;;  %v17476_v40 = vld [vmem:[#allocation5 + $0x1c00] ss:$24 sps:$4 sm:$0xff]  }
 0x4bf   : > { %11240 = vmatprep.subr.bf16.mxu1 %v17445_v52  ;;  %v17484_v52 = vld [vmem:[#allocation5 + $0x1c34] ss:$24 sps:$4 sm:$0xff]  }
 0x4c1   : > { %12294 = vmatpush1.bf16.msra.mxu0 %v17440_v32  ;;  %11180 = vmatmul.mubr.bf16.vlgmr.msra.gmra.mrb[24].mxu1 %v23326_v38  ;;  %v17479_v32 = vld [vmem:[#allocation5 + $0x1c28] ss:$24 sps:$4 sm:$0xff]  }
 0x4c2   : > { %12356 = vmatprep.subr.bf16.mxu0 %v17448_v14  ;;  %11241 = vmatpush1.bf16.msra.mxu1 %v17443_v19  ;;  %v17487_v14 = vld [vmem:[#allocation5 + $0x1c5c] ss:$24 sps:$4 sm:$0xff]   ;;  %v17482_v19 = vld [vmem:[#allocation5 + $0x1c30] ss:$24 sps:$4 sm:$0xff]  }
 0x4c3   : > { %11189 = vmatprep.mubr.bf16.mxu1 %v23327_v60  ;;  %11242 = vmatprep.subr.bf16.mxu1 %v17451_v57  ;;  %v17490_v57 = vld [vmem:[#allocation5 + $0x1c64] ss:$24 sps:$4 sm:$0xff]  }
 0x4c4   : > { %12296 = vmatmul.mubr.bf16.vlgmr.msra.gmra.mrb[24].mxu0 %v23326_v38  ;;  %v17485_v38 = vld [vmem:[#allocation5 + $0x1c58] ss:$24 sps:$4 sm:$0xff]  }
 0x4c5   : > { %12357 = vmatpush1.bf16.msra.mxu0 %v17446_v29  ;;  %12305 = vmatprep.mubr.bf16.mxu0 %v23327_v60  ;;  %v23332_v29 = vld [vmem:[#allocation52_spill] sm:$0xff]  ;;  %v17488_v60 = vld [vmem:[#allocation5 + $0x1c60] ss:$24 sps:$4 sm:$0xff]  }
 0x4c6   : > { %12358 = vmatprep.subr.bf16.mxu0 %v17454_v15  ;;  %11243 = vmatpush1.bf16.msra.mxu1 %v17449_v55  ;;  %v23333_v15 = vld [vmem:[#allocation54_spill] sm:$0xff]  ;;  %v17493_v55 = vld [vmem:[#allocation5 + $0x1c8c] ss:$24 sps:$4 sm:$0xff]  }
 0x4c7   : > { %11244 = vmatprep.subr.bf16.mxu1 %v17457_v7  ;;  %v17496_v7 = vld [vmem:[#allocation5 + $0x1c94] ss:$24 sps:$4 sm:$0xff]  }
 0x4c9   : > { %12359 = vmatpush1.bf16.msra.mxu0 %v17452_v49  ;;  %11190 = vmatmul.mubr.bf16.gmra.mrb[28].mxu1 %v23328_v30  ;;  %v17491_v49 = vld [vmem:[#allocation5 + $0x1c88] ss:$24 sps:$4 sm:$0xff]  }
 0x4ca   : > { %12360 = vmatprep.subr.bf16.mxu0 %v17460_v36  ;;  %11245 = vmatpush1.bf16.msra.mxu1 %v17455_v22  ;;  %v17499_v36 = vld [vmem:[#allocation5 + $0x1cbc] ss:$24 sps:$4 sm:$0xff]   ;;  %v17494_v22 = vld [vmem:[#allocation5 + $0x1c90] ss:$24 sps:$4 sm:$0xff]  }
 0x4cb   : > { %11199 = vmatprep.mubr.bf16.mxu1 %v23329_v41  ;;  %11246 = vmatprep.subr.bf16.mxu1 %v17463_v45  ;;  %v17502_v45 = vld [vmem:[#allocation5 + $0x1cc4] ss:$24 sps:$4 sm:$0xff]  }
 0x4cc   : > { %12306 = vmatmul.mubr.bf16.gmra.mrb[28].mxu0 %v23328_v30  ;;  %v23335_v30 = vld [vmem:[#allocation58_spill] sm:$0xff] }
 0x4cd   : > { %12361 = vmatpush1.bf16.msra.mxu0 %v17458_v61  ;;  %12315 = vmatprep.mubr.bf16.mxu0 %v23329_v41  ;;  %v23334_v61 = vld [vmem:[#allocation56_spill] sm:$0xff]  ;;  %v17500_v41 = vld [vmem:[#allocation5 + $0x1cc0] ss:$24 sps:$4 sm:$0xff]  }
 0x4ce   : > { %12362 = vmatprep.subr.bf16.mxu0 %v17466_v37  ;;  %11247 = vmatpush1.bf16.msra.mxu1 %v17461_v28  ;;  %v17497_v37 = vld [vmem:[#allocation5 + $0x1cb8] ss:$24 sps:$4 sm:$0xff]   ;;  %v17505_v28 = vld [vmem:[#allocation5 + $0x1cec] ss:$24 sps:$4 sm:$0xff]  }
 0x4cf   : > { %11248 = vmatprep.subr.bf16.mxu1 %v17469_v59  ;;  %v17508_v59 = vld [vmem:[#allocation5 + $0x1cf4] ss:$24 sps:$4 sm:$0xff]  }
 0x4d1   : > { %12363 = vmatpush1.bf16.msra.mxu0 %v17464_v42  ;;  %11200 = vmatmul.mubr.bf16.gmra.mrb[32].mxu1 %v23330_v12  ;;  %v17503_v42 = vld [vmem:[#allocation5 + $0x1ce8] ss:$24 sps:$4 sm:$0xff]  }
 0x4d2   : > { %12364 = vmatprep.subr.bf16.mxu0 %v17472_v27  ;;  %11249 = vmatpush1.bf16.msra.mxu1 %v17467_v51  ;;  %v17511_v27 = vld [vmem:[#allocation5 + $0x1d1c] ss:$24 sps:$4 sm:$0xff]   ;;  %v17506_v51 = vld [vmem:[#allocation5 + $0x1cf0] ss:$24 sps:$4 sm:$0xff]  }
 0x4d3   : > { %11209 = vmatprep.mubr.bf16.mxu1 %v23331_v16  ;;  %11250 = vmatprep.subr.bf16.mxu1 %v17475_v58  ;;  %v17514_v58 = vld [vmem:[#allocation5 + $0x1d24] ss:$24 sps:$4 sm:$0xff]  }
 0x4d4   : > { %12316 = vmatmul.mubr.bf16.gmra.mrb[32].mxu0 %v23330_v12  ;;  %v23337_v12 = vld [vmem:[#allocation64_spill] sm:$0xff] }
 0x4d5   : > { %12365 = vmatpush1.bf16.msra.mxu0 %v17470_v35  ;;  %12325 = vmatprep.mubr.bf16.mxu0 %v23331_v16  ;;  %v23336_v35 = vld [vmem:[#allocation60_spill] sm:$0xff]  ;;  %v17512_v16 = vld [vmem:[#allocation5 + $0x1d20] ss:$24 sps:$4 sm:$0xff]  }
 0x4d6   : > { %12366 = vmatprep.subr.bf16.mxu0 %v17478_v31  ;;  %11251 = vmatpush1.bf16.msra.mxu1 %v17473_v54  ;;  %v17509_v31 = vld [vmem:[#allocation5 + $0x1d18] ss:$24 sps:$4 sm:$0xff]   ;;  %v17517_v54 = vld [vmem:[#allocation5 + $0x1d4c] ss:$24 sps:$4 sm:$0xff]  }
 0x4d7   : > { %11252 = vmatprep.subr.bf16.mxu1 %v17481_v26  ;;  %v17520_v26 = vld [vmem:[#allocation5 + $0x1d54] ss:$24 sps:$4 sm:$0xff]  }
 0x4d9   : > { %12367 = vmatpush1.bf16.msra.mxu0 %v17476_v40  ;;  %11210 = vmatmul.mubr.bf16.gmra.mrb[36].mxu1 %v23332_v29  ;;  %v17515_v40 = vld [vmem:[#allocation5 + $0x1d48] ss:$24 sps:$4 sm:$0xff]  }
 0x4da   : > { %12368 = vmatprep.subr.bf16.mxu0 %v17484_v52  ;;  %11253 = vmatpush1.bf16.msra.mxu1 %v17479_v32  ;;  %v17523_v52 = vld [vmem:[#allocation5 + $0x1d7c] ss:$24 sps:$4 sm:$0xff]   ;;  %v17518_v32 = vld [vmem:[#allocation5 + $0x1d50] ss:$24 sps:$4 sm:$0xff]  }
 0x4db   : > { %11219 = vmatprep.mubr.bf16.mxu1 %v23333_v15  ;;  %11254 = vmatprep.subr.bf16.mxu1 %v17487_v14  ;;  %v17526_v14 = vld [vmem:[#allocation5 + $0x1d84] ss:$24 sps:$4 sm:$0xff]  }
 0x4dc   : > { %12326 = vmatmul.mubr.bf16.gmra.mrb[36].mxu0 %v23332_v29  ;;  %v17524_v29 = vld [vmem:[#allocation5 + $0x1d80] ss:$24 sps:$4 sm:$0xff]  }
 0x4dd   : > { %12369 = vmatpush1.bf16.msra.mxu0 %v17482_v19  ;;  %12335 = vmatprep.mubr.bf16.mxu0 %v23333_v15  ;;  %v17521_v19 = vld [vmem:[#allocation5 + $0x1d78] ss:$24 sps:$4 sm:$0xff]   ;;  %v17527_v15 = vld [vmem:[#allocation5 + $0x1da8] ss:$24 sps:$4 sm:$0xff]  }
 0x4de   : > { %12370 = vmatprep.subr.bf16.mxu0 %v17490_v57  ;;  %11255 = vmatpush1.bf16.msra.mxu1 %v17485_v38  ;;  %v17529_v57 = vld [vmem:[#allocation5 + $0x1dac] ss:$24 sps:$4 sm:$0xff]  }
 0x4df   : > { %11256 = vmatprep.subr.bf16.mxu1 %v17493_v55  ;;  %v17532_v38 = vld [vmem:[#allocation5 + $0x1db4] ss:$24 sps:$4 sm:$0xff]  }
 0x4e0   : > { %v17535_v55 = vld [vmem:[#allocation5 + $0x1ddc] ss:$24 sps:$4 sm:$0xff]  }
 0x4e1   : > { %12371 = vmatpush1.bf16.msra.mxu0 %v17488_v60  ;;  %11220 = vmatmul.mubr.bf16.gmra.mrb[40].mxu1 %v23334_v61  ;;  %v17530_v60 = vld [vmem:[#allocation5 + $0x1db0] ss:$24 sps:$4 sm:$0xff]  }
 0x4e2   : > { %12372 = vmatprep.subr.bf16.mxu0 %v17496_v7  ;;  %11257 = vmatpush1.bf16.msra.mxu1 %v17491_v49  ;;  %v17538_v7 = vld [vmem:[#allocation5 + $0x1de4] ss:$24 sps:$4 sm:$0xff]   ;;  %v17533_v49 = vld [vmem:[#allocation5 + $0x1dd8] ss:$24 sps:$4 sm:$0xff]  }
 0x4e3   : > { %11229 = vmatprep.mubr.bf16.mxu1 %v23335_v30  ;;  %11258 = vmatprep.subr.bf16.mxu1 %v17499_v36  ;;  %v17541_v36 = vld [vmem:[#allocation5 + $0x1e0c] ss:$24 sps:$4 sm:$0xff]  }
 0x4e4   : > { %12336 = vmatmul.mubr.bf16.gmra.mrb[40].mxu0 %v23334_v61  ;;  %v17539_v61 = vld [vmem:[#allocation5 + $0x1e08] ss:$24 sps:$4 sm:$0xff]  }
 0x4e5   : > { %12373 = vmatpush1.bf16.msra.mxu0 %v17494_v22  ;;  %12345 = vmatprep.mubr.bf16.mxu0 %v23335_v30  ;;  %v17536_v22 = vld [vmem:[#allocation5 + $0x1de0] ss:$24 sps:$4 sm:$0xff]   ;;  %v17542_v30 = vld [vmem:[#allocation5 + $0x1e10] ss:$24 sps:$4 sm:$0xff]  }
 0x4e6   : > { %12374 = vmatprep.subr.bf16.mxu0 %v17502_v45  ;;  %11259 = vmatpush1.bf16.msra.mxu1 %v17497_v37  ;;  %v17544_v45 = vld [vmem:[#allocation5 + $0x1e14] ss:$24 sps:$4 sm:$0xff]  }
 0x4e7   : > { %11260 = vmatprep.subr.bf16.mxu1 %v17505_v28  ;;  %v17547_v37 = vld [vmem:[#allocation5 + $0x1e3c] ss:$24 sps:$4 sm:$0xff]   ;;  %v23338_v28 = vld [vmem:[#allocation63_spill] sm:$0xff] }
 0x4e9   : > { %12375 = vmatpush1.bf16.msra.mxu0 %v17500_v41  ;;  %11230 = vmatmul.mubr.bf16.gmra.mrb[44].mxu1 %v23336_v35  ;;  %v17550_v41 = vld [vmem:[#allocation5 + $0x1e44] ss:$24 sps:$4 sm:$0xff]  }
 0x4ea   : > { %12376 = vmatprep.subr.bf16.mxu0 %v17508_v59  ;;  %11261 = vmatpush1.bf16.msra.mxu1 %v17503_v42  ;;  %v17545_v59 = vld [vmem:[#allocation5 + $0x1e38] ss:$24 sps:$4 sm:$0xff]  }
 0x4eb   : > { %11272 = vmatprep.mubr.bf16.mxu1 %v23337_v12  ;;  %11262 = vmatprep.subr.bf16.mxu1 %v17511_v27  ;;  %v23339_v42 = vld [vmem:[#allocation66_spill] sm:$0xff]  ;;  %v17553_v27 = vld [vmem:[#allocation5 + $0x1e6c] ss:$24 sps:$4 sm:$0xff]  }
 0x4ec   : > { %12346 = vmatmul.mubr.bf16.gmra.mrb[44].mxu0 %v23336_v35  ;;  %v17551_v35 = vld [vmem:[#allocation5 + $0x1e68] ss:$24 sps:$4 sm:$0xff]  }
 0x4ed   : > { %12377 = vmatpush1.bf16.msra.mxu0 %v17506_v51  ;;  %12388 = vmatprep.mubr.bf16.mxu0 %v23337_v12  ;;  %v17548_v51 = vld [vmem:[#allocation5 + $0x1e40] ss:$24 sps:$4 sm:$0xff]   ;;  %v17554_v12 = vld [vmem:[#allocation5 + $0x1e70] ss:$24 sps:$4 sm:$0xff]  }
 0x4ee   : > { %12378 = vmatprep.subr.bf16.mxu0 %v17514_v58  ;;  %11263 = vmatpush1.bf16.msra.mxu1 %v17509_v31  ;;  %v17556_v58 = vld [vmem:[#allocation5 + $0x1e74] ss:$24 sps:$4 sm:$0xff]  }
 0x4ef   : > { %11264 = vmatprep.subr.bf16.mxu1 %v17517_v54  ;;  %v17559_v31 = vld [vmem:[#allocation5 + $0x1e9c] ss:$24 sps:$4 sm:$0xff]  }
 0x4f0   : > { %v17562_v54 = vld [vmem:[#allocation5 + $0x1ea4] ss:$24 sps:$4 sm:$0xff]  }
 0x4f1   : > { %12379 = vmatpush1.bf16.msra.mxu0 %v17512_v16  ;;  %v23340_v16 = vld [vmem:[#allocation68_spill] sm:$0xff] }
 0x4f2   : > { %12380 = vmatprep.subr.bf16.mxu0 %v17520_v26  ;;  %11265 = vmatpush1.bf16.msra.mxu1 %v17515_v40  ;;  %v17557_v26 = vld [vmem:[#allocation5 + $0x1e98] ss:$24 sps:$4 sm:$0xff]  }
 0x4f3   : > { %11266 = vmatprep.subr.bf16.mxu1 %v17523_v52  ;;  %v23341_v40 = vld [vmem:[#allocation70_spill] sm:$0xff]  ;;  %v17565_v52 = vld [vmem:[#allocation5 + $0x1ecc] ss:$24 sps:$4 sm:$0xff]  }
 0x4f5   : > { %12381 = vmatpush1.bf16.msra.mxu0 %v17518_v32  ;;  %v17560_v32 = vld [vmem:[#allocation5 + $0x1ea0] ss:$24 sps:$4 sm:$0xff]  }
 0x4f6   : > { %12382 = vmatprep.subr.bf16.mxu0 %v17526_v14  ;;  %11267 = vmatpush1.bf16.msra.mxu1 %v17521_v19  ;;  %v17568_v14 = vld [vmem:[#allocation5 + $0x1ed4] ss:$24 sps:$4 sm:$0xff]   ;;  %v17563_v19 = vld [vmem:[#allocation5 + $0x1ec8] ss:$24 sps:$4 sm:$0xff]  }
 0x4f7   : > { %11268 = vmatprep.subr.bf16.mxu1 %v17529_v57  ;;  %v17571_v57 = vld [vmem:[#allocation5 + $0x1efc] ss:$24 sps:$4 sm:$0xff]  }
 0x4f9   : > { %12383 = vmatpush1.bf16.msra.mxu0 %v17524_v29  ;;  %v17566_v29 = vld [vmem:[#allocation5 + $0x1ed0] ss:$24 sps:$4 sm:$0xff]  }
 0x4fa   : > { %12384 = vmatprep.subr.bf16.mxu0 %v17532_v38  ;;  %11269 = vmatpush1.bf16.msra.mxu1 %v17527_v15  ;;  %v17574_v38 = vld [vmem:[#allocation5 + $0x1f04] ss:$24 sps:$4 sm:$0xff]   ;;  %v23342_v15 = vld [vmem:[#allocation72_spill] sm:$0xff] }
 0x4fb   : > { %11270 = vmatprep.subr.bf16.mxu1 %v17535_v55  ;;  %v17569_v55 = vld [vmem:[#allocation5 + $0x1ef8] ss:$24 sps:$4 sm:$0xff]  }
 0x4fd   : > { %12385 = vmatpush1.bf16.msra.mxu0 %v17530_v60  ;;  %v23343_v60 = vld [vmem:[#allocation74_spill] sm:$0xff] }
 0x4fe   : > { %12386 = vmatprep.subr.bf16.mxu0 %v17538_v7  ;;  %11271 = vmatpush1.bf16.msra.mxu1 %v17533_v49  ;;  %v17577_v7 = vld [vmem:[#allocation5 + $0x1f2c] ss:$24 sps:$4 sm:$0xff]   ;;  %v17572_v49 = vld [vmem:[#allocation5 + $0x1f00] ss:$24 sps:$4 sm:$0xff]  }
 0x4ff   : > { %11333 = vmatprep.subr.bf16.mxu1 %v17541_v36  ;;  %v17580_v36 = vld [vmem:[#allocation5 + $0x1f34] ss:$24 sps:$4 sm:$0xff]  }
 0x501   : > { %12387 = vmatpush1.bf16.msra.mxu0 %v17536_v22  ;;  %11273 = vmatmul.mubr.bf16.vlgmr.msra.gmra.mrb[24].mxu1 %v23338_v28  ;;  %v17575_v22 = vld [vmem:[#allocation5 + $0x1f28] ss:$24 sps:$4 sm:$0xff]  }
 0x502   : > { %12449 = vmatprep.subr.bf16.mxu0 %v17544_v45  ;;  %11334 = vmatpush1.bf16.msra.mxu1 %v17539_v61  ;;  %v17583_v45 = vld [vmem:[#allocation5 + $0x1f5c] ss:$24 sps:$4 sm:$0xff]   ;;  %v17578_v61 = vld [vmem:[#allocation5 + $0x1f30] ss:$24 sps:$4 sm:$0xff]  }
 0x503   : > { %11282 = vmatprep.mubr.bf16.mxu1 %v23339_v42  ;;  %11335 = vmatprep.subr.bf16.mxu1 %v17547_v37  ;;  %v17586_v37 = vld [vmem:[#allocation5 + $0x1f64] ss:$24 sps:$4 sm:$0xff]  }
 0x504   : > { %12389 = vmatmul.mubr.bf16.vlgmr.msra.gmra.mrb[24].mxu0 %v23338_v28  ;;  %v17581_v28 = vld [vmem:[#allocation5 + $0x1f58] ss:$24 sps:$4 sm:$0xff]  }
 0x505   : > { %12450 = vmatpush1.bf16.msra.mxu0 %v17542_v30  ;;  %12398 = vmatprep.mubr.bf16.mxu0 %v23339_v42  ;;  %v23344_v30 = vld [vmem:[#allocation76_spill] sm:$0xff]  ;;  %v17584_v42 = vld [vmem:[#allocation5 + $0x1f60] ss:$24 sps:$4 sm:$0xff]  }
 0x506   : > { %12451 = vmatprep.subr.bf16.mxu0 %v17550_v41  ;;  %11336 = vmatpush1.bf16.msra.mxu1 %v17545_v59  ;;  %v23345_v41 = vld [vmem:[#allocation78_spill] sm:$0xff]  ;;  %v17589_v59 = vld [vmem:[#allocation5 + $0x1f8c] ss:$24 sps:$4 sm:$0xff]  }
 0x507   : > { %11337 = vmatprep.subr.bf16.mxu1 %v17553_v27  ;;  %v17592_v27 = vld [vmem:[#allocation5 + $0x1f94] ss:$24 sps:$4 sm:$0xff]  }
 0x509   : > { %12452 = vmatpush1.bf16.msra.mxu0 %v17548_v51  ;;  %11283 = vmatmul.mubr.bf16.gmra.mrb[28].mxu1 %v23340_v16  ;;  %v17587_v51 = vld [vmem:[#allocation5 + $0x1f88] ss:$24 sps:$4 sm:$0xff]  }
 0x50a   : > { %12453 = vmatprep.subr.bf16.mxu0 %v17556_v58  ;;  %11338 = vmatpush1.bf16.msra.mxu1 %v17551_v35  ;;  %v17595_v58 = vld [vmem:[#allocation5 + $0x1fbc] ss:$24 sps:$4 sm:$0xff]   ;;  %v17590_v35 = vld [vmem:[#allocation5 + $0x1f90] ss:$24 sps:$4 sm:$0xff]  }
 0x50b   : > { %11292 = vmatprep.mubr.bf16.mxu1 %v23341_v40  ;;  %11339 = vmatprep.subr.bf16.mxu1 %v17559_v31  ;;  %v17598_v31 = vld [vmem:[#allocation5 + $0x1fc4] ss:$24 sps:$4 sm:$0xff]  }
 0x50c   : > { %12399 = vmatmul.mubr.bf16.gmra.mrb[28].mxu0 %v23340_v16  ;;  %v23347_v16 = vld [vmem:[#allocation81_spill] sm:$0xff] }
 0x50d   : > { %12454 = vmatpush1.bf16.msra.mxu0 %v17554_v12  ;;  %12408 = vmatprep.mubr.bf16.mxu0 %v23341_v40  ;;  %v23346_v12 = vld [vmem:[#allocation80_spill] sm:$0xff]  ;;  %v17596_v40 = vld [vmem:[#allocation5 + $0x1fc0] ss:$24 sps:$4 sm:$0xff]  }
 0x50e   : > { %12455 = vmatprep.subr.bf16.mxu0 %v17562_v54  ;;  %11340 = vmatpush1.bf16.msra.mxu1 %v17557_v26  ;;  %v17593_v54 = vld [vmem:[#allocation5 + $0x1fb8] ss:$24 sps:$4 sm:$0xff]   ;;  %v17601_v26 = vld [vmem:[#allocation5 + $0x1fec] ss:$24 sps:$4 sm:$0xff]  }
 0x50f   : > { %11341 = vmatprep.subr.bf16.mxu1 %v17565_v52  ;;  %v17604_v52 = vld [vmem:[#allocation5 + $0x1ff4] ss:$24 sps:$4 sm:$0xff]  }
 0x511   : > { %12456 = vmatpush1.bf16.msra.mxu0 %v17560_v32  ;;  %11293 = vmatmul.mubr.bf16.gmra.mrb[32].mxu1 %v23342_v15  ;;  %v17599_v32 = vld [vmem:[#allocation5 + $0x1fe8] ss:$24 sps:$4 sm:$0xff]  }
 0x512   : > { %12457 = vmatprep.subr.bf16.mxu0 %v17568_v14  ;;  %11342 = vmatpush1.bf16.msra.mxu1 %v17563_v19  ;;  %v17607_v14 = vld [vmem:[#allocation5 + $0x201c] ss:$24 sps:$4 sm:$0xff]   ;;  %v17602_v19 = vld [vmem:[#allocation5 + $0x1ff0] ss:$24 sps:$4 sm:$0xff]  }
 0x513   : > { %11302 = vmatprep.mubr.bf16.mxu1 %v23343_v60  ;;  %11343 = vmatprep.subr.bf16.mxu1 %v17571_v57  ;;  %v17610_v57 = vld [vmem:[#allocation5 + $0x2024] ss:$24 sps:$4 sm:$0xff]  }
 0x514   : > { %12409 = vmatmul.mubr.bf16.gmra.mrb[32].mxu0 %v23342_v15  ;;  %v23349_v15 = vld [vmem:[#allocation86_spill] sm:$0xff] }
 0x515   : > { %12458 = vmatpush1.bf16.msra.mxu0 %v17566_v29  ;;  %12418 = vmatprep.mubr.bf16.mxu0 %v23343_v60  ;;  %v23348_v29 = vld [vmem:[#allocation82_spill] sm:$0xff] }
 0x516   : > { %12459 = vmatprep.subr.bf16.mxu0 %v17574_v38  ;;  %11344 = vmatpush1.bf16.msra.mxu1 %v17569_v55  ;;  %v17605_v38 = vld [vmem:[#allocation5 + $0x2018] ss:$24 sps:$4 sm:$0xff]   ;;  %v17613_v55 = vld [vmem:[#allocation5 + $0x204c] ss:$24 sps:$4 sm:$0xff]  }
 0x517   : > { %11345 = vmatprep.subr.bf16.mxu1 %v17577_v7  ;;  %v17608_v60 = vld [vmem:[#allocation5 + $0x2020] ss:$24 sps:$4 sm:$0xff]   ;;  %v17616_v7 = vld [vmem:[#allocation5 + $0x2054] ss:$24 sps:$4 sm:$0xff]  }
 0x519   : > { %12460 = vmatpush1.bf16.msra.mxu0 %v17572_v49  ;;  %11303 = vmatmul.mubr.bf16.gmra.mrb[36].mxu1 %v23344_v30  ;;  %v17611_v49 = vld [vmem:[#allocation5 + $0x2048] ss:$24 sps:$4 sm:$0xff]  }
 0x51a   : > { %12461 = vmatprep.subr.bf16.mxu0 %v17580_v36  ;;  %11346 = vmatpush1.bf16.msra.mxu1 %v17575_v22  ;;  %v17619_v36 = vld [vmem:[#allocation5 + $0x207c] ss:$24 sps:$4 sm:$0xff]   ;;  %v17614_v22 = vld [vmem:[#allocation5 + $0x2050] ss:$24 sps:$4 sm:$0xff]  }
 0x51b   : > { %11312 = vmatprep.mubr.bf16.mxu1 %v23345_v41  ;;  %11347 = vmatprep.subr.bf16.mxu1 %v17583_v45  ;;  %v17622_v45 = vld [vmem:[#allocation5 + $0x2084] ss:$24 sps:$4 sm:$0xff]  }
 0x51c   : > { %12419 = vmatmul.mubr.bf16.gmra.mrb[36].mxu0 %v23344_v30  ;;  %v17620_v30 = vld [vmem:[#allocation5 + $0x2080] ss:$24 sps:$4 sm:$0xff]  }
 0x51d   : > { %12462 = vmatpush1.bf16.msra.mxu0 %v17578_v61  ;;  %12428 = vmatprep.mubr.bf16.mxu0 %v23345_v41  ;;  %v17617_v61 = vld [vmem:[#allocation5 + $0x2078] ss:$24 sps:$4 sm:$0xff]   ;;  %v17623_v41 = vld [vmem:[#allocation5 + $0x20a8] ss:$24 sps:$4 sm:$0xff]  }
 0x51e   : > { %12463 = vmatprep.subr.bf16.mxu0 %v17586_v37  ;;  %11348 = vmatpush1.bf16.msra.mxu1 %v17581_v28  ;;  %v17625_v37 = vld [vmem:[#allocation5 + $0x20ac] ss:$24 sps:$4 sm:$0xff]  }
 0x51f   : > { %11349 = vmatprep.subr.bf16.mxu1 %v17589_v59  ;;  %v17628_v28 = vld [vmem:[#allocation5 + $0x20b4] ss:$24 sps:$4 sm:$0xff]  }
 0x520   : > { %v17631_v59 = vld [vmem:[#allocation5 + $0x20dc] ss:$24 sps:$4 sm:$0xff]  }
 0x521   : > { %12464 = vmatpush1.bf16.msra.mxu0 %v17584_v42  ;;  %11313 = vmatmul.mubr.bf16.gmra.mrb[40].mxu1 %v23346_v12  ;;  %v17626_v42 = vld [vmem:[#allocation5 + $0x20b0] ss:$24 sps:$4 sm:$0xff]  }
 0x522   : > { %12465 = vmatprep.subr.bf16.mxu0 %v17592_v27  ;;  %11350 = vmatpush1.bf16.msra.mxu1 %v17587_v51  ;;  %v17634_v27 = vld [vmem:[#allocation5 + $0x20e4] ss:$24 sps:$4 sm:$0xff]   ;;  %v17629_v51 = vld [vmem:[#allocation5 + $0x20d8] ss:$24 sps:$4 sm:$0xff]  }
 0x523   : > { %11322 = vmatprep.mubr.bf16.mxu1 %v23347_v16  ;;  %11351 = vmatprep.subr.bf16.mxu1 %v17595_v58  ;;  %v17637_v58 = vld [vmem:[#allocation5 + $0x210c] ss:$24 sps:$4 sm:$0xff]  }
 0x524   : > { %12429 = vmatmul.mubr.bf16.gmra.mrb[40].mxu0 %v23346_v12  ;;  %v17635_v12 = vld [vmem:[#allocation5 + $0x2108] ss:$24 sps:$4 sm:$0xff]  }
 0x525   : > { %12466 = vmatpush1.bf16.msra.mxu0 %v17590_v35  ;;  %12438 = vmatprep.mubr.bf16.mxu0 %v23347_v16  ;;  %v17632_v35 = vld [vmem:[#allocation5 + $0x20e0] ss:$24 sps:$4 sm:$0xff]   ;;  %v17638_v16 = vld [vmem:[#allocation5 + $0x2110] ss:$24 sps:$4 sm:$0xff]  }
 0x526   : > { %12467 = vmatprep.subr.bf16.mxu0 %v17598_v31  ;;  %11352 = vmatpush1.bf16.msra.mxu1 %v17593_v54  ;;  %v17640_v31 = vld [vmem:[#allocation5 + $0x2114] ss:$24 sps:$4 sm:$0xff]  }
 0x527   : > { %11353 = vmatprep.subr.bf16.mxu1 %v17601_v26  ;;  %v17643_v54 = vld [vmem:[#allocation5 + $0x213c] ss:$24 sps:$4 sm:$0xff]  }
 0x528   : > { %v23350_v26 = vld [vmem:[#allocation85_spill] sm:$0xff] }
 0x529   : > { %12468 = vmatpush1.bf16.msra.mxu0 %v17596_v40  ;;  %11323 = vmatmul.mubr.bf16.gmra.mrb[44].mxu1 %v23348_v29  ;;  %v17646_v40 = vld [vmem:[#allocation5 + $0x2144] ss:$24 sps:$4 sm:$0xff]  }
 0x52a   : > { %12469 = vmatprep.subr.bf16.mxu0 %v17604_v52  ;;  %11354 = vmatpush1.bf16.msra.mxu1 %v17599_v32  ;;  %v17641_v52 = vld [vmem:[#allocation5 + $0x2138] ss:$24 sps:$4 sm:$0xff]   ;;  %v23351_v32 = vld [vmem:[#allocation88_spill] sm:$0xff] }
 0x52b   : > { %11365 = vmatprep.mubr.bf16.mxu1 %v23349_v15  ;;  %11355 = vmatprep.subr.bf16.mxu1 %v17607_v14  ;;  %v17649_v14 = vld [vmem:[#allocation5 + $0x216c] ss:$24 sps:$4 sm:$0xff]  }
 0x52c   : > { %12439 = vmatmul.mubr.bf16.gmra.mrb[44].mxu0 %v23348_v29  ;;  %v17647_v29 = vld [vmem:[#allocation5 + $0x2168] ss:$24 sps:$4 sm:$0xff]  }
 0x52d   : > { %12470 = vmatpush1.bf16.msra.mxu0 %v17602_v19  ;;  %12481 = vmatprep.mubr.bf16.mxu0 %v23349_v15  ;;  %v17644_v19 = vld [vmem:[#allocation5 + $0x2140] ss:$24 sps:$4 sm:$0xff]   ;;  %v17650_v15 = vld [vmem:[#allocation5 + $0x2170] ss:$24 sps:$4 sm:$0xff]  }
 0x52e   : > { %12471 = vmatprep.subr.bf16.mxu0 %v17610_v57  ;;  %11356 = vmatpush1.bf16.msra.mxu1 %v17605_v38  ;;  %v17652_v57 = vld [vmem:[#allocation5 + $0x2174] ss:$24 sps:$4 sm:$0xff]  }
 0x52f   : > { %11357 = vmatprep.subr.bf16.mxu1 %v17613_v55  ;;  %v17655_v38 = vld [vmem:[#allocation5 + $0x219c] ss:$24 sps:$4 sm:$0xff]  }
 0x530   : > { %v17658_v55 = vld [vmem:[#allocation5 + $0x21a4] ss:$24 sps:$4 sm:$0xff]  }
 0x531   : > { %12472 = vmatpush1.bf16.msra.mxu0 %v17608_v60  ;;  %v23352_v60 = vld [vmem:[#allocation90_spill] sm:$0xff] }
 0x532   : > { %12473 = vmatprep.subr.bf16.mxu0 %v17616_v7  ;;  %11358 = vmatpush1.bf16.msra.mxu1 %v17611_v49  ;;  %v17653_v7 = vld [vmem:[#allocation5 + $0x2198] ss:$24 sps:$4 sm:$0xff]   ;;  %v23353_v49 = vld [vmem:[#allocation92_spill] sm:$0xff] }
 0x533   : > { %11359 = vmatprep.subr.bf16.mxu1 %v17619_v36  ;;  %v17661_v36 = vld [vmem:[#allocation5 + $0x21cc] ss:$24 sps:$4 sm:$0xff]  }
 0x535   : > { %12474 = vmatpush1.bf16.msra.mxu0 %v17614_v22  ;;  %v17656_v22 = vld [vmem:[#allocation5 + $0x21a0] ss:$24 sps:$4 sm:$0xff]  }
 0x536   : > { %12475 = vmatprep.subr.bf16.mxu0 %v17622_v45  ;;  %11360 = vmatpush1.bf16.msra.mxu1 %v17617_v61  ;;  %v17664_v45 = vld [vmem:[#allocation5 + $0x21d4] ss:$24 sps:$4 sm:$0xff]   ;;  %v17659_v61 = vld [vmem:[#allocation5 + $0x21c8] ss:$24 sps:$4 sm:$0xff]  }
 0x537   : > { %11361 = vmatprep.subr.bf16.mxu1 %v17625_v37  ;;  %v17667_v37 = vld [vmem:[#allocation5 + $0x21fc] ss:$24 sps:$4 sm:$0xff]  }
 0x539   : > { %12476 = vmatpush1.bf16.msra.mxu0 %v17620_v30  ;;  %v17662_v30 = vld [vmem:[#allocation5 + $0x21d0] ss:$24 sps:$4 sm:$0xff]  }
 0x53a   : > { %12477 = vmatprep.subr.bf16.mxu0 %v17628_v28  ;;  %11362 = vmatpush1.bf16.msra.mxu1 %v17623_v41  ;;  %v17670_v28 = vld [vmem:[#allocation5 + $0x2204] ss:$24 sps:$4 sm:$0xff]  }
 0x53b   : > { %11363 = vmatprep.subr.bf16.mxu1 %v17631_v59  ;;  %v23354_v41 = vld [vmem:[#allocation94_spill] sm:$0xff] }
 0x53c   : > { %v17665_v59 = vld [vmem:[#allocation5 + $0x21f8] ss:$24 sps:$4 sm:$0xff]  }
 0x53d   : > { %12478 = vmatpush1.bf16.msra.mxu0 %v17626_v42  ;;  %v23355_v42 = vld [vmem:[#allocation96_spill] sm:$0xff] }
 0x53e   : > { %12479 = vmatprep.subr.bf16.mxu0 %v17634_v27  ;;  %11364 = vmatpush1.bf16.msra.mxu1 %v17629_v51  ;;  %v17673_v27 = vld [vmem:[#allocation5 + $0x222c] ss:$24 sps:$4 sm:$0xff]   ;;  %v17668_v51 = vld [vmem:[#allocation5 + $0x2200] ss:$24 sps:$4 sm:$0xff]  }
 0x53f   : > { %11426 = vmatprep.subr.bf16.mxu1 %v17637_v58  ;;  %v17676_v58 = vld [vmem:[#allocation5 + $0x2234] ss:$24 sps:$4 sm:$0xff]  }
 0x541   : > { %12480 = vmatpush1.bf16.msra.mxu0 %v17632_v35  ;;  %11366 = vmatmul.mubr.bf16.vlgmr.msra.gmra.mrb[24].mxu1 %v23350_v26  ;;  %v17671_v35 = vld [vmem:[#allocation5 + $0x2228] ss:$24 sps:$4 sm:$0xff]  }
 0x542   : > { %12542 = vmatprep.subr.bf16.mxu0 %v17640_v31  ;;  %11427 = vmatpush1.bf16.msra.mxu1 %v17635_v12  ;;  %v17679_v31 = vld [vmem:[#allocation5 + $0x225c] ss:$24 sps:$4 sm:$0xff]   ;;  %v17674_v12 = vld [vmem:[#allocation5 + $0x2230] ss:$24 sps:$4 sm:$0xff]  }
 0x543   : > { %11375 = vmatprep.mubr.bf16.mxu1 %v23351_v32  ;;  %11428 = vmatprep.subr.bf16.mxu1 %v17643_v54  ;;  %v17682_v54 = vld [vmem:[#allocation5 + $0x2264] ss:$24 sps:$4 sm:$0xff]  }
 0x544   : > { %12482 = vmatmul.mubr.bf16.vlgmr.msra.gmra.mrb[24].mxu0 %v23350_v26  ;;  %v17677_v26 = vld [vmem:[#allocation5 + $0x2258] ss:$24 sps:$4 sm:$0xff]  }
 0x545   : > { %12543 = vmatpush1.bf16.msra.mxu0 %v17638_v16  ;;  %12491 = vmatprep.mubr.bf16.mxu0 %v23351_v32  ;;  %v23356_v16 = vld [vmem:[#allocation98_spill] sm:$0xff] }
 0x546   : > { %12544 = vmatprep.subr.bf16.mxu0 %v17646_v40  ;;  %11429 = vmatpush1.bf16.msra.mxu1 %v17641_v52  ;;  %v23357_v40 = vld [vmem:[#allocation100_spill] sm:$0xff]  ;;  %v17680_v32 = vld [vmem:[#allocation5 + $0x2260] ss:$24 sps:$4 sm:$0xff]  }
 0x547   : > { %11430 = vmatprep.subr.bf16.mxu1 %v17649_v14  ;;  %v17685_v52 = vld [vmem:[#allocation5 + $0x228c] ss:$24 sps:$4 sm:$0xff]  }
 0x548   : > { %v17688_v14 = vld [vmem:[#allocation5 + $0x2294] ss:$24 sps:$4 sm:$0xff]  }
 0x549   : > { %12545 = vmatpush1.bf16.msra.mxu0 %v17644_v19  ;;  %11376 = vmatmul.mubr.bf16.gmra.mrb[28].mxu1 %v23352_v60  ;;  %v17683_v19 = vld [vmem:[#allocation5 + $0x2288] ss:$24 sps:$4 sm:$0xff]  }
 0x54a   : > { %12546 = vmatprep.subr.bf16.mxu0 %v17652_v57  ;;  %11431 = vmatpush1.bf16.msra.mxu1 %v17647_v29  ;;  %v17691_v57 = vld [vmem:[#allocation5 + $0x22bc] ss:$24 sps:$4 sm:$0xff]   ;;  %v17686_v29 = vld [vmem:[#allocation5 + $0x2290] ss:$24 sps:$4 sm:$0xff]  }
 0x54b   : > { %11385 = vmatprep.mubr.bf16.mxu1 %v23353_v49  ;;  %11432 = vmatprep.subr.bf16.mxu1 %v17655_v38  ;;  %v17694_v38 = vld [vmem:[#allocation5 + $0x22c4] ss:$24 sps:$4 sm:$0xff]  }
 0x54c   : > { %12492 = vmatmul.mubr.bf16.gmra.mrb[28].mxu0 %v23352_v60  ;;  %v23359_v60 = vld [vmem:[#allocation104_spill] sm:$0xff] }
 0x54d   : > { %12547 = vmatpush1.bf16.msra.mxu0 %v17650_v15  ;;  %12501 = vmatprep.mubr.bf16.mxu0 %v23353_v49  ;;  %v23358_v15 = vld [vmem:[#allocation102_spill] sm:$0xff] }
 0x54e   : > { %12548 = vmatprep.subr.bf16.mxu0 %v17658_v55  ;;  %11433 = vmatpush1.bf16.msra.mxu1 %v17653_v7  ;;  %v17689_v55 = vld [vmem:[#allocation5 + $0x22b8] ss:$24 sps:$4 sm:$0xff]   ;;  %v17697_v7 = vld [vmem:[#allocation5 + $0x22ec] ss:$24 sps:$4 sm:$0xff]  }
 0x54f   : > { %11434 = vmatprep.subr.bf16.mxu1 %v17661_v36  ;;  %v17692_v49 = vld [vmem:[#allocation5 + $0x22c0] ss:$24 sps:$4 sm:$0xff]   ;;  %v17700_v36 = vld [vmem:[#allocation5 + $0x22f4] ss:$24 sps:$4 sm:$0xff]  }
 0x551   : > { %12549 = vmatpush1.bf16.msra.mxu0 %v17656_v22  ;;  %11386 = vmatmul.mubr.bf16.gmra.mrb[32].mxu1 %v23354_v41  ;;  %v17695_v22 = vld [vmem:[#allocation5 + $0x22e8] ss:$24 sps:$4 sm:$0xff]  }
 0x552   : > { %12550 = vmatprep.subr.bf16.mxu0 %v17664_v45  ;;  %11435 = vmatpush1.bf16.msra.mxu1 %v17659_v61  ;;  %v17703_v45 = vld [vmem:[#allocation5 + $0x231c] ss:$24 sps:$4 sm:$0xff]   ;;  %v17698_v61 = vld [vmem:[#allocation5 + $0x22f0] ss:$24 sps:$4 sm:$0xff]  }
 0x553   : > { %11395 = vmatprep.mubr.bf16.mxu1 %v23355_v42  ;;  %11436 = vmatprep.subr.bf16.mxu1 %v17667_v37  ;;  %v17706_v37 = vld [vmem:[#allocation5 + $0x2324] ss:$24 sps:$4 sm:$0xff]  }
 0x554   : > { %12502 = vmatmul.mubr.bf16.gmra.mrb[32].mxu0 %v23354_v41  ;;  %v23361_v41 = vld [vmem:[#allocation110_spill] sm:$0xff] }
 0x555   : > { %12551 = vmatpush1.bf16.msra.mxu0 %v17662_v30  ;;  %12511 = vmatprep.mubr.bf16.mxu0 %v23355_v42  ;;  %v23360_v30 = vld [vmem:[#allocation106_spill] sm:$0xff] }
 0x556   : > { %12552 = vmatprep.subr.bf16.mxu0 %v17670_v28  ;;  %11437 = vmatpush1.bf16.msra.mxu1 %v17665_v59  ;;  %v17701_v28 = vld [vmem:[#allocation5 + $0x2318] ss:$24 sps:$4 sm:$0xff]   ;;  %v17709_v59 = vld [vmem:[#allocation5 + $0x234c] ss:$24 sps:$4 sm:$0xff]  }
 0x557   : > { %11438 = vmatprep.subr.bf16.mxu1 %v17673_v27  ;;  %v17704_v42 = vld [vmem:[#allocation5 + $0x2320] ss:$24 sps:$4 sm:$0xff]   ;;  %v17712_v27 = vld [vmem:[#allocation5 + $0x2354] ss:$24 sps:$4 sm:$0xff]  }
 0x559   : > { %12553 = vmatpush1.bf16.msra.mxu0 %v17668_v51  ;;  %11396 = vmatmul.mubr.bf16.gmra.mrb[36].mxu1 %v23356_v16  ;;  %v17707_v51 = vld [vmem:[#allocation5 + $0x2348] ss:$24 sps:$4 sm:$0xff]  }
 0x55a   : > { %12554 = vmatprep.subr.bf16.mxu0 %v17676_v58  ;;  %11439 = vmatpush1.bf16.msra.mxu1 %v17671_v35  ;;  %v17715_v58 = vld [vmem:[#allocation5 + $0x237c] ss:$24 sps:$4 sm:$0xff]   ;;  %v17710_v35 = vld [vmem:[#allocation5 + $0x2350] ss:$24 sps:$4 sm:$0xff]  }
 0x55b   : > { %11405 = vmatprep.mubr.bf16.mxu1 %v23357_v40  ;;  %11440 = vmatprep.subr.bf16.mxu1 %v17679_v31  ;;  %v17718_v31 = vld [vmem:[#allocation5 + $0x2384] ss:$24 sps:$4 sm:$0xff]  }
 0x55c   : > { %12512 = vmatmul.mubr.bf16.gmra.mrb[36].mxu0 %v23356_v16  ;;  %v17716_v16 = vld [vmem:[#allocation5 + $0x2380] ss:$24 sps:$4 sm:$0xff]  }
 0x55d   : > { %12555 = vmatpush1.bf16.msra.mxu0 %v17674_v12  ;;  %12521 = vmatprep.mubr.bf16.mxu0 %v23357_v40  ;;  %v17713_v12 = vld [vmem:[#allocation5 + $0x2378] ss:$24 sps:$4 sm:$0xff]   ;;  %v17719_v40 = vld [vmem:[#allocation5 + $0x23a8] ss:$24 sps:$4 sm:$0xff]  }
 0x55e   : > { %12556 = vmatprep.subr.bf16.mxu0 %v17682_v54  ;;  %11441 = vmatpush1.bf16.msra.mxu1 %v17677_v26  ;;  %v17721_v54 = vld [vmem:[#allocation5 + $0x23ac] ss:$24 sps:$4 sm:$0xff]  }
 0x55f   : > { %11442 = vmatprep.subr.bf16.mxu1 %v17685_v52  ;;  %v17724_v26 = vld [vmem:[#allocation5 + $0x23b4] ss:$24 sps:$4 sm:$0xff]  }
 0x560   : > { %v17727_v52 = vld [vmem:[#allocation5 + $0x23dc] ss:$24 sps:$4 sm:$0xff]  }
 0x561   : > { %12557 = vmatpush1.bf16.msra.mxu0 %v17680_v32  ;;  %11406 = vmatmul.mubr.bf16.gmra.mrb[40].mxu1 %v23358_v15  ;;  %v17722_v32 = vld [vmem:[#allocation5 + $0x23b0] ss:$24 sps:$4 sm:$0xff]  }
 0x562   : > { %12558 = vmatprep.subr.bf16.mxu0 %v17688_v14  ;;  %11443 = vmatpush1.bf16.msra.mxu1 %v17683_v19  ;;  %v17730_v14 = vld [vmem:[#allocation5 + $0x23e4] ss:$24 sps:$4 sm:$0xff]   ;;  %v17725_v19 = vld [vmem:[#allocation5 + $0x23d8] ss:$24 sps:$4 sm:$0xff]  }
 0x563   : > { %11415 = vmatprep.mubr.bf16.mxu1 %v23359_v60  ;;  %11444 = vmatprep.subr.bf16.mxu1 %v17691_v57  ;;  %v17728_v57 = vld [vmem:[#allocation5 + $0x23e0] ss:$24 sps:$4 sm:$0xff]  }
 0x564   : > { %12522 = vmatmul.mubr.bf16.gmra.mrb[40].mxu0 %v23358_v15  ;;  %v23364_v15 = vld [vmem:[#allocation113_spill] sm:$0xff] }
 0x565   : > { %12559 = vmatpush1.bf16.msra.mxu0 %v17686_v29  ;;  %12531 = vmatprep.mubr.bf16.mxu0 %v23359_v60  ;;  %v23362_v29 = vld [vmem:[#allocation109_spill] sm:$0xff] }
 0x566   : > { %12560 = vmatprep.subr.bf16.mxu0 %v17694_v38  ;;  %11445 = vmatpush1.bf16.msra.mxu1 %v17689_v55  ;;  %v23363_v38 = vld [vmem:[#allocation111_spill] sm:$0xff]  ;;  %v23366_v60 = vld [vmem:[#allocation117_spill] sm:$0xff] }
 0x567   : > { %11446 = vmatprep.subr.bf16.mxu1 %v17697_v7  ;;  %v23365_v55 = vld [vmem:[#allocation115_spill] sm:$0xff] }
 0x568   : > { %v23367_v7 = vld [vmem:[#allocation119_spill] sm:$0xff] }
 0x569   : > { %12561 = vmatpush1.bf16.msra.mxu0 %v17692_v49  ;;  %11416 = vmatmul.mubr.bf16.gmra.mrb[44].mxu1 %v23360_v30  ;;  %v12635_v49 = vld [vmem:[%s18742_s19] sm:$0xff] }
 0x56a   : > { %12562 = vmatprep.subr.bf16.mxu0 %v17700_v36  ;;  %11447 = vmatpush1.bf16.msra.mxu1 %v17695_v22  ;;  %v12638_v36 = vld [vmem:[%s18742_s19 + $0x18] sm:$0xff]  ;;  %v12641_v22 = vld [vmem:[%s18742_s19 + $0x30] sm:$0xff] }
 0x56b   : > { %11458 = vmatprep.mubr.bf16.mxu1 %v23361_v41  ;;  %11448 = vmatprep.subr.bf16.mxu1 %v17703_v45  ;;  %v12647_v45 = vld [vmem:[%s18742_s19 + $0x60] sm:$0xff] }
 0x56c   : > { %12532 = vmatmul.mubr.bf16.gmra.mrb[44].mxu0 %v23360_v30  ;;  %v12672_v30 = vunpack.c.h.bf16 %v12635_v49 }
 0x56d   : > { %12563 = vmatpush1.bf16.msra.mxu0 %v17698_v61  ;;  %12574 = vmatprep.mubr.bf16.mxu0 %v23361_v41  ;;  %v12650_v61 = vld [vmem:[%s18742_s19 + $0x78] sm:$0xff]  ;;  %v12678_v41 = vunpack.c.h.bf16 %v12638_v36 }
 0x56e   : > { %12564 = vmatprep.subr.bf16.mxu0 %v17706_v37  ;;  %11449 = vmatpush1.bf16.msra.mxu1 %v17701_v28  ;;  %v12653_v37 = vld [vmem:[%s18742_s19 + $0x90] sm:$0xff]  ;;  %v12677_v28 = vunpack.c.l.bf16 %v12638_v36 }
 0x56f   : > { %11450 = vmatprep.subr.bf16.mxu1 %v17709_v59  ;;  %v12659_v59 = vld [vmem:[%s18742_s19 + $0xc0] sm:$0xff] }
 0x571   : > { %12565 = vmatpush1.bf16.msra.mxu0 %v17704_v42  ;;  %v12684_v42 = vunpack.c.h.bf16 %v12641_v22 }
 0x572   : > { %12566 = vmatprep.subr.bf16.mxu0 %v17712_v27  ;;  %11451 = vmatpush1.bf16.msra.mxu1 %v17707_v51 }
 0x573   : > { %11452 = vmatprep.subr.bf16.mxu1 %v17715_v58  ;;  %v12696_v58 = vunpack.c.h.bf16 %v12647_v45 }
 0x575   : > { %12567 = vmatpush1.bf16.msra.mxu0 %v17710_v35  ;;  %v12701_v35 = vunpack.c.l.bf16 %v12650_v61  ;;  %v21306_v36 = vadd.f32 %v21007_v63, %v12696_v58 }
 0x576   : > { %12568 = vmatprep.subr.bf16.mxu0 %v17718_v31  ;;  %11453 = vmatpush1.bf16.msra.mxu1 %v17713_v12  ;;  %v12702_v31 = vunpack.c.h.bf16 %v12650_v61  ;;  %v12707_v12 = vunpack.c.l.bf16 %v12653_v37 }
 0x577   : > { %11454 = vmatprep.subr.bf16.mxu1 %v17721_v54  ;;  %v12708_v54 = vunpack.c.h.bf16 %v12653_v37  ;;  %23369 = vst [vmem:[#allocation45_spill] sm:$0xff] %v21306_v36 }
 0x578   : > { %v21332_v61 = vadd.f32 %v21013_v62, %v12702_v31  ;;  %v21335_v37 = vadd.f32 %v21018_v48, %v12707_v12  ;;  %v12637_v31 = vld [vmem:[%s18742_s19 + $0x10] sm:$0xff] }
 0x579   : > { %12569 = vmatpush1.bf16.msra.mxu0 %v17716_v16  ;;  %v12676_v34 = vunpack.c.h.bf16 %v12637_v31 }
 0x57a   : > { %12570 = vmatprep.subr.bf16.mxu0 %v17724_v26  ;;  %11455 = vmatpush1.bf16.msra.mxu1 %v17719_v40  ;;  %v12719_v40 = vunpack.c.l.bf16 %v12659_v59  ;;  %23373 = vst [vmem:[#allocation53_spill] sm:$0xff] %v21332_v61  ;;  %23374 = vst [vmem:[#allocation55_spill] sm:$0xff] %v21335_v37 }
 0x57b   : > { %11456 = vmatprep.subr.bf16.mxu1 %v17727_v52  ;;  %v12662_v52 = vld [vmem:[%s18742_s19 + $0xd8] sm:$0xff] }
 0x57c   : > { %v21354_v48 = vadd.f32 %v21034_v13, %v12719_v40 }
 0x57d   : > { %12571 = vmatpush1.bf16.msra.mxu0 %v17722_v32  ;;  %v12665_v32 = vld [vmem:[%s18742_s19 + $0xf0] sm:$0xff] }
 0x57e   : > { %12572 = vmatprep.subr.bf16.mxu0 %v17730_v14  ;;  %11457 = vmatpush1.bf16.msra.mxu1 %v17725_v19  ;;  %v21281_v19 = vadd.f32 %v20970_v9, %v12672_v30  ;;  %v12720_v9 = vunpack.c.h.bf16 %v12659_v59  ;;  %v21338_v30 = vadd.f32 %v21021_v46, %v12708_v54  ;;  %23379 = vst [vmem:[#allocation65_spill] sm:$0xff] %v21354_v48  ;;  %v18331_v59 = vld [vmem:[%s22423_s2] sm:$0x3f] }
 0x580   : > { %23375 = vst [vmem:[#allocation57_spill] sm:$0xff] %v21338_v30  ;;  %v21358_v46 = vadd.f32 %v21037_v21, %v12720_v9 }
 0x581   : > { %12573 = vmatpush1.bf16.msra.mxu0 %v17728_v57  ;;  %11459 = vmatmul.mubr.bf16.vlgmr.msra.gmra.mrb[24].mxu1 %v23362_v29  ;;  %v21284_v57 = vadd.f32 %v20973_v50, %v12677_v28  ;;  %v12726_v50 = vunpack.c.h.bf16 %v12662_v52  ;;  %v21341_v28 = vsub.s32 4, %v20939_v10 }
 0x582   : > { %11468 = vmatprep.mubr.bf16.mxu1 %v23363_v38  ;;  %23380 = vst [vmem:[#allocation67_spill] sm:$0xff] %v21358_v46  ;;  %v21409_v54 = vadd.f32 %v21358_v46, %v21354_v48 }
 0x583   : > { %23376 = vst [vmem:[#allocation59_spill] sm:$0xff] %v21341_v28  ;;  %v21373_v13 = vadd.f32 %v21042_v8, %v12726_v50 }
 0x584   : > { %12575 = vmatmul.mubr.bf16.vlgmr.msra.gmra.mrb[24].mxu0 %v23362_v29  ;;  %v21287_v29 = vadd.f32 %v20976_v11, %v12678_v41 }
 0x585   : > { %12584 = vmatprep.mubr.bf16.mxu0 %v23363_v38  ;;  %v12668_v38 = vld [vmem:[%s18742_s19 + $0x108] sm:$0xff]  ;;  %23383 = vst [vmem:[#allocation73_spill] sm:$0xff] %v21373_v13 }
 0x589   : > { %11469 = vmatmul.mubr.bf16.gmra.mrb[28].mxu1 %v23364_v15 }
 0x58a   : > { %11478 = vmatprep.mubr.bf16.mxu1 %v23365_v55 }
 0x58c   : > { %12585 = vmatmul.mubr.bf16.gmra.mrb[28].mxu0 %v23364_v15 }
 0x58d   : > { %12594 = vmatprep.mubr.bf16.mxu0 %v23365_v55  ;;  %v21294_v55 = vadd.f32 %v20989_v3, %v12684_v42 }
 0x591   : > { %11479 = vmatmul.mubr.bf16.gmra.mrb[32].mxu1 %v23366_v60 }
 0x592   : > { %11488 = vmatprep.mubr.bf16.mxu1 %v23367_v7 }
 0x594   : > { %12595 = vmatmul.mubr.bf16.gmra.mrb[32].mxu0 %v23366_v60 }
 0x595   : > { %12604 = vmatprep.mubr.bf16.mxu0 %v23367_v7  ;;  %v12725_v7 = vunpack.c.l.bf16 %v12662_v52 }
 0x599   : > { %11489 = vmatmul.mubr.bf16.gmra.mrb[36].mxu1 %v20816_v18 }
 0x59a   : > { %11498 = vmatprep.mubr.bf16.mxu1 %v20848_v56 }
 0x59c   : > { %12605 = vmatmul.mubr.bf16.gmra.mrb[36].mxu0 %v20816_v18  ;;  %v12644_v18 = vld [vmem:[%s18742_s19 + $0x48] sm:$0xff] }
 0x59d   : > { %12614 = vmatprep.mubr.bf16.mxu0 %v20848_v56  ;;  %v12671_v56 = vunpack.c.l.bf16 %v12635_v49  ;;  %v12689_v27 = vunpack.c.l.bf16 %v12644_v18  ;;  %v12690_v51 = vunpack.c.h.bf16 %v12644_v18  ;;  %v12731_v49 = vunpack.c.l.bf16 %v12665_v32 }
 0x59e   : > { %v21315_v18 = vsub.s32 2, %v20939_v10 }
 0x59f   : > { %v21278_v14 = vadd.f32 %v20968_v6, %v12671_v56  ;;  %v21297_v60 = vadd.f32 %v20992_v1, %v12689_v27  ;;  %v21300_v6 = vadd.f32 %v20994_v0, %v12690_v51  ;;  %v21312_v1 = vadd.f32 %v21287_v29, %v21284_v57  ;;  %v12639_v27 = vld [vmem:[%s18742_s19 + $0x20] sm:$0xff] }
 0x5a0   : > { %v12738_v0 = vunpack.c.h.bf16 %v12668_v38  ;;  %23370 = vst [vmem:[#allocation47_spill] sm:$0xff] %v21315_v18  ;;  %v21329_v56 = vsub.s32 3, %v20939_v10  ;;  %v21376_v21 = vadd.f32 %v21050_v43, %v12731_v49  ;;  %v21394_v43 = vrot.slane %v18331_v59, %v21341_v28 }
 0x5a1   : > { %11499 = vmatmul.mubr.bf16.gmra.mrb[40].mxu1 %v20864_v17  ;;  %v12815_v3 = vadd.f32 %v21281_v19, %v21278_v14  ;;  %v21323_v63 = vadd.f32 %v21300_v6, %v21297_v60  ;;  %v12679_v52 = vunpack.c.l.bf16 %v12639_v27  ;;  %v12680_v50 = vunpack.c.h.bf16 %v12639_v27 }
 0x5a2   : > { %11508 = vmatprep.mubr.bf16.mxu1 %v20878_v53  ;;  %23372 = vst [vmem:[#allocation51_spill] sm:$0xff] %v21329_v56  ;;  %23384 = vst [vmem:[#allocation75_spill] sm:$0xff] %v21376_v21  ;;  %v21382_v42 = vrot.slane %v18331_v59, %v21329_v56  ;;  %v21404_v58 = vadd.f32 %v21059_v47, %v12738_v0 }
 0x5a4   : > { %12615 = vmatmul.mubr.bf16.gmra.mrb[40].mxu0 %v20864_v17  ;;  %v12683_v17 = vunpack.c.l.bf16 %v12641_v22  ;;  %v12737_v22 = vunpack.c.l.bf16 %v12668_v38  ;;  %23387 = vst [vmem:[#allocation84_spill] sm:$0xff] %v21404_v58 }
 0x5a5   : > { %12624 = vmatprep.mubr.bf16.mxu0 %v20878_v53  ;;  %v12656_v53 = vld [vmem:[%s18742_s19 + $0xa8] sm:$0xff] }
 0x5a6   : > { %v12713_v16 = vunpack.c.l.bf16 %v12656_v53  ;;  %v12714_v26 = vunpack.c.h.bf16 %v12656_v53  ;;  %v21291_v15 = vadd.f32 %v20985_v24, %v12683_v17  ;;  %v12732_v24 = vunpack.c.h.bf16 %v12665_v32  ;;  %v12636_v17 = vld [vmem:[%s18742_s19 + $0x8] sm:$0xff] }
 0x5a7   : > { %v21361_v53 = vadd.f32 %v21040_v2, %v12725_v7  ;;  %v12673_v8 = vunpack.c.l.bf16 %v12636_v17  ;;  %v12674_v12 = vunpack.c.h.bf16 %v12636_v17 }
 0x5a8   : > { %v21348_v41 = vadd.f32 %v21024_v39, %v12713_v16  ;;  %v21351_v62 = vadd.f32 %v21026_v4, %v12714_v26  ;;  %v21367_v39 = vrot.slane %v18331_v59, %v21315_v18  ;;  %v21370_v4 = vsub.s32 5, %v20939_v10  ;;  %v21445_v18 = vld [vmem:[%s18742_s19 + $0x40] sm:$0xff] }
 0x5a9   : > { %11509 = vmatmul.mubr.bf16.gmra.mrb[44].mxu1 %v20886_v5  ;;  %23381 = vst [vmem:[#allocation69_spill] sm:$0xff] %v21361_v53  ;;  %v21379_v2 = vadd.f32 %v21053_v44, %v12732_v24  ;;  %v21391_v10 = vadd.f32 %v21338_v30, %v21335_v37  ;;  %v21420_v47 = vadd.f32 %v21373_v13, %v21361_v53 }
 0x5aa   : > { %23377 = vst [vmem:[#allocation62_spill] sm:$0xff] %v21348_v41  ;;  %23378 = vst [vmem:[#allocation61_spill] sm:$0xff] %v21351_v62  ;;  %v21398_v44 = vadd.f32 %v21351_v62, %v21348_v41  ;;  %v21413_v40 = vrot.slane %v18331_v59, %v21370_v4 }
 0x5ab   : > { %23382 = vst [vmem:[#allocation71_spill] sm:$0xff] %v21370_v4  ;;  %23385 = vst [vmem:[#allocation77_spill] sm:$0xff] %v21379_v2  ;;  %v21424_v32 = vadd.f32 %v21379_v2, %v21376_v21 }
 0x5ac   : > { %12625 = vmatmul.mubr.bf16.gmra.mrb[44].mxu0 %v20886_v5  ;;  %v12695_v5 = vunpack.c.l.bf16 %v12647_v45  ;;  %v21326_v45 = vadd.f32 %v21010_v20, %v12701_v35 }
 0x5ae   : > { %v21303_v11 = vadd.f32 %v21004_v25, %v12695_v5  ;;  %v21319_v25 = vadd.f32 %v21294_v55, %v21291_v15  ;;  %23371 = vst [vmem:[#allocation49_spill] sm:$0xff] %v21326_v45  ;;  %v21387_v51 = vadd.f32 %v21332_v61, %v21326_v45  ;;  %v21401_v5 = vadd.f32 %v21056_v23, %v12737_v22  ;;  %v21416_v23 = vld [vmem:[%s18742_s19 + $0x28] sm:$0xff] }
 0x5af   : > { %v12675_v22 = vunpack.c.l.bf16 %v12637_v31  ;;  %v12681_v27 = vunpack.c.l.bf16 %v21416_v23 }
 0x5b0   : > { %23368 = vst [vmem:[#allocation43_spill] sm:$0xff] %v21303_v11  ;;  %v21345_v20 = vadd.f32 %v21306_v36, %v21303_v11  ;;  %23386 = vst [vmem:[#allocation79_spill] sm:$0xff] %v21401_v5  ;;  %v21434_v4 = vadd.f32 %v21404_v58, %v21401_v5  ;;  %v12682_v58 = vunpack.c.h.bf16 %v21416_v23 }
 0x654   : > { %v11460_v35 = vpop.f32.mrb[24].mxu1 }
 0x655   : > { %v15109_v16 = vadd.f32 %v11460_v35, %v21367_v39  ;;  %v11462_v26 = vpop.f32.mrb[25].mxu1  ;;  %v12642_v35 = vld [vmem:[%s18742_s19 + $0x38] sm:$0xff] }
 0x656   : > { %v15110_v9 = vadd.f32 %v11462_v26, %v21382_v42  ;;  %v11464_v7 = vpop.f32.mrb[26].mxu1  ;;  %v12685_v5 = vunpack.c.l.bf16 %v12642_v35 }
 0x657   : > { %v12576_v38 = vpop.f32.mrb[24].mxu0  ;;  %v21427_v49 = vadd.f32 %v15109_v16, %v12673_v8  ;;  %v15111_v17 = vadd.f32 %v11464_v7, %v21367_v39  ;;  %v11466_v59 = vpop.f32.mrb[27].mxu1 }
 0x658   : > { %v15133_v24 = vadd.f32 %v12576_v38, %v21394_v43  ;;  %v12578_v0 = vpop.f32.mrb[25].mxu0  ;;  %v21436_v28 = vadd.f32 %v15110_v9, %v12674_v12  ;;  %v15112_v8 = vadd.f32 %v11466_v59, %v21382_v42 }
 0x659   : > { %v12580_v26 = vpop.f32.mrb[26].mxu0  ;;  %v12816_v16 = vadd.f32 %v12815_v3, %v21427_v49  ;;  %v15134_v38 = vadd.f32 %v12578_v0, %v21413_v40  ;;  %v21442_v56 = vadd.f32 %v15111_v17, %v12679_v52  ;;  %v12686_v0 = vunpack.c.h.bf16 %v12642_v35  ;;  %v21457_v52 = vld [vmem:[%s18742_s19 + $0x58] sm:$0xff] }
 0x65a   : > { %v12582_v7 = vpop.f32.mrb[27].mxu0  ;;  %v15135_v12 = vadd.f32 %v12580_v26, %v21394_v43  ;;  %v21449_v9 = vadd.f32 %v15112_v8, %v12680_v50  ;;  %v21452_v2 = vadd.f32 %v15133_v24, %v12675_v22  ;;  %v12687_v26 = vunpack.c.l.bf16 %v21445_v18 }
 0x65b   : > { %v12823_v3 = vadd.f32 %v21312_v1, %v21442_v56  ;;  %v12817_v17 = vadd.f32 %v12816_v16, %v21436_v28  ;;  %v15136_v59 = vadd.f32 %v12582_v7, %v21413_v40  ;;  %v12691_v50 = vunpack.c.l.bf16 %v12645_v33 }
 0x65c   : > { %v11470_v31 = vpop.f32.mrb[28].mxu1  ;;  %v12692_v8 = vunpack.c.h.bf16 %v12645_v33  ;;  %v21464_v21 = vadd.f32 %v15134_v38, %v12676_v34  ;;  %v21467_v35 = vadd.f32 %v15135_v12, %v12681_v27  ;;  %v12693_v53 = vunpack.c.l.bf16 %v21457_v52  ;;  %v12648_v12 = vld [vmem:[%s18742_s19 + $0x68] sm:$0xff] }
 0x65d   : > { %v12824_v23 = vadd.f32 %v12823_v3, %v21449_v9  ;;  %v15113_v24 = vadd.f32 %v11470_v31, %v21367_v39  ;;  %v11472_v22 = vpop.f32.mrb[29].mxu1  ;;  %v12818_v1 = vadd.f32 %v12817_v17, %v21452_v2  ;;  %v12694_v33 = vunpack.c.h.bf16 %v21457_v52 }
 0x65e   : > { %v15114_v7 = vadd.f32 %v11472_v22, %v21382_v42  ;;  %v11474_v13 = vpop.f32.mrb[30].mxu1  ;;  %v12698_v41 = vunpack.c.h.bf16 %v12648_v12 }
 0x65f   : > { %v12586_v16 = vpop.f32.mrb[28].mxu0  ;;  %v21472_v46 = vadd.f32 %v15113_v24, %v12685_v5  ;;  %v15115_v34 = vadd.f32 %v11474_v13, %v21367_v39  ;;  %v11476_v38 = vpop.f32.mrb[31].mxu1  ;;  %v12819_v27 = vadd.f32 %v12818_v1, %v21464_v21  ;;  %v12825_v52 = vadd.f32 %v12824_v23, %v21467_v35 }
 0x660   : > { %v15137_v3 = vadd.f32 %v12586_v16, %v21394_v43  ;;  %v12588_v31 = vpop.f32.mrb[29].mxu0  ;;  %v21478_v17 = vadd.f32 %v15114_v7, %v12686_v0  ;;  %v15116_v48 = vadd.f32 %v11476_v38, %v21382_v42  ;;  %v12688_v5 = vunpack.c.h.bf16 %v21445_v18  ;;  %v21491_v0 = vld [vmem:[%s18742_s19 + $0x70] sm:$0xff]  ;;  %v12651_v7 = vld [vmem:[%s18742_s19 + $0x80] sm:$0xff] }
 0x661   : > { %v12590_v22 = vpop.f32.mrb[30].mxu0  ;;  %v21483_v24 = vadd.f32 %v15136_v59, %v12682_v58  ;;  %v12830_v13 = vadd.f32 %v21319_v25, %v21472_v46  ;;  %v15138_v16 = vadd.f32 %v12588_v31, %v21413_v40  ;;  %v21488_v62 = vadd.f32 %v15115_v34, %v12691_v50  ;;  %12820 = vadd.xlane.f32.xlu0 %v12819_v27  ;;  %v21503_v50 = vld [vmem:[%s18742_s19 + $0x88] sm:$0xff] }
 0x662   : > { %v12592_v1 = vpop.f32.mrb[31].mxu0  ;;  %v15139_v38 = vadd.f32 %v12590_v22, %v21394_v43  ;;  %v21495_v23 = vadd.f32 %v15116_v48, %v12692_v8  ;;  %v12697_v18 = vunpack.c.l.bf16 %v12648_v12  ;;  %v21497_v58 = vadd.f32 %v15137_v3, %v12687_v26 }
 0x663   : > { %v12837_v25 = vadd.f32 %v21323_v63, %v21488_v62  ;;  %v12826_v59 = vadd.f32 %v12825_v52, %v21483_v24  ;;  %v12831_v31 = vadd.f32 %v12830_v13, %v21478_v17  ;;  %v15140_v34 = vadd.f32 %v12592_v1, %v21413_v40 }
 0x664   : > { %v11480_v27 = vpop.f32.mrb[32].mxu1  ;;  %v12699_v22 = vunpack.c.l.bf16 %v21491_v0  ;;  %v12700_v48 = vunpack.c.h.bf16 %v21491_v0  ;;  %v12703_v8 = vunpack.c.l.bf16 %v12651_v7  ;;  %v21511_v63 = vadd.f32 %v15138_v16, %v12688_v5 }
 0x665   : > { %v12838_v26 = vadd.f32 %v12837_v25, %v21495_v23  ;;  %v15117_v3 = vadd.f32 %v11480_v27, %v21367_v39  ;;  %v11482_v12 = vpop.f32.mrb[33].mxu1  ;;  %12827 = vadd.xlane.f32.xlu0 %v12826_v59  ;;  %v12832_v52 = vadd.f32 %v12831_v31, %v21497_v58  ;;  %v21514_v13 = vadd.f32 %v15139_v38, %v12693_v53  ;;  %v12654_v38 = vld [vmem:[%s18742_s19 + $0x98] sm:$0xff] }
 0x666   : > { %v15118_v30 = vadd.f32 %v11482_v12, %v21382_v42  ;;  %v11484_v37 = vpop.f32.mrb[34].mxu1  ;;  %v12705_v0 = vunpack.c.l.bf16 %v21503_v50  ;;  %v12704_v61 = vunpack.c.h.bf16 %v12651_v7  ;;  %v12706_v7 = vunpack.c.h.bf16 %v21503_v50 }
 0x667   : > { %v12596_v1 = vpop.f32.mrb[32].mxu0  ;;  %v21518_v45 = vadd.f32 %v15117_v3, %v12697_v18  ;;  %v15119_v5 = vadd.f32 %v11484_v37, %v21367_v39  ;;  %v11486_v16 = vpop.f32.mrb[35].mxu1  ;;  %v12833_v53 = vadd.f32 %v12832_v52, %v21511_v63  ;;  %v12839_v18 = vadd.f32 %v12838_v26, %v21514_v13 }
 0x668   : > { %v15141_v25 = vadd.f32 %v12596_v1, %v21394_v43  ;;  %v12598_v27 = vpop.f32.mrb[33].mxu0  ;;  %v21524_v59 = vadd.f32 %v15118_v30, %v12698_v41  ;;  %v15120_v12 = vadd.f32 %v11486_v16, %v21382_v42  ;;  %v21529_v3 = vadd.f32 %v15140_v34, %v12694_v33  ;;  %v21537_v30 = vld [vmem:[%s18742_s19 + $0xa0] sm:$0xff]  ;;  %v12657_v41 = vld [vmem:[%s18742_s19 + $0xb0] sm:$0xff] }
 0x669   : > { %23388 = vst [vmem:[#allocation83_spill] sm:$0xff] %v21518_v45  ;;  %v12600_v31 = vpop.f32.mrb[34].mxu0  ;;  %v12844_v37 = vadd.f32 %v21345_v20, %v21518_v45  ;;  %v15142_v1 = vadd.f32 %v12598_v27, %v21413_v40  ;;  %v21534_v36 = vadd.f32 %v15119_v5, %v12703_v8  ;;  %12834 = vadd.xlane.f32.xlu1 %v12833_v53  ;;  %v12709_v26 = vunpack.c.l.bf16 %v12654_v38  ;;  %v21550_v27 = vld [vmem:[%s18742_s19 + $0xb8] sm:$0xff] }
 0x66a   : > { %23389 = vst [vmem:[#allocation87_spill] sm:$0xff] %v21524_v59  ;;  %v12602_v52 = vpop.f32.mrb[35].mxu0  ;;  %v15143_v16 = vadd.f32 %v12600_v31, %v21394_v43  ;;  %v21541_v50 = vadd.f32 %v15120_v12, %v12704_v61  ;;  %v12710_v33 = vunpack.c.h.bf16 %v12654_v38  ;;  %v21543_v34 = vadd.f32 %v15141_v25, %v12699_v22 }
 0x66b   : > { %23390 = vst [vmem:[#allocation89_spill] sm:$0xff] %v21534_v36  ;;  %v12845_v11 = vadd.f32 %v12844_v37, %v21524_v59  ;;  %v12851_v20 = vadd.f32 %v21387_v51, %v21534_v36  ;;  %v12840_v8 = vadd.f32 %v12839_v18, %v21529_v3  ;;  %v15144_v5 = vadd.f32 %v12602_v52, %v21413_v40 }
 0x66c   : > { %23391 = vst [vmem:[#allocation91_spill] sm:$0xff] %v21541_v50  ;;  %23392 = vst [vmem:[#allocation93_spill] sm:$0xff] %v21543_v34  ;;  %v11490_v53 = vpop.f32.mrb[36].mxu1  ;;  %v12711_v31 = vunpack.c.l.bf16 %v21537_v30  ;;  %v12712_v61 = vunpack.c.h.bf16 %v21537_v30  ;;  %v12715_v12 = vunpack.c.l.bf16 %v12657_v41  ;;  %v21555_v38 = vadd.f32 %v15142_v1, %v12700_v48 }
 0x66d   : > { %v12852_v22 = vadd.f32 %v12851_v20, %v21541_v50  ;;  %v15121_v25 = vadd.f32 %v11490_v53, %v21367_v39  ;;  %v11492_v51 = vpop.f32.mrb[37].mxu1  ;;  %12841 = vadd.xlane.f32.xlu1 %v12840_v8  ;;  %v12846_v18 = vadd.f32 %v12845_v11, %v21543_v34  ;;  %v21560_v37 = vadd.f32 %v15143_v16, %v12705_v0  ;;  %v12660_v0 = vld [vmem:[%s18742_s19 + $0xc8] sm:$0xff] }
 0x66e   : > { %v15122_v36 = vadd.f32 %v11492_v51, %v21382_v42  ;;  %v11494_v59 = vpop.f32.mrb[38].mxu1  ;;  %v12717_v30 = vunpack.c.l.bf16 %v21550_v27  ;;  %v12716_v45 = vunpack.c.h.bf16 %v12657_v41  ;;  %v21570_v16 = vadd.f32 %v15144_v5, %v12706_v7  ;;  %v21583_v7 = vld [vmem:[%s18742_s19 + $0xd0] sm:$0xff] }
 0x66f   : > { %v12606_v52 = vpop.f32.mrb[36].mxu0  ;;  %v21564_v48 = vadd.f32 %v15121_v25, %v12709_v26  ;;  %v15123_v53 = vadd.f32 %v11494_v59, %v21367_v39  ;;  %v11496_v8 = vpop.f32.mrb[39].mxu1  ;;  %v12847_v11 = vadd.f32 %v12846_v18, %v21555_v38  ;;  %v12853_v26 = vadd.f32 %v12852_v22, %v21560_v37 }
 0x670   : > { %v15145_v1 = vadd.f32 %v12606_v52, %v21394_v43  ;;  %v12608_v20 = vpop.f32.mrb[37].mxu0  ;;  %23394 = vst [vmem:[#allocation97_spill] sm:$0xff] %v21570_v16  ;;  %v21572_v51 = vadd.f32 %v15122_v36, %v12710_v33  ;;  %v15124_v41 = vadd.f32 %v11496_v8, %v21382_v42  ;;  %v12718_v18 = vunpack.c.h.bf16 %v21550_v27  ;;  %v12663_v36 = vld [vmem:[%s18742_s19 + $0xe0] sm:$0xff]  ;;  %v21596_v27 = vld [vmem:[%s18742_s19 + $0xe8] sm:$0xff] }
 0x671   : > { %23393 = vst [vmem:[#allocation95_spill] sm:$0xff] %v21564_v48  ;;  %v12610_v50 = vpop.f32.mrb[38].mxu0  ;;  %v12858_v25 = vadd.f32 %v21391_v10, %v21564_v48  ;;  %v15146_v59 = vadd.f32 %v12608_v20, %v21413_v40  ;;  %v21579_v52 = vadd.f32 %v15123_v53, %v12715_v12  ;;  %12848 = vadd.xlane.f32.xlu0 %v12847_v11  ;;  %v12721_v8 = vunpack.c.l.bf16 %v12660_v0 }
 0x672   : > { %23395 = vst [vmem:[#allocation99_spill] sm:$0xff] %v21572_v51  ;;  %v12612_v34 = vpop.f32.mrb[39].mxu0  ;;  %v15147_v33 = vadd.f32 %v12610_v50, %v21394_v43  ;;  %v21587_v5 = vadd.f32 %v15124_v41, %v12716_v45  ;;  %v12854_v22 = vadd.f32 %v12853_v26, %v21570_v16  ;;  %v21590_v10 = vadd.f32 %v15145_v1, %v12711_v31 }
 0x673   : > { %23396 = vst [vmem:[#allocation101_spill] sm:$0xff] %v21579_v52  ;;  %v12859_v20 = vadd.f32 %v12858_v25, %v21572_v51  ;;  %v12865_v12 = vadd.f32 %v21398_v44, %v21579_v52  ;;  %v12722_v53 = vunpack.c.h.bf16 %v12660_v0  ;;  %v15148_v11 = vadd.f32 %v12612_v34, %v21413_v40 }
 0x674   : > { %23397 = vst [vmem:[#allocation103_spill] sm:$0xff] %v21587_v5  ;;  %23398 = vst [vmem:[#allocation105_spill] sm:$0xff] %v21590_v10  ;;  %12855 = vadd.xlane.f32.xlu1 %v12854_v22  ;;  %v11500_v48 = vpop.f32.mrb[40].mxu1  ;;  %v12723_v45 = vunpack.c.l.bf16 %v21583_v7  ;;  %v12724_v50 = vunpack.c.h.bf16 %v21583_v7  ;;  %v12727_v41 = vunpack.c.l.bf16 %v12663_v36  ;;  %v21601_v26 = vadd.f32 %v15146_v59, %v12712_v61 }
 0x675   : > { %v12866_v31 = vadd.f32 %v12865_v12, %v21587_v5  ;;  %v15125_v1 = vadd.f32 %v11500_v48, %v21367_v39  ;;  %v11502_v44 = vpop.f32.mrb[41].mxu1  ;;  %v12860_v0 = vadd.f32 %v12859_v20, %v21590_v10  ;;  %v21606_v25 = vadd.f32 %v15147_v33, %v12717_v30  ;;  %v12666_v33 = vld [vmem:[%s18742_s19 + $0xf8] sm:$0xff] }
 0x676   : > { %v15126_v22 = vadd.f32 %v11502_v44, %v21382_v42  ;;  %v11504_v52 = vpop.f32.mrb[42].mxu1  ;;  %v12729_v51 = vunpack.c.l.bf16 %v21596_v27  ;;  %v12728_v7 = vunpack.c.h.bf16 %v12663_v36  ;;  %v21616_v20 = vadd.f32 %v15148_v11, %v12718_v18  ;;  %v12667_v18 = vld [vmem:[%s18742_s19 + $0x100] sm:$0xff] }
 0x677   : > { %23399 = vst [vmem:[#allocation108_spill] sm:$0xff] %v21606_v25  ;;  %v12616_v34 = vpop.f32.mrb[40].mxu0  ;;  %v21610_v16 = vadd.f32 %v15125_v1, %v12721_v8  ;;  %v15127_v48 = vadd.f32 %v11504_v52, %v21367_v39  ;;  %v11506_v12 = vpop.f32.mrb[43].mxu1  ;;  %v12861_v30 = vadd.f32 %v12860_v0, %v21601_v26  ;;  %v12867_v8 = vadd.f32 %v12866_v31, %v21606_v25 }
 0x678   : > { %v15149_v61 = vadd.f32 %v12616_v34, %v21394_v43  ;;  %v12618_v59 = vpop.f32.mrb[41].mxu0  ;;  %23401 = vst [vmem:[#allocation112_spill] sm:$0xff] %v21616_v20  ;;  %v21618_v44 = vadd.f32 %v15126_v22, %v12722_v53  ;;  %v15128_v36 = vadd.f32 %v11506_v12, %v21382_v42  ;;  %v12730_v0 = vunpack.c.h.bf16 %v21596_v27  ;;  %v12669_v53 = vld [vmem:[%s18742_s19 + $0x110] sm:$0xff] }
 0x679   : > { %23400 = vst [vmem:[#allocation107_spill] sm:$0xff] %v21610_v16  ;;  %v12620_v5 = vpop.f32.mrb[42].mxu0  ;;  %v12872_v1 = vadd.f32 %v21409_v54, %v21610_v16  ;;  %v15150_v52 = vadd.f32 %v12618_v59, %v21413_v40  ;;  %v21625_v34 = vadd.f32 %v15127_v48, %v12727_v41  ;;  %12862 = vadd.xlane.f32.xlu0 %v12861_v30  ;;  %v12733_v12 = vunpack.c.l.bf16 %v12666_v33  ;;  %v12670_v48 = vld [vmem:[%s18742_s19 + $0x118] sm:$0xff]  ;;  %s18424_s19 = sshll.u32 %s18503_s16, 4  ;;  %s18425_s19 = int_to_ptr.vmem [resolvable:$false] %s18424_s19 }
 0x67a   : > { %23402 = vst [vmem:[#allocation114_spill] sm:$0xff] %v21618_v44  ;;  %v12622_v10 = vpop.f32.mrb[43].mxu0  ;;  %v15151_v11 = vadd.f32 %v12620_v5, %v21394_v43  ;;  %v21631_v22 = vadd.f32 %v15128_v36, %v12728_v7  ;;  %v12868_v31 = vadd.f32 %v12867_v8, %v21616_v20  ;;  %v21634_v25 = vadd.f32 %v15149_v61, %v12723_v45  ;;  %s18426_s18 = scalar_lea.vmem %s18425_s19, 9216  ;;  %p18427_p12 = scmp.lt.s32.totalorder %s22375_s9, %s18425_s19 }
 0x67b   : > { %23403 = vst [vmem:[#allocation116_spill] sm:$0xff] %v21625_v34  ;;  %v12873_v54 = vadd.f32 %v12872_v1, %v21618_v44  ;;  %v12879_v41 = vadd.f32 %v21420_v47, %v21625_v34  ;;  %v12734_v59 = vunpack.c.h.bf16 %v12666_v33  ;;  %v15152_v27 = vadd.f32 %v12622_v10, %v21413_v40  ;;  %p18428_p7 = scmp.lt.s32.totalorder %s18426_s18, %s18420_s8 }
 0x67c   : > { %23404 = vst [vmem:[#allocation118_spill] sm:$0xff] %v21631_v22  ;;  %12869 = vadd.xlane.f32.xlu1 %v12868_v31  ;;  %v11510_v30 = vpop.f32.mrb[44].mxu1  ;;  %v12735_v16 = vunpack.c.l.bf16 %v12667_v18  ;;  %v12736_v5 = vunpack.c.h.bf16 %v12667_v18  ;;  %v12739_v7 = vunpack.c.l.bf16 %v12669_v53  ;;  %v21641_v36 = vadd.f32 %v15150_v52, %v12724_v50 }
 0x67d   : > { %v12880_v8 = vadd.f32 %v12879_v41, %v21631_v22  ;;  %v15129_v45 = vadd.f32 %v11510_v30, %v21367_v39  ;;  %v11512_v61 = vpop.f32.mrb[45].mxu1  ;;  %v12874_v1 = vadd.f32 %v12873_v54, %v21634_v25  ;;  %v21646_v44 = vadd.f32 %v15151_v11, %v12729_v51  ;;  %p18429_p13 = por %p18428_p7, %p18427_p12 }
 0x67e   : > { %v15130_v33 = vadd.f32 %v11512_v61, %v21382_v42  ;;  %v11514_v10 = vpop.f32.mrb[46].mxu1  ;;  %v12741_v31 = vunpack.c.l.bf16 %v12670_v48  ;;  %v12740_v34 = vunpack.c.h.bf16 %v12669_v53  ;;  %v21654_v22 = vadd.f32 %v15152_v27, %v12730_v0 }
 0x67f   : > { %v12626_v47 = vpop.f32.mrb[44].mxu0  ;;  %v21649_v20 = vadd.f32 %v15129_v45, %v12733_v12  ;;  %v15131_v18 = vadd.f32 %v11514_v10, %v21367_v39  ;;  %v11516_v41 = vpop.f32.mrb[47].mxu1  ;;  %v12875_v30 = vadd.f32 %v12874_v1, %v21641_v36  ;;  %v12881_v61 = vadd.f32 %v12880_v8, %v21646_v44  ;;  %p18430_p4 = pnand %p18429_p13, %p18423_p10 }
 0x680   : > { %v15153_v50 = vadd.f32 %v12626_v47, %v21394_v43  ;;  %v12628_v52 = vpop.f32.mrb[45].mxu0  ;;  %v21656_v51 = vadd.f32 %v15130_v33, %v12734_v59  ;;  %v15132_v54 = vadd.f32 %v11516_v41, %v21382_v42  ;;  %v12742_v59 = vunpack.c.h.bf16 %v12670_v48 }
 0x681   : > { %v12630_v11 = vpop.f32.mrb[46].mxu0  ;;  %v12886_v53 = vadd.f32 %v21424_v32, %v21649_v20  ;;  %v15154_v12 = vadd.f32 %v12628_v52, %v21413_v40  ;;  %v21663_v45 = vadd.f32 %v15131_v18, %v12739_v7  ;;  %12876 = vadd.xlane.f32.xlu0 %v12875_v30  ;;  %v12882_v27 = vadd.f32 %v12881_v61, %v21654_v22 }
 0x682   : > { %v15155_v39 = vadd.f32 %v12630_v11, %v21394_v43  ;;  %v12632_v47 = vpop.f32.mrb[47].mxu0  ;;  %v21666_v0 = vadd.f32 %v15132_v54, %v12740_v34  ;;  %v21669_v1 = vadd.f32 %v15153_v50, %v12735_v16 }
 0x683   : > { %v12887_v42 = vadd.f32 %v12886_v53, %v21656_v51  ;;  %v12893_v32 = vadd.f32 %v21434_v4, %v21663_v45  ;;  %v15156_v8 = vadd.f32 %v12632_v47, %v21413_v40  ;;  %12883 = vadd.xlane.f32.xlu1 %v12882_v27  ;;  %v21675_v7 = vadd.f32 %v15154_v12, %v12736_v5 }
 0x684   : > { %v21677_v43 = vadd.f32 %v15155_v39, %v12741_v31 }
 0x685   : > { %v12894_v34 = vadd.f32 %v12893_v32, %v21666_v0  ;;  %v12888_v48 = vadd.f32 %v12887_v42, %v21669_v1  ;;  %v21681_v33 = vadd.f32 %v15156_v8, %v12742_v59 }
 0x687   : > { %v12889_v16 = vadd.f32 %v12888_v48, %v21675_v7  ;;  %v12895_v10 = vadd.f32 %v12894_v34, %v21677_v43 }
 0x689   : > { %12890 = vadd.xlane.f32.xlu0 %v12889_v16  ;;  %v12896_v4 = vadd.f32 %v12895_v10, %v21681_v33 }
 0x68b   : > { %12897 = vadd.xlane.f32.xlu1 %v12896_v4 }
 0x6ee   : > { %v12821_v40 = vpop.xlane.xlu0 %12820 }
 0x6ef   : > { %v12900_v50 = vmul.f32 0.0013020834, %v12821_v40 }
 0x6f1   : > { %v21687_v5 = vsub.f32 %v21278_v14, %v12900_v50  ;;  %v21690_v31 = vsub.f32 %v21281_v19, %v12900_v50  ;;  %v21693_v52 = vsub.f32 %v21427_v49, %v12900_v50  ;;  %v21696_v41 = vsub.f32 %v21436_v28, %v12900_v50 }
 0x6f2   : > { %v12828_v18 = vpop.xlane.xlu0 %12827  ;;  %v21703_v14 = vsub.f32 %v21452_v2, %v12900_v50  ;;  %v21717_v39 = vsub.f32 %v21464_v21, %v12900_v50 }
 0x6f3   : > { %v12901_v30 = vmul.f32 0.0013020834, %v12828_v18  ;;  %v12984_v11 = vmul.f32 %v21687_v5, %v21687_v5  ;;  %v12985_v54 = vmul.f32 %v21690_v31, %v21690_v31  ;;  %v12986_v19 = vmul.f32 %v21693_v52, %v21693_v52 }
 0x6f4   : > { %v12987_v2 = vmul.f32 %v21696_v41, %v21696_v41  ;;  %v12989_v10 = vmul.f32 %v21717_v39, %v21717_v39 }
 0x6f5   : > { %v13056_v61 = vadd.f32 %v12985_v54, %v12984_v11  ;;  %v21708_v49 = vsub.f32 %v21284_v57, %v12901_v30  ;;  %v21711_v28 = vsub.f32 %v21287_v29, %v12901_v30  ;;  %v21714_v53 = vsub.f32 %v21442_v56, %v12901_v30 }
 0x6f6   : > { %v12835_v12 = vpop.xlane.xlu1 %12834  ;;  %v21722_v47 = vsub.f32 %v21449_v9, %v12901_v30  ;;  %v12988_v56 = vmul.f32 %v21703_v14, %v21703_v14  ;;  %v21731_v21 = vsub.f32 %v21467_v35, %v12901_v30  ;;  %v21734_v42 = vsub.f32 %v21483_v24, %v12901_v30 }
 0x6f7   : > { %v12902_v59 = vmul.f32 0.0013020834, %v12835_v12  ;;  %v13057_v27 = vadd.f32 %v13056_v61, %v12986_v19  ;;  %v12990_v57 = vmul.f32 %v21708_v49, %v21708_v49  ;;  %v12991_v29 = vmul.f32 %v21711_v28, %v21711_v28 }
 0x6f8   : > { %v12992_v9 = vmul.f32 %v21714_v53, %v21714_v53  ;;  %v12993_v35 = vmul.f32 %v21722_v47, %v21722_v47  ;;  %v12994_v18 = vmul.f32 %v21731_v21, %v21731_v21  ;;  %v12995_v30 = vmul.f32 %v21734_v42, %v21734_v42 }
 0x6f9   : > { %v13058_v32 = vadd.f32 %v13057_v27, %v12987_v2  ;;  %v13063_v8 = vadd.f32 %v12991_v29, %v12990_v57  ;;  %v21739_v34 = vsub.f32 %v21291_v15, %v12902_v59  ;;  %v21742_v48 = vsub.f32 %v21294_v55, %v12902_v59 }
 0x6fa   : > { %v12842_v16 = vpop.xlane.xlu1 %12841  ;;  %v21749_v24 = vsub.f32 %v21472_v46, %v12902_v59  ;;  %v21752_v4 = vsub.f32 %v21478_v17, %v12902_v59  ;;  %v21761_v11 = vsub.f32 %v21497_v58, %v12902_v59  ;;  %v21766_v19 = vsub.f32 %v21511_v63, %v12902_v59 }
 0x6fb   : > { %v12903_v40 = vmul.f32 0.0013020834, %v12842_v16  ;;  %v13059_v50 = vadd.f32 %v13058_v32, %v12988_v56  ;;  %v13064_v15 = vadd.f32 %v13063_v8, %v12992_v9  ;;  %v12996_v55 = vmul.f32 %v21739_v34, %v21739_v34 }
 0x6fc   : > { %v12997_v46 = vmul.f32 %v21742_v48, %v21742_v48  ;;  %v12998_v2 = vmul.f32 %v21749_v24, %v21749_v24  ;;  %v12999_v63 = vmul.f32 %v21752_v4, %v21752_v4  ;;  %v13000_v59 = vmul.f32 %v21761_v11, %v21761_v11 }
 0x6fd   : > { %v13060_v17 = vadd.f32 %v13059_v50, %v12989_v10  ;;  %v13065_v54 = vadd.f32 %v13064_v15, %v12993_v35  ;;  %v21769_v61 = vsub.f32 %v21297_v60, %v12903_v40  ;;  %v21774_v57 = vsub.f32 %v21300_v6, %v12903_v40 }
 0x6fe   : > { %v12849_v12 = vpop.xlane.xlu0 %12848  ;;  %v13070_v27 = vadd.f32 %v12997_v46, %v12996_v55  ;;  %v21777_v58 = vsub.f32 %v21488_v62, %v12903_v40  ;;  %v21782_v60 = vsub.f32 %v21495_v23, %v12903_v40  ;;  %v13001_v16 = vmul.f32 %v21766_v19, %v21766_v19  ;;  %v23405_v55 = vld [vmem:[#allocation43_spill] sm:$0xff] }
 0x6ff   : > { %v12904_v29 = vmul.f32 0.0013020834, %v12849_v12  ;;  %13061 = vadd.xlane.f32.xlu0 %v13060_v17  ;;  %v13066_v56 = vadd.f32 %v13065_v54, %v12994_v18  ;;  %v13002_v6 = vmul.f32 %v21769_v61, %v21769_v61  ;;  %v13003_v62 = vmul.f32 %v21774_v57, %v21774_v57  ;;  %v23407_v17 = vld [vmem:[#allocation45_spill] sm:$0xff] }
 0x700   : > { %v13071_v9 = vadd.f32 %v13070_v27, %v12998_v2  ;;  %v21793_v10 = vsub.f32 %v21514_v13, %v12903_v40  ;;  %v13004_v23 = vmul.f32 %v21777_v58, %v21777_v58  ;;  %v21801_v46 = vsub.f32 %v21529_v3, %v12903_v40  ;;  %v23409_v13 = vld [vmem:[#allocation83_spill] sm:$0xff]  ;;  %v23413_v40 = vld [vmem:[#allocation93_spill] sm:$0xff] }
 0x701   : > { %v12856_v32 = vpop.xlane.xlu1 %12855  ;;  %v13067_v8 = vadd.f32 %v13066_v56, %v12995_v30  ;;  %v13077_v15 = vadd.f32 %v13003_v62, %v13002_v6  ;;  %v21798_v18 = vsub.f32 %v23405_v55, %v12904_v29  ;;  %v13005_v30 = vmul.f32 %v21782_v60, %v21782_v60  ;;  %v23411_v56 = vld [vmem:[#allocation87_spill] sm:$0xff] }
 0x702   : > { %v12905_v35 = vmul.f32 0.0013020834, %v12856_v32  ;;  %v13072_v50 = vadd.f32 %v13071_v9, %v12999_v63  ;;  %v21806_v54 = vsub.f32 %v23407_v17, %v12904_v29  ;;  %v21809_v12 = vsub.f32 %v23409_v13, %v12904_v29 }
 0x703   : > { %23406 = vst [vmem:[#allocation15_spill] sm:$0xff] %v21798_v18  ;;  %13068 = vadd.xlane.f32.xlu1 %v13067_v8  ;;  %v13078_v27 = vadd.f32 %v13077_v15, %v13004_v23  ;;  %v21812_v63 = vsub.f32 %v23411_v56, %v12904_v29  ;;  %v13008_v9 = vmul.f32 %v21798_v18, %v21798_v18  ;;  %v23416_v15 = vld [vmem:[#allocation49_spill] sm:$0xff] }
 0x704   : > { %23408 = vst [vmem:[#allocation16_spill] sm:$0xff] %v21806_v54  ;;  %23410 = vst [vmem:[#allocation17_spill] sm:$0xff] %v21809_v12  ;;  %v13073_v2 = vadd.f32 %v13072_v50, %v13000_v59  ;;  %v13006_v3 = vmul.f32 %v21793_v10, %v21793_v10  ;;  %v21819_v6 = vsub.f32 %v23413_v40, %v12904_v29  ;;  %v23418_v56 = vld [vmem:[#allocation53_spill] sm:$0xff] }
 0x705   : > { %23412 = vst [vmem:[#allocation18_spill] sm:$0xff] %v21812_v63  ;;  %v21822_v62 = vsub.f32 %v21555_v38, %v12904_v29  ;;  %v13009_v32 = vmul.f32 %v21806_v54, %v21806_v54  ;;  %v13079_v23 = vadd.f32 %v13078_v27, %v13005_v30  ;;  %v13010_v50 = vmul.f32 %v21809_v12, %v21809_v12  ;;  %v23420_v18 = vld [vmem:[#allocation89_spill] sm:$0xff] }
 0x706   : > { %23414 = vst [vmem:[#allocation19_spill] sm:$0xff] %v21819_v6  ;;  %v12863_v59 = vpop.xlane.xlu0 %12862  ;;  %v13074_v8 = vadd.f32 %v13073_v2, %v13001_v16  ;;  %v21829_v55 = vsub.f32 %v23416_v15, %v12905_v35  ;;  %v21832_v40 = vsub.f32 %v23418_v56, %v12905_v35  ;;  %v21835_v38 = vsub.f32 %v23420_v18, %v12905_v35  ;;  %v23422_v2 = vld [vmem:[#allocation91_spill] sm:$0xff]  ;;  %v23425_v56 = vld [vmem:[#allocation97_spill] sm:$0xff] }
 0x707   : > { %23415 = vst [vmem:[#allocation20_spill] sm:$0xff] %v21822_v62  ;;  %v12906_v17 = vmul.f32 0.0013020834, %v12863_v59  ;;  %v13084_v13 = vadd.f32 %v13009_v32, %v13008_v9  ;;  %v13007_v29 = vmul.f32 %v21801_v46, %v21801_v46  ;;  %v13080_v16 = vadd.f32 %v13079_v23, %v13006_v3 }
 0x708   : > { %23417 = vst [vmem:[#allocation21_spill] sm:$0xff] %v21829_v55  ;;  %23419 = vst [vmem:[#allocation22_spill] sm:$0xff] %v21832_v40  ;;  %13075 = vadd.xlane.f32.xlu0 %v13074_v8  ;;  %v13011_v30 = vmul.f32 %v21812_v63, %v21812_v63  ;;  %v21842_v27 = vsub.f32 %v23422_v2, %v12905_v35  ;;  %v13012_v9 = vmul.f32 %v21819_v6, %v21819_v6  ;;  %v23426_v6 = vld [vmem:[#allocation55_spill] sm:$0xff] }
 0x709   : > { %23421 = vst [vmem:[#allocation23_spill] sm:$0xff] %v21835_v38  ;;  %v12870_v15 = vpop.xlane.xlu1 %12869  ;;  %v13085_v32 = vadd.f32 %v13084_v13, %v13010_v50  ;;  %v13014_v18 = vmul.f32 %v21829_v55, %v21829_v55  ;;  %v13015_v59 = vmul.f32 %v21832_v40, %v21832_v40  ;;  %v13081_v8 = vadd.f32 %v13080_v16, %v13007_v29  ;;  %v23428_v16 = vld [vmem:[#allocation57_spill] sm:$0xff] }
 0x70a   : > { %23423 = vst [vmem:[#allocation24_spill] sm:$0xff] %v21842_v27  ;;  %v13013_v3 = vmul.f32 %v21822_v62, %v21822_v62  ;;  %v21853_v23 = vsub.f32 %v21560_v37, %v12905_v35  ;;  %v21856_v2 = vsub.f32 %v23425_v56, %v12905_v35  ;;  %v13016_v50 = vmul.f32 %v21835_v38, %v21835_v38  ;;  %v23429_v37 = vld [vmem:[#allocation95_spill] sm:$0xff] }
 0x70b   : > { %v13086_v63 = vadd.f32 %v13085_v32, %v13011_v30  ;;  %v13091_v13 = vadd.f32 %v13015_v59, %v13014_v18  ;;  %v21861_v55 = vsub.f32 %v23426_v6, %v12906_v17  ;;  %v12907_v12 = vmul.f32 0.0013020834, %v12870_v15  ;;  %13082 = vadd.xlane.f32.xlu1 %v13081_v8  ;;  %v23431_v32 = vld [vmem:[#allocation99_spill] sm:$0xff]  ;;  %v23433_v59 = vld [vmem:[#allocation105_spill] sm:$0xff] }
 0x70c   : > { %23424 = vst [vmem:[#allocation25_spill] sm:$0xff] %v21853_v23  ;;  %v13017_v29 = vmul.f32 %v21842_v27, %v21842_v27  ;;  %v21866_v40 = vsub.f32 %v23428_v16, %v12906_v17  ;;  %v21869_v62 = vsub.f32 %v23429_v37, %v12906_v17  ;;  %v21872_v56 = vsub.f32 %v23431_v32, %v12906_v17 }
 0x70d   : > { %23427 = vst [vmem:[#allocation26_spill] sm:$0xff] %v21861_v55  ;;  %v13087_v35 = vadd.f32 %v13086_v63, %v13012_v9  ;;  %v13092_v30 = vadd.f32 %v13091_v13, %v13016_v50  ;;  %v13020_v6 = vmul.f32 %v21861_v55, %v21861_v55  ;;  %v13018_v15 = vmul.f32 %v21853_v23, %v21853_v23  ;;  %v23436_v55 = vld [vmem:[#allocation62_spill] sm:$0xff]  ;;  %v23438_v23 = vld [vmem:[#allocation61_spill] sm:$0xff] }
 0x70e   : > { %23430 = vst [vmem:[#allocation28_spill] sm:$0xff] %v21869_v62  ;;  %23432 = vst [vmem:[#allocation27_spill] sm:$0xff] %v21872_v56  ;;  %v12877_v18 = vpop.xlane.xlu0 %12876  ;;  %v21879_v8 = vsub.f32 %v23433_v59, %v12906_v17  ;;  %v21882_v16 = vsub.f32 %v21601_v26, %v12906_v17  ;;  %v13021_v63 = vmul.f32 %v21866_v40, %v21866_v40  ;;  %v23440_v59 = vld [vmem:[#allocation101_spill] sm:$0xff] }
 0x70f   : > { %v12908_v9 = vmul.f32 0.0013020834, %v12877_v18  ;;  %v13088_v50 = vadd.f32 %v13087_v35, %v13013_v3  ;;  %v13093_v13 = vadd.f32 %v13092_v30, %v13017_v29  ;;  %v13022_v37 = vmul.f32 %v21869_v62, %v21869_v62  ;;  %v23442_v29 = vld [vmem:[#allocation103_spill] sm:$0xff] }
 0x710   : > { %23434 = vst [vmem:[#allocation29_spill] sm:$0xff] %v21879_v8  ;;  %23435 = vst [vmem:[#allocation30_spill] sm:$0xff] %v21882_v16  ;;  %v13098_v32 = vadd.f32 %v13021_v63, %v13020_v6  ;;  %v21889_v27 = vsub.f32 %v23436_v55, %v12907_v12  ;;  %v21892_v38 = vsub.f32 %v23438_v23, %v12907_v12  ;;  %v12884_v30 = vpop.xlane.xlu1 %12883 }
 0x711   : > { %v21895_v54 = vsub.f32 %v23440_v59, %v12907_v12  ;;  %13089 = vadd.xlane.f32.xlu0 %v13088_v50  ;;  %v13019_v26 = vmul.f32 %v21856_v2, %v21856_v2  ;;  %v13094_v17 = vadd.f32 %v13093_v13, %v13018_v15  ;;  %v13023_v3 = vmul.f32 %v21872_v56, %v21872_v56  ;;  %v23444_v50 = vld [vmem:[#allocation108_spill] sm:$0xff] }
 0x712   : > { %23437 = vst [vmem:[#allocation31_spill] sm:$0xff] %v21889_v27  ;;  %23439 = vst [vmem:[#allocation32_spill] sm:$0xff] %v21892_v38  ;;  %v21902_v35 = vsub.f32 %v23442_v29, %v12907_v12  ;;  %v13024_v55 = vmul.f32 %v21879_v8, %v21879_v8  ;;  %v13099_v23 = vadd.f32 %v13098_v32, %v13022_v37  ;;  %v23446_v59 = vld [vmem:[#allocation112_spill] sm:$0xff]  ;;  %v23448_v8 = vld [vmem:[#allocation65_spill] sm:$0xff]  ;;  %v12909_v62 = vmul.f32 0.0013020834, %v12884_v30 }
 0x713   : > { %23441 = vst [vmem:[#allocation33_spill] sm:$0xff] %v21895_v54  ;;  %v13026_v6 = vmul.f32 %v21889_v27, %v21889_v27  ;;  %v13027_v18 = vmul.f32 %v21892_v38, %v21892_v38  ;;  %v13095_v63 = vadd.f32 %v13094_v17, %v13019_v26  ;;  %v13025_v15 = vmul.f32 %v21882_v16, %v21882_v16  ;;  %v23450_v17 = vld [vmem:[#allocation67_spill] sm:$0xff] }
 0x714   : > { %23443 = vst [vmem:[#allocation34_spill] sm:$0xff] %v21902_v35  ;;  %v21913_v13 = vsub.f32 %v23444_v50, %v12907_v12  ;;  %v21916_v29 = vsub.f32 %v23446_v59, %v12907_v12  ;;  %v13100_v56 = vadd.f32 %v13099_v23, %v13023_v3  ;;  %v13028_v37 = vmul.f32 %v21895_v54, %v21895_v54  ;;  %v23451_v50 = vld [vmem:[#allocation107_spill] sm:$0xff]  ;;  %v23452_v59 = vld [vmem:[#allocation114_spill] sm:$0xff] }
 0x715   : > { %v13105_v32 = vadd.f32 %v13027_v18, %v13026_v6  ;;  %v21921_v27 = vsub.f32 %v23448_v8, %v12908_v9  ;;  %13096 = vadd.xlane.f32.xlu1 %v13095_v63  ;;  %v13029_v26 = vmul.f32 %v21902_v35, %v21902_v35  ;;  %v21926_v38 = vsub.f32 %v23450_v17, %v12908_v9 }
 0x716   : > { %23445 = vst [vmem:[#allocation35_spill] sm:$0xff] %v21913_v13  ;;  %23447 = vst [vmem:[#allocation36_spill] sm:$0xff] %v21916_v29  ;;  %v21929_v16 = vsub.f32 %v23451_v50, %v12908_v9  ;;  %v12891_v12 = vpop.xlane.xlu0 %12890  ;;  %v13101_v3 = vadd.f32 %v13100_v56, %v13024_v55  ;;  %v21932_v54 = vsub.f32 %v23452_v59, %v12908_v9  ;;  %v23453_v59 = vld [vmem:[#allocation69_spill] sm:$0xff] }
 0x717   : > { %23449 = vst [vmem:[#allocation37_spill] sm:$0xff] %v21921_v27  ;;  %v13106_v23 = vadd.f32 %v13105_v32, %v13028_v37  ;;  %v13032_v8 = vmul.f32 %v21921_v27, %v21921_v27  ;;  %v13030_v30 = vmul.f32 %v21913_v13, %v21913_v13  ;;  %v13031_v6 = vmul.f32 %v21916_v29, %v21916_v29  ;;  %v23454_v13 = vld [vmem:[#allocation73_spill] sm:$0xff] }
 0x718   : > { %v13033_v18 = vmul.f32 %v21926_v38, %v21926_v38  ;;  %v12910_v63 = vmul.f32 0.0013020834, %v12891_v12  ;;  %v13102_v17 = vadd.f32 %v13101_v3, %v13025_v15  ;;  %v21943_v56 = vsub.f32 %v21634_v25, %v12908_v9  ;;  %v12898_v55 = vpop.xlane.xlu1 %12897  ;;  %v23455_v15 = vld [vmem:[#allocation116_spill] sm:$0xff] }
 0x719   : > { %v13107_v50 = vadd.f32 %v13106_v23, %v13029_v26  ;;  %v13034_v37 = vmul.f32 %v21929_v16, %v21929_v16  ;;  %v21948_v27 = vsub.f32 %v23453_v59, %v12909_v62  ;;  %v21951_v35 = vsub.f32 %v23454_v13, %v12909_v62  ;;  %v23456_v23 = vld [vmem:[#allocation118_spill] sm:$0xff]  ;;  %v23458_v59 = vld [vmem:[#allocation75_spill] sm:$0xff] }
 0x71a   : > { %v13112_v32 = vadd.f32 %v13033_v18, %v13032_v8  ;;  %13103 = vadd.xlane.f32.xlu0 %v13102_v17  ;;  %v21954_v12 = vsub.f32 %v21641_v36, %v12908_v9  ;;  %v13035_v25 = vmul.f32 %v21932_v54, %v21932_v54  ;;  %v21959_v26 = vsub.f32 %v23455_v15, %v12909_v62 }
 0x71b   : > { %v13108_v29 = vadd.f32 %v13107_v50, %v13030_v30  ;;  %v21962_v8 = vsub.f32 %v23456_v23, %v12909_v62  ;;  %v13038_v18 = vmul.f32 %v21948_v27, %v21948_v27  ;;  %v13039_v13 = vmul.f32 %v21951_v35, %v21951_v35 }
 0x71c   : > { %v13113_v3 = vadd.f32 %v13112_v32, %v13034_v37  ;;  %v12911_v30 = vmul.f32 0.0013020834, %v12898_v55  ;;  %v13036_v36 = vmul.f32 %v21943_v56, %v21943_v56  ;;  %v21971_v9 = vsub.f32 %v21646_v44, %v12909_v62 }
 0x71d   : > { %v13109_v17 = vadd.f32 %v13108_v29, %v13031_v6  ;;  %v13040_v37 = vmul.f32 %v21959_v26, %v21959_v26  ;;  %v13119_v32 = vadd.f32 %v13039_v13, %v13038_v18  ;;  %v21976_v15 = vsub.f32 %v23458_v59, %v12910_v63  ;;  %v23460_v6 = vld [vmem:[#allocation77_spill] sm:$0xff] }
 0x71e   : > { %23457 = vst [vmem:[#allocation38_spill] sm:$0xff] %v21971_v9  ;;  %v13114_v50 = vadd.f32 %v13113_v3, %v13035_v25  ;;  %v13037_v23 = vmul.f32 %v21954_v12, %v21954_v12  ;;  %v21981_v29 = vsub.f32 %v21654_v22, %v12909_v62  ;;  %v21984_v55 = vsub.f32 %v23460_v6, %v12910_v63 }
 0x71f   : > { %23459 = vst [vmem:[#allocation40_spill] sm:$0xff] %v21976_v15  ;;  %13110 = vadd.xlane.f32.xlu1 %v13109_v17  ;;  %v21987_v44 = vsub.f32 %v21649_v20, %v12910_v63  ;;  %v13041_v3 = vmul.f32 %v21962_v8, %v21962_v8  ;;  %v13120_v18 = vadd.f32 %v13119_v32, %v13040_v37 }
 0x720   : > { %v13115_v25 = vadd.f32 %v13114_v50, %v13036_v36  ;;  %v13044_v13 = vmul.f32 %v21976_v15, %v21976_v15  ;;  %v13042_v17 = vmul.f32 %v21971_v9, %v21971_v9  ;;  %v21996_v22 = vsub.f32 %v21656_v51, %v12910_v63  ;;  %v23463_v50 = vld [vmem:[#allocation79_spill] sm:$0xff]  ;;  %v23465_v15 = vld [vmem:[#allocation84_spill] sm:$0xff] }
 0x721   : > { %v13045_v62 = vmul.f32 %v21984_v55, %v21984_v55  ;;  %v13121_v20 = vadd.f32 %v13120_v18, %v13041_v3  ;;  %v22001_v36 = vsub.f32 %v21669_v1, %v12910_v63  ;;  %v22004_v6 = vsub.f32 %v23463_v50, %v12911_v30 }
 0x722   : > { %23461 = vst [vmem:[#allocation39_spill] sm:$0xff] %v21996_v22  ;;  %v13116_v59 = vadd.f32 %v13115_v25, %v13037_v23  ;;  %v13046_v37 = vmul.f32 %v21987_v44, %v21987_v44  ;;  %v22009_v9 = vsub.f32 %v23465_v15, %v12911_v30  ;;  %v22012_v51 = vsub.f32 %v21663_v45, %v12911_v30 }
 0x723   : > { %23462 = vst [vmem:[#allocation42_spill] sm:$0xff] %v22001_v36  ;;  %23464 = vst [vmem:[#allocation44_spill] sm:$0xff] %v22004_v6  ;;  %v13126_v32 = vadd.f32 %v13045_v62, %v13044_v13  ;;  %v13043_v23 = vmul.f32 %v21981_v29, %v21981_v29  ;;  %v13122_v25 = vadd.f32 %v13121_v20, %v13042_v17 }
 0x724   : > { %23466 = vst [vmem:[#allocation46_spill] sm:$0xff] %v22009_v9  ;;  %23467 = vst [vmem:[#allocation48_spill] sm:$0xff] %v22012_v51  ;;  %13117 = vadd.xlane.f32.xlu0 %v13116_v59  ;;  %v22017_v1 = vsub.f32 %v21675_v7, %v12910_v63  ;;  %v13050_v3 = vmul.f32 %v22004_v6, %v22004_v6  ;;  %v13047_v18 = vmul.f32 %v21996_v22, %v21996_v22 }
 0x725   : > { %v13127_v13 = vadd.f32 %v13126_v32, %v13046_v37  ;;  %v22024_v15 = vsub.f32 %v21666_v0, %v12911_v30  ;;  %v13051_v45 = vmul.f32 %v22009_v9, %v22009_v9  ;;  %v13123_v62 = vadd.f32 %v13122_v25, %v13043_v23 }
 0x726   : > { %23468 = vst [vmem:[#allocation50_spill] sm:$0xff] %v22017_v1  ;;  %v13048_v17 = vmul.f32 %v22001_v36, %v22001_v36  ;;  %v22031_v7 = vsub.f32 %v21677_v43, %v12911_v30  ;;  %v13052_v63 = vmul.f32 %v22012_v51, %v22012_v51  ;;  %v13049_v0 = vmul.f32 %v22017_v1, %v22017_v1 }
 0x727   : > { %23469 = vst [vmem:[#allocation52_spill] sm:$0xff] %v22024_v15  ;;  %v13128_v59 = vadd.f32 %v13127_v13, %v13047_v18  ;;  %v13133_v20 = vadd.f32 %v13051_v45, %v13050_v3  ;;  %13124 = vadd.xlane.f32.xlu1 %v13123_v62  ;;  %v22038_v37 = vsub.f32 %v21681_v33, %v12911_v30 }
 0x728   : > { %23470 = vst [vmem:[#allocation54_spill] sm:$0xff] %v22031_v7  ;;  %v13053_v32 = vmul.f32 %v22024_v15, %v22024_v15  ;;  %v13054_v43 = vmul.f32 %v22031_v7, %v22031_v7  ;;  %v23477_v7 = vld [vmem:[#allocation71_spill] sm:$0xff] }
 0x729   : > { %v13129_v50 = vadd.f32 %v13128_v59, %v13048_v17  ;;  %23471 = vst [vmem:[#allocation56_spill] sm:$0xff] %v22038_v37  ;;  %v13134_v23 = vadd.f32 %v13133_v20, %v13052_v63  ;;  %v13055_v3 = vmul.f32 %v22038_v37, %v22038_v37  ;;  %v13248_v63 = vld [vmem:[%s22425_s4] sm:$0x3f] }
 0x72a   : > { %v22083_v51 = vrot.slane %v13248_v63, %v23477_v7 }
 0x72b   : > { %v13130_v25 = vadd.f32 %v13129_v50, %v13049_v0  ;;  %v13135_v18 = vadd.f32 %v13134_v23, %v13053_v32  ;;  %v13352_v0 = vld [vmem:[%s22426_s5] sm:$0x3f]  ;;  %v23472_v32 = vld [vmem:[#allocation41_spill] sm:$0xff] }
 0x72c   : > { %v22053_v23 = vrot.slane %v13248_v63, %v23472_v32  ;;  %v22090_v6 = vrot.slane %v13352_v0, %v23477_v7 }
 0x72d   : > { %13131 = vadd.xlane.f32.xlu0 %v13130_v25  ;;  %v13136_v13 = vadd.f32 %v13135_v18, %v13054_v43  ;;  %v22056_v43 = vrot.slane %v13352_v0, %v23472_v32  ;;  %v23473_v18 = vld [vmem:[#allocation120_spill] sm:$0xff] }
 0x72f   : > { %v13137_v45 = vadd.f32 %v13136_v13, %v13055_v3  ;;  %v22059_v3 = vrot.slane %v13248_v63, %v23473_v18  ;;  %v22062_v13 = vrot.slane %v13352_v0, %v23473_v18 }
 0x731   : > { %13138 = vadd.xlane.f32.xlu1 %v13137_v45 }
 0x78c   : > { %v13062_v62 = vpop.xlane.xlu0 %13061 }
 0x78d   : > { %v13140_v17 = vmul.f32 0.0013020834, %v13062_v62 }
 0x78f   : > { %v13152_v33 = vadd.f32 1e-05, %v13140_v17 }
 0x790   : > { %v13069_v30 = vpop.xlane.xlu1 %13068 }
 0x791   : > { %18307 = vrsqrt.f32 %v13152_v33  ;;  %v13141_v59 = vmul.f32 0.0013020834, %v13069_v30  ;;  %v23475_v33 = vld [vmem:[#allocation51_spill] sm:$0xff] }
 0x792   : > { %v22071_v30 = vrot.slane %v13248_v63, %v23475_v33  ;;  %v22080_v18 = vrot.slane %v13352_v0, %v23475_v33 }
 0x793   : > { %v13153_v15 = vadd.f32 1e-05, %v13141_v59 }
 0x795   : > { %18309 = vrsqrt.f32 %v13153_v15  ;;  %v13076_v20 = vpop.xlane.xlu0 %13075  ;;  %v23474_v15 = vld [vmem:[#allocation47_spill] sm:$0xff] }
 0x796   : > { %v13142_v50 = vmul.f32 0.0013020834, %v13076_v20  ;;  %v22065_v45 = vrot.slane %v13248_v63, %v23474_v15  ;;  %v22068_v17 = vrot.slane %v13352_v0, %v23474_v15 }
 0x798   : > { %v13154_v25 = vadd.f32 1e-05, %v13142_v50  ;;  %v13083_v62 = vpop.xlane.xlu1 %13082  ;;  %v23476_v50 = vld [vmem:[#allocation59_spill] sm:$0xff] }
 0x799   : > { %v13143_v59 = vmul.f32 0.0013020834, %v13083_v62  ;;  %v22074_v32 = vrot.slane %v13248_v63, %v23476_v50  ;;  %v22077_v37 = vrot.slane %v13352_v0, %v23476_v50 }
 0x79a   : > { %18311 = vrsqrt.f32 %v13154_v25 }
 0x79b   : > { %v18308_v20 = vpop.eup %18307  ;;  %v13155_v33 = vadd.f32 1e-05, %v13143_v59 }
 0x79c   : > { %v13176_v15 = vmul.f32 %v18308_v20, %v21687_v5  ;;  %v13177_v9 = vmul.f32 %v18308_v20, %v21690_v31  ;;  %v13178_v25 = vmul.f32 %v18308_v20, %v21693_v52  ;;  %v13179_v62 = vmul.f32 %v18308_v20, %v21696_v41 }
 0x79d   : > { %v13180_v50 = vmul.f32 %v18308_v20, %v21703_v14  ;;  %v13181_v1 = vmul.f32 %v18308_v20, %v21717_v39  ;;  %18313 = vrsqrt.f32 %v13155_v33 }
 0x79e   : > { %v13280_v36 = vmul.f32 %v22053_v23, %v13176_v15  ;;  %v13281_v63 = vmul.f32 %v22059_v3, %v13177_v9  ;;  %v13282_v5 = vmul.f32 %v22065_v45, %v13178_v25  ;;  %v13283_v31 = vmul.f32 %v22071_v30, %v13179_v62  ;;  %v13090_v22 = vpop.xlane.xlu0 %13089 }
 0x79f   : > { %v18310_v52 = vpop.eup %18309  ;;  %v13284_v41 = vmul.f32 %v22074_v32, %v13180_v50  ;;  %v13285_v7 = vmul.f32 %v22083_v51, %v13181_v1  ;;  %v13144_v0 = vmul.f32 0.0013020834, %v13090_v22 }
 0x7a0   : > { %v13384_v14 = vadd.f32 %v22056_v43, %v13280_v36  ;;  %v13385_v39 = vadd.f32 %v22062_v13, %v13281_v63  ;;  %v13386_v59 = vadd.f32 %v22068_v17, %v13282_v5  ;;  %v13387_v9 = vadd.f32 %v22080_v18, %v13283_v31 }
 0x7a1   : > { %v13388_v20 = vadd.f32 %v22077_v37, %v13284_v41  ;;  %v13389_v15 = vadd.f32 %v22090_v6, %v13285_v7  ;;  %v13182_v25 = vmul.f32 %v18310_v52, %v21708_v49  ;;  %v13183_v62 = vmul.f32 %v18310_v52, %v21711_v28 }
 0x7a2   : > { %v15025_v1 = vpack.c.bf16 %v13385_v39, %v13384_v14  ;;  %v15026_v50 = vpack.c.bf16 %v13387_v9, %v13386_v59  ;;  %v13184_v22 = vmul.f32 %v18310_v52, %v21714_v53  ;;  %v13185_v36 = vmul.f32 %v18310_v52, %v21722_v47 }
 0x7a3   : > { %v15027_v33 = vpack.c.bf16 %v13389_v15, %v13388_v20  ;;  %v13186_v63 = vmul.f32 %v18310_v52, %v21731_v21  ;;  %v13187_v5 = vmul.f32 %v18310_v52, %v21734_v42  ;;  %v13286_v31 = vmul.f32 %v22053_v23, %v13182_v25 }
 0x7a4   : > { %v18312_v41 = vpop.eup %18311  ;;  %13672 = vst [vmem:[%s22115_s7] sm:$0xff] %v15025_v1  ;;  %13673 = vst [vmem:[%s22115_s7 + $0x8] sm:$0xff] %v15026_v50  ;;  %v13287_v49 = vmul.f32 %v22059_v3, %v13183_v62  ;;  %v13288_v28 = vmul.f32 %v22065_v45, %v13184_v22  ;;  %v13289_v53 = vmul.f32 %v22071_v30, %v13185_v36  ;;  %v13156_v47 = vadd.f32 1e-05, %v13144_v0 }
 0x7a5   : > { %13674 = vst [vmem:[%s22115_s7 + $0x10] sm:$0xff] %v15027_v33  ;;  %v13290_v21 = vmul.f32 %v22074_v32, %v13186_v63  ;;  %v13291_v42 = vmul.f32 %v22083_v51, %v13187_v5  ;;  %v13390_v52 = vadd.f32 %v22056_v43, %v13286_v31  ;;  %v13188_v7 = vmul.f32 %v18312_v41, %v21739_v34 }
 0x7a6   : > { %v13391_v14 = vadd.f32 %v22062_v13, %v13287_v49  ;;  %v13392_v39 = vadd.f32 %v22068_v17, %v13288_v28  ;;  %v13393_v59 = vadd.f32 %v22080_v18, %v13289_v53  ;;  %v13189_v9 = vmul.f32 %v18312_v41, %v21742_v48  ;;  %v13097_v28 = vpop.xlane.xlu1 %13096 }
 0x7a7   : > { %v13394_v0 = vadd.f32 %v22077_v37, %v13290_v21  ;;  %v13395_v20 = vadd.f32 %v22090_v6, %v13291_v42  ;;  %v13190_v15 = vmul.f32 %v18312_v41, %v21749_v24  ;;  %v13191_v25 = vmul.f32 %v18312_v41, %v21752_v4  ;;  %v18314_v22 = vpop.eup %18313 }
 0x7a8   : > { %v15028_v34 = vpack.c.bf16 %v13391_v14, %v13390_v52  ;;  %v15029_v62 = vpack.c.bf16 %v13393_v59, %v13392_v39  ;;  %v13192_v1 = vmul.f32 %v18312_v41, %v21761_v11  ;;  %v13193_v50 = vmul.f32 %v18312_v41, %v21766_v19 }
 0x7a9   : > { %v15030_v36 = vpack.c.bf16 %v13395_v20, %v13394_v0  ;;  %v13292_v33 = vmul.f32 %v22053_v23, %v13188_v7  ;;  %v13293_v48 = vmul.f32 %v22059_v3, %v13189_v9  ;;  %v13294_v63 = vmul.f32 %v22065_v45, %v13190_v15 }
 0x7aa   : > { %13675 = vst [vmem:[%s22115_s7 + $0x18] sm:$0xff] %v15028_v34  ;;  %13676 = vst [vmem:[%s22115_s7 + $0x20] sm:$0xff] %v15029_v62  ;;  %v13295_v24 = vmul.f32 %v22071_v30, %v13191_v25  ;;  %v13296_v4 = vmul.f32 %v22074_v32, %v13192_v1  ;;  %v13297_v5 = vmul.f32 %v22083_v51, %v13193_v50  ;;  %18315 = vrsqrt.f32 %v13156_v47 }
 0x7ab   : > { %v13194_v11 = vmul.f32 %v18314_v22, %v21769_v61  ;;  %13677 = vst [vmem:[%s22115_s7 + $0x28] sm:$0xff] %v15030_v36  ;;  %v13396_v19 = vadd.f32 %v22056_v43, %v13292_v33  ;;  %v13397_v31 = vadd.f32 %v22062_v13, %v13293_v48  ;;  %v13398_v41 = vadd.f32 %v22068_v17, %v13294_v63  ;;  %v13104_v61 = vpop.xlane.xlu0 %13103 }
 0x7ac   : > { %v13195_v49 = vmul.f32 %v18314_v22, %v21774_v57  ;;  %v13399_v53 = vadd.f32 %v22080_v18, %v13295_v24  ;;  %v13400_v21 = vadd.f32 %v22077_v37, %v13296_v4  ;;  %v13401_v42 = vadd.f32 %v22090_v6, %v13297_v5 }
 0x7ad   : > { %v13196_v52 = vmul.f32 %v18314_v22, %v21777_v58  ;;  %v15031_v7 = vpack.c.bf16 %v13397_v31, %v13396_v19  ;;  %v13197_v14 = vmul.f32 %v18314_v22, %v21782_v60  ;;  %v13198_v39 = vmul.f32 %v18314_v22, %v21793_v10  ;;  %v13111_v60 = vpop.xlane.xlu1 %13110 }
 0x7ae   : > { %v13199_v59 = vmul.f32 %v18314_v22, %v21801_v46  ;;  %v15032_v57 = vpack.c.bf16 %v13399_v53, %v13398_v41  ;;  %v15033_v9 = vpack.c.bf16 %v13401_v42, %v13400_v21  ;;  %v13298_v0 = vmul.f32 %v22053_v23, %v13194_v11 }
 0x7af   : > { %v13299_v20 = vmul.f32 %v22059_v3, %v13195_v49  ;;  %13678 = vst [vmem:[%s22115_s7 + $0x30] sm:$0xff] %v15031_v7  ;;  %v13300_v15 = vmul.f32 %v22065_v45, %v13196_v52  ;;  %v13301_v58 = vmul.f32 %v22071_v30, %v13197_v14  ;;  %v13302_v25 = vmul.f32 %v22074_v32, %v13198_v39  ;;  %v23479_v14 = vld [vmem:[#allocation16_spill] sm:$0xff] }
 0x7b0   : > { %v13303_v34 = vmul.f32 %v22083_v51, %v13199_v59  ;;  %13679 = vst [vmem:[%s22115_s7 + $0x38] sm:$0xff] %v15032_v57  ;;  %13680 = vst [vmem:[%s22115_s7 + $0x40] sm:$0xff] %v15033_v9  ;;  %v13402_v10 = vadd.f32 %v22056_v43, %v13298_v0  ;;  %v13145_v62 = vmul.f32 0.0013020834, %v13097_v28  ;;  %v13146_v24 = vmul.f32 0.0013020834, %v13104_v61 }
 0x7b1   : > { %v13403_v46 = vadd.f32 %v22062_v13, %v13299_v20  ;;  %v13118_v1 = vpop.xlane.xlu0 %13117  ;;  %v13404_v50 = vadd.f32 %v22068_v17, %v13300_v15  ;;  %v13405_v22 = vadd.f32 %v22080_v18, %v13301_v58  ;;  %v13406_v36 = vadd.f32 %v22077_v37, %v13302_v25  ;;  %v23478_v61 = vld [vmem:[#allocation15_spill] sm:$0xff]  ;;  %v23480_v59 = vld [vmem:[#allocation17_spill] sm:$0xff]  ;;  %v23481_v9 = vld [vmem:[#allocation18_spill] sm:$0xff] }
 0x7b2   : > { %v13407_v33 = vadd.f32 %v22090_v6, %v13303_v34  ;;  %v13157_v63 = vadd.f32 1e-05, %v13145_v62  ;;  %v13147_v4 = vmul.f32 0.0013020834, %v13111_v60  ;;  %v13148_v19 = vmul.f32 0.0013020834, %v13118_v1 }
 0x7b3   : > { %v15034_v48 = vpack.c.bf16 %v13403_v46, %v13402_v10  ;;  %v15035_v5 = vpack.c.bf16 %v13405_v22, %v13404_v50  ;;  %v13158_v47 = vadd.f32 1e-05, %v13146_v24  ;;  %v23482_v20 = vld [vmem:[#allocation19_spill] sm:$0xff]  ;;  %v23483_v58 = vld [vmem:[#allocation20_spill] sm:$0xff] }
 0x7b4   : > { %v15036_v11 = vpack.c.bf16 %v13407_v33, %v13406_v36  ;;  %18317 = vrsqrt.f32 %v13157_v63  ;;  %v13125_v31 = vpop.xlane.xlu1 %13124  ;;  %v13159_v41 = vadd.f32 1e-05, %v13147_v4  ;;  %v13160_v28 = vadd.f32 1e-05, %v13148_v19  ;;  %v18316_v42 = vpop.eup %18315 }
 0x7b5   : > { %13681 = vst [vmem:[%s22115_s7 + $0x48] sm:$0xff] %v15034_v48  ;;  %13682 = vst [vmem:[%s22115_s7 + $0x50] sm:$0xff] %v15035_v5  ;;  %v13149_v49 = vmul.f32 0.0013020834, %v13125_v31  ;;  %18319 = vrsqrt.f32 %v13158_v47  ;;  %v13200_v7 = vmul.f32 %v18316_v42, %v23478_v61  ;;  %v13201_v39 = vmul.f32 %v18316_v42, %v23479_v14  ;;  %v23484_v47 = vld [vmem:[#allocation21_spill] sm:$0xff] }
 0x7b6   : > { %13683 = vst [vmem:[%s22115_s7 + $0x58] sm:$0xff] %v15036_v11  ;;  %18321 = vrsqrt.f32 %v13159_v41  ;;  %v13202_v57 = vmul.f32 %v18316_v42, %v23480_v59  ;;  %v13203_v0 = vmul.f32 %v18316_v42, %v23481_v9  ;;  %v13204_v15 = vmul.f32 %v18316_v42, %v23482_v20  ;;  %v23485_v41 = vld [vmem:[#allocation22_spill] sm:$0xff]  ;;  %v23488_v14 = vld [vmem:[#allocation25_spill] sm:$0xff] }
 0x7b7   : > { %v13161_v53 = vadd.f32 1e-05, %v13149_v49  ;;  %18323 = vrsqrt.f32 %v13160_v28  ;;  %v13205_v25 = vmul.f32 %v18316_v42, %v23483_v58  ;;  %v13304_v60 = vmul.f32 %v22053_v23, %v13200_v7  ;;  %v23489_v58 = vld [vmem:[#allocation26_spill] sm:$0xff] }
 0x7b8   : > { %v13305_v10 = vmul.f32 %v22059_v3, %v13201_v39  ;;  %v13306_v46 = vmul.f32 %v22065_v45, %v13202_v57  ;;  %v13307_v62 = vmul.f32 %v22071_v30, %v13203_v0  ;;  %v13308_v22 = vmul.f32 %v22074_v32, %v13204_v15 }
 0x7b9   : > { %18325 = vrsqrt.f32 %v13161_v53  ;;  %v13309_v36 = vmul.f32 %v22083_v51, %v13205_v25  ;;  %v13408_v48 = vadd.f32 %v22056_v43, %v13304_v60 }
 0x7ba   : > { %v13132_v21 = vpop.xlane.xlu0 %13131  ;;  %v13409_v63 = vadd.f32 %v22062_v13, %v13305_v10  ;;  %v13410_v24 = vadd.f32 %v22068_v17, %v13306_v46  ;;  %v13411_v4 = vadd.f32 %v22080_v18, %v13307_v62  ;;  %v13412_v11 = vadd.f32 %v22077_v37, %v13308_v22  ;;  %v23490_v22 = vld [vmem:[#allocation28_spill] sm:$0xff] }
 0x7bb   : > { %v13150_v52 = vmul.f32 0.0013020834, %v13132_v21  ;;  %v13413_v19 = vadd.f32 %v22090_v6, %v13309_v36  ;;  %v23486_v21 = vld [vmem:[#allocation23_spill] sm:$0xff] }
 0x7bc   : > { %v15037_v28 = vpack.c.bf16 %v13409_v63, %v13408_v48  ;;  %v15038_v53 = vpack.c.bf16 %v13411_v4, %v13410_v24  ;;  %v23491_v4 = vld [vmem:[#allocation27_spill] sm:$0xff] }
 0x7bd   : > { %v13162_v34 = vadd.f32 1e-05, %v13150_v52  ;;  %v23487_v52 = vld [vmem:[#allocation24_spill] sm:$0xff]  ;;  %v15039_v7 = vpack.c.bf16 %v13413_v19, %v13412_v11  ;;  %v23492_v19 = vld [vmem:[#allocation29_spill] sm:$0xff] }
 0x7be   : > { %v13139_v1 = vpop.xlane.xlu1 %13138  ;;  %v18318_v50 = vpop.eup %18317  ;;  %13684 = vst [vmem:[%s22115_s7 + $0x60] sm:$0xff] %v15037_v28  ;;  %13685 = vst [vmem:[%s22115_s7 + $0x68] sm:$0xff] %v15038_v53 }
 0x7bf   : > { %18327 = vrsqrt.f32 %v13162_v34  ;;  %v22188_v33 = vmul.f32 0.0013020834, %v13139_v1  ;;  %v18320_v5 = vpop.eup %18319  ;;  %v13206_v31 = vmul.f32 %v18318_v50, %v23484_v47  ;;  %v13207_v49 = vmul.f32 %v18318_v50, %v23485_v41  ;;  %13686 = vst [vmem:[%s22115_s7 + $0x70] sm:$0xff] %v15039_v7  ;;  %v23493_v41 = vld [vmem:[#allocation30_spill] sm:$0xff] }
 0x7c0   : > { %v13208_v42 = vmul.f32 %v18318_v50, %v23486_v21  ;;  %v13209_v61 = vmul.f32 %v18318_v50, %v23487_v52  ;;  %v13210_v39 = vmul.f32 %v18318_v50, %v23488_v14  ;;  %v13211_v59 = vmul.f32 %v18318_v50, %v21856_v2  ;;  %v18322_v9 = vpop.eup %18321 }
 0x7c1   : > { %v13310_v57 = vmul.f32 %v22053_v23, %v13206_v31  ;;  %v13311_v0 = vmul.f32 %v22059_v3, %v13207_v49  ;;  %v13212_v25 = vmul.f32 %v18320_v5, %v23489_v58  ;;  %v22209_v34 = vpop.eup %18323  ;;  %v13213_v46 = vmul.f32 %v18320_v5, %v21866_v40 }
 0x7c2   : > { %v13312_v20 = vmul.f32 %v22065_v45, %v13208_v42  ;;  %v13313_v15 = vmul.f32 %v22071_v30, %v13209_v61  ;;  %v13314_v60 = vmul.f32 %v22074_v32, %v13210_v39  ;;  %v13315_v2 = vmul.f32 %v22083_v51, %v13211_v59 }
 0x7c3   : > { %v13414_v10 = vadd.f32 %v22056_v43, %v13310_v57  ;;  %v13415_v62 = vadd.f32 %v22062_v13, %v13311_v0  ;;  %v13214_v36 = vmul.f32 %v18320_v5, %v23490_v22  ;;  %v22220_v48 = vpop.eup %18325  ;;  %v13215_v11 = vmul.f32 %v18320_v5, %v23491_v4  ;;  %v23498_v22 = vld [vmem:[#allocation35_spill] sm:$0xff] }
 0x7c4   : > { %v13416_v1 = vadd.f32 %v22068_v17, %v13312_v20  ;;  %v13417_v50 = vadd.f32 %v22080_v18, %v13313_v15  ;;  %v13418_v63 = vadd.f32 %v22077_v37, %v13314_v60  ;;  %v13419_v24 = vadd.f32 %v22090_v6, %v13315_v2  ;;  %v23495_v15 = vld [vmem:[#allocation32_spill] sm:$0xff]  ;;  %v23496_v2 = vld [vmem:[#allocation33_spill] sm:$0xff] }
 0x7c5   : > { %v13216_v40 = vmul.f32 %v18320_v5, %v23492_v19  ;;  %v15040_v47 = vpack.c.bf16 %v13415_v62, %v13414_v10  ;;  %v13217_v49 = vmul.f32 %v18320_v5, %v23493_v41  ;;  %v13316_v28 = vmul.f32 %v22053_v23, %v13212_v25  ;;  %v23494_v5 = vld [vmem:[#allocation31_spill] sm:$0xff] }
 0x7c6   : > { %v15041_v31 = vpack.c.bf16 %v13417_v50, %v13416_v1  ;;  %v15042_v21 = vpack.c.bf16 %v13419_v24, %v13418_v63  ;;  %v13317_v42 = vmul.f32 %v22059_v3, %v13213_v46  ;;  %v13318_v52 = vmul.f32 %v22065_v45, %v13214_v36  ;;  %v23497_v46 = vld [vmem:[#allocation34_spill] sm:$0xff]  ;;  %v23499_v63 = vld [vmem:[#allocation36_spill] sm:$0xff] }
 0x7c7   : > { %v13319_v61 = vmul.f32 %v22071_v30, %v13215_v11  ;;  %13687 = vst [vmem:[%s22115_s7 + $0x78] sm:$0xff] %v15040_v47  ;;  %v13320_v7 = vmul.f32 %v22074_v32, %v13216_v40  ;;  %v13321_v14 = vmul.f32 %v22083_v51, %v13217_v49  ;;  %v13420_v39 = vadd.f32 %v22056_v43, %v13316_v28  ;;  %v23500_v49 = vld [vmem:[#allocation37_spill] sm:$0xff] }
 0x7c8   : > { %13688 = vst [vmem:[%s22115_s7 + $0x80] sm:$0xff] %v15041_v31  ;;  %v13218_v59 = vmul.f32 %v18322_v9, %v23494_v5  ;;  %13689 = vst [vmem:[%s22115_s7 + $0x88] sm:$0xff] %v15042_v21  ;;  %v13421_v57 = vadd.f32 %v22062_v13, %v13317_v42  ;;  %v13422_v0 = vadd.f32 %v22068_v17, %v13318_v52 }
 0x7c9   : > { %v22228_v53 = vpop.eup %18327  ;;  %v13423_v20 = vadd.f32 %v22080_v18, %v13319_v61  ;;  %v13219_v58 = vmul.f32 %v18322_v9, %v23495_v15  ;;  %v13424_v25 = vadd.f32 %v22077_v37, %v13320_v7  ;;  %v13425_v60 = vadd.f32 %v22090_v6, %v13321_v14 }
 0x7ca   : > { %v13220_v10 = vmul.f32 %v18322_v9, %v23496_v2  ;;  %v13221_v62 = vmul.f32 %v18322_v9, %v23497_v46  ;;  %v15043_v1 = vpack.c.bf16 %v13421_v57, %v13420_v39  ;;  %v13222_v36 = vmul.f32 %v18322_v9, %v23498_v22 }
 0x7cb   : > { %v15044_v50 = vpack.c.bf16 %v13423_v20, %v13422_v0  ;;  %v13223_v24 = vmul.f32 %v18322_v9, %v23499_v63  ;;  %v15045_v4 = vpack.c.bf16 %v13425_v60, %v13424_v25  ;;  %v13322_v11 = vmul.f32 %v22053_v23, %v13218_v59 }
 0x7cc   : > { %v13323_v19 = vmul.f32 %v22059_v3, %v13219_v58  ;;  %v13324_v40 = vmul.f32 %v22065_v45, %v13220_v10  ;;  %13690 = vst [vmem:[%s22115_s7 + $0x90] sm:$0xff] %v15043_v1  ;;  %v13325_v47 = vmul.f32 %v22071_v30, %v13221_v62  ;;  %v13326_v31 = vmul.f32 %v22074_v32, %v13222_v36  ;;  %v23501_v36 = vld [vmem:[#allocation38_spill] sm:$0xff] }
 0x7cd   : > { %13691 = vst [vmem:[%s22115_s7 + $0x98] sm:$0xff] %v15044_v50  ;;  %v13327_v41 = vmul.f32 %v22083_v51, %v13223_v24  ;;  %v13224_v28 = vmul.f32 %v22209_v34, %v23500_v49  ;;  %13692 = vst [vmem:[%s22115_s7 + $0xa0] sm:$0xff] %v15045_v4  ;;  %v13426_v9 = vadd.f32 %v22056_v43, %v13322_v11 }
 0x7ce   : > { %v13427_v21 = vadd.f32 %v22062_v13, %v13323_v19  ;;  %v13428_v42 = vadd.f32 %v22068_v17, %v13324_v40  ;;  %v13225_v52 = vmul.f32 %v22209_v34, %v21926_v38  ;;  %v13429_v61 = vadd.f32 %v22080_v18, %v13325_v47 }
 0x7cf   : > { %v13430_v7 = vadd.f32 %v22077_v37, %v13326_v31  ;;  %v13431_v14 = vadd.f32 %v22090_v6, %v13327_v41  ;;  %v13226_v39 = vmul.f32 %v22209_v34, %v21929_v16  ;;  %v13227_v59 = vmul.f32 %v22209_v34, %v21932_v54  ;;  %v23502_v41 = vld [vmem:[#allocation40_spill] sm:$0xff] }
 0x7d0   : > { %v15046_v5 = vpack.c.bf16 %v13427_v21, %v13426_v9  ;;  %v13228_v57 = vmul.f32 %v22209_v34, %v21943_v56  ;;  %v13229_v38 = vmul.f32 %v22209_v34, %v21954_v12  ;;  %v15047_v0 = vpack.c.bf16 %v13429_v61, %v13428_v42  ;;  %v23503_v61 = vld [vmem:[#allocation39_spill] sm:$0xff] }
 0x7d1   : > { %v15048_v20 = vpack.c.bf16 %v13431_v14, %v13430_v7  ;;  %v13328_v15 = vmul.f32 %v22053_v23, %v13224_v28  ;;  %v13329_v58 = vmul.f32 %v22059_v3, %v13225_v52  ;;  %v13330_v25 = vmul.f32 %v22065_v45, %v13226_v39  ;;  %v23504_v14 = vld [vmem:[#allocation42_spill] sm:$0xff] }
 0x7d2   : > { %13693 = vst [vmem:[%s22115_s7 + $0xa8] sm:$0xff] %v15046_v5  ;;  %v13331_v16 = vmul.f32 %v22071_v30, %v13227_v59  ;;  %v13332_v60 = vmul.f32 %v22074_v32, %v13228_v57  ;;  %v13333_v54 = vmul.f32 %v22083_v51, %v13229_v38  ;;  %13694 = vst [vmem:[%s22115_s7 + $0xb0] sm:$0xff] %v15047_v0  ;;  %v23505_v59 = vld [vmem:[#allocation50_spill] sm:$0xff] }
 0x7d3   : > { %13695 = vst [vmem:[%s22115_s7 + $0xb8] sm:$0xff] %v15048_v20  ;;  %v13432_v56 = vadd.f32 %v22056_v43, %v13328_v15  ;;  %v13433_v12 = vadd.f32 %v22062_v13, %v13329_v58  ;;  %v13230_v34 = vmul.f32 %v22220_v48, %v21948_v27  ;;  %v13231_v2 = vmul.f32 %v22220_v48, %v21951_v35 }
 0x7d4   : > { %v13434_v10 = vadd.f32 %v22068_v17, %v13330_v25  ;;  %v13435_v46 = vadd.f32 %v22080_v18, %v13331_v16  ;;  %v13436_v62 = vadd.f32 %v22077_v37, %v13332_v60  ;;  %v13437_v1 = vadd.f32 %v22090_v6, %v13333_v54 }
 0x7d5   : > { %v15049_v50 = vpack.c.bf16 %v13433_v12, %v13432_v56  ;;  %v13232_v22 = vmul.f32 %v22220_v48, %v21959_v26  ;;  %v13233_v27 = vmul.f32 %v22220_v48, %v21962_v8  ;;  %v13234_v35 = vmul.f32 %v22220_v48, %v23501_v36 }
 0x7d6   : > { %v15050_v63 = vpack.c.bf16 %v13435_v46, %v13434_v10  ;;  %v15051_v24 = vpack.c.bf16 %v13437_v1, %v13436_v62  ;;  %v13235_v4 = vmul.f32 %v22220_v48, %v21981_v29  ;;  %v13334_v11 = vmul.f32 %v22053_v23, %v13230_v34  ;;  %v23506_v62 = vld [vmem:[#allocation44_spill] sm:$0xff] }
 0x7d7   : > { %13696 = vst [vmem:[%s22115_s7 + $0xc0] sm:$0xff] %v15049_v50  ;;  %v13335_v19 = vmul.f32 %v22059_v3, %v13231_v2  ;;  %v13336_v40 = vmul.f32 %v22065_v45, %v13232_v22  ;;  %v13337_v26 = vmul.f32 %v22071_v30, %v13233_v27  ;;  %v13338_v47 = vmul.f32 %v22074_v32, %v13234_v35  ;;  %v23507_v50 = vld [vmem:[#allocation46_spill] sm:$0xff]  ;;  %v23508_v27 = vld [vmem:[#allocation48_spill] sm:$0xff] }
 0x7d8   : > { %13697 = vst [vmem:[%s22115_s7 + $0xc8] sm:$0xff] %v15050_v63  ;;  %13698 = vst [vmem:[%s22115_s7 + $0xd0] sm:$0xff] %v15051_v24  ;;  %v13339_v8 = vmul.f32 %v22083_v51, %v13235_v4  ;;  %v13438_v31 = vadd.f32 %v22056_v43, %v13334_v11  ;;  %v13236_v29 = vmul.f32 %v22228_v53, %v23502_v41  ;;  %v13163_v16 = vadd.f32 1e-05, %v22188_v33  ;;  %v23509_v35 = vld [vmem:[#allocation52_spill] sm:$0xff]  ;;  %v23510_v24 = vld [vmem:[#allocation54_spill] sm:$0xff] }
 0x7d9   : > { %v13237_v48 = vmul.f32 %v22228_v53, %v21984_v55  ;;  %v13439_v49 = vadd.f32 %v22062_v13, %v13335_v19  ;;  %v13440_v28 = vadd.f32 %v22068_v17, %v13336_v40  ;;  %v13441_v9 = vadd.f32 %v22080_v18, %v13337_v26  ;;  %v23511_v11 = vld [vmem:[#allocation56_spill] sm:$0xff] }
 0x7da   : > { %v13442_v21 = vadd.f32 %v22077_v37, %v13338_v47  ;;  %v13443_v42 = vadd.f32 %v22090_v6, %v13339_v8  ;;  %v13238_v52 = vmul.f32 %v22228_v53, %v21987_v44  ;;  %v13239_v7 = vmul.f32 %v22228_v53, %v23503_v61 }
 0x7db   : > { %v13240_v55 = vmul.f32 %v22228_v53, %v23504_v14  ;;  %v15052_v39 = vpack.c.bf16 %v13439_v49, %v13438_v31  ;;  %v15053_v5 = vpack.c.bf16 %v13441_v9, %v13440_v28  ;;  %v13241_v57 = vmul.f32 %v22228_v53, %v23505_v59 }
 0x7dc   : > { %v13340_v38 = vmul.f32 %v22053_v23, %v13236_v29  ;;  %v15054_v0 = vpack.c.bf16 %v13443_v42, %v13442_v21  ;;  %v13341_v20 = vmul.f32 %v22059_v3, %v13237_v48  ;;  %v13342_v15 = vmul.f32 %v22065_v45, %v13238_v52 }
 0x7dd   : > { %v13343_v44 = vmul.f32 %v22071_v30, %v13239_v7  ;;  %13699 = vst [vmem:[%s22115_s7 + $0xd8] sm:$0xff] %v15052_v39  ;;  %13700 = vst [vmem:[%s22115_s7 + $0xe0] sm:$0xff] %v15053_v5  ;;  %v13344_v58 = vmul.f32 %v22074_v32, %v13240_v55  ;;  %v13345_v25 = vmul.f32 %v22083_v51, %v13241_v57  ;;  %18329 = vrsqrt.f32 %v13163_v16 }
 0x7de   : > { %v13444_v53 = vadd.f32 %v22056_v43, %v13340_v38  ;;  %13701 = vst [vmem:[%s22115_s7 + $0xe8] sm:$0xff] %v15054_v0  ;;  %v13445_v60 = vadd.f32 %v22062_v13, %v13341_v20  ;;  %v13446_v54 = vadd.f32 %v22068_v17, %v13342_v15 }
 0x7df   : > { %v13447_v56 = vadd.f32 %v22080_v18, %v13343_v44  ;;  %v13448_v12 = vadd.f32 %v22077_v37, %v13344_v58  ;;  %v13449_v34 = vadd.f32 %v22090_v6, %v13345_v25 }
 0x7e0   : > { %v15055_v2 = vpack.c.bf16 %v13445_v60, %v13444_v53 }
 0x7e1   : > { %v15056_v10 = vpack.c.bf16 %v13447_v56, %v13446_v54  ;;  %v15057_v46 = vpack.c.bf16 %v13449_v34, %v13448_v12 }
 0x7e2   : > { %13702 = vst [vmem:[%s22115_s7 + $0xf0] sm:$0xff] %v15055_v2 }
 0x7e3   : > { %13703 = vst [vmem:[%s22115_s7 + $0xf8] sm:$0xff] %v15056_v10  ;;  %13704 = vst [vmem:[%s22115_s7 + $0x100] sm:$0xff] %v15057_v46 }
 0x7e7   : > { %v18330_v33 = vpop.eup %18329 }
 0x7e8   : > { %v13242_v1 = vmul.f32 %v18330_v33, %v23506_v62  ;;  %v13243_v22 = vmul.f32 %v18330_v33, %v23507_v50  ;;  %v13244_v36 = vmul.f32 %v18330_v33, %v23508_v27  ;;  %v13245_v63 = vmul.f32 %v18330_v33, %v23509_v35 }
 0x7e9   : > { %v13246_v4 = vmul.f32 %v18330_v33, %v23510_v24  ;;  %v13247_v19 = vmul.f32 %v18330_v33, %v23511_v11 }
 0x7ea   : > { %v13346_v40 = vmul.f32 %v22053_v23, %v13242_v1  ;;  %v13347_v26 = vmul.f32 %v22059_v3, %v13243_v22  ;;  %v13348_v47 = vmul.f32 %v22065_v45, %v13244_v36  ;;  %v13349_v8 = vmul.f32 %v22071_v30, %v13245_v63 }
 0x7eb   : > { %v13350_v31 = vmul.f32 %v22074_v32, %v13246_v4  ;;  %v13351_v41 = vmul.f32 %v22083_v51, %v13247_v19 }
 0x7ec   : > { %v13450_v29 = vadd.f32 %v22056_v43, %v13346_v40  ;;  %v13451_v23 = vadd.f32 %v22062_v13, %v13347_v26  ;;  %v13452_v3 = vadd.f32 %v22068_v17, %v13348_v47  ;;  %v13453_v45 = vadd.f32 %v22080_v18, %v13349_v8 }
 0x7ed   : > { %v13454_v30 = vadd.f32 %v22077_v37, %v13350_v31  ;;  %v13455_v48 = vadd.f32 %v22090_v6, %v13351_v41 }
 0x7ee   : > { %v15058_v49 = vpack.c.bf16 %v13451_v23, %v13450_v29  ;;  %v15059_v32 = vpack.c.bf16 %v13453_v45, %v13452_v3 }
 0x7ef   : > { %v15060_v51 = vpack.c.bf16 %v13455_v48, %v13454_v30 }
 0x7f0   : > { %13705 = vst [vmem:[%s22115_s7 + $0x108] sm:$0xff] %v15058_v49  ;;  %13706 = vst [vmem:[%s22115_s7 + $0x110] sm:$0xff] %v15059_v32 }
 0x7f1   : > { %13707 = vst [vmem:[%s22115_s7 + $0x118] sm:$0xff] %v15060_v51 }
 0x7f2   : > { %18433 = shalt.err (!%p18430_p4)
}
 0x7f3   : > { %s18434_s30 = scalar_lea.hbm %s22373_s20, 4608  ;;  %s18438_s0 = scalar_lea.hbm %s22427_s6, 18432 }
 0x7f4   : > { %p18435_p8 = scmp.ne.s32.totalorder %s22373_s20, %s18434_s30  ;;  %p18439_p9 = scmp.lt.u32.totalorder %s22373_s20, %s22427_s6 }
 0x7f5   : > { %p18440_p5 = scmp.lt.u32.totalorder %s18438_s0, %s18434_s30  ;;  %p18442_p2 = scmp.lt.u32.totalorder %s18434_s30, %s22373_s20 }
 0x7f6   : > { %p18436_p11 = pnand %p18435_p8, %p23512_p3 }
 0x7f7   : > { %p18441_p1 = por %p18440_p5, %p18439_p9 }
 0x7f8   : > { %p18437_p6 = pneg %p18436_p11 }
 0x7f9   : > { %p18443_p0 = por %p18442_p2, %p18441_p1 }
 0x7fb   : > { %p18444_p10 = pnand %p18443_p0, %p18437_p6 }
 0x7fd   : > { %18447 = shalt.err (!%p18444_p10)
}
 0x7fe   : > { %s18504_s26 = smov 384   ;;  %s18505_s7 = smov 24  }
 0x7ff   : > { %15940 = dma.vmem_to_hbm [thread:$0]  (%p23512_p3), %s22375_s9, 4608, %s22373_s20, %s13709_s15, %s18504_s26, %s18504_s26, %s18505_s7  }
 0x800 PF: > { %p15963_p12 = scmp.ge.s32.totalorder %s18494_s24, 2  ;;  %s13738_s23 = sand.u32 1, %s18482_s21  }
 0x801   : > { %p23513_p7 = scmp.ne.s32.totalorder %s22843_s14, 0  ;;  %s13739_s13 = scalar_lea.sflag [#allocation4], %s13738_s23 }
 0x803   : > { %p15954_p13 = pnand %p15963_p12, %p23513_p7 }
 0x805   : > { %18477 = dma.done.wait (!%p15954_p13), %s13739_s13, 4608  }
 0x806   : > { %18479 = vsyncadd (!%p15954_p13), %s13739_s13, 4294962688  ;;  %s23514_s10 = sld [smem:[#allocation13_spill]]  ;;  %s23515_s23 = sld [smem:[#allocation14_spill]] }
 0x807   : > { %p20_p4 = scmp.ge.s32.totalorder %s18562_s25, 6   ;;  %s23516_s21 = smov %s18486_s22 }
 0x808   : > { %s23518_s24 = smov %s18562_s25 }
 0x809   :  { %22 = sbr.rel (!%p20_p4) target bundleno = 8 (0x8), region = 104 }
 0x80c   : > { %s23517_s22 = smov %s23514_s10 }
 0x810   :  { %13744 = vsyncpa [#allocation3], 1 }
 0x811   :  { %13746 = vsyncpa [#allocation3 + $0x1], 1 }
 0x812   :  { %13747 = vsyncpa [#allocation6], 1 }
 0x813   :  { %13748 = vsyncpa [#allocation4], 1 }
 0x814   :  { %13750 = vsyncpa [#allocation4 + $0x1], 1 }

</bundles_post_ra>
